<compile_context>
chip_gen: v6e
topology: v6e:2x2x1
jax: 0.10.0
libtpu: 0.0.40
codegen_flags: <defaults>
</compile_context>

<pallas_src>
import jax
import jax.numpy as jnp
from jax import lax
from jax.experimental import pallas as pl
from jax.experimental.pallas import tpu as pltpu

# ---------------------------------------------------------------------------
# Configuration: CriticNet(input_channel=4, num_outputs=2), is_training=False.
# Spatial 24x40 -> conv(s2) 12x20 -> maxpool(s2) 6x10 -> 128*6*10 = 7680 = fc1 in.
# fc4 in = 64 + 1 (FAR) + 10 (history) + 4 (action) = 79.
# ---------------------------------------------------------------------------
B = 2
C_IN = 4                       # channels of state[0] (2) + state[1] (2)
H, W = 24, 40
NUM_OUTPUTS = 2
ACTION_DIM = 4
CONV_OC = 128
CH, CW = H // 2, W // 2        # conv output 12 x 20
PH, PW = CH // 2, CW // 2      # pooled      6 x 10
FC1_IN = CONV_OC * PH * PW     # 7680
FC1_OUT = 1024
FC1_SPLIT = 2                  # two contiguous N slabs (one per v7x TensorCore)


# ---------------------------------------------------------------------------
# Pallas kernels
# ---------------------------------------------------------------------------
def _conv_pool_kernel(p_ref, w_ref, o_ref):
    # p_ref: (9, B*PH*PW, C_IN*9) bf16 -- one conv patch per (pooled pos, pool tap)
    # w_ref: (C_IN*9, 128) bf16;  o_ref: (B*PH*PW, 128) bf16
    w = w_ref[...]
    m = jnp.dot(p_ref[0], w, preferred_element_type=jnp.float32)
    for t in range(1, 9):
        m = jnp.maximum(m, jnp.dot(p_ref[t], w, preferred_element_type=jnp.float32))
    # relu(max(taps)) == max(relu(taps)); the all-zero "pool padding" taps are
    # safe ONLY because the conv has no bias and ReLU precedes the pool
    # (real taps are >= 0 post-ReLU, so a 0 tap never wins wrongly).
    o_ref[...] = jnp.maximum(m, 0.0).astype(o_ref.dtype)


def _fc1_kernel(x_ref, w_ref, b_ref, o_ref):
    # One grid step per contiguous (7680, 512) bf16 weight slab; full K per step.
    o_ref[...] = jnp.maximum(
        jnp.dot(x_ref[...], w_ref[...], preferred_element_type=jnp.float32)
        + b_ref[...], 0.0)


def _head_kernel(x_ref, far_ref, hist_ref, act_ref,
                 w2_ref, b2_ref, w3_ref, b3_ref,
                 w4x_ref, w4f_ref, w4h_ref, w4a_ref, b4_ref, o_ref):
    # Fused fc2+relu, fc3+relu, concat([x, y, action]) and fc4.
    def bdot(a, b):
        return jnp.dot(a.astype(jnp.bfloat16), b.astype(jnp.bfloat16),
                       preferred_element_type=jnp.float32)

    h2 = jnp.maximum(bdot(x_ref[...], w2_ref[...]) + b2_ref[...], 0.0)
    h3 = jnp.maximum(bdot(h2, w3_ref[...]) + b3_ref[...], 0.0)
    q = bdot(h3, w4x_ref[...])                   # fc4 rows 0:64   (x)
    q = q + far_ref[...] * w4f_ref[...]          # fc4 rows 64:65  (feat_FAR)
    q = q + bdot(hist_ref[...], w4h_ref[...])    # fc4 rows 65:75  (history)
    q = q + bdot(act_ref[...], w4a_ref[...])     # fc4 rows 75:79  (action)
    o_ref[...] = q + b4_ref[...]


# ---------------------------------------------------------------------------
# Wrappers (glue: small patch extraction / reshapes in plain JAX)
# ---------------------------------------------------------------------------
def _conv_pool_patches(x_nchw):
    """(9, B*PH*PW, C_IN*9) bf16 patch tensor: leading axis = pool tap (kh,kw),
    rows = (b, ph, pw), cols = c*9 + (r*3 + s).  Out-of-range pool taps are
    all-zero rows (safe, see _conv_pool_kernel)."""
    b, c, h, w = x_nchw.shape
    ch, cw = h // 2, w // 2
    ph, pw = ch // 2, cw // 2
    xb = x_nchw.astype(jnp.bfloat16)
    xp = jnp.pad(xb, ((0, 0), (0, 0), (1, 1), (1, 1)))          # conv pad 1
    # conv-position im2col (9 slices): (B, ch, cw, c*9)
    cols = [xp[:, :, r:r + 2 * ch:2, s:s + 2 * cw:2]            # (B, c, ch, cw)
            for r in range(3) for s in range(3)]
    pconv = jnp.stack(cols, axis=-1)                            # (B, c, ch, cw, 9)
    pconv = pconv.transpose(0, 2, 3, 1, 4).reshape(b, ch, cw, c * 9)
    # pool-tap gather (9 slices of the padded conv-patch tensor)
    ppad = jnp.pad(pconv, ((0, 0), (1, 0), (1, 0), (0, 0)))     # pool pad top/left
    taps = [ppad[:, kh:kh + 2 * ph:2, kw:kw + 2 * pw:2, :]
            .reshape(b * ph * pw, c * 9)
            for kh in range(3) for kw in range(3)]
    return jnp.stack(taps, axis=0)                              # (9, B*60, 36)


def conv_relu_maxpool(x_nchw, conv_wmat_bf16):
    """Fused conv3x3/s2(pad1, no bias) + ReLU + maxpool3x3/s2(pad1).
    Returns (B*PH*PW, 128) bf16 with rows in (b, ph, pw) order (NHWC flatten)."""
    b = x_nchw.shape[0]
    patches = _conv_pool_patches(x_nchw)
    m, ck, oc = b * PH * PW, C_IN * 9, CONV_OC
    return pl.pallas_call(
        _conv_pool_kernel,
        out_shape=jax.ShapeDtypeStruct((m, oc), jnp.bfloat16),
        grid=(1,),
        in_specs=[pl.BlockSpec((9, m, ck), lambda i: (0, 0, 0)),
                  pl.BlockSpec((ck, oc), lambda i: (0, 0))],
        out_specs=pl.BlockSpec((m, oc), lambda i: (0, 0)),
    )(patches, conv_wmat_bf16)


def fc1_linear(x_bf16, w_slabs_bf16, bias):
    """relu(x @ W + b).  W is pre-split into FC1_SPLIT contiguous bf16 slabs of
    shape (K, N/FC1_SPLIT); one grid step per slab with full K.  The slab axis
    is "parallel": v7x's two TensorCores each stream one contiguous ~7.9 MB
    slab; on single-TC v5e/v6e it is simply two large contiguous weight DMAs
    (no strided 1 KB row chunks, minimal per-step overhead)."""
    bsz, kdim = x_bf16.shape
    nsplit, _, tn = w_slabs_bf16.shape
    return pl.pallas_call(
        _fc1_kernel,
        out_shape=jax.ShapeDtypeStruct((bsz, nsplit * tn), jnp.float32),
        grid=(nsplit,),
        in_specs=[
            pl.BlockSpec((bsz, kdim), lambda nb: (0, 0)),
            pl.BlockSpec((None, kdim, tn), lambda nb: (nb, 0, 0)),
            pl.BlockSpec((1, tn), lambda nb: (0, nb)),
        ],
        out_specs=pl.BlockSpec((bsz, tn), lambda nb: (0, nb)),
        compiler_params=pltpu.CompilerParams(
            dimension_semantics=("parallel",),
            # double-buffered (7680, 512) bf16 slabs (~15.7 MB total) plus the
            # tiny activation/bias/out buffers; safe on every generation
            # (v7x physical VMEM = 64 MiB, v5e scoped default is only 16 MiB).
            vmem_limit_bytes=40 * 1024 * 1024,
        ),
    )(x_bf16, w_slabs_bf16, bias)


def head_fused(x1, far, hist, act, pp):
    """Single kernel for fc2+relu, fc3+relu, the [x, y, action] concat and fc4.
    The concat is realized by splitting fc4's weight rows (64 | 1 | 10 | 4)."""
    ins = [x1, far, hist, act,
           pp["fc2_w"], pp["fc2_b"], pp["fc3_w"], pp["fc3_b"],
           pp["fc4_wx"], pp["fc4_wf"], pp["fc4_wh"], pp["fc4_wa"], pp["fc4_b"]]
    return pl.pallas_call(
        _head_kernel,
        out_shape=jax.ShapeDtypeStruct((x1.shape[0], NUM_OUTPUTS), jnp.float32),
        grid=(1,),
        in_specs=[pl.BlockSpec(a.shape, lambda i: (0, 0)) for a in ins],
        out_specs=pl.BlockSpec((x1.shape[0], NUM_OUTPUTS), lambda i: (0, 0)),
    )(*ins)


# ---------------------------------------------------------------------------
# CriticNet forward (Pallas path)
# ---------------------------------------------------------------------------
def critic_net_forward(pparams, state, action):
    state0, state1, feat_far, feat_hist = state
    x = jnp.concatenate([state0, state1], axis=1)              # (B, 4, 24, 40)
    far = feat_far.reshape(-1, 1).astype(jnp.float32)          # (B, 1)
    hist = feat_hist.reshape(-1, 10).astype(jnp.float32)       # (B, 10)
    b = x.shape[0]

    pooled = conv_relu_maxpool(x, pparams["conv_w"])           # (B*60, 128) bf16
    # TODO(synk): BatchNorm2d / BatchNorm1d only run when is_training=True; skipped.
    xf = pooled.reshape(b, FC1_IN)   # NHWC flatten; fc1_w rows were permuted to match
    h1 = fc1_linear(xf, pparams["fc1_w"], pparams["fc1_b"])    # (B, 1024)
    # TODO(synk): cross-pallas_call prefetch (P10) of the first fc1 weight slab under
    # the conv stage is not implemented.
    return head_fused(h1, far, hist, action, pparams)          # (B, 2)


# ---------------------------------------------------------------------------
# Deterministic synthetic parameters (shapes from CriticNet.__init__) and the
# one-time re-layout for the Pallas path.
# ---------------------------------------------------------------------------
def init_params(key):
    ks = jax.random.split(key, 9)

    def kaiming(k, fan_in, shape):
        return jax.random.normal(k, shape, jnp.float32) * jnp.sqrt(2.0 / fan_in)

    def bias(k, fan_in, n):
        lim = 1.0 / jnp.sqrt(fan_in)
        return jax.random.uniform(k, (n,), jnp.float32, -lim, lim)

    p = {}
    p["conv_w"] = kaiming(ks[0], C_IN * 9, (CONV_OC, C_IN, 3, 3))  # OIHW, no bias
    p["fc1_w"] = kaiming(ks[1], FC1_IN, (FC1_IN, FC1_OUT))
    p["fc1_b"] = bias(ks[2], FC1_IN, FC1_OUT)
    p["fc2_w"] = kaiming(ks[3], 1024, (1024, 256))
    p["fc2_b"] = bias(ks[4], 1024, 256)
    p["fc3_w"] = kaiming(ks[5], 256, (256, 64))
    p["fc3_b"] = bias(ks[6], 256, 64)
    p["fc4_w"] = kaiming(ks[7], 64 + 15, (64 + 15, NUM_OUTPUTS))
    p["fc4_b"] = bias(ks[8], 64 + 15, NUM_OUTPUTS)
    return p


def prepare_pallas_params(p):
    """One-time (outside jit) re-layout of the canonical torch-shaped f32 params:
    bf16 weights, NHWC-row-ordered + slab-split fc1_w, row-split fc4_w."""
    pp = {}
    pp["conv_w"] = p["conv_w"].reshape(CONV_OC, C_IN * 9).T.astype(jnp.bfloat16)
    # fc1 rows: torch (C,H,W) flatten order -> NHWC flatten order, then split N
    # into FC1_SPLIT contiguous slabs (one per v7x TensorCore).
    w1 = p["fc1_w"].reshape(CONV_OC, PH, PW, FC1_OUT).transpose(1, 2, 0, 3)
    w1 = w1.reshape(FC1_IN, FC1_OUT)
    pp["fc1_w"] = (w1.reshape(FC1_IN, FC1_SPLIT, FC1_OUT // FC1_SPLIT)
                     .transpose(1, 0, 2).astype(jnp.bfloat16))   # (2, 7680, 512)
    pp["fc1_b"] = p["fc1_b"].reshape(1, FC1_OUT)
    pp["fc2_w"] = p["fc2_w"].astype(jnp.bfloat16)
    pp["fc2_b"] = p["fc2_b"].reshape(1, -1)
    pp["fc3_w"] = p["fc3_w"].astype(jnp.bfloat16)
    pp["fc3_b"] = p["fc3_b"].reshape(1, -1)
    w4 = p["fc4_w"]
    pp["fc4_wx"] = w4[0:64].astype(jnp.bfloat16)
    pp["fc4_wf"] = w4[64:65]                                     # f32, used in a VPU mul
    pp["fc4_wh"] = w4[65:75].astype(jnp.bfloat16)
    pp["fc4_wa"] = w4[75:79].astype(jnp.bfloat16)
    pp["fc4_b"] = p["fc4_b"].reshape(1, -1)
    return pp


# ---------------------------------------------------------------------------
# Pure-JAX reference (mirrors the bf16-MXU / f32-accumulate numerics, torch layouts)
# ---------------------------------------------------------------------------
def reference_forward(params, state, action):
    state0, state1, feat_far, feat_hist = state
    x = jnp.concatenate([state0, state1], axis=1)
    y = jnp.concatenate(
        [feat_far.reshape(-1, 1).astype(jnp.float32), feat_hist.reshape(-1, 10)],
        axis=1,
    )

    def bdot(a, b):
        return jnp.dot(a.astype(jnp.bfloat16), b.astype(jnp.bfloat16),
                       preferred_element_type=jnp.float32)

    x = lax.conv_general_dilated(
        x.astype(jnp.bfloat16), params["conv_w"].astype(jnp.bfloat16),
        window_strides=(2, 2), padding=((1, 1), (1, 1)),
        dimension_numbers=("NCHW", "OIHW", "NCHW"),
        preferred_element_type=jnp.float32,
    )
    x = jnp.maximum(x, 0.0)
    x = lax.reduce_window(
        x, -jnp.inf, lax.max,
        window_dimensions=(1, 1, 3, 3), window_strides=(1, 1, 2, 2),
        padding=((0, 0), (0, 0), (1, 1), (1, 1)),
    )
    x = x.reshape(x.shape[0], -1)
    x = jnp.maximum(bdot(x, params["fc1_w"]) + params["fc1_b"], 0.0)
    x = jnp.maximum(bdot(x, params["fc2_w"]) + params["fc2_b"], 0.0)
    x = jnp.maximum(bdot(x, params["fc3_w"]) + params["fc3_b"], 0.0)
    z = jnp.concatenate([x, y, action], axis=1)
    return bdot(z, params["fc4_w"]) + params["fc4_b"]


if __name__ == "__main__":
    key = jax.random.PRNGKey(0)
    pk, k0, k1, k2, k3, k4 = jax.random.split(key, 6)
    params = init_params(pk)
    pparams = prepare_pallas_params(params)

    state0 = jax.random.normal(k0, (B, 2, H, W), jnp.float32)
    state1 = jax.random.normal(k1, (B, 2, H, W), jnp.float32)
    feat_far = jax.random.uniform(k2, (B,), jnp.float32)        # state[2]
    feat_hist = jax.random.normal(k3, (B, 10), jnp.float32)     # state[3]
    action = jax.random.normal(k4, (B, ACTION_DIM), jnp.float32)
    state = (state0, state1, feat_far, feat_hist)

    q = jax.jit(critic_net_forward)(pparams, state, action)
    q = jax.block_until_ready(q)
    assert q.shape == (B, NUM_OUTPUTS), q.shape

    q_ref = reference_forward(params, state, action)
    if not jnp.allclose(q, q_ref, rtol=2e-2, atol=2e-2):
        raise AssertionError(f"Pallas/reference mismatch:\n{q}\nvs\n{q_ref}")

    print("KERNEL_OK")
</pallas_src>

<mosaic_0001>
module attributes {stable_mosaic.version = 11 : i64} {
  func.func @_conv_pool_kernel(%arg0: i32, %arg1: memref<9x120x36xbf16, #tpu.memory_space<vmem>>, %arg2: memref<36x128xbf16, #tpu.memory_space<vmem>>, %arg3: memref<120x128xbf16, #tpu.memory_space<vmem>>) attributes {dimension_semantics = [#tpu.dimension_semantics<arbitrary>], iteration_bounds = array<i64: 1>, scalar_prefetch = 0 : i64, scratch_operands = 0 : i64, tpu.core_type = #tpu.core_type<tc>, window_params = [{pipeline_mode = #tpu.pipeline_mode<synchronous>, transform_indices = @transform_0, window_bounds = array<i64: 9, 120, 36>}, {pipeline_mode = #tpu.pipeline_mode<synchronous>, transform_indices = @transform_1, window_bounds = array<i64: 36, 128>}, {pipeline_mode = #tpu.pipeline_mode<synchronous>, transform_indices = @transform_2, window_bounds = array<i64: 120, 128>}]} {
    %c0 = arith.constant 0 : index
    %c0_0 = arith.constant 0 : index
    %0 = vector.load %arg2[%c0, %c0_0] : memref<36x128xbf16, #tpu.memory_space<vmem>>, vector<36x128xbf16>
    %c0_1 = arith.constant 0 : index
    %c0_2 = arith.constant 0 : index
    %c0_3 = arith.constant 0 : index
    %1 = vector.load %arg1[%c0_1, %c0_2, %c0_3] : memref<9x120x36xbf16, #tpu.memory_space<vmem>>, vector<1x120x36xbf16>
    %2 = vector.shape_cast %1 : vector<1x120x36xbf16> to vector<120x36xbf16>
    %cst = arith.constant dense<0.000000e+00> : vector<120x128xf32>
    %3 = tpu.matmul %2, %0, %cst {dimension_numbers = #tpu.dot_dimension_numbers<[1], [0], [0], [1], [0, 0, 1, 1], [], []>} : vector<120x36xbf16>, vector<36x128xbf16>, vector<120x128xf32> -> vector<120x128xf32>
    %c1 = arith.constant 1 : index
    %c0_4 = arith.constant 0 : index
    %c0_5 = arith.constant 0 : index
    %4 = vector.load %arg1[%c1, %c0_4, %c0_5] : memref<9x120x36xbf16, #tpu.memory_space<vmem>>, vector<1x120x36xbf16>
    %5 = vector.shape_cast %4 : vector<1x120x36xbf16> to vector<120x36xbf16>
    %cst_6 = arith.constant dense<0.000000e+00> : vector<120x128xf32>
    %6 = tpu.matmul %5, %0, %cst_6 {dimension_numbers = #tpu.dot_dimension_numbers<[1], [0], [0], [1], [0, 0, 1, 1], [], []>} : vector<120x36xbf16>, vector<36x128xbf16>, vector<120x128xf32> -> vector<120x128xf32>
    %7 = arith.maximumf %3, %6 : vector<120x128xf32>
    %c2 = arith.constant 2 : index
    %c0_7 = arith.constant 0 : index
    %c0_8 = arith.constant 0 : index
    %8 = vector.load %arg1[%c2, %c0_7, %c0_8] : memref<9x120x36xbf16, #tpu.memory_space<vmem>>, vector<1x120x36xbf16>
    %9 = vector.shape_cast %8 : vector<1x120x36xbf16> to vector<120x36xbf16>
    %cst_9 = arith.constant dense<0.000000e+00> : vector<120x128xf32>
    %10 = tpu.matmul %9, %0, %cst_9 {dimension_numbers = #tpu.dot_dimension_numbers<[1], [0], [0], [1], [0, 0, 1, 1], [], []>} : vector<120x36xbf16>, vector<36x128xbf16>, vector<120x128xf32> -> vector<120x128xf32>
    %11 = arith.maximumf %7, %10 : vector<120x128xf32>
    %c3 = arith.constant 3 : index
    %c0_10 = arith.constant 0 : index
    %c0_11 = arith.constant 0 : index
    %12 = vector.load %arg1[%c3, %c0_10, %c0_11] : memref<9x120x36xbf16, #tpu.memory_space<vmem>>, vector<1x120x36xbf16>
    %13 = vector.shape_cast %12 : vector<1x120x36xbf16> to vector<120x36xbf16>
    %cst_12 = arith.constant dense<0.000000e+00> : vector<120x128xf32>
    %14 = tpu.matmul %13, %0, %cst_12 {dimension_numbers = #tpu.dot_dimension_numbers<[1], [0], [0], [1], [0, 0, 1, 1], [], []>} : vector<120x36xbf16>, vector<36x128xbf16>, vector<120x128xf32> -> vector<120x128xf32>
    %15 = arith.maximumf %11, %14 : vector<120x128xf32>
    %c4 = arith.constant 4 : index
    %c0_13 = arith.constant 0 : index
    %c0_14 = arith.constant 0 : index
    %16 = vector.load %arg1[%c4, %c0_13, %c0_14] : memref<9x120x36xbf16, #tpu.memory_space<vmem>>, vector<1x120x36xbf16>
    %17 = vector.shape_cast %16 : vector<1x120x36xbf16> to vector<120x36xbf16>
    %cst_15 = arith.constant dense<0.000000e+00> : vector<120x128xf32>
    %18 = tpu.matmul %17, %0, %cst_15 {dimension_numbers = #tpu.dot_dimension_numbers<[1], [0], [0], [1], [0, 0, 1, 1], [], []>} : vector<120x36xbf16>, vector<36x128xbf16>, vector<120x128xf32> -> vector<120x128xf32>
    %19 = arith.maximumf %15, %18 : vector<120x128xf32>
    %c5 = arith.constant 5 : index
    %c0_16 = arith.constant 0 : index
    %c0_17 = arith.constant 0 : index
    %20 = vector.load %arg1[%c5, %c0_16, %c0_17] : memref<9x120x36xbf16, #tpu.memory_space<vmem>>, vector<1x120x36xbf16>
    %21 = vector.shape_cast %20 : vector<1x120x36xbf16> to vector<120x36xbf16>
    %cst_18 = arith.constant dense<0.000000e+00> : vector<120x128xf32>
    %22 = tpu.matmul %21, %0, %cst_18 {dimension_numbers = #tpu.dot_dimension_numbers<[1], [0], [0], [1], [0, 0, 1, 1], [], []>} : vector<120x36xbf16>, vector<36x128xbf16>, vector<120x128xf32> -> vector<120x128xf32>
    %23 = arith.maximumf %19, %22 : vector<120x128xf32>
    %c6 = arith.constant 6 : index
    %c0_19 = arith.constant 0 : index
    %c0_20 = arith.constant 0 : index
    %24 = vector.load %arg1[%c6, %c0_19, %c0_20] : memref<9x120x36xbf16, #tpu.memory_space<vmem>>, vector<1x120x36xbf16>
    %25 = vector.shape_cast %24 : vector<1x120x36xbf16> to vector<120x36xbf16>
    %cst_21 = arith.constant dense<0.000000e+00> : vector<120x128xf32>
    %26 = tpu.matmul %25, %0, %cst_21 {dimension_numbers = #tpu.dot_dimension_numbers<[1], [0], [0], [1], [0, 0, 1, 1], [], []>} : vector<120x36xbf16>, vector<36x128xbf16>, vector<120x128xf32> -> vector<120x128xf32>
    %27 = arith.maximumf %23, %26 : vector<120x128xf32>
    %c7 = arith.constant 7 : index
    %c0_22 = arith.constant 0 : index
    %c0_23 = arith.constant 0 : index
    %28 = vector.load %arg1[%c7, %c0_22, %c0_23] : memref<9x120x36xbf16, #tpu.memory_space<vmem>>, vector<1x120x36xbf16>
    %29 = vector.shape_cast %28 : vector<1x120x36xbf16> to vector<120x36xbf16>
    %cst_24 = arith.constant dense<0.000000e+00> : vector<120x128xf32>
    %30 = tpu.matmul %29, %0, %cst_24 {dimension_numbers = #tpu.dot_dimension_numbers<[1], [0], [0], [1], [0, 0, 1, 1], [], []>} : vector<120x36xbf16>, vector<36x128xbf16>, vector<120x128xf32> -> vector<120x128xf32>
    %31 = arith.maximumf %27, %30 : vector<120x128xf32>
    %c8 = arith.constant 8 : index
    %c0_25 = arith.constant 0 : index
    %c0_26 = arith.constant 0 : index
    %32 = vector.load %arg1[%c8, %c0_25, %c0_26] : memref<9x120x36xbf16, #tpu.memory_space<vmem>>, vector<1x120x36xbf16>
    %33 = vector.shape_cast %32 : vector<1x120x36xbf16> to vector<120x36xbf16>
    %cst_27 = arith.constant dense<0.000000e+00> : vector<120x128xf32>
    %34 = tpu.matmul %33, %0, %cst_27 {dimension_numbers = #tpu.dot_dimension_numbers<[1], [0], [0], [1], [0, 0, 1, 1], [], []>} : vector<120x36xbf16>, vector<36x128xbf16>, vector<120x128xf32> -> vector<120x128xf32>
    %35 = arith.maximumf %31, %34 : vector<120x128xf32>
    %cst_28 = arith.constant 0.000000e+00 : f32
    %36 = vector.broadcast %cst_28 : f32 to vector<120x128xf32>
    %37 = arith.maximumf %35, %36 : vector<120x128xf32>
    %38 = arith.truncf %37 : vector<120x128xf32> to vector<120x128xbf16>
    %c0_29 = arith.constant 0 : index
    %c0_30 = arith.constant 0 : index
    %39 = vector.load %arg3[%c0_29, %c0_30] : memref<120x128xbf16, #tpu.memory_space<vmem>>, vector<120x128xbf16>
    tpu.vector_store %arg3[%c0_29, %c0_30], %38 {strides = array<i32>} : memref<120x128xbf16, #tpu.memory_space<vmem>>, vector<120x128xbf16>,
    return
  }
  func.func @transform_0(%arg0: i32) -> (i32, i32, i32) {
    %c0_i32 = arith.constant 0 : i32
    %c0_i32_0 = arith.constant 0 : i32
    %c0_i32_1 = arith.constant 0 : i32
    %c0_i32_2 = arith.constant 0 : i32
    return %c0_i32, %c0_i32_0, %c0_i32_1 : i32, i32, i32
  }
  func.func @transform_1(%arg0: i32) -> (i32, i32) {
    %c0_i32 = arith.constant 0 : i32
    %c0_i32_0 = arith.constant 0 : i32
    %c0_i32_1 = arith.constant 0 : i32
    return %c0_i32, %c0_i32_0 : i32, i32
  }
  func.func @transform_2(%arg0: i32) -> (i32, i32) {
    %c0_i32 = arith.constant 0 : i32
    %c0_i32_0 = arith.constant 0 : i32
    %c0_i32_1 = arith.constant 0 : i32
    return %c0_i32, %c0_i32_0 : i32, i32
  }
}

module attributes {stable_mosaic.version = 11 : i64} {
  func.func @_fc1_kernel(%arg0: i32, %arg1: memref<2x7680xbf16, #tpu.memory_space<vmem>>, %arg2: memref<1x7680x512xbf16, #tpu.memory_space<vmem>>, %arg3: memref<1x512xf32, #tpu.memory_space<vmem>>, %arg4: memref<2x512xf32, #tpu.memory_space<vmem>>) attributes {dimension_semantics = [#tpu.dimension_semantics<parallel>], iteration_bounds = array<i64: 2>, scalar_prefetch = 0 : i64, scratch_operands = 0 : i64, tpu.core_type = #tpu.core_type<tc>, window_params = [{pipeline_mode = #tpu.pipeline_mode<synchronous>, transform_indices = @transform_0, window_bounds = array<i64: 2, 7680>}, {transform_indices = @transform_1, window_bounds = array<i64: 1, 7680, 512>}, {transform_indices = @transform_2, window_bounds = array<i64: 1, 512>}, {transform_indices = @transform_3, window_bounds = array<i64: 2, 512>}]} {
    %c0 = arith.constant 0 : index
    %c0_0 = arith.constant 0 : index
    %0 = vector.load %arg1[%c0, %c0_0] : memref<2x7680xbf16, #tpu.memory_space<vmem>>, vector<2x7680xbf16>
    %c0_1 = arith.constant 0 : index
    %c0_2 = arith.constant 0 : index
    %c0_3 = arith.constant 0 : index
    %1 = vector.load %arg2[%c0_1, %c0_2, %c0_3] : memref<1x7680x512xbf16, #tpu.memory_space<vmem>>, vector<1x7680x512xbf16>
    %2 = vector.shape_cast %1 : vector<1x7680x512xbf16> to vector<7680x512xbf16>
    %cst = arith.constant dense<0.000000e+00> : vector<2x512xf32>
    %3 = tpu.matmul %0, %2, %cst {dimension_numbers = #tpu.dot_dimension_numbers<[1], [0], [0], [1], [0, 0, 1, 1], [], []>} : vector<2x7680xbf16>, vector<7680x512xbf16>, vector<2x512xf32> -> vector<2x512xf32>
    %c0_4 = arith.constant 0 : index
    %c0_5 = arith.constant 0 : index
    %4 = vector.load %arg3[%c0_4, %c0_5] : memref<1x512xf32, #tpu.memory_space<vmem>>, vector<1x512xf32>
    %5 = vector.broadcast %4 : vector<1x512xf32> to vector<2x512xf32>
    %6 = arith.addf %3, %5 : vector<2x512xf32>
    %cst_6 = arith.constant 0.000000e+00 : f32
    %7 = vector.broadcast %cst_6 : f32 to vector<2x512xf32>
    %8 = arith.maximumf %6, %7 : vector<2x512xf32>
    %c0_7 = arith.constant 0 : index
    %c0_8 = arith.constant 0 : index
    %9 = vector.load %arg4[%c0_7, %c0_8] : memref<2x512xf32, #tpu.memory_space<vmem>>, vector<2x512xf32>
    tpu.vector_store %arg4[%c0_7, %c0_8], %8 {strides = array<i32>} : memref<2x512xf32, #tpu.memory_space<vmem>>, vector<2x512xf32>,
    return
  }
  func.func @transform_0(%arg0: i32) -> (i32, i32) {
    %c0_i32 = arith.constant 0 : i32
    %c0_i32_0 = arith.constant 0 : i32
    %c0_i32_1 = arith.constant 0 : i32
    return %c0_i32, %c0_i32_0 : i32, i32
  }
  func.func @transform_1(%arg0: i32) -> (i32, i32, i32) {
    %c0_i32 = arith.constant 0 : i32
    %c0_i32_0 = arith.constant 0 : i32
    %c0_i32_1 = arith.constant 0 : i32
    return %arg0, %c0_i32, %c0_i32_0 : i32, i32, i32
  }
  func.func @transform_2(%arg0: i32) -> (i32, i32) {
    %c0_i32 = arith.constant 0 : i32
    %c0_i32_0 = arith.constant 0 : i32
    return %c0_i32, %arg0 : i32, i32
  }
  func.func @transform_3(%arg0: i32) -> (i32, i32) {
    %c0_i32 = arith.constant 0 : i32
    %c0_i32_0 = arith.constant 0 : i32
    return %c0_i32, %arg0 : i32, i32
  }
}

module attributes {stable_mosaic.version = 11 : i64} {
  func.func @_head_kernel(%arg0: i32, %arg1: memref<2x1024xf32, #tpu.memory_space<vmem>>, %arg2: memref<2x1xf32, #tpu.memory_space<vmem>>, %arg3: memref<2x10xf32, #tpu.memory_space<vmem>>, %arg4: memref<2x4xf32, #tpu.memory_space<vmem>>, %arg5: memref<1024x256xbf16, #tpu.memory_space<vmem>>, %arg6: memref<1x256xf32, #tpu.memory_space<vmem>>, %arg7: memref<256x64xbf16, #tpu.memory_space<vmem>>, %arg8: memref<1x64xf32, #tpu.memory_space<vmem>>, %arg9: memref<64x2xbf16, #tpu.memory_space<vmem>>, %arg10: memref<1x2xf32, #tpu.memory_space<vmem>>, %arg11: memref<10x2xbf16, #tpu.memory_space<vmem>>, %arg12: memref<4x2xbf16, #tpu.memory_space<vmem>>, %arg13: memref<1x2xf32, #tpu.memory_space<vmem>>, %arg14: memref<2x2xf32, #tpu.memory_space<vmem>>) attributes {dimension_semantics = [#tpu.dimension_semantics<arbitrary>], iteration_bounds = array<i64: 1>, scalar_prefetch = 0 : i64, scratch_operands = 0 : i64, tpu.core_type = #tpu.core_type<tc>, window_params = [{pipeline_mode = #tpu.pipeline_mode<synchronous>, transform_indices = @transform_0, window_bounds = array<i64: 2, 1024>}, {pipeline_mode = #tpu.pipeline_mode<synchronous>, transform_indices = @transform_1, window_bounds = array<i64: 2, 1>}, {pipeline_mode = #tpu.pipeline_mode<synchronous>, transform_indices = @transform_2, window_bounds = array<i64: 2, 10>}, {pipeline_mode = #tpu.pipeline_mode<synchronous>, transform_indices = @transform_3, window_bounds = array<i64: 2, 4>}, {pipeline_mode = #tpu.pipeline_mode<synchronous>, transform_indices = @transform_4, window_bounds = array<i64: 1024, 256>}, {pipeline_mode = #tpu.pipeline_mode<synchronous>, transform_indices = @transform_5, window_bounds = array<i64: 1, 256>}, {pipeline_mode = #tpu.pipeline_mode<synchronous>, transform_indices = @transform_6, window_bounds = array<i64: 256, 64>}, {pipeline_mode = #tpu.pipeline_mode<synchronous>, transform_indices = @transform_7, window_bounds = array<i64: 1, 64>}, {pipeline_mode = #tpu.pipeline_mode<synchronous>, transform_indices = @transform_8, window_bounds = array<i64: 64, 2>}, {pipeline_mode = #tpu.pipeline_mode<synchronous>, transform_indices = @transform_9, window_bounds = array<i64: 1, 2>}, {pipeline_mode = #tpu.pipeline_mode<synchronous>, transform_indices = @transform_10, window_bounds = array<i64: 10, 2>}, {pipeline_mode = #tpu.pipeline_mode<synchronous>, transform_indices = @transform_11, window_bounds = array<i64: 4, 2>}, {pipeline_mode = #tpu.pipeline_mode<synchronous>, transform_indices = @transform_12, window_bounds = array<i64: 1, 2>}, {pipeline_mode = #tpu.pipeline_mode<synchronous>, transform_indices = @transform_13, window_bounds = array<i64: 2, 2>}]} {
    %c0 = arith.constant 0 : index
    %c0_0 = arith.constant 0 : index
    %0 = vector.load %arg1[%c0, %c0_0] : memref<2x1024xf32, #tpu.memory_space<vmem>>, vector<2x1024xf32>
    %c0_1 = arith.constant 0 : index
    %c0_2 = arith.constant 0 : index
    %1 = vector.load %arg5[%c0_1, %c0_2] : memref<1024x256xbf16, #tpu.memory_space<vmem>>, vector<1024x256xbf16>
    %2 = arith.truncf %0 : vector<2x1024xf32> to vector<2x1024xbf16>
    %cst = arith.constant dense<0.000000e+00> : vector<2x256xf32>
    %3 = tpu.matmul %2, %1, %cst {dimension_numbers = #tpu.dot_dimension_numbers<[1], [0], [0], [1], [0, 0, 1, 1], [], []>} : vector<2x1024xbf16>, vector<1024x256xbf16>, vector<2x256xf32> -> vector<2x256xf32>
    %c0_3 = arith.constant 0 : index
    %c0_4 = arith.constant 0 : index
    %4 = vector.load %arg6[%c0_3, %c0_4] : memref<1x256xf32, #tpu.memory_space<vmem>>, vector<1x256xf32>
    %5 = vector.broadcast %4 : vector<1x256xf32> to vector<2x256xf32>
    %6 = arith.addf %3, %5 : vector<2x256xf32>
    %cst_5 = arith.constant 0.000000e+00 : f32
    %7 = vector.broadcast %cst_5 : f32 to vector<2x256xf32>
    %8 = arith.maximumf %6, %7 : vector<2x256xf32>
    %c0_6 = arith.constant 0 : index
    %c0_7 = arith.constant 0 : index
    %9 = vector.load %arg7[%c0_6, %c0_7] : memref<256x64xbf16, #tpu.memory_space<vmem>>, vector<256x64xbf16>
    %10 = arith.truncf %8 : vector<2x256xf32> to vector<2x256xbf16>
    %cst_8 = arith.constant dense<0.000000e+00> : vector<2x64xf32>
    %11 = tpu.matmul %10, %9, %cst_8 {dimension_numbers = #tpu.dot_dimension_numbers<[1], [0], [0], [1], [0, 0, 1, 1], [], []>} : vector<2x256xbf16>, vector<256x64xbf16>, vector<2x64xf32> -> vector<2x64xf32>
    %c0_9 = arith.constant 0 : index
    %c0_10 = arith.constant 0 : index
    %12 = vector.load %arg8[%c0_9, %c0_10] : memref<1x64xf32, #tpu.memory_space<vmem>>, vector<1x64xf32>
    %13 = vector.broadcast %12 : vector<1x64xf32> to vector<2x64xf32>
    %14 = arith.addf %11, %13 : vector<2x64xf32>
    %cst_11 = arith.constant 0.000000e+00 : f32
    %15 = vector.broadcast %cst_11 : f32 to vector<2x64xf32>
    %16 = arith.maximumf %14, %15 : vector<2x64xf32>
    %c0_12 = arith.constant 0 : index
    %c0_13 = arith.constant 0 : index
    %17 = vector.load %arg9[%c0_12, %c0_13] : memref<64x2xbf16, #tpu.memory_space<vmem>>, vector<64x2xbf16>
    %18 = arith.truncf %16 : vector<2x64xf32> to vector<2x64xbf16>
    %cst_14 = arith.constant dense<0.000000e+00> : vector<2x2xf32>
    %19 = tpu.matmul %18, %17, %cst_14 {dimension_numbers = #tpu.dot_dimension_numbers<[1], [0], [0], [1], [0, 0, 1, 1], [], []>} : vector<2x64xbf16>, vector<64x2xbf16>, vector<2x2xf32> -> vector<2x2xf32>
    %c0_15 = arith.constant 0 : index
    %c0_16 = arith.constant 0 : index
    %20 = vector.load %arg2[%c0_15, %c0_16] : memref<2x1xf32, #tpu.memory_space<vmem>>, vector<2x1xf32>
    %c0_17 = arith.constant 0 : index
    %c0_18 = arith.constant 0 : index
    %21 = vector.load %arg10[%c0_17, %c0_18] : memref<1x2xf32, #tpu.memory_space<vmem>>, vector<1x2xf32>
    %22 = vector.broadcast %20 : vector<2x1xf32> to vector<2x2xf32>
    %23 = vector.broadcast %21 : vector<1x2xf32> to vector<2x2xf32>
    %24 = arith.mulf %22, %23 : vector<2x2xf32>
    %25 = arith.addf %19, %24 : vector<2x2xf32>
    %c0_19 = arith.constant 0 : index
    %c0_20 = arith.constant 0 : index
    %26 = vector.load %arg3[%c0_19, %c0_20] : memref<2x10xf32, #tpu.memory_space<vmem>>, vector<2x10xf32>
    %c0_21 = arith.constant 0 : index
    %c0_22 = arith.constant 0 : index
    %27 = vector.load %arg11[%c0_21, %c0_22] : memref<10x2xbf16, #tpu.memory_space<vmem>>, vector<10x2xbf16>
    %28 = arith.truncf %26 : vector<2x10xf32> to vector<2x10xbf16>
    %cst_23 = arith.constant dense<0.000000e+00> : vector<2x2xf32>
    %29 = tpu.matmul %28, %27, %cst_23 {dimension_numbers = #tpu.dot_dimension_numbers<[1], [0], [0], [1], [0, 0, 1, 1], [], []>} : vector<2x10xbf16>, vector<10x2xbf16>, vector<2x2xf32> -> vector<2x2xf32>
    %30 = arith.addf %25, %29 : vector<2x2xf32>
    %c0_24 = arith.constant 0 : index
    %c0_25 = arith.constant 0 : index
    %31 = vector.load %arg4[%c0_24, %c0_25] : memref<2x4xf32, #tpu.memory_space<vmem>>, vector<2x4xf32>
    %c0_26 = arith.constant 0 : index
    %c0_27 = arith.constant 0 : index
    %32 = vector.load %arg12[%c0_26, %c0_27] : memref<4x2xbf16, #tpu.memory_space<vmem>>, vector<4x2xbf16>
    %33 = arith.truncf %31 : vector<2x4xf32> to vector<2x4xbf16>
    %cst_28 = arith.constant dense<0.000000e+00> : vector<2x2xf32>
    %34 = tpu.matmul %33, %32, %cst_28 {dimension_numbers = #tpu.dot_dimension_numbers<[1], [0], [0], [1], [0, 0, 1, 1], [], []>} : vector<2x4xbf16>, vector<4x2xbf16>, vector<2x2xf32> -> vector<2x2xf32>
    %35 = arith.addf %30, %34 : vector<2x2xf32>
    %c0_29 = arith.constant 0 : index
    %c0_30 = arith.constant 0 : index
    %36 = vector.load %arg13[%c0_29, %c0_30] : memref<1x2xf32, #tpu.memory_space<vmem>>, vector<1x2xf32>
    %37 = vector.broadcast %36 : vector<1x2xf32> to vector<2x2xf32>
    %38 = arith.addf %35, %37 : vector<2x2xf32>
    %c0_31 = arith.constant 0 : index
    %c0_32 = arith.constant 0 : index
    %39 = vector.load %arg14[%c0_31, %c0_32] : memref<2x2xf32, #tpu.memory_space<vmem>>, vector<2x2xf32>
    tpu.vector_store %arg14[%c0_31, %c0_32], %38 {strides = array<i32>} : memref<2x2xf32, #tpu.memory_space<vmem>>, vector<2x2xf32>,
    return
  }
  func.func @transform_0(%arg0: i32) -> (i32, i32) {
    %c0_i32 = arith.constant 0 : i32
    %c0_i32_0 = arith.constant 0 : i32
    %c0_i32_1 = arith.constant 0 : i32
    return %c0_i32, %c0_i32_0 : i32, i32
  }
  func.func @transform_1(%arg0: i32) -> (i32, i32) {
    %c0_i32 = arith.constant 0 : i32
    %c0_i32_0 = arith.constant 0 : i32
    %c0_i32_1 = arith.constant 0 : i32
    return %c0_i32, %c0_i32_0 : i32, i32
  }
  func.func @transform_2(%arg0: i32) -> (i32, i32) {
    %c0_i32 = arith.constant 0 : i32
    %c0_i32_0 = arith.constant 0 : i32
    %c0_i32_1 = arith.constant 0 : i32
    return %c0_i32, %c0_i32_0 : i32, i32
  }
  func.func @transform_3(%arg0: i32) -> (i32, i32) {
    %c0_i32 = arith.constant 0 : i32
    %c0_i32_0 = arith.constant 0 : i32
    %c0_i32_1 = arith.constant 0 : i32
    return %c0_i32, %c0_i32_0 : i32, i32
  }
  func.func @transform_4(%arg0: i32) -> (i32, i32) {
    %c0_i32 = arith.constant 0 : i32
    %c0_i32_0 = arith.constant 0 : i32
    %c0_i32_1 = arith.constant 0 : i32
    return %c0_i32, %c0_i32_0 : i32, i32
  }
  func.func @transform_5(%arg0: i32) -> (i32, i32) {
    %c0_i32 = arith.constant 0 : i32
    %c0_i32_0 = arith.constant 0 : i32
    %c0_i32_1 = arith.constant 0 : i32
    return %c0_i32, %c0_i32_0 : i32, i32
  }
  func.func @transform_6(%arg0: i32) -> (i32, i32) {
    %c0_i32 = arith.constant 0 : i32
    %c0_i32_0 = arith.constant 0 : i32
    %c0_i32_1 = arith.constant 0 : i32
    return %c0_i32, %c0_i32_0 : i32, i32
  }
  func.func @transform_7(%arg0: i32) -> (i32, i32) {
    %c0_i32 = arith.constant 0 : i32
    %c0_i32_0 = arith.constant 0 : i32
    %c0_i32_1 = arith.constant 0 : i32
    return %c0_i32, %c0_i32_0 : i32, i32
  }
  func.func @transform_8(%arg0: i32) -> (i32, i32) {
    %c0_i32 = arith.constant 0 : i32
    %c0_i32_0 = arith.constant 0 : i32
    %c0_i32_1 = arith.constant 0 : i32
    return %c0_i32, %c0_i32_0 : i32, i32
  }
  func.func @transform_9(%arg0: i32) -> (i32, i32) {
    %c0_i32 = arith.constant 0 : i32
    %c0_i32_0 = arith.constant 0 : i32
    %c0_i32_1 = arith.constant 0 : i32
    return %c0_i32, %c0_i32_0 : i32, i32
  }
  func.func @transform_10(%arg0: i32) -> (i32, i32) {
    %c0_i32 = arith.constant 0 : i32
    %c0_i32_0 = arith.constant 0 : i32
    %c0_i32_1 = arith.constant 0 : i32
    return %c0_i32, %c0_i32_0 : i32, i32
  }
  func.func @transform_11(%arg0: i32) -> (i32, i32) {
    %c0_i32 = arith.constant 0 : i32
    %c0_i32_0 = arith.constant 0 : i32
    %c0_i32_1 = arith.constant 0 : i32
    return %c0_i32, %c0_i32_0 : i32, i32
  }
  func.func @transform_12(%arg0: i32) -> (i32, i32) {
    %c0_i32 = arith.constant 0 : i32
    %c0_i32_0 = arith.constant 0 : i32
    %c0_i32_1 = arith.constant 0 : i32
    return %c0_i32, %c0_i32_0 : i32, i32
  }
  func.func @transform_13(%arg0: i32) -> (i32, i32) {
    %c0_i32 = arith.constant 0 : i32
    %c0_i32_0 = arith.constant 0 : i32
    %c0_i32_1 = arith.constant 0 : i32
    return %c0_i32, %c0_i32_0 : i32, i32
  }
}

</mosaic_0001>

<bundles_post_ra>
// kernel: critic_net_forward.3
= control target key start
LH: loop header
LB: loop body
LE: loop exit
PB: predicated region body
PF: predicated region fallthrough
CT: control target
= control target key end

     0   :  { %7 = vsyncpa [#allocation3], 0  ;;  %s2583_s9 = smov [#allocation2]   ;;  %s3194_s0 = inlined_call_operand.vmem [shape: bf16[9,120,36], index: 0, kind: input, shape index: {}]   ;;  %s3195_s1 = inlined_call_operand.hbm [shape: bf16[36,128], index: 1, kind: input, shape index: {}]   ;;  %s3196_s2 = inlined_call_operand.vmem [shape: bf16[120,128], index: 2, kind: output, shape index: {}]  }
   0x1   :  { %s15_s10 = sshll.u32 %s2583_s9, 4  ;;  %s16_s10 = int_to_ptr.vmem [resolvable:$true] %s15_s10 }
   0x2   :  { %s2569_s11 = scalar_lea.vmem %s16_s10, 320  ;;  %p2574_p1 = scmp.lt.s32.totalorder %s16_s10, %s16_s10 }
   0x3   :  { %p2570_p0 = scmp.ne.s32.totalorder %s16_s10, %s2569_s11  ;;  %p2575_p2 = scmp.lt.s32.totalorder %s2569_s11, %s2569_s11 }
   0x5   :  { %p2576_p3 = por %p2575_p2, %p2574_p1 }
   0x7   :  { %p2577_p4 = pnand %p2576_p3, %p2570_p0 }
   0x9   :  { %2580 = shalt.err (!%p2577_p4)
}
   0xa   :  { %s2584_s12 = smov 64   ;;  %s2585_s13 = smov 4  }
   0xb   :  { %21 = dma.hbm_to_vmem [thread:$0]  %s3195_s1, 320, %s16_s10, [#allocation3], %s2584_s12, %s2584_s12, %s2585_s13  }
   0xc   :  { %2581 = dma.done.wait [#allocation3], 320  }
   0xd   :  { %2582 = vsyncadd [#allocation3], 4294966976  ;;  %vm124_vm0 = vcmask 1041408   ;;  %vm99_vm1 = vcmask 293888   ;;  %v2606_v1 = vld [vmem:[#allocation2 + $0x8] sm:$0xff]   ;;  %v2616_v3 = vld [vmem:[#allocation2] sm:$0xff]  }
   0xe   :  { %v2604_v0 = vld [vmem:[#allocation2 + $0x10] ss:$0 sps:$4 sm:$0x33]   ;;  %v2489_v4 = vld [vmem:[%s3194_s0] sm:$0xff]   ;;  %v2491_v6 = vld [vmem:[%s3194_s0 + $0x8] sm:$0xff]  }
   0xf   :  { %2473 = vmatprep.subr.msk.bf16.mxu0 %vm124_vm0, %v2604_v0  ;;  %2474 = vmatprep.subr.msk.bf16.mxu1 %vm124_vm0, %v2604_v0  ;;  %v2614_v2 = vsel %vm124_vm0, %v2604_v0, 0  ;;  %v2490_v5 = vld [vmem:[%s3194_s0 + $0x20] sm:$0xff]   ;;  %v2492_v7 = vld [vmem:[%s3194_s0 + $0x28] sm:$0xff]   ;;  %v2493_v8 = vld [vmem:[%s3194_s0 + $0x10] sm:$0xff]  }
  0x10   :  { %2270 = vmatpush3.bf16.msra.mxu0 %v2614_v2  ;;  %2470 = vmatpush3.bf16.msra.mxu1 %v2614_v2  ;;  %v2494_v9 = vld [vmem:[%s3194_s0 + $0x30] sm:$0xff]   ;;  %v2495_v10 = vld [vmem:[%s3194_s0 + $0x18] sm:$0xff]   ;;  %v2499_v14 = vld [vmem:[%s3194_s0 + $0x44] sm:$0xff]  }
  0x11   :  { %2271 = vmatprep.subr.bf16.mxu0 %v2606_v1  ;;  %2468 = vmatprep.subr.bf16.mxu1 %v2606_v1  ;;  %v2496_v11 = vld [vmem:[%s3194_s0 + $0x38] ss:$0 sps:$4 sm:$0xff]   ;;  %v2497_v12 = vld [vmem:[%s3194_s0 + $0x3c] sm:$0xff]   ;;  %v2501_v16 = vld [vmem:[%s3194_s0 + $0x4c] sm:$0xff]  }
  0x12   :  { %2275 = vmatprep.mubr.msk.bf16.mxu0 %vm99_vm1, %v2489_v4  ;;  %2283 = vmatprep.mubr.msk.bf16.mxu1 %vm99_vm1, %v2490_v5  ;;  %v2498_v13 = vld [vmem:[%s3194_s0 + $0x78] sm:$0xff]   ;;  %v2500_v15 = vld [vmem:[%s3194_s0 + $0x80] sm:$0xff]   ;;  %v2502_v17 = vld [vmem:[%s3194_s0 + $0x88] sm:$0xff]  }
  0x13   :  { %v2503_v18 = vld [vmem:[%s3194_s0 + $0x54] sm:$0xff]   ;;  %v2505_v20 = vld [vmem:[%s3194_s0 + $0x5c] sm:$0xff]   ;;  %v2507_v22 = vld [vmem:[%s3194_s0 + $0x64] sm:$0xff]  }
  0x14   :  { %2272 = vmatpush3.bf16.msra.mxu0 %v2606_v1  ;;  %2471 = vmatpush3.bf16.msra.mxu1 %v2606_v1  ;;  %v2504_v19 = vld [vmem:[%s3194_s0 + $0x90] sm:$0xff]   ;;  %v2506_v21 = vld [vmem:[%s3194_s0 + $0x98] sm:$0xff]   ;;  %v2508_v23 = vld [vmem:[%s3194_s0 + $0xa0] sm:$0xff]  }
  0x15   :  { %2273 = vmatprep.subr.bf16.mxu0 %v2616_v3  ;;  %2469 = vmatprep.subr.bf16.mxu1 %v2616_v3  ;;  %v2509_v24 = vld [vmem:[%s3194_s0 + $0x6c] sm:$0xff]   ;;  %v2511_v26 = vld [vmem:[%s3194_s0 + $0x74] ss:$0 sps:$4 sm:$0xff]   ;;  %v2515_v30 = vld [vmem:[%s3194_s0 + $0xbc] sm:$0xff]  }
  0x16   :  { %v2510_v25 = vld [vmem:[%s3194_s0 + $0xa8] sm:$0xff]   ;;  %v2512_v27 = vld [vmem:[%s3194_s0 + $0xb0] ss:$0 sps:$4 sm:$0xff]   ;;  %v2513_v28 = vld [vmem:[%s3194_s0 + $0xb4] sm:$0xff]  }
  0x17   :  { %v2514_v29 = vld [vmem:[%s3194_s0 + $0xf0] sm:$0xff]   ;;  %v2516_v31 = vld [vmem:[%s3194_s0 + $0xf8] sm:$0xff]   ;;  %v2517_v32 = vld [vmem:[%s3194_s0 + $0xc4] sm:$0xff]  }
  0x18   :  { %2274 = vmatpush3.bf16.msra.mxu0 %v2616_v3  ;;  %2472 = vmatpush3.bf16.msra.mxu1 %v2616_v3  ;;  %v2518_v33 = vld [vmem:[%s3194_s0 + $0x100] sm:$0xff]   ;;  %v2519_v34 = vld [vmem:[%s3194_s0 + $0xcc] sm:$0xff]   ;;  %v2521_v36 = vld [vmem:[%s3194_s0 + $0xd4] sm:$0xff]  }
  0x19   :  { %2475 = vmatprep.subr.msk.bf16.mxu1 %vm124_vm0, %v2604_v0  ;;  %2476 = vmatprep.subr.msk.bf16.mxu0 %vm124_vm0, %v2604_v0  ;;  %v2520_v35 = vld [vmem:[%s3194_s0 + $0x108] sm:$0xff]   ;;  %v2522_v37 = vld [vmem:[%s3194_s0 + $0x110] sm:$0xff]   ;;  %v2523_v38 = vld [vmem:[%s3194_s0 + $0xdc] sm:$0xff]  }
  0x1a   :  { %v2524_v39 = vld [vmem:[%s3194_s0 + $0x118] sm:$0xff]   ;;  %v2525_v40 = vld [vmem:[%s3194_s0 + $0xe4] sm:$0xff]   ;;  %v2527_v42 = vld [vmem:[%s3194_s0 + $0xec] ss:$0 sps:$4 sm:$0xff]  }
  0x1b   :  { %2276 = vmatmul.mubr.msk.bf16.vlgmr.msra.gmra.mxu0 %vm99_vm1, %v2491_v6  ;;  %2284 = vmatmul.mubr.msk.bf16.vlgmr.msra.gmra.mxu1 %vm99_vm1, %v2492_v7  ;;  %v2526_v41 = vld [vmem:[%s3194_s0 + $0x120] sm:$0xff]   ;;  %v2528_v43 = vld [vmem:[%s3194_s0 + $0x128] ss:$0 sps:$4 sm:$0xff]   ;;  %v2529_v44 = vld [vmem:[%s3194_s0 + $0x12c] sm:$0xff]  }
  0x1c   :  { %2292 = vmatpush3.bf16.msra.mxu1 %v2614_v2  ;;  %2314 = vmatpush3.bf16.msra.mxu0 %v2614_v2  ;;  %v2530_v45 = vld [vmem:[%s3194_s0 + $0x168] sm:$0xff]   ;;  %v2531_v46 = vld [vmem:[%s3194_s0 + $0x134] sm:$0xff]   ;;  %v2533_v48 = vld [vmem:[%s3194_s0 + $0x13c] sm:$0xff]  }
  0x1d   :  { %2293 = vmatprep.subr.bf16.mxu1 %v2606_v1  ;;  %2279 = vmatprep.mubr.msk.bf16.mxu0 %vm99_vm1, %v2493_v8  ;;  %v2532_v47 = vld [vmem:[%s3194_s0 + $0x170] sm:$0xff]   ;;  %v2534_v49 = vld [vmem:[%s3194_s0 + $0x178] sm:$0xff]   ;;  %v2535_v50 = vld [vmem:[%s3194_s0 + $0x144] sm:$0xff]  }
  0x1e   :  { %2287 = vmatprep.mubr.msk.bf16.mxu1 %vm99_vm1, %v2494_v9  ;;  %2315 = vmatprep.subr.bf16.mxu0 %v2606_v1  ;;  %v2536_v51 = vld [vmem:[%s3194_s0 + $0x180] sm:$0xff]   ;;  %v2537_v52 = vld [vmem:[%s3194_s0 + $0x14c] sm:$0xff]   ;;  %v2539_v54 = vld [vmem:[%s3194_s0 + $0x154] sm:$0xff]  }
  0x1f   :  { %v2538_v53 = vld [vmem:[%s3194_s0 + $0x188] sm:$0xff]   ;;  %v2540_v55 = vld [vmem:[%s3194_s0 + $0x190] sm:$0xff]   ;;  %v2541_v56 = vld [vmem:[%s3194_s0 + $0x15c] sm:$0xff]  }
  0x20   :  { %2294 = vmatpush3.bf16.msra.mxu1 %v2606_v1  ;;  %2316 = vmatpush3.bf16.msra.mxu0 %v2606_v1  ;;  %v2542_v57 = vld [vmem:[%s3194_s0 + $0x198] sm:$0xff]   ;;  %v2543_v58 = vld [vmem:[%s3194_s0 + $0x164] ss:$0 sps:$4 sm:$0xff]   ;;  %v2544_v59 = vld [vmem:[%s3194_s0 + $0x1a0] ss:$0 sps:$4 sm:$0xff]  }
  0x21   :  { %2295 = vmatprep.subr.bf16.mxu1 %v2616_v3  ;;  %2317 = vmatprep.subr.bf16.mxu0 %v2616_v3  ;;  %v2545_v60 = vld [vmem:[%s3194_s0 + $0x1a4] sm:$0xff]   ;;  %v2547_v62 = vld [vmem:[%s3194_s0 + $0x1ac] sm:$0xff]   ;;  %v2557_v8 = vld [vmem:[%s3194_s0 + $0x1d4] sm:$0xff]  }
  0x22   :  { %v2546_v61 = vld [vmem:[%s3194_s0 + $0x1e0] sm:$0xff]   ;;  %v2548_v63 = vld [vmem:[%s3194_s0 + $0x1e8] sm:$0xff]   ;;  %v2558_v9 = vld [vmem:[%s3194_s0 + $0x210] sm:$0xff]  }
  0x23   :  { %2280 = vmatmul.mubr.msk.bf16.gmra.mxu0 %vm99_vm1, %v2495_v10  ;;  %2288 = vmatmul.mubr.msk.bf16.gmra.mxu1 %vm99_vm1, %v2496_v11  ;;  %v2553_v4 = vld [vmem:[%s3194_s0 + $0x1c4] sm:$0xff]   ;;  %v2555_v6 = vld [vmem:[%s3194_s0 + $0x1cc] sm:$0xff]   ;;  %v2559_v10 = vld [vmem:[%s3194_s0 + $0x1dc] ss:$0 sps:$4 sm:$0xff]  }
  0x24   :  { %2296 = vmatpush3.bf16.msra.mxu1 %v2616_v3  ;;  %2318 = vmatpush3.bf16.msra.mxu0 %v2616_v3  ;;  %v2554_v5 = vld [vmem:[%s3194_s0 + $0x200] sm:$0xff]   ;;  %v2556_v7 = vld [vmem:[%s3194_s0 + $0x208] sm:$0xff]   ;;  %v2560_v11 = vld [vmem:[%s3194_s0 + $0x218] ss:$0 sps:$4 sm:$0xff]  }
  0x25   :  { %2297 = vmatprep.mubr.msk.bf16.mxu1 %vm99_vm1, %v2497_v12  ;;  %2319 = vmatprep.mubr.msk.bf16.mxu0 %vm99_vm1, %v2498_v13 }
  0x26   :  { %2477 = vmatprep.subr.msk.bf16.mxu1 %vm124_vm0, %v2604_v0  ;;  %2478 = vmatprep.subr.msk.bf16.mxu0 %vm124_vm0, %v2604_v0 }
  0x2b   :  { %2298 = vmatmul.mubr.msk.bf16.vlgmr.msra.gmra.mxu1 %vm99_vm1, %v2499_v14  ;;  %2320 = vmatmul.mubr.msk.bf16.vlgmr.msra.gmra.mxu0 %vm99_vm1, %v2500_v15 }
  0x2c   :  { %2336 = vmatpush3.bf16.msra.mxu1 %v2614_v2  ;;  %2358 = vmatpush3.bf16.msra.mxu0 %v2614_v2 }
  0x2d   :  { %2301 = vmatprep.mubr.msk.bf16.mxu1 %vm99_vm1, %v2501_v16  ;;  %2323 = vmatprep.mubr.msk.bf16.mxu0 %vm99_vm1, %v2502_v17 }
  0x2e   :  { %2337 = vmatprep.subr.bf16.mxu1 %v2606_v1  ;;  %2359 = vmatprep.subr.bf16.mxu0 %v2606_v1 }
  0x30   :  { %2338 = vmatpush3.bf16.msra.mxu1 %v2606_v1  ;;  %2360 = vmatpush3.bf16.msra.mxu0 %v2606_v1 }
  0x31   :  { %2339 = vmatprep.subr.bf16.mxu1 %v2616_v3  ;;  %2361 = vmatprep.subr.bf16.mxu0 %v2616_v3 }
  0x33   :  { %2302 = vmatmul.mubr.msk.bf16.gmra.mxu1 %vm99_vm1, %v2503_v18  ;;  %2324 = vmatmul.mubr.msk.bf16.gmra.mxu0 %vm99_vm1, %v2504_v19 }
  0x34   :  { %2305 = vmatprep.mubr.msk.bf16.mxu1 %vm99_vm1, %v2505_v20  ;;  %2327 = vmatprep.mubr.msk.bf16.mxu0 %vm99_vm1, %v2506_v21 }
  0x35   :  { %2340 = vmatpush3.bf16.msra.mxu1 %v2616_v3  ;;  %2362 = vmatpush3.bf16.msra.mxu0 %v2616_v3 }
  0x36   :  { %2479 = vmatprep.subr.msk.bf16.mxu1 %vm124_vm0, %v2604_v0  ;;  %2480 = vmatprep.subr.msk.bf16.mxu0 %vm124_vm0, %v2604_v0 }
  0x3b   :  { %2306 = vmatmul.mubr.msk.bf16.gmra.mxu1 %vm99_vm1, %v2507_v22  ;;  %2328 = vmatmul.mubr.msk.bf16.gmra.mxu0 %vm99_vm1, %v2508_v23 }
  0x3c   :  { %2309 = vmatprep.mubr.msk.bf16.mxu1 %vm99_vm1, %v2509_v24  ;;  %2331 = vmatprep.mubr.msk.bf16.mxu0 %vm99_vm1, %v2510_v25 }
  0x43   :  { %2310 = vmatmul.mubr.msk.bf16.gmra.mxu1 %vm99_vm1, %v2511_v26  ;;  %2332 = vmatmul.mubr.msk.bf16.gmra.mxu0 %vm99_vm1, %v2512_v27 }
  0x44   :  { %2341 = vmatprep.mubr.msk.bf16.mxu1 %vm99_vm1, %v2513_v28  ;;  %2363 = vmatprep.mubr.msk.bf16.mxu0 %vm99_vm1, %v2514_v29 }
  0x4b   :  { %2342 = vmatmul.mubr.msk.bf16.vlgmr.msra.gmra.mxu1 %vm99_vm1, %v2515_v30  ;;  %2364 = vmatmul.mubr.msk.bf16.vlgmr.msra.gmra.mxu0 %vm99_vm1, %v2516_v31 }
  0x4c   :  { %2380 = vmatpush3.bf16.msra.mxu1 %v2614_v2  ;;  %2402 = vmatpush3.bf16.msra.mxu0 %v2614_v2 }
  0x4d   :  { %2345 = vmatprep.mubr.msk.bf16.mxu1 %vm99_vm1, %v2517_v32  ;;  %2367 = vmatprep.mubr.msk.bf16.mxu0 %vm99_vm1, %v2518_v33 }
  0x4e   :  { %2381 = vmatprep.subr.bf16.mxu1 %v2606_v1  ;;  %2403 = vmatprep.subr.bf16.mxu0 %v2606_v1 }
  0x50   :  { %2382 = vmatpush3.bf16.msra.mxu1 %v2606_v1  ;;  %2404 = vmatpush3.bf16.msra.mxu0 %v2606_v1 }
  0x51   :  { %2383 = vmatprep.subr.bf16.mxu1 %v2616_v3  ;;  %2405 = vmatprep.subr.bf16.mxu0 %v2616_v3 }
  0x53   :  { %2346 = vmatmul.mubr.msk.bf16.gmra.mxu1 %vm99_vm1, %v2519_v34  ;;  %2368 = vmatmul.mubr.msk.bf16.gmra.mxu0 %vm99_vm1, %v2520_v35 }
  0x54   :  { %2349 = vmatprep.mubr.msk.bf16.mxu1 %vm99_vm1, %v2521_v36  ;;  %2371 = vmatprep.mubr.msk.bf16.mxu0 %vm99_vm1, %v2522_v37 }
  0x55   :  { %2384 = vmatpush3.bf16.msra.mxu1 %v2616_v3  ;;  %2406 = vmatpush3.bf16.msra.mxu0 %v2616_v3 }
  0x56   :  { %2481 = vmatprep.subr.msk.bf16.mxu1 %vm124_vm0, %v2604_v0  ;;  %2482 = vmatprep.subr.msk.bf16.mxu0 %vm124_vm0, %v2604_v0  ;;  %v2549_v0 = vld [vmem:[%s3194_s0 + $0x1b4] sm:$0xff]  }
  0x5b   :  { %2350 = vmatmul.mubr.msk.bf16.gmra.mxu1 %vm99_vm1, %v2523_v38  ;;  %2372 = vmatmul.mubr.msk.bf16.gmra.mxu0 %vm99_vm1, %v2524_v39 }
  0x5c   :  { %2353 = vmatprep.mubr.msk.bf16.mxu1 %vm99_vm1, %v2525_v40  ;;  %2375 = vmatprep.mubr.msk.bf16.mxu0 %vm99_vm1, %v2526_v41 }
  0x63   :  { %2354 = vmatmul.mubr.msk.bf16.gmra.mxu1 %vm99_vm1, %v2527_v42  ;;  %2376 = vmatmul.mubr.msk.bf16.gmra.mxu0 %vm99_vm1, %v2528_v43 }
  0x64   :  { %2385 = vmatprep.mubr.msk.bf16.mxu1 %vm99_vm1, %v2529_v44  ;;  %2407 = vmatprep.mubr.msk.bf16.mxu0 %vm99_vm1, %v2530_v45 }
  0x6b   :  { %2386 = vmatmul.mubr.msk.bf16.vlgmr.msra.gmra.mxu1 %vm99_vm1, %v2531_v46  ;;  %2408 = vmatmul.mubr.msk.bf16.vlgmr.msra.gmra.mxu0 %vm99_vm1, %v2532_v47 }
  0x6c   :  { %2424 = vmatpush3.bf16.msra.mxu1 %v2614_v2  ;;  %2446 = vmatpush3.bf16.msra.mxu0 %v2614_v2  ;;  %v2551_v2 = vld [vmem:[%s3194_s0 + $0x1bc] sm:$0xff]  }
  0x6d   :  { %2389 = vmatprep.mubr.msk.bf16.mxu1 %vm99_vm1, %v2533_v48  ;;  %2411 = vmatprep.mubr.msk.bf16.mxu0 %vm99_vm1, %v2534_v49 }
  0x6e   :  { %2425 = vmatprep.subr.bf16.mxu1 %v2606_v1  ;;  %2447 = vmatprep.subr.bf16.mxu0 %v2606_v1 }
  0x70   :  { %2426 = vmatpush3.bf16.msra.mxu1 %v2606_v1  ;;  %2448 = vmatpush3.bf16.msra.mxu0 %v2606_v1  ;;  %v2550_v1 = vld [vmem:[%s3194_s0 + $0x1f0] sm:$0xff]  }
  0x71   :  { %2427 = vmatprep.subr.bf16.mxu1 %v2616_v3  ;;  %2449 = vmatprep.subr.bf16.mxu0 %v2616_v3 }
  0x73   :  { %2390 = vmatmul.mubr.msk.bf16.gmra.mxu1 %vm99_vm1, %v2535_v50  ;;  %2412 = vmatmul.mubr.msk.bf16.gmra.mxu0 %vm99_vm1, %v2536_v51 }
  0x74   :  { %2393 = vmatprep.mubr.msk.bf16.mxu1 %vm99_vm1, %v2537_v52  ;;  %2415 = vmatprep.mubr.msk.bf16.mxu0 %vm99_vm1, %v2538_v53 }
  0x75   :  { %2428 = vmatpush3.bf16.msra.mxu1 %v2616_v3  ;;  %2450 = vmatpush3.bf16.msra.mxu0 %v2616_v3  ;;  %v2552_v3 = vld [vmem:[%s3194_s0 + $0x1f8] sm:$0xff]  }
  0x7b   :  { %2394 = vmatmul.mubr.msk.bf16.gmra.mxu1 %vm99_vm1, %v2539_v54  ;;  %2416 = vmatmul.mubr.msk.bf16.gmra.mxu0 %vm99_vm1, %v2540_v55 }
  0x7c   :  { %2397 = vmatprep.mubr.msk.bf16.mxu1 %vm99_vm1, %v2541_v56  ;;  %2419 = vmatprep.mubr.msk.bf16.mxu0 %vm99_vm1, %v2542_v57 }
  0x83   :  { %2398 = vmatmul.mubr.msk.bf16.gmra.mxu1 %vm99_vm1, %v2543_v58  ;;  %2420 = vmatmul.mubr.msk.bf16.gmra.mxu0 %vm99_vm1, %v2544_v59 }
  0x84   :  { %2429 = vmatprep.mubr.msk.bf16.mxu1 %vm99_vm1, %v2545_v60  ;;  %2451 = vmatprep.mubr.msk.bf16.mxu0 %vm99_vm1, %v2546_v61 }
  0x8b   :  { %2430 = vmatmul.mubr.msk.bf16.vlgmr.msra.gmra.mxu1 %vm99_vm1, %v2547_v62  ;;  %2452 = vmatmul.mubr.msk.bf16.vlgmr.msra.gmra.mxu0 %vm99_vm1, %v2548_v63 }
  0x8c   :  { %2433 = vmatprep.mubr.msk.bf16.mxu1 %vm99_vm1, %v2549_v0  ;;  %2455 = vmatprep.mubr.msk.bf16.mxu0 %vm99_vm1, %v2550_v1 }
  0x93   :  { %2434 = vmatmul.mubr.msk.bf16.gmra.mxu1 %vm99_vm1, %v2551_v2  ;;  %2456 = vmatmul.mubr.msk.bf16.gmra.mxu0 %vm99_vm1, %v2552_v3 }
  0x94   :  { %2437 = vmatprep.mubr.msk.bf16.mxu1 %vm99_vm1, %v2553_v4  ;;  %2459 = vmatprep.mubr.msk.bf16.mxu0 %vm99_vm1, %v2554_v5 }
  0x9b   :  { %2438 = vmatmul.mubr.msk.bf16.gmra.mxu1 %vm99_vm1, %v2555_v6  ;;  %2460 = vmatmul.mubr.msk.bf16.gmra.mxu0 %vm99_vm1, %v2556_v7 }
  0x9c   :  { %2441 = vmatprep.mubr.msk.bf16.mxu1 %vm99_vm1, %v2557_v8  ;;  %2463 = vmatprep.mubr.msk.bf16.mxu0 %vm99_vm1, %v2558_v9 }
  0xa3   :  { %2442 = vmatmul.mubr.msk.bf16.gmra.mxu1 %vm99_vm1, %v2559_v10  ;;  %2464 = vmatmul.mubr.msk.bf16.gmra.mxu0 %vm99_vm1, %v2560_v11 }
  0xdb   :  { %v2277_v12 = vpop.f32.mrf.mxu0  ;;  %v2285_v13 = vpop.f32.mrf.mxu1 }
  0xdd   :  { %v162_v14 = vpop.f32.mrf.mxu0  ;;  %v194_v15 = vpop.f32.mrf.mxu1 }
  0xdf   :  { %v2278_v16 = vpop.f32.mrf.mxu0  ;;  %v2286_v17 = vpop.f32.mrf.mxu1 }
  0xe1   :  { %v165_v18 = vpop.f32.mrf.mxu0  ;;  %v197_v19 = vpop.f32.mrf.mxu1 }
  0xe3   :  { %v2281_v20 = vpop.f32.mrf.mxu0  ;;  %v2289_v21 = vpop.f32.mrf.mxu1 }
  0xe5   :  { %v178_v22 = vpop.f32.mrf.mxu0  ;;  %v2972_v23 = vpop.f32.mrf.mxu1 }
  0xe7   :  { %v2282_v24 = vpop.f32.mrf.mxu0  ;;  %v2290_v25 = vpop.f32.mrf.mxu1 }
  0xe9   :  { %v181_v26 = vpop.f32.mrf.mxu0  ;;  %v2974_v27 = vpop.f32.mrf.mxu1 }
  0xeb   :  { %v2299_v28 = vpop.f32.mrf.mxu1  ;;  %v2321_v29 = vpop.f32.mrf.mxu0 }
  0xec   :  { %v400_v30 = vmax.f32 %v2277_v12, %v2299_v28 }
  0xed   :  { %v336_v31 = vpop.f32.mrf.mxu1  ;;  %v525_v32 = vpop.f32.mrf.mxu0 }
  0xee   :  { %v2976_v33 = vmax.f32 %v400_v30, %v2321_v29  ;;  %v398_v34 = vmax.f32 %v162_v14, %v336_v31 }
  0xef   :  { %v2300_v35 = vpop.f32.mrf.mxu1  ;;  %v2322_v36 = vpop.f32.mrf.mxu0 }
  0xf0   :  { %v2978_v37 = vmax.f32 %v398_v34, %v525_v32  ;;  %v401_v38 = vmax.f32 %v2278_v16, %v2300_v35 }
  0xf1   :  { %v339_v39 = vpop.f32.mrf.mxu1  ;;  %v528_v40 = vpop.f32.mrf.mxu0 }
  0xf2   :  { %v2980_v41 = vmax.f32 %v401_v38, %v2322_v36  ;;  %v399_v42 = vmax.f32 %v165_v18, %v339_v39 }
  0xf3   :  { %v2303_v43 = vpop.f32.mrf.mxu1  ;;  %v2325_v44 = vpop.f32.mrf.mxu0 }
  0xf4   :  { %v2982_v45 = vmax.f32 %v399_v42, %v528_v40  ;;  %v404_v46 = vmax.f32 %v2281_v20, %v2303_v43 }
  0xf5   :  { %v352_v47 = vpop.f32.mrf.mxu1  ;;  %v541_v48 = vpop.f32.mrf.mxu0 }
  0xf6   :  { %v2984_v49 = vmax.f32 %v404_v46, %v2325_v44  ;;  %v402_v50 = vmax.f32 %v178_v22, %v352_v47 }
  0xf7   :  { %v2304_v51 = vpop.f32.mrf.mxu1  ;;  %v2326_v52 = vpop.f32.mrf.mxu0 }
  0xf8   :  { %v2986_v53 = vmax.f32 %v402_v50, %v541_v48  ;;  %v405_v54 = vmax.f32 %v2282_v24, %v2304_v51 }
  0xf9   :  { %v355_v55 = vpop.f32.mrf.mxu1  ;;  %v544_v56 = vpop.f32.mrf.mxu0 }
  0xfa   :  { %v2988_v57 = vmax.f32 %v405_v54, %v2326_v52  ;;  %v403_v58 = vmax.f32 %v181_v26, %v355_v55 }
  0xfb   :  { %v2307_v59 = vpop.f32.mrf.mxu1  ;;  %v2329_v60 = vpop.f32.mrf.mxu0 }
  0xfc   :  { %v2990_v61 = vmax.f32 %v403_v58, %v544_v56  ;;  %v408_v62 = vmax.f32 %v2285_v13, %v2307_v59 }
  0xfd   :  { %v368_v63 = vpop.f32.mrf.mxu1  ;;  %v557_v0 = vpop.f32.mrf.mxu0 }
  0xfe   :  { %v2992_v1 = vmax.f32 %v408_v62, %v2329_v60  ;;  %v406_v2 = vmax.f32 %v194_v15, %v368_v63 }
  0xff   :  { %v2308_v3 = vpop.f32.mrf.mxu1  ;;  %v2330_v4 = vpop.f32.mrf.mxu0 }
 0x100   :  { %v2994_v5 = vmax.f32 %v406_v2, %v557_v0  ;;  %v409_v6 = vmax.f32 %v2286_v17, %v2308_v3 }
 0x101   :  { %v371_v7 = vpop.f32.mrf.mxu1  ;;  %v560_v8 = vpop.f32.mrf.mxu0 }
 0x102   :  { %v2996_v9 = vmax.f32 %v409_v6, %v2330_v4  ;;  %v407_v10 = vmax.f32 %v197_v19, %v371_v7 }
 0x103   :  { %v2311_v11 = vpop.f32.mrf.mxu1  ;;  %v2333_v12 = vpop.f32.mrf.mxu0 }
 0x104   :  { %v2998_v14 = vmax.f32 %v407_v10, %v560_v8  ;;  %v412_v13 = vmax.f32 %v2289_v21, %v2311_v11 }
 0x105   :  { %v384_v16 = vpop.f32.mrf.mxu1  ;;  %v573_v18 = vpop.f32.mrf.mxu0 }
 0x106   :  { %v3000_v20 = vmax.f32 %v412_v13, %v2333_v12  ;;  %v410_v15 = vmax.f32 %v2972_v23, %v384_v16 }
 0x107   :  { %v2312_v22 = vpop.f32.mrf.mxu1  ;;  %v2334_v24 = vpop.f32.mrf.mxu0 }
 0x108   :  { %v3003_v25 = vmax.f32 %v410_v15, %v573_v18 }
 0x109   :  { %v387_v17 = vpop.f32.mrf.mxu1  ;;  %v576_v26 = vpop.f32.mrf.mxu0 }
 0x10a   :  { %3197 = vst [vmem:[#allocation5_spill] sm:$0xff] %v3003_v25  ;;  %v411_v28 = vmax.f32 %v2974_v27, %v387_v17 }
 0x10b   :  { %v2343_v19 = vpop.f32.mrf.mxu1  ;;  %v2365_v29 = vpop.f32.mrf.mxu0 }
 0x10c   :  { %v3006_v30 = vmax.f32 %v411_v28, %v576_v26 }
 0x10d   :  { %v3008_v31 = vpop.f32.mrf.mxu1  ;;  %v903_v21 = vpop.f32.mrf.mxu0 }
 0x10e   :  { %3198 = vst [vmem:[#allocation6_spill] sm:$0xff] %v3006_v30 }
 0x10f   :  { %v3010_v32 = vpop.f32.mrf.mxu1  ;;  %v3012_v34 = vpop.f32.mrf.mxu0 }
 0x111   :  { %v3014_v23 = vpop.f32.mrf.mxu1  ;;  %v3016_v35 = vpop.f32.mrf.mxu0 }
 0x113   :  { %v3018_v36 = vpop.f32.mrf.mxu1  ;;  %v3020_v38 = vpop.f32.mrf.mxu0 }
 0x115   :  { %v3022_v27 = vpop.f32.mrf.mxu1  ;;  %v3024_v39 = vpop.f32.mrf.mxu0 }
 0x117   :  { %v3026_v40 = vpop.f32.mrf.mxu1  ;;  %v3028_v42 = vpop.f32.mrf.mxu0 }
 0x119   :  { %v3030_v43 = vpop.f32.mrf.mxu1  ;;  %v3032_v44 = vpop.f32.mrf.mxu0 }
 0x11b   :  { %v3034_v46 = vpop.f32.mrf.mxu1  ;;  %v3036_v47 = vpop.f32.mrf.mxu0 }
 0x11d   :  { %v3038_v48 = vpop.f32.mrf.mxu1  ;;  %v3040_v50 = vpop.f32.mrf.mxu0 }
 0x11f   :  { %v3042_v51 = vpop.f32.mrf.mxu1  ;;  %v3044_v52 = vpop.f32.mrf.mxu0 }
 0x121   :  { %v3046_v54 = vpop.f32.mrf.mxu1  ;;  %v3048_v55 = vpop.f32.mrf.mxu0 }
 0x122   :  { %3199 = vst [vmem:[#allocation7_spill] sm:$0xff] %v3048_v55 }
 0x123   :  { %v3050_v56 = vpop.f32.mrf.mxu1  ;;  %v3052_v58 = vpop.f32.mrf.mxu0 }
 0x124   :  { %3200 = vst [vmem:[#allocation8_spill] sm:$0xff] %v3052_v58 }
 0x125   :  { %v3054_v59 = vpop.f32.mrf.mxu1  ;;  %v3056_v60 = vpop.f32.mrf.mxu0 }
 0x126   :  { %3201 = vst [vmem:[#allocation9_spill] sm:$0xff] %v3054_v59  ;;  %3202 = vst [vmem:[#allocation10_spill] sm:$0xff] %v3056_v60  ;;  %v778_v60 = vmax.f32 %v2976_v33, %v2343_v19  ;;  %v776_v59 = vmax.f32 %v2978_v37, %v3008_v31  ;;  %v777_v19 = vmax.f32 %v2982_v45, %v3014_v23 }
 0x127   :  { %v2356_v62 = vpop.f32.mrf.mxu1  ;;  %v2378_v63 = vpop.f32.mrf.mxu0  ;;  %v782_v31 = vmax.f32 %v2984_v49, %v3018_v36  ;;  %v783_v23 = vmax.f32 %v2988_v57, %v3026_v40  ;;  %v786_v40 = vmax.f32 %v2992_v1, %v3034_v46 }
 0x128   :  { %v965_v33 = vmax.f32 %v776_v59, %v903_v21  ;;  %v966_v21 = vmax.f32 %v777_v19, %v3016_v35 }
 0x129   :  { %v3058_v0 = vpop.f32.mrf.mxu1  ;;  %v3060_v2 = vpop.f32.mrf.mxu0  ;;  %v972_v57 = vmax.f32 %v783_v23, %v3028_v42 }
 0x12a   :  { %3203 = vst [vmem:[#allocation11_spill] sm:$0xff] %v3058_v0  ;;  %3204 = vst [vmem:[#allocation12_spill] sm:$0xff] %v3060_v2 }
 0x12b   :  { %v2387_v3 = vpop.f32.mrf.mxu1  ;;  %v2409_v4 = vpop.f32.mrf.mxu0 }
 0x12d   :  { %v1092_v6 = vpop.f32.mrf.mxu1  ;;  %v1281_v7 = vpop.f32.mrf.mxu0 }
 0x12f   :  { %v2388_v8 = vpop.f32.mrf.mxu1  ;;  %v2410_v10 = vpop.f32.mrf.mxu0 }
 0x131   :  { %v1095_v11 = vpop.f32.mrf.mxu1  ;;  %v1284_v12 = vpop.f32.mrf.mxu0 }
 0x132   :  { %v1155_v36 = vmax.f32 %v966_v21, %v1095_v11  ;;  %v785_v21 = vmax.f32 %v2998_v14, %v3046_v54 }
 0x133   :  { %v3062_v13 = vpop.f32.mrf.mxu1  ;;  %v3064_v16 = vpop.f32.mrf.mxu0 }
 0x134   :  { %v1344_v11 = vmax.f32 %v1155_v36, %v1284_v12  ;;  %v787_v12 = vmax.f32 %v2996_v9, %v3042_v51 }
 0x135   :  { %v3066_v18 = vpop.f32.mrf.mxu1  ;;  %v3068_v15 = vpop.f32.mrf.mxu0 }
 0x137   :  { %v3070_v22 = vpop.f32.mrf.mxu1  ;;  %v3072_v24 = vpop.f32.mrf.mxu0 }
 0x139   :  { %v3074_v17 = vpop.f32.mrf.mxu1  ;;  %v3076_v26 = vpop.f32.mrf.mxu0 }
 0x13a   :  { %3205 = vst [vmem:[#allocation13_spill] sm:$0xff] %v3076_v26  ;;  %v967_v26 = vmax.f32 %v778_v60, %v2365_v29  ;;  %v1154_v29 = vmax.f32 %v965_v33, %v1092_v6 }
 0x13b   :  { %v3078_v28 = vpop.f32.mrf.mxu1  ;;  %v3080_v62 = vpop.f32.mrf.mxu0 }
 0x13c   :  { %3206 = vst [vmem:[#allocation14_spill] sm:$0xff] %v3080_v62  ;;  %v1343_v49 = vmax.f32 %v1154_v29, %v1281_v7 }
 0x13d   :  { %v3082_v63 = vpop.f32.mrf.mxu1  ;;  %v3084_v2 = vpop.f32.mrf.mxu0 }
 0x13e   :  { %3207 = vst [vmem:[#allocation15_spill] sm:$0xff] %v3082_v63  ;;  %3208 = vst [vmem:[#allocation16_spill] sm:$0xff] %v3084_v2  ;;  %v779_v2 = vmax.f32 %v2980_v41, %v3010_v32  ;;  %v780_v41 = vmax.f32 %v2986_v53, %v3022_v27  ;;  %v781_v27 = vmax.f32 %v2990_v61, %v3030_v43 }
 0x13f   :  { %v3086_v30 = vpop.f32.mrf.mxu1  ;;  %v3088_v0 = vpop.f32.mrf.mxu0  ;;  %v784_v43 = vmax.f32 %v2994_v5, %v3038_v48 }
 0x140   :  { %3209 = vst [vmem:[#allocation17_spill] sm:$0xff] %v3086_v30  ;;  %3210 = vst [vmem:[#allocation18_spill] sm:$0xff] %v3088_v0  ;;  %v968_v37 = vmax.f32 %v779_v2, %v3012_v34  ;;  %v971_v2 = vmax.f32 %v782_v31, %v3020_v38  ;;  %v969_v53 = vmax.f32 %v780_v41, %v3024_v39 }
 0x141   :  { %v3091_v58 = vpop.f32.mrf.mxu1  ;;  %v3093_v25 = vpop.f32.mrf.mxu0  ;;  %v970_v61 = vmax.f32 %v781_v27, %v3032_v44  ;;  %v3214_v14 = vld [vmem:[#allocation13_spill] sm:$0xff] }
 0x142   :  { %3211 = vst [vmem:[#allocation19_spill] sm:$0xff] %v3091_v58  ;;  %3212 = vst [vmem:[#allocation20_spill] sm:$0xff] %v3093_v25  ;;  %v1156_v25 = vmax.f32 %v967_v26, %v2387_v3  ;;  %v1157_v45 = vmax.f32 %v968_v37, %v2388_v8  ;;  %v1158_v38 = vmax.f32 %v969_v53, %v3066_v18  ;;  %v3215_v53 = vld [vmem:[#allocation7_spill] sm:$0xff] }
 0x143   :  { %v3097_v55 = vpop.f32.mrf.mxu1  ;;  %v3099_v62 = vpop.f32.mrf.mxu0  ;;  %v975_v18 = vmax.f32 %v786_v40, %v3036_v47  ;;  %v1159_v44 = vmax.f32 %v970_v61, %v3074_v17  ;;  %v974_v27 = vmax.f32 %v785_v21, %v3215_v53 }
 0x144   :  { %v1345_v59 = vmax.f32 %v1156_v25, %v2409_v4  ;;  %v1346_v35 = vmax.f32 %v1157_v45, %v2410_v10  ;;  %v1160_v25 = vmax.f32 %v971_v2, %v3062_v13  ;;  %v1161_v10 = vmax.f32 %v972_v57, %v3070_v22 }
 0x145   :  { %v3103_v30 = vpop.f32.mrf.mxu1  ;;  %v3105_v0 = vpop.f32.mrf.mxu0  ;;  %v1347_v37 = vmax.f32 %v1158_v38, %v3068_v15  ;;  %v3213_v2 = vld [vmem:[#allocation15_spill] sm:$0xff]  ;;  %v1348_v54 = vmax.f32 %v1159_v44, %v3214_v14 }
 0x146   :  { %v1349_v42 = vmax.f32 %v1160_v25, %v3064_v16  ;;  %v973_v16 = vmax.f32 %v784_v43, %v3040_v50  ;;  %v1350_v47 = vmax.f32 %v1161_v10, %v3072_v24 }
 0x147   :  { %v2400_v58 = vpop.f32.mrf.mxu1  ;;  %v2422_v63 = vpop.f32.mrf.mxu0 }
 0x148   :  { %v1162_v50 = vmax.f32 %v973_v16, %v3213_v2 }
 0x149   :  { %v3114_v32 = vpop.f32.mrf.mxu1  ;;  %v3116_v60 = vpop.f32.mrf.mxu0  ;;  %v3222_v61 = vld [vmem:[#allocation19_spill] sm:$0xff] }
 0x14a   :  { %v1163_v43 = vmax.f32 %v974_v27, %v3222_v61 }
 0x14b   :  { %v2431_v58 = vpop.f32.mrf.mxu1  ;;  %v2453_v34 = vpop.f32.mrf.mxu0 }
 0x14c   :  { %v1534_v3 = vmax.f32 %v1345_v59, %v2431_v58  ;;  %v1164_v59 = vmax.f32 %v975_v18, %v3078_v28  ;;  %v976_v58 = vmax.f32 %v787_v12, %v3044_v52  ;;  %v3217_v52 = vld [vmem:[#allocation5_spill] sm:$0xff]  ;;  %v3224_v12 = vld [vmem:[#allocation11_spill] sm:$0xff] }
 0x14d   :  { %v1470_v6 = vpop.f32.mrf.mxu1  ;;  %v1659_v26 = vpop.f32.mrf.mxu0 }
 0x14e   :  { %v1532_v4 = vmax.f32 %v1343_v49, %v1470_v6  ;;  %v1723_v39 = vmax.f32 %v1534_v3, %v2453_v34  ;;  %v790_v34 = vmax.f32 %v3000_v20, %v3050_v56  ;;  %v3216_v6 = vld [vmem:[#allocation9_spill] sm:$0xff] }
 0x14f   :  { %v2432_v7 = vpop.f32.mrf.mxu1  ;;  %v2454_v8 = vpop.f32.mrf.mxu0 }
 0x150   :  { %v1535_v63 = vmax.f32 %v1346_v35, %v2432_v7  ;;  %v1721_v19 = vmax.f32 %v1532_v4, %v1659_v26  ;;  %v1738_v48 = vmax.f32 %v1723_v39, 0.0  ;;  %v788_v26 = vmax.f32 %v3217_v52, %v3216_v6  ;;  %v3218_v35 = vld [vmem:[#allocation17_spill] sm:$0xff]  ;;  %v3219_v4 = vld [vmem:[#allocation14_spill] sm:$0xff]  ;;  %v3221_v39 = vld [vmem:[#allocation16_spill] sm:$0xff] }
 0x151   :  { %v1473_v13 = vpop.f32.mrf.mxu1  ;;  %v1662_v33 = vpop.f32.mrf.mxu0  ;;  %v1165_v20 = vmax.f32 %v976_v58, %v3218_v35  ;;  %v1353_v57 = vmax.f32 %v1164_v59, %v3219_v4 }
 0x152   :  { %v1724_v1 = vmax.f32 %v1535_v63, %v2454_v8  ;;  %v1533_v46 = vmax.f32 %v1344_v11, %v1473_v13  ;;  %v1736_v15 = vmax.f32 %v1721_v19, 0.0  ;;  %v3220_v8 = vld [vmem:[#allocation8_spill] sm:$0xff]  ;;  %v1351_v63 = vmax.f32 %v1162_v50, %v3221_v39 }
 0x153   :  { %v2435_v31 = vpop.f32.mrf.mxu1  ;;  %v2457_v5 = vpop.f32.mrf.mxu0  ;;  %v979_v11 = vmax.f32 %v790_v34, %v3220_v8 }
 0x154   :  { %v1739_v22 = vmax.f32 %v1724_v1, 0.0  ;;  %v1722_v29 = vmax.f32 %v1533_v46, %v1662_v33  ;;  %v1538_v41 = vmax.f32 %v1349_v42, %v2435_v31  ;;  %v3223_v46 = vld [vmem:[#allocation10_spill] sm:$0xff] }
 0x155   :  { %v1486_v9 = vpop.f32.mrf.mxu1  ;;  %v1675_v51 = vpop.f32.mrf.mxu0  ;;  %v977_v18 = vmax.f32 %v788_v26, %v3223_v46  ;;  %v3226_v31 = vld [vmem:[#allocation18_spill] sm:$0xff] }
 0x156   :  { %v2137_v45 = vpack.c.bf16 %v1739_v22, %v1738_v48  ;;  %v1737_v17 = vmax.f32 %v1722_v29, 0.0  ;;  %v1536_v23 = vmax.f32 %v1347_v37, %v1486_v9  ;;  %v1727_v28 = vmax.f32 %v1538_v41, %v2457_v5  ;;  %v3225_v37 = vld [vmem:[#allocation6_spill] sm:$0xff] }
 0x157   :  { %v2436_v49 = vpop.f32.mrf.mxu1  ;;  %v2458_v36 = vpop.f32.mrf.mxu0  ;;  %v789_v44 = vmax.f32 %v3225_v37, %v3224_v12  ;;  %v1354_v5 = vmax.f32 %v1165_v20, %v3226_v31  ;;  %v1168_v48 = vmax.f32 %v979_v11, %v3097_v55  ;;  %v1166_v59 = vmax.f32 %v977_v18, %v3103_v30  ;;  %v3228_v55 = vld [vmem:[#allocation12_spill] sm:$0xff] }
 0x158   :  { %2164 = vst [vmem:[%s3196_s2 + $0x8] sm:$0xff] %v2137_v45   ;;  %v2132_v24 = vpack.c.bf16 %v1737_v17, %v1736_v15  ;;  %v1539_v3 = vmax.f32 %v1350_v47, %v2436_v49  ;;  %v1725_v40 = vmax.f32 %v1536_v23, %v1675_v51  ;;  %v1742_v33 = vmax.f32 %v1727_v28, 0.0  ;;  %v3227_v15 = vld [vmem:[#allocation20_spill] sm:$0xff] }
 0x159   :  { %v1489_v56 = vpop.f32.mrf.mxu1  ;;  %v1678_v25 = vpop.f32.mrf.mxu0  ;;  %v1352_v45 = vmax.f32 %v1163_v43, %v3227_v15  ;;  %v978_v34 = vmax.f32 %v789_v44, %v3228_v55 }
 0x15a   :  { %2133 = vst [vmem:[%s3196_s2] sm:$0xff] %v2132_v24   ;;  %v1728_v38 = vmax.f32 %v1539_v3, %v2458_v36  ;;  %v1537_v7 = vmax.f32 %v1348_v54, %v1489_v56  ;;  %v1740_v41 = vmax.f32 %v1725_v40, 0.0  ;;  %v1357_v36 = vmax.f32 %v1168_v48, %v3099_v62 }
 0x15b   :  { %v2439_v10 = vpop.f32.mrf.mxu1  ;;  %v2461_v13 = vpop.f32.mrf.mxu0  ;;  %v1355_v54 = vmax.f32 %v1166_v59, %v3105_v0  ;;  %v1167_v24 = vmax.f32 %v978_v34, %v3114_v32 }
 0x15c   :  { %v1743_v42 = vmax.f32 %v1728_v38, 0.0  ;;  %v1726_v19 = vmax.f32 %v1537_v7, %v1678_v25  ;;  %v1542_v1 = vmax.f32 %v1353_v57, %v2439_v10 }
 0x15d   :  { %v1502_v22 = vpop.f32.mrf.mxu1  ;;  %v1691_v29 = vpop.f32.mrf.mxu0  ;;  %v1356_v38 = vmax.f32 %v1167_v24, %v3116_v60 }
 0x15e   :  { %v2147_v16 = vpack.c.bf16 %v1743_v42, %v1742_v33  ;;  %v1741_v21 = vmax.f32 %v1726_v19, 0.0  ;;  %v1540_v47 = vmax.f32 %v1351_v63, %v1502_v22  ;;  %v1731_v23 = vmax.f32 %v1542_v1, %v2461_v13 }
 0x15f   :  { %v2440_v9 = vpop.f32.mrf.mxu1  ;;  %v2462_v51 = vpop.f32.mrf.mxu0 }
 0x160   :  { %2166 = vst [vmem:[%s3196_s2 + $0x18] sm:$0xff] %v2147_v16   ;;  %v2142_v17 = vpack.c.bf16 %v1741_v21, %v1740_v41  ;;  %v1543_v58 = vmax.f32 %v1354_v5, %v2440_v9  ;;  %v1729_v2 = vmax.f32 %v1540_v47, %v1691_v29  ;;  %v1746_v53 = vmax.f32 %v1731_v23, 0.0 }
 0x161   :  { %v1505_v50 = vpop.f32.mrf.mxu1  ;;  %v1694_v49 = vpop.f32.mrf.mxu0 }
 0x162   :  { %2165 = vst [vmem:[%s3196_s2 + $0x10] sm:$0xff] %v2142_v17   ;;  %v1732_v30 = vmax.f32 %v1543_v58, %v2462_v51  ;;  %v1541_v14 = vmax.f32 %v1352_v45, %v1505_v50  ;;  %v1744_v26 = vmax.f32 %v1729_v2, 0.0 }
 0x163   :  { %v2443_v28 = vpop.f32.mrf.mxu1  ;;  %v2465_v3 = vpop.f32.mrf.mxu0 }
 0x164   :  { %v1747_v27 = vmax.f32 %v1732_v30, 0.0  ;;  %v1730_v6 = vmax.f32 %v1541_v14, %v1694_v49  ;;  %v1546_v52 = vmax.f32 %v1357_v36, %v2443_v28 }
 0x165   :  { %v1518_v35 = vpop.f32.mrf.mxu1  ;;  %v1707_v20 = vpop.f32.mrf.mxu0 }
 0x166   :  { %v2157_v62 = vpack.c.bf16 %v1747_v27, %v1746_v53  ;;  %v1745_v56 = vmax.f32 %v1730_v6, 0.0  ;;  %v1735_v25 = vmax.f32 %v1546_v52, %v2465_v3  ;;  %v1544_v4 = vmax.f32 %v1355_v54, %v1518_v35 }
 0x167   :  { %v2444_v57 = vpop.f32.mrf.mxu1  ;;  %v2466_v40 = vpop.f32.mrf.mxu0 }
 0x168   :  { %2168 = vst [vmem:[%s3196_s2 + $0x28] sm:$0xff] %v2157_v62   ;;  %v2152_v0 = vpack.c.bf16 %v1745_v56, %v1744_v26  ;;  %v1750_v32 = vmax.f32 %v1735_v25, 0.0  ;;  %v1733_v11 = vmax.f32 %v1544_v4, %v1707_v20 }
 0x169   :  { %v1521_v7 = vpop.f32.mrf.mxu1  ;;  %v1710_v63 = vpop.f32.mrf.mxu0 }
 0x16a   :  { %2167 = vst [vmem:[%s3196_s2 + $0x20] sm:$0xff] %v2152_v0   ;;  %v2128_v8 = vpack.c.bf16 %v1750_v32, %v1750_v32  ;;  %v1545_v39 = vmax.f32 %v1356_v38, %v1521_v7  ;;  %v1748_v61 = vmax.f32 %v1733_v11, 0.0 }
 0x16c   :  { %1826 = vst [vmem:[%s3196_s2 + $0x38] sm:$0xf] %v2128_v8  ;;  %v1734_v60 = vmax.f32 %v1545_v39, %v1710_v63 }
 0x16e   :  { %v1749_v43 = vmax.f32 %v1734_v60, 0.0 }
 0x170   :  { %v2162_v10 = vpack.c.bf16 %v1749_v43, %v1748_v61 }
 0x172   :  { %2169 = vst [vmem:[%s3196_s2 + $0x30] sm:$0xff] %v2162_v10  }
 0x173   :  { %1831 = vsyncpa [#allocation3], 1 }

// kernel: critic_net_forward.5
= control target key start
LH: loop header
LB: loop body
LE: loop exit
PB: predicated region body
PF: predicated region fallthrough
CT: control target
= control target key end

     0   :  { %v1902_v36 = vmov 1983009808   ;;  %v182_v38 = vlaneseq  ;;  %s2492_s0 = inlined_call_operand.vmem [shape: f32[2,1024], index: 0, kind: input, shape index: {}]   ;;  %s2493_s1 = inlined_call_operand.vmem [shape: f32[2,1], index: 1, kind: input, shape index: {}]   ;;  %s2494_s2 = inlined_call_operand.vmem [shape: f32[2,10], index: 2, kind: input, shape index: {}]   ;;  %s2495_s3 = inlined_call_operand.vmem [shape: f32[2,4], index: 3, kind: input, shape index: {}]   ;;  %s2496_s4 = inlined_call_operand.vmem [shape: bf16[1024,256], index: 4, kind: input, shape index: {}]   ;;  %s2497_s5 = inlined_call_operand.vmem [shape: f32[1,256], index: 5, kind: input, shape index: {}]   ;;  %s2498_s6 = inlined_call_operand.vmem [shape: bf16[256,64], index: 6, kind: input, shape index: {}]   ;;  %s2499_s7 = inlined_call_operand.vmem [shape: f32[1,64], index: 7, kind: input, shape index: {}]   ;;  %s2500_s8 = inlined_call_operand.vmem [shape: bf16[64,2], index: 8, kind: input, shape index: {}]   ;;  %s2501_s9 = inlined_call_operand.vmem [shape: f32[1,2], index: 9, kind: input, shape index: {}]   ;;  %s2502_s10 = inlined_call_operand.vmem [shape: bf16[10,2], index: 10, kind: input, shape index: {}]   ;;  %s2503_s11 = inlined_call_operand.vmem [shape: bf16[4,2], index: 11, kind: input, shape index: {}]   ;;  %s2504_s12 = inlined_call_operand.vmem [shape: f32[1,2], index: 12, kind: input, shape index: {}]   ;;  %s2505_s13 = inlined_call_operand.hbm [shape: f32[2,2], index: 13, kind: output, shape index: {}]  }
   0x1   :  { %v1665_v0 = vld [vmem:[%s2496_s4 + $0x74] ss:$8 sps:$4 sm:$0xff]   ;;  %v1669_v2 = vld [vmem:[%s2496_s4 + $0x70] ss:$8 sps:$4 sm:$0xff]   ;;  %v1671_v4 = vld [vmem:[%s2496_s4 + $0x64] ss:$8 sps:$4 sm:$0xff]   ;;  %v180_v37 = vunpack.c.l.s4 %v1902_v36 }
   0x2   :  { %v1667_v1 = vld [vmem:[%s2496_s4 + $0x174] ss:$8 sps:$4 sm:$0xff]   ;;  %880 = vmatprep.subr.bf16.mxu0 %v1665_v0  ;;  %v1670_v3 = vld [vmem:[%s2496_s4 + $0x170] ss:$8 sps:$4 sm:$0xff]   ;;  %v1673_v5 = vld [vmem:[%s2496_s4 + $0x164] ss:$8 sps:$4 sm:$0xff]  }
   0x3   :  { %921 = vmatprep.subr.bf16.mxu1 %v1667_v1  ;;  %881 = vmatpush1.bf16.msra.mxu0 %v1669_v2  ;;  %v1675_v6 = vld [vmem:[%s2496_s4 + $0x60] ss:$8 sps:$4 sm:$0xff]   ;;  %v1677_v8 = vld [vmem:[%s2496_s4 + $0x54] ss:$8 sps:$4 sm:$0xff]   ;;  %v1681_v10 = vld [vmem:[%s2496_s4 + $0x50] ss:$8 sps:$4 sm:$0xff]   ;;  %v181_v42 = vunpack.c.0.s8 %v180_v37 }
   0x4   :  { %922 = vmatpush1.bf16.msra.mxu1 %v1670_v3  ;;  %882 = vmatprep.subr.bf16.mxu0 %v1671_v4  ;;  %v1676_v7 = vld [vmem:[%s2496_s4 + $0x160] ss:$8 sps:$4 sm:$0xff]   ;;  %v1679_v9 = vld [vmem:[%s2496_s4 + $0x154] ss:$8 sps:$4 sm:$0xff]   ;;  %v1682_v11 = vld [vmem:[%s2496_s4 + $0x150] ss:$8 sps:$4 sm:$0xff]  }
   0x5   :  { %923 = vmatprep.subr.bf16.mxu1 %v1673_v5  ;;  %v1683_v12 = vld [vmem:[%s2496_s4 + $0x44] ss:$8 sps:$4 sm:$0xff]   ;;  %v1687_v14 = vld [vmem:[%s2496_s4 + $0x40] ss:$8 sps:$4 sm:$0xff]   ;;  %v1689_v16 = vld [vmem:[%s2496_s4 + $0x34] ss:$8 sps:$4 sm:$0xff]  }
   0x6   :  { %v1685_v13 = vld [vmem:[%s2496_s4 + $0x144] ss:$8 sps:$4 sm:$0xff]   ;;  %v1688_v15 = vld [vmem:[%s2496_s4 + $0x140] ss:$8 sps:$4 sm:$0xff]   ;;  %v1691_v17 = vld [vmem:[%s2496_s4 + $0x134] ss:$8 sps:$4 sm:$0xff]  }
   0x7   :  { %883 = vmatpush1.bf16.msra.mxu0 %v1675_v6  ;;  %v1693_v18 = vld [vmem:[%s2496_s4 + $0x30] ss:$8 sps:$4 sm:$0xff]   ;;  %v1695_v20 = vld [vmem:[%s2496_s4 + $0x24] ss:$8 sps:$4 sm:$0xff]   ;;  %v1699_v22 = vld [vmem:[%s2496_s4 + $0x20] ss:$8 sps:$4 sm:$0xff]  }
   0x8   :  { %924 = vmatpush1.bf16.msra.mxu1 %v1676_v7  ;;  %884 = vmatprep.subr.bf16.mxu0 %v1677_v8  ;;  %v1694_v19 = vld [vmem:[%s2496_s4 + $0x130] ss:$8 sps:$4 sm:$0xff]   ;;  %v1697_v21 = vld [vmem:[%s2496_s4 + $0x124] ss:$8 sps:$4 sm:$0xff]   ;;  %v1700_v23 = vld [vmem:[%s2496_s4 + $0x120] ss:$8 sps:$4 sm:$0xff]  }
   0x9   :  { %925 = vmatprep.subr.bf16.mxu1 %v1679_v9  ;;  %v1701_v24 = vld [vmem:[%s2496_s4 + $0x14] ss:$8 sps:$4 sm:$0xff]   ;;  %v1705_v26 = vld [vmem:[%s2496_s4 + $0x10] ss:$8 sps:$4 sm:$0xff]   ;;  %v1707_v28 = vld [vmem:[%s2496_s4 + $0x4] ss:$8 sps:$4 sm:$0xff]  }
   0xa   :  { %v1703_v25 = vld [vmem:[%s2496_s4 + $0x114] ss:$8 sps:$4 sm:$0xff]   ;;  %v1706_v27 = vld [vmem:[%s2496_s4 + $0x110] ss:$8 sps:$4 sm:$0xff]   ;;  %v1709_v29 = vld [vmem:[%s2496_s4 + $0x104] ss:$8 sps:$4 sm:$0xff]  }
   0xb   :  { %885 = vmatpush1.bf16.msra.mxu0 %v1681_v10  ;;  %v1711_v30 = vld [vmem:[%s2496_s4] ss:$8 sps:$4 sm:$0xff]   ;;  %v1713_v32 = vld [vmem:[%s2496_s4 + $0xf4] ss:$8 sps:$4 sm:$0xff]   ;;  %v1717_v34 = vld [vmem:[%s2496_s4 + $0xf0] ss:$8 sps:$4 sm:$0xff]  }
   0xc   :  { %926 = vmatpush1.bf16.msra.mxu1 %v1682_v11  ;;  %886 = vmatprep.subr.bf16.mxu0 %v1683_v12  ;;  %v1712_v31 = vld [vmem:[%s2496_s4 + $0x100] ss:$8 sps:$4 sm:$0xff]   ;;  %v1715_v33 = vld [vmem:[%s2496_s4 + $0x1f4] ss:$8 sps:$4 sm:$0xff]   ;;  %v1718_v35 = vld [vmem:[%s2496_s4 + $0x1f0] ss:$8 sps:$4 sm:$0xff]  }
   0xd   :  { %927 = vmatprep.subr.bf16.mxu1 %v1685_v13  ;;  %v1719_v39 = vld [vmem:[%s2496_s4 + $0xe4] ss:$8 sps:$4 sm:$0xff]   ;;  %v1723_v41 = vld [vmem:[%s2496_s4 + $0xe0] ss:$8 sps:$4 sm:$0xff]   ;;  %v2094_v43 = vshrl.u32 %v182_v38, 7 }
   0xe   :  { %v1721_v40 = vld [vmem:[%s2496_s4 + $0x1e4] ss:$8 sps:$4 sm:$0xff]   ;;  %v1724_v44 = vld [vmem:[%s2496_s4 + $0x1e0] ss:$8 sps:$4 sm:$0xff]   ;;  %v1725_v45 = vld [vmem:[%s2496_s4 + $0xd4] ss:$8 sps:$4 sm:$0xff]  }
   0xf   :  { %887 = vmatpush1.bf16.msra.mxu0 %v1687_v14  ;;  %v1727_v46 = vld [vmem:[%s2496_s4 + $0x1d4] ss:$8 sps:$4 sm:$0xff]   ;;  %v1729_v47 = vld [vmem:[%s2496_s4 + $0xd0] ss:$8 sps:$4 sm:$0xff]   ;;  %v2112_v49 = vsub.s32 %v181_v42, %v2094_v43  ;;  %v1731_v50 = vld [vmem:[%s2496_s4 + $0xc4] ss:$8 sps:$4 sm:$0xff]  }
  0x10   :  { %928 = vmatpush1.bf16.msra.mxu1 %v1688_v15  ;;  %888 = vmatprep.subr.bf16.mxu0 %v1689_v16  ;;  %v1730_v48 = vld [vmem:[%s2496_s4 + $0x1d0] ss:$8 sps:$4 sm:$0xff]   ;;  %v1733_v51 = vld [vmem:[%s2496_s4 + $0x1c4] ss:$8 sps:$4 sm:$0xff]   ;;  %v1735_v53 = vld [vmem:[%s2496_s4 + $0xc0] ss:$8 sps:$4 sm:$0xff]  }
  0x11   :  { %929 = vmatprep.subr.bf16.mxu1 %v1691_v17  ;;  %v46_v52 = vld [vmem:[%s2492_s0] sm:$0xff]  ;;  %v1737_v57 = vld [vmem:[%s2496_s4 + $0xb4] ss:$8 sps:$4 sm:$0xff]   ;;  %v1741_v61 = vld [vmem:[%s2496_s4 + $0xb0] ss:$8 sps:$4 sm:$0xff]  }
  0x12   :  { %v185_v54 = vrot.slane %v46_v52, %v2112_v49  ;;  %v178_v55 = vcombine.high %v46_v52, %v46_v52  ;;  %v1736_v56 = vld [vmem:[%s2496_s4 + $0x1c0] ss:$8 sps:$4 sm:$0xff]   ;;  %v1739_v58 = vld [vmem:[%s2496_s4 + $0x1b4] ss:$8 sps:$4 sm:$0xff]   ;;  %v1742_v0 = vld [vmem:[%s2496_s4 + $0x1b0] ss:$8 sps:$4 sm:$0xff]  }
  0x13   :  { %889 = vmatpush1.bf16.msra.mxu0 %v1693_v18  ;;  %v1743_v1 = vld [vmem:[%s2496_s4 + $0xa4] ss:$8 sps:$4 sm:$0xff]   ;;  %v1747_v4 = vld [vmem:[%s2496_s4 + $0xa0] ss:$8 sps:$4 sm:$0xff]   ;;  %v1749_v6 = vld [vmem:[%s2496_s4 + $0x94] ss:$8 sps:$4 sm:$0xff]  }
  0x14   :  { %930 = vmatpush1.bf16.msra.mxu1 %v1694_v19  ;;  %890 = vmatprep.subr.bf16.mxu0 %v1695_v20  ;;  %v193_v59 = vcombine.high %v185_v54, %v185_v54  ;;  %v192_v60 = vrot.slane %v178_v55, %v2112_v49  ;;  %v1745_v2 = vld [vmem:[%s2496_s4 + $0x1a4] ss:$8 sps:$4 sm:$0xff]   ;;  %v1748_v5 = vld [vmem:[%s2496_s4 + $0x1a0] ss:$8 sps:$4 sm:$0xff]   ;;  %v1751_v7 = vld [vmem:[%s2496_s4 + $0x194] ss:$8 sps:$4 sm:$0xff]   ;;  %v220_v16 = vpack.c.bf16 %v185_v54, %v185_v54 }
  0x15   :  { %931 = vmatprep.subr.bf16.mxu1 %v1697_v21  ;;  %v1753_v8 = vld [vmem:[%s2496_s4 + $0x90] ss:$8 sps:$4 sm:$0xff]   ;;  %v1755_v10 = vld [vmem:[%s2496_s4 + $0x84] ss:$8 sps:$4 sm:$0xff]   ;;  %v1759_v12 = vld [vmem:[%s2496_s4 + $0x80] ss:$8 sps:$4 sm:$0xff]  }
  0x16   :  { %v221_v62 = vpack.c.bf16 %v193_v59, %v193_v59  ;;  %v194_v63 = vcombine.high %v192_v60, %v192_v60  ;;  %v1754_v9 = vld [vmem:[%s2496_s4 + $0x190] ss:$8 sps:$4 sm:$0xff]   ;;  %v1757_v11 = vld [vmem:[%s2496_s4 + $0x184] ss:$8 sps:$4 sm:$0xff]   ;;  %v1760_v13 = vld [vmem:[%s2496_s4 + $0x180] ss:$8 sps:$4 sm:$0xff]   ;;  %v222_v17 = vpack.c.bf16 %v192_v60, %v192_v60 }
  0x17   :  { %891 = vmatpush1.bf16.msra.mxu0 %v1699_v22  ;;  %v1764_v14 = vld [vmem:[%s2496_s4 + $0x274] ss:$8 sps:$4 sm:$0xff]   ;;  %v1762_v18 = vld [vmem:[%s2496_s4 + $0x270] ss:$8 sps:$4 sm:$0xff]   ;;  %v1770_v20 = vld [vmem:[%s2496_s4 + $0x264] ss:$8 sps:$4 sm:$0xff]  }
  0x18   :  { %932 = vmatpush1.bf16.msra.mxu1 %v1700_v23  ;;  %892 = vmatprep.subr.bf16.mxu0 %v1701_v24  ;;  %v223_v3 = vpack.c.bf16 %v194_v63, %v194_v63  ;;  %v1767_v15 = vld [vmem:[%s2496_s4 + $0x374] ss:$8 sps:$4 sm:$0xff]   ;;  %v1765_v19 = vld [vmem:[%s2496_s4 + $0x370] ss:$8 sps:$4 sm:$0xff]   ;;  %v1773_v21 = vld [vmem:[%s2496_s4 + $0x364] ss:$8 sps:$4 sm:$0xff]  }
  0x19   :  { %933 = vmatprep.subr.bf16.mxu1 %v1703_v25  ;;  %912 = vmatprep.mubr.bf16.mxu0 %v221_v62  ;;  %v1768_v22 = vld [vmem:[%s2496_s4 + $0x260] ss:$8 sps:$4 sm:$0xff]   ;;  %v1776_v24 = vld [vmem:[%s2496_s4 + $0x254] ss:$8 sps:$4 sm:$0xff]   ;;  %v1794_v36 = vld [vmem:[%s2496_s4 + $0x224] ss:$8 sps:$4 sm:$0xff]  }
  0x1a   :  { %953 = vmatprep.mubr.bf16.mxu1 %v223_v3  ;;  %v1771_v23 = vld [vmem:[%s2496_s4 + $0x360] ss:$8 sps:$4 sm:$0xff]   ;;  %v1779_v25 = vld [vmem:[%s2496_s4 + $0x354] ss:$8 sps:$4 sm:$0xff]   ;;  %v1797_v37 = vld [vmem:[%s2496_s4 + $0x324] ss:$8 sps:$4 sm:$0xff]  }
  0x1b   :  { %893 = vmatpush1.bf16.msra.mxu0 %v1705_v26  ;;  %v1774_v26 = vld [vmem:[%s2496_s4 + $0x250] ss:$8 sps:$4 sm:$0xff]   ;;  %v1792_v38 = vld [vmem:[%s2496_s4 + $0x220] ss:$8 sps:$4 sm:$0xff]   ;;  %v1821_v62 = vld [vmem:[%s2496_s4 + $0x3e4] ss:$8 sps:$4 sm:$0xff]  }
  0x1c   :  { %934 = vmatpush1.bf16.msra.mxu1 %v1706_v27  ;;  %894 = vmatprep.subr.bf16.mxu0 %v1707_v28  ;;  %v1777_v27 = vld [vmem:[%s2496_s4 + $0x350] ss:$8 sps:$4 sm:$0xff]   ;;  %v1782_v28 = vld [vmem:[%s2496_s4 + $0x244] ss:$8 sps:$4 sm:$0xff]   ;;  %v1807_v54 = vld [vmem:[%s2496_s4 + $0x300] ss:$8 sps:$4 sm:$0xff]  }
  0x1d   :  { %935 = vmatprep.subr.bf16.mxu1 %v1709_v29  ;;  %v1785_v29 = vld [vmem:[%s2496_s4 + $0x344] ss:$8 sps:$4 sm:$0xff]   ;;  %v1810_v59 = vld [vmem:[%s2496_s4 + $0x2f0] ss:$8 sps:$4 sm:$0xff]   ;;  %v1816_v63 = vld [vmem:[%s2496_s4 + $0x2e0] ss:$8 sps:$4 sm:$0xff]  }
  0x1e   :  { %v47_v42 = vld [vmem:[%s2492_s0 + $0x8] sm:$0xff]  ;;  %v1813_v60 = vld [vmem:[%s2496_s4 + $0x3f0] ss:$8 sps:$4 sm:$0xff]  }
  0x1f   :  { %895 = vmatpush1.bf16.msra.mxu0 %v1711_v30  ;;  %v1780_v30 = vld [vmem:[%s2496_s4 + $0x240] ss:$8 sps:$4 sm:$0xff]  }
  0x20   :  { %936 = vmatpush1.bf16.msra.mxu1 %v1712_v31  ;;  %896 = vmatprep.subr.bf16.mxu0 %v1713_v32  ;;  %v1783_v31 = vld [vmem:[%s2496_s4 + $0x340] ss:$8 sps:$4 sm:$0xff]   ;;  %v1788_v32 = vld [vmem:[%s2496_s4 + $0x234] ss:$8 sps:$4 sm:$0xff]  }
  0x21   :  { %937 = vmatprep.subr.bf16.mxu1 %v1715_v33  ;;  %v1791_v33 = vld [vmem:[%s2496_s4 + $0x334] ss:$8 sps:$4 sm:$0xff]  }
  0x23   :  { %897 = vmatpush2.bf16.msra.mxu0 %v1717_v34  ;;  %v1786_v34 = vld [vmem:[%s2496_s4 + $0x230] ss:$8 sps:$4 sm:$0xff]  }
  0x24   :  { %938 = vmatpush2.bf16.msra.mxu1 %v1718_v35  ;;  %898 = vmatprep.subr.bf16.mxu0 %v1719_v39  ;;  %v1789_v35 = vld [vmem:[%s2496_s4 + $0x330] ss:$8 sps:$4 sm:$0xff]   ;;  %v1795_v39 = vld [vmem:[%s2496_s4 + $0x320] ss:$8 sps:$4 sm:$0xff]  }
  0x25   :  { %939 = vmatprep.subr.bf16.mxu1 %v1721_v40  ;;  %v1800_v40 = vld [vmem:[%s2496_s4 + $0x214] ss:$8 sps:$4 sm:$0xff]  }
  0x27   :  { %899 = vmatpush2.bf16.msra.mxu0 %v1723_v41  ;;  %v1803_v41 = vld [vmem:[%s2496_s4 + $0x314] ss:$8 sps:$4 sm:$0xff]  }
  0x28   :  { %940 = vmatpush2.bf16.msra.mxu1 %v1724_v44  ;;  %900 = vmatprep.subr.bf16.mxu0 %v1725_v45  ;;  %v1798_v44 = vld [vmem:[%s2496_s4 + $0x210] ss:$8 sps:$4 sm:$0xff]  }
  0x29   :  { %941 = vmatprep.subr.bf16.mxu1 %v1727_v46  ;;  %v1801_v45 = vld [vmem:[%s2496_s4 + $0x310] ss:$8 sps:$4 sm:$0xff]   ;;  %v2267_v46 = vrot.slane %v47_v42, %v2112_v49 }
  0x2b   :  { %901 = vmatpush2.bf16.msra.mxu0 %v1729_v47  ;;  %v195_v47 = vcombine.high %v47_v42, %v47_v42 }
  0x2c   :  { %942 = vmatpush2.bf16.msra.mxu1 %v1730_v48  ;;  %902 = vmatprep.subr.bf16.mxu0 %v1731_v50  ;;  %v1806_v48 = vld [vmem:[%s2496_s4 + $0x204] ss:$8 sps:$4 sm:$0xff]  }
  0x2d   :  { %943 = vmatprep.subr.bf16.mxu1 %v1733_v51  ;;  %v1809_v50 = vld [vmem:[%s2496_s4 + $0x304] ss:$8 sps:$4 sm:$0xff]   ;;  %v210_v51 = vcombine.high %v2267_v46, %v2267_v46  ;;  %v2278_v52 = vrot.slane %v195_v47, %v2112_v49  ;;  %v1815_v49 = vld [vmem:[%s2496_s4 + $0x3f4] ss:$8 sps:$4 sm:$0xff]  }
  0x2f   :  { %903 = vmatpush2.bf16.msra.mxu0 %v1735_v53  ;;  %v1804_v53 = vld [vmem:[%s2496_s4 + $0x200] ss:$8 sps:$4 sm:$0xff]   ;;  %v225_v55 = vpack.c.bf16 %v210_v51, %v210_v51 }
  0x30   :  { %944 = vmatpush2.bf16.msra.mxu1 %v1736_v56  ;;  %904 = vmatprep.subr.bf16.mxu0 %v1737_v57  ;;  %v211_v56 = vcombine.high %v2278_v52, %v2278_v52  ;;  %v1812_v57 = vld [vmem:[%s2496_s4 + $0x2f4] ss:$8 sps:$4 sm:$0xff]  }
  0x31   :  { %945 = vmatprep.subr.bf16.mxu1 %v1739_v58 }
  0x32   :  { %v227_v58 = vpack.c.bf16 %v211_v56, %v211_v56 }
  0x33   :  { %905 = vmatpush2.bf16.msra.mxu0 %v1741_v61  ;;  %v1818_v61 = vld [vmem:[%s2496_s4 + $0x2e4] ss:$8 sps:$4 sm:$0xff]  }
  0x34   :  { %946 = vmatpush2.bf16.msra.mxu1 %v1742_v0  ;;  %906 = vmatprep.subr.bf16.mxu0 %v1743_v1  ;;  %v1819_v0 = vld [vmem:[%s2496_s4 + $0x3e0] ss:$8 sps:$4 sm:$0xff]  }
  0x35   :  { %947 = vmatprep.subr.bf16.mxu1 %v1745_v2 }
  0x37   :  { %907 = vmatpush2.bf16.msra.mxu0 %v1747_v4 }
  0x38   :  { %948 = vmatpush2.bf16.msra.mxu1 %v1748_v5  ;;  %908 = vmatprep.subr.bf16.mxu0 %v1749_v6 }
  0x39   :  { %949 = vmatprep.subr.bf16.mxu1 %v1751_v7 }
  0x3b   :  { %909 = vmatpush2.bf16.msra.mxu0 %v1753_v8 }
  0x3c   :  { %950 = vmatpush2.bf16.msra.mxu1 %v1754_v9  ;;  %910 = vmatprep.subr.bf16.mxu0 %v1755_v10 }
  0x3d   :  { %951 = vmatprep.subr.bf16.mxu1 %v1757_v11 }
  0x3f   :  { %911 = vmatpush2.bf16.msra.mxu0 %v1759_v12 }
  0x40   :  { %952 = vmatpush2.bf16.msra.mxu1 %v1760_v13  ;;  %962 = vmatprep.subr.bf16.mxu0 %v1764_v14 }
  0x41   :  { %1003 = vmatprep.subr.bf16.mxu1 %v1767_v15 }
  0x42   :  { %913 = vmatmul.mubr.bf16.vlgmr.msra.gmra.mxu0 %v220_v16 }
  0x43   :  { %954 = vmatmul.mubr.bf16.vlgmr.msra.gmra.mxu1 %v222_v17  ;;  %963 = vmatpush1.bf16.msra.mxu0 %v1762_v18 }
  0x44   :  { %1004 = vmatpush1.bf16.msra.mxu1 %v1765_v19  ;;  %964 = vmatprep.subr.bf16.mxu0 %v1770_v20 }
  0x45   :  { %1005 = vmatprep.subr.bf16.mxu1 %v1773_v21  ;;  %994 = vmatprep.mubr.bf16.mxu0 %v225_v55 }
  0x46   :  { %1035 = vmatprep.mubr.bf16.mxu1 %v227_v58 }
  0x47   :  { %965 = vmatpush1.bf16.msra.mxu0 %v1768_v22 }
  0x48   :  { %1006 = vmatpush1.bf16.msra.mxu1 %v1771_v23  ;;  %966 = vmatprep.subr.bf16.mxu0 %v1776_v24 }
  0x49   :  { %1007 = vmatprep.subr.bf16.mxu1 %v1779_v25 }
  0x4b   :  { %967 = vmatpush1.bf16.msra.mxu0 %v1774_v26 }
  0x4c   :  { %1008 = vmatpush1.bf16.msra.mxu1 %v1777_v27  ;;  %968 = vmatprep.subr.bf16.mxu0 %v1782_v28 }
  0x4d   :  { %1009 = vmatprep.subr.bf16.mxu1 %v1785_v29 }
  0x4f   :  { %969 = vmatpush1.bf16.msra.mxu0 %v1780_v30 }
  0x50   :  { %1010 = vmatpush1.bf16.msra.mxu1 %v1783_v31  ;;  %970 = vmatprep.subr.bf16.mxu0 %v1788_v32 }
  0x51   :  { %1011 = vmatprep.subr.bf16.mxu1 %v1791_v33 }
  0x53   :  { %971 = vmatpush1.bf16.msra.mxu0 %v1786_v34 }
  0x54   :  { %1012 = vmatpush1.bf16.msra.mxu1 %v1789_v35  ;;  %972 = vmatprep.subr.bf16.mxu0 %v1794_v36 }
  0x55   :  { %1013 = vmatprep.subr.bf16.mxu1 %v1797_v37 }
  0x57   :  { %973 = vmatpush1.bf16.msra.mxu0 %v1792_v38 }
  0x58   :  { %1014 = vmatpush1.bf16.msra.mxu1 %v1795_v39  ;;  %974 = vmatprep.subr.bf16.mxu0 %v1800_v40 }
  0x59   :  { %1015 = vmatprep.subr.bf16.mxu1 %v1803_v41 }
  0x5b   :  { %975 = vmatpush1.bf16.msra.mxu0 %v1798_v44 }
  0x5c   :  { %1016 = vmatpush1.bf16.msra.mxu1 %v1801_v45  ;;  %976 = vmatprep.subr.bf16.mxu0 %v1806_v48 }
  0x5d   :  { %1017 = vmatprep.subr.bf16.mxu1 %v1809_v50 }
  0x5f   :  { %977 = vmatpush1.bf16.msra.mxu0 %v1804_v53 }
  0x60   :  { %1018 = vmatpush1.bf16.msra.mxu1 %v1807_v54  ;;  %978 = vmatprep.subr.bf16.mxu0 %v1812_v57 }
  0x61   :  { %1019 = vmatprep.subr.bf16.mxu1 %v1815_v49 }
  0x63   :  { %979 = vmatpush2.bf16.msra.mxu0 %v1810_v59 }
  0x64   :  { %1020 = vmatpush2.bf16.msra.mxu1 %v1813_v60 }
  0x65   :  { %18 = vsyncpa [#allocation3], 0  ;;  %980 = vmatprep.subr.bf16.mxu0 %v1818_v61  ;;  %1021 = vmatprep.subr.bf16.mxu1 %v1821_v62  ;;  %v1824_v1 = vld [vmem:[%s2496_s4 + $0x2d4] ss:$8 sps:$4 sm:$0xff]   ;;  %v1822_v3 = vld [vmem:[%s2496_s4 + $0x2d0] ss:$8 sps:$4 sm:$0xff]   ;;  %v224_v25 = vpack.c.bf16 %v2267_v46, %v2267_v46  ;;  %v226_v26 = vpack.c.bf16 %v2278_v52, %v2278_v52 }
  0x66   :  { %v1827_v2 = vld [vmem:[%s2496_s4 + $0x3d4] ss:$8 sps:$4 sm:$0xff]   ;;  %v1825_v4 = vld [vmem:[%s2496_s4 + $0x3d0] ss:$8 sps:$4 sm:$0xff]   ;;  %v1830_v5 = vld [vmem:[%s2496_s4 + $0x2c4] ss:$8 sps:$4 sm:$0xff]  }
  0x67   :  { %981 = vmatpush2.bf16.msra.mxu0 %v1816_v63  ;;  %v1833_v6 = vld [vmem:[%s2496_s4 + $0x3c4] ss:$8 sps:$4 sm:$0xff]   ;;  %v1828_v7 = vld [vmem:[%s2496_s4 + $0x2c0] ss:$8 sps:$4 sm:$0xff]   ;;  %v1836_v9 = vld [vmem:[%s2496_s4 + $0x2b4] ss:$8 sps:$4 sm:$0xff]  }
  0x68   :  { %1022 = vmatpush2.bf16.msra.mxu1 %v1819_v0  ;;  %982 = vmatprep.subr.bf16.mxu0 %v1824_v1  ;;  %v1831_v8 = vld [vmem:[%s2496_s4 + $0x3c0] ss:$8 sps:$4 sm:$0xff]   ;;  %v1839_v10 = vld [vmem:[%s2496_s4 + $0x3b4] ss:$8 sps:$4 sm:$0xff]   ;;  %v1834_v11 = vld [vmem:[%s2496_s4 + $0x2b0] ss:$8 sps:$4 sm:$0xff]  }
  0x69   :  { %1023 = vmatprep.subr.bf16.mxu1 %v1827_v2  ;;  %v1837_v12 = vld [vmem:[%s2496_s4 + $0x3b0] ss:$8 sps:$4 sm:$0xff]   ;;  %v1842_v13 = vld [vmem:[%s2496_s4 + $0x2a4] ss:$8 sps:$4 sm:$0xff]   ;;  %v1840_v15 = vld [vmem:[%s2496_s4 + $0x2a0] ss:$8 sps:$4 sm:$0xff]  }
  0x6a   :  { %v1845_v14 = vld [vmem:[%s2496_s4 + $0x3a4] ss:$8 sps:$4 sm:$0xff]   ;;  %v1843_v16 = vld [vmem:[%s2496_s4 + $0x3a0] ss:$8 sps:$4 sm:$0xff]   ;;  %v1848_v17 = vld [vmem:[%s2496_s4 + $0x294] ss:$8 sps:$4 sm:$0xff]  }
  0x6b   :  { %983 = vmatpush2.bf16.msra.mxu0 %v1822_v3  ;;  %v1851_v18 = vld [vmem:[%s2496_s4 + $0x394] ss:$8 sps:$4 sm:$0xff]   ;;  %v1846_v19 = vld [vmem:[%s2496_s4 + $0x290] ss:$8 sps:$4 sm:$0xff]   ;;  %v1854_v21 = vld [vmem:[%s2496_s4 + $0x284] ss:$8 sps:$4 sm:$0xff]  }
  0x6c   :  { %1024 = vmatpush2.bf16.msra.mxu1 %v1825_v4  ;;  %984 = vmatprep.subr.bf16.mxu0 %v1830_v5  ;;  %v1849_v20 = vld [vmem:[%s2496_s4 + $0x390] ss:$8 sps:$4 sm:$0xff]   ;;  %v1857_v22 = vld [vmem:[%s2496_s4 + $0x384] ss:$8 sps:$4 sm:$0xff]   ;;  %v1852_v23 = vld [vmem:[%s2496_s4 + $0x280] ss:$8 sps:$4 sm:$0xff]  }
  0x6d   :  { %1025 = vmatprep.subr.bf16.mxu1 %v1833_v6  ;;  %v1855_v24 = vld [vmem:[%s2496_s4 + $0x380] ss:$8 sps:$4 sm:$0xff]   ;;  %v1859_v27 = vld [vmem:[%s2498_s6 + $0x78] sm:$0xff]   ;;  %v1861_v29 = vld [vmem:[%s2498_s6 + $0x70] sm:$0xff]   ;;  %v1903_v45 = vmov 0.0   ;;  %v232_v56 = vsub.s32 0, %v2094_v43 }
  0x6e   :  { %v1860_v28 = vld [vmem:[%s2498_s6 + $0x38] sm:$0xff]   ;;  %v1862_v30 = vld [vmem:[%s2498_s6 + $0x30] sm:$0xff]   ;;  %v1863_v31 = vld [vmem:[%s2498_s6 + $0x68] sm:$0xff]   ;;  %v236_v49 = vsub.s32 1, %v2094_v43  ;;  %vm1904_vm0 = vmmov 0   ;;  %vm1328_vm1 = vcmask 1044480  }
  0x6f   :  { %985 = vmatpush2.bf16.msra.mxu0 %v1828_v7  ;;  %v1864_v32 = vld [vmem:[%s2498_s6 + $0x28] sm:$0xff]   ;;  %v1865_v33 = vld [vmem:[%s2498_s6 + $0x60] sm:$0xff]   ;;  %v1867_v35 = vld [vmem:[%s2498_s6 + $0x58] sm:$0xff]   ;;  %vm1271_vm2 = vcmask 523264   ;;  %vm1380_vm3 = vcmask 1041408   ;;  %vm1324_vm4 = vcmask 80896  }
  0x70   :  { %1026 = vmatpush2.bf16.msra.mxu1 %v1831_v8  ;;  %986 = vmatprep.subr.bf16.mxu0 %v1836_v9  ;;  %v1866_v34 = vld [vmem:[%s2498_s6 + $0x20] sm:$0xff]   ;;  %v1868_v36 = vld [vmem:[%s2498_s6 + $0x18] sm:$0xff]   ;;  %v1869_v37 = vld [vmem:[%s2498_s6 + $0x50] sm:$0xff]   ;;  %vm1376_vm5 = vcmask 31744   ;;  %s1906_s18 = smov [#allocation2]   ;;  %vm1433_vm6 = vcmask 9216  }
  0x71   :  { %1027 = vmatprep.subr.bf16.mxu1 %v1839_v10  ;;  %v1870_v38 = vld [vmem:[%s2498_s6 + $0x10] sm:$0xff]   ;;  %v1871_v39 = vld [vmem:[%s2498_s6 + $0x48] sm:$0xff]   ;;  %v1873_v41 = vld [vmem:[%s2498_s6 + $0x40] sm:$0xff]   ;;  %s1441_s19 = sshll.u32 %s1906_s18, 4  ;;  %s1442_s19 = int_to_ptr.vmem [resolvable:$true] %s1441_s19 }
  0x72   :  { %v1872_v40 = vld [vmem:[%s2498_s6 + $0x8] sm:$0xff]   ;;  %v1874_v42 = vld [vmem:[%s2498_s6] sm:$0xff]   ;;  %v1875_v44 = vld [vmem:[%s2500_s8 + $0x18] sm:$0xff]   ;;  %p1885_p1 = scmp.lt.s32.totalorder %s1442_s19, %s1442_s19 }
  0x73   :  { %987 = vmatpush2.bf16.msra.mxu0 %v1834_v11  ;;  %v1876_v46 = vld [vmem:[%s2500_s8 + $0x10] sm:$0xff]   ;;  %v228_v57 = vld [vmem:[%s2497_s5] sm:$0x3] }
  0x74   :  { %1028 = vmatpush2.bf16.msra.mxu1 %v1837_v12  ;;  %988 = vmatprep.subr.bf16.mxu0 %v1842_v13  ;;  %v233_v58 = vrot.slane %v228_v57, %v232_v56  ;;  %v237_v59 = vrot.slane %v228_v57, %v236_v49 }
  0x75   :  { %1029 = vmatprep.subr.bf16.mxu1 %v1845_v14 }
  0x77   :  { %989 = vmatpush2.bf16.msra.mxu0 %v1840_v15  ;;  %v1877_v15 = vld [vmem:[%s2500_s8 + $0x8] sm:$0xff]  }
  0x78   :  { %1030 = vmatpush2.bf16.msra.mxu1 %v1843_v16  ;;  %990 = vmatprep.subr.bf16.mxu0 %v1848_v17  ;;  %v1878_v16 = vld [vmem:[%s2500_s8] sm:$0xff]  }
  0x79   :  { %1031 = vmatprep.subr.bf16.mxu1 %v1851_v18  ;;  %v1233_v17 = vld [vmem:[%s2493_s1] sm:$0x3]  ;;  %v1905_v18 = vmov 0  }
  0x7a   :  { %1664 = vset.pattern.permute.xlu0 %v1905_v18 }
  0x7b   :  { %991 = vmatpush2.bf16.msra.mxu0 %v1846_v19  ;;  %1237 = vperm.xlu0 %1664, %v1233_v17  }
  0x7c   :  { %1032 = vmatpush2.bf16.msra.mxu1 %v1849_v20  ;;  %992 = vmatprep.subr.bf16.mxu0 %v1854_v21  ;;  %v1577_v20 = vld [vmem:[%s2499_s7] ss:$0 sm:$0xff] }
  0x7d   :  { %1033 = vmatprep.subr.bf16.mxu1 %v1857_v22 }
  0x7f   :  { %993 = vmatpush2.bf16.msra.mxu0 %v1852_v23 }
  0x80   :  { %1034 = vmatpush2.bf16.msra.mxu1 %v1855_v24  ;;  %1604 = vmatprep.subr.bf16.mxu0 %v1859_v27 }
  0x81   :  { %1635 = vmatprep.subr.bf16.mxu1 %v1903_v45 }
  0x82   :  { %995 = vmatmul.mubr.bf16.vlgmr.msra.gmra.mxu0 %v224_v25  ;;  %v1879_v25 = vld [vmem:[%s2502_s10] sm:$0x1f]  }
  0x83   :  { %1036 = vmatmul.mubr.bf16.vlgmr.msra.gmra.mxu1 %v226_v26  ;;  %1605 = vmatpush3.bf16.msra.mxu0 %v1860_v28 }
  0x84   :  { %1606 = vmatprep.subr.bf16.mxu0 %v1861_v29  ;;  %1636 = vmatpush3.bf16.msra.mxu1 %v1875_v44  ;;  %v1330_v29 = vsel %vm1328_vm1, %v1879_v25, 0 }
  0x85   :  { %1637 = vmatprep.subr.bf16.mxu1 %v1903_v45  ;;  %1643 = vmatprep.mubr.msk.bf16.mxu1 %vm1904_vm0, %v1903_v45 }
  0x87   :  { %1607 = vmatpush3.bf16.msra.mxu0 %v1862_v30  ;;  %v1315_v30 = vld [vmem:[%s2494_s2] sm:$0x3] }
  0x88   :  { %1608 = vmatprep.subr.bf16.mxu0 %v1863_v31  ;;  %1638 = vmatpush3.bf16.msra.mxu1 %v1876_v46  ;;  %v1374_v31 = vld [vmem:[%s2503_s11] sm:$0x3] }
  0x89   :  { %1639 = vmatprep.subr.bf16.mxu1 %v1903_v45 }
  0x8b   :  { %1609 = vmatpush3.bf16.msra.mxu0 %v1864_v32  ;;  %v1318_v32 = vpack.c.bf16 %v1315_v30, %v1315_v30 }
  0x8c   :  { %1610 = vmatprep.subr.bf16.mxu0 %v1865_v33  ;;  %1640 = vmatpush3.bf16.msra.mxu1 %v1877_v15  ;;  %v1382_v33 = vsel %vm1380_vm3, %v1374_v31, 0 }
  0x8d   :  { %1641 = vmatprep.subr.bf16.mxu1 %v1903_v45 }
  0x8f   :  { %1611 = vmatpush3.bf16.msra.mxu0 %v1866_v34  ;;  %v1373_v34 = vld [vmem:[%s2495_s3] sm:$0x3] }
  0x90   :  { %1612 = vmatprep.subr.bf16.mxu0 %v1867_v35  ;;  %1642 = vmatpush3.bf16.msra.mxu1 %v1878_v16  ;;  %v1375_v35 = vpack.c.bf16 %v1373_v34, %v1373_v34 }
  0x91   :  { %1647 = vmatprep.subr.bf16.mxu1 %v1903_v45 }
  0x93   :  { %1613 = vmatpush3.bf16.msra.mxu0 %v1868_v36 }
  0x94   :  { %1614 = vmatprep.subr.bf16.mxu0 %v1869_v37 }
  0x97   :  { %1615 = vmatpush3.bf16.msra.mxu0 %v1870_v38 }
  0x98   :  { %1616 = vmatprep.subr.bf16.mxu0 %v1871_v39  ;;  %v1594_v39 = vld [vmem:[%s2501_s9] ss:$0 sm:$0xff]  ;;  %s1880_s9 = scalar_lea.vmem %s1442_s19, 32 }
  0x99   :  { %p1881_p0 = scmp.ne.s32.totalorder %s1442_s19, %s1880_s9  ;;  %p1886_p2 = scmp.lt.s32.totalorder %s1880_s9, %s1880_s9 }
  0x9b   :  { %1617 = vmatpush3.bf16.msra.mxu0 %v1872_v40  ;;  %p1887_p3 = por %p1886_p2, %p1885_p1 }
  0x9c   :  { %1618 = vmatprep.subr.bf16.mxu0 %v1873_v41 }
  0x9d   :  { %p1888_p4 = pnand %p1887_p3, %p1881_p0 }
  0x9f   :  { %1619 = vmatpush3.bf16.msra.mxu0 %v1874_v42 }
  0xf6   :  { %v1238_v40 = vpop.permute.xlu0 %1237 }
  0xf7   :  { %v1246_v44 = vmul.f32 %v1594_v39, %v1238_v40 }
 0x102   :  { %v914_v47 = vpop.f32.mrf.mxu0 }
 0x103   :  { %v955_v48 = vpop.f32.mrf.mxu1  ;;  %v915_v60 = vadd.f32 %v914_v47, %v233_v58 }
 0x104   :  { %v916_v50 = vpop.f32.mrf.mxu0 }
 0x105   :  { %v957_v51 = vpop.f32.mrf.mxu1  ;;  %v917_v61 = vadd.f32 %v916_v50, %v237_v59  ;;  %v956_v62 = vadd.f32 %v955_v48, %v915_v60 }
 0x106   :  { %v918_v52 = vpop.f32.mrf.mxu0 }
 0x107   :  { %v959_v53 = vpop.f32.mrf.mxu1  ;;  %v958_v1 = vadd.f32 %v957_v51, %v917_v61  ;;  %v1603_v52 = vld [vmem:[%s2504_s12] ss:$0 sm:$0xff] }
 0x108   :  { %v919_v54 = vpop.f32.mrf.mxu0 }
 0x109   :  { %v960_v55 = vpop.f32.mrf.mxu1 }
 0x142   :  { %v996_v63 = vpop.f32.mrf.mxu0 }
 0x143   :  { %v1037_v0 = vpop.f32.mrf.mxu1  ;;  %v997_v2 = vadd.f32 %v996_v63, %v956_v62 }
 0x144   :  { %v998_v3 = vpop.f32.mrf.mxu0 }
 0x145   :  { %v1039_v4 = vpop.f32.mrf.mxu1  ;;  %v1038_v5 = vadd.f32 %v1037_v0, %v997_v2  ;;  %v999_v6 = vadd.f32 %v998_v3, %v958_v1 }
 0x146   :  { %v1000_v7 = vpop.f32.mrf.mxu0 }
 0x147   :  { %v1041_v8 = vpop.f32.mrf.mxu1  ;;  %v1040_v9 = vadd.f32 %v1039_v4, %v999_v6  ;;  %v1044_v10 = vmax.f32 %v1038_v5, 0.0 }
 0x148   :  { %v1001_v11 = vpop.f32.mrf.mxu0 }
 0x149   :  { %v1042_v12 = vpop.f32.mrf.mxu1  ;;  %v1045_v43 = vmax.f32 %v1040_v9, 0.0  ;;  %v1078_v14 = vpack.c.bf16 %v1044_v10, %v1044_v10 }
 0x14b   :  { %v1079_v13 = vpack.c.bf16 %v1045_v43, %v1045_v43 }
 0x14d   :  { %1215 = vmatprep.mubr.bf16.mxu0 %v1079_v13 }
 0x14e   :  { %1216 = vmatmul.mubr.bf16.vlgmr.msra.gmra.mxu0 %v1078_v14 }
 0x20e   :  { %v1620_v19 = vpop.f32.mrf.mxu0 }
 0x210   :  { %v1621_v21 = vpop.f32.mrf.mxu0 }
 0x211   :  { %v1622_v22 = vadd.f32 %v1621_v21, %v1620_v19 }
 0x212   :  { %v1623_v23 = vpop.f32.mrf.mxu0 }
 0x213   :  { %v1218_v24 = vadd.f32 %v1622_v22, %v1577_v20 }
 0x214   :  { %v1624_v26 = vpop.f32.mrf.mxu0 }
 0x215   :  { %v1223_v27 = vmax.f32 %v1218_v24, 0.0 }
 0x217   :  { %v1232_v28 = vpack.c.bf16 %v1223_v27, %v1223_v27 }
 0x219   :  { %1644 = vmatmul.mubr.msk.bf16.vlgmr.msra.gmra.mxu1 %vm1271_vm2, %v1232_v28 }
 0x21a   :  { %1648 = vmatpush3.bf16.msra.mxu1 %v1330_v29  ;;  %1649 = vmatprep.mubr.msk.bf16.mxu1 %vm1904_vm0, %v1903_v45 }
 0x21b   :  { %1653 = vmatprep.subr.bf16.mxu1 %v1903_v45 }
 0x221   :  { %1650 = vmatmul.mubr.msk.bf16.vlgmr.msra.gmra.mxu1 %vm1324_vm4, %v1318_v32 }
 0x222   :  { %1654 = vmatpush3.bf16.msra.mxu1 %v1382_v33  ;;  %1655 = vmatprep.mubr.msk.bf16.mxu1 %vm1904_vm0, %v1903_v45 }
 0x229   :  { %1656 = vmatmul.mubr.msk.bf16.vlgmr.msra.gmra.mxu1 %vm1376_vm5, %v1375_v35 }
 0x2d9   :  { %v1309_v36 = vpop.f32.mrf.mxu1 }
 0x2da   :  { %v1310_v47 = vadd.f32 %v1309_v36, %v1246_v44 }
 0x2db   :  { %v1645_v37 = vpop.f32.mrf.mxu1 }
 0x2dd   :  { %v1312_v38 = vpop.f32.mrf.mxu1 }
 0x2df   :  { %v1646_v41 = vpop.f32.mrf.mxu1 }
 0x2e1   :  { %v1366_v42 = vpop.f32.mrf.mxu1 }
 0x2e2   :  { %v1372_v50 = vadd.f32 %v1366_v42, %v1310_v47 }
 0x2e3   :  { %v1651_v46 = vpop.f32.mrf.mxu1 }
 0x2e5   :  { %v1369_v45 = vpop.f32.mrf.mxu1 }
 0x2e7   :  { %v1652_v48 = vpop.f32.mrf.mxu1 }
 0x2e9   :  { %v1418_v51 = vpop.f32.mrf.mxu1 }
 0x2ea   :  { %v1424_v53 = vadd.f32 %v1418_v51, %v1372_v50 }
 0x2eb   :  { %v1657_v54 = vpop.f32.mrf.mxu1 }
 0x2ec   :  { %v1432_v55 = vadd.f32 %v1603_v52, %v1424_v53 }
 0x2ed   :  { %v1421_v56 = vpop.f32.mrf.mxu1 }
 0x2ee   :  { %1434 = vst.msk [vmem:[#allocation2] sm:$0x3] %vm1433_vm6, %v1432_v55 }
 0x2ef   :  { %v1658_v57 = vpop.f32.mrf.mxu1 }
 0x2f0   :  { %1891 = shalt.err (!%p1888_p4)
}
 0x2f1   :  { %1444 = dma.vmem_to_hbm [thread:$0]  %s1442_s19, 32, %s2505_s13, [#allocation3]  }
 0x2f2   :  { %1900 = dma.done.wait [#allocation3], 32  }
 0x2f3   :  { %1901 = vsyncadd [#allocation3], 4294967264 }
 0x2f4   :  { %1448 = vsyncpa [#allocation3], 1 }

// kernel: critic_net_forward.4
= control target key start
LH: loop header
LB: loop body
LE: loop exit
PB: predicated region body
PF: predicated region fallthrough
CT: control target
= control target key end

     0   :  { %8 = vsyncpa [#allocation3], 0  ;;  %s22492_s0 = inlined_call_operand.vmem [shape: bf16[2,7680], index: 0, kind: input, shape index: {}]   ;;  %s22493_s1 = inlined_call_operand.hbm [shape: bf16[2,7680,512], index: 1, kind: input, shape index: {}]   ;;  %s22494_s2 = inlined_call_operand.hbm [shape: f32[1,1024], index: 2, kind: input, shape index: {}]   ;;  %s22495_s3 = inlined_call_operand.vmem [shape: f32[2,1024], index: 3, kind: output, shape index: {}]  }
   0x1   :  { %10 = vsyncpa [#allocation3 + $0x1], 0 }
   0x2   :  { %11 = vsyncpa [#allocation5], 0 }
   0x3   :  { %13 = vsyncpa [#allocation5 + $0x1], 0  ;;  %s19790_s12 = smov 0   ;;  %s19792_s13 = smov 0  }
   0x4   :  { %s19794_s14 = smov 0   ;;  %s19796_s15 = smov 0  }
   0x5 LB: > { %s14793_s16 = sadd.s32 4294967295, %s19762_s15   ;;  %s19810_s17 = sadd.s32 1, %s19762_s15   ;;  %s19762_s15 = sphi %s19796_s15, %s22554_s15   ;;  %s19758_s14 = sphi %s19794_s14, %s22553_s14   ;;  %s19754_s13 = sphi %s19792_s13, %s22552_s13   ;;  %s19750_s12 = sphi %s19790_s12, %s22551_s12  }
   0x6   : > { %s44_s18 = ssub.s32 %s19762_s15, %s19810_s17  ;;  %s47_s19 = sadd.s32 1, %s19758_s14 }
   0x7   : > { %p45_p0 = scmp.eq.s32.totalorder %s44_s18, 0  ;;  %p54_p1 = scmp.ne.s32.totalorder %s19758_s14, %s19754_s13 }
   0x8   : > { %p55_p2 = scmp.eq.s32.totalorder %s19762_s15, 0  ;;  %p60_p3 = scmp.ne.s32.totalorder %s19754_s13, %s19750_s12 }
   0x9   : > { %s19820_s20 = scalar_select %p45_p0, %s19758_s14, %s47_s19  }
   0xa   : > { %p56_p4 = por %p55_p2, %p54_p1  ;;  %p61_p5 = scmp.eq.s32.totalorder %s14793_s16, 0 }
   0xb   : > { %p16743_p6 = scmp.lt.s32.totalorder %s19762_s15, 2  ;;  %s19830_s22 = sand.u32 1, %s19758_s14  }
   0xc   : > { %p19825_p7 = por %p61_p5, %p60_p3  ;;  %s16729_s23 = smul.u32 15360, %s19830_s22 }
   0xd   : > { %s16730_s24 = smul.u32 245760, %s19762_s15  ;;  %p19834_p8 = pnand %p16743_p6, %p56_p4 }
   0xe   : > { %s22513_s21 = scalar_select %p19825_p7, 1, 0 }
   0xf   : > { %s19841_s28 = scalar_lea.hbm %s22493_s1, %s16730_s24  ;;  %s143_s29 = scalar_lea.vmem [#allocation2], %s16729_s23 }
  0x10   : > { %s150_s30 = sshll.u32 %s143_s29, 4  ;;  %s140_s4 = scalar_lea.sflag [#allocation3], %s19830_s22  ;;  %s19843_s30 = int_to_ptr.vmem [resolvable:$true] %s150_s30 }
  0x11   : > { %s19668_s5 = scalar_lea.hbm %s19841_s28, 245760  ;;  %p19670_p11 = pneg %p19834_p8 }
  0x12   : > { %p19669_p10 = scmp.ne.s32.totalorder %s19841_s28, %s19668_s5  ;;  %s19673_s8 = scalar_lea.hbm %s22493_s1, 491520 }
  0x13   : > { %p19674_p0 = scmp.lt.s32.totalorder %s19841_s28, %s22493_s1  ;;  %p19675_p1 = scmp.lt.s32.totalorder %s19673_s8, %s19668_s5 }
  0x14   : > { %p19671_p12 = pnand %p19670_p11, %p19669_p10 }
  0x15   : > { %p19676_p2 = por %p19675_p1, %p19674_p0 }
  0x16   : > { %p19672_p13 = pneg %p19671_p12 }
  0x18   : > { %p19677_p3 = pnand %p19676_p2, %p19672_p13 }
  0x1a   : > { %19680 = shalt.err (!%p19677_p3)
}
  0x1b   : > { %s19681_s11 = scalar_lea.vmem %s19843_s30, 245760  ;;  %s19764_s12 = smov [#allocation2]  }
  0x1c   : > { %p19682_p4 = scmp.ne.s32.totalorder %s19843_s30, %s19681_s11  ;;  %s19686_s18 = sshll.u32 %s19764_s12, 4  ;;  %s19687_s18 = int_to_ptr.vmem [resolvable:$false] %s19686_s18 }
  0x1d   : > { %s19688_s19 = scalar_lea.vmem %s19687_s18, 491520  ;;  %p19689_p10 = scmp.lt.s32.totalorder %s19843_s30, %s19687_s18 }
  0x1e   : > { %p19684_p5 = pnand %p19682_p4, %p19670_p11  ;;  %p19690_p12 = scmp.lt.s32.totalorder %s19688_s19, %s19681_s11 }
  0x20   : > { %p19685_p6 = pneg %p19684_p5  ;;  %p19691_p9 = por %p19690_p12, %p19689_p10 }
  0x22   : > { %p19692_p0 = pnand %p19691_p9, %p19685_p6 }
  0x24   : > { %19695 = shalt.err (!%p19692_p0)
}
  0x25   : > { %s19765_s23 = smov 256   ;;  %s19766_s24 = smov 16  }
  0x26   : > { %16739 = dma.hbm_to_vmem [thread:$0]  (!%p19834_p8), %s19841_s28, 245760, %s19843_s30, %s140_s4, %s19765_s23, %s19765_s23, %s19766_s24  }
  0x27   : > { %p177_p13 = scmp.lt.s32.totalorder %s19762_s15, 3  ;;  %s14798_s26 = sshll.u32 %s19830_s22, 2 }
  0x28   : > { %s16728_s27 = sshll.u32 %s19762_s15, 6  ;;  %p22515_p9 = scmp.ge.s32.totalorder %s19762_s15, 1 }
  0x29   : > { %s19885_s7 = scalar_lea.hbm %s22494_s2, %s16728_s27  ;;  %s164_s8 = scalar_lea.vmem [#allocation4], %s14798_s26 }
  0x2a   : > { %p19878_p1 = pnand %p22515_p9, %p177_p13  ;;  %s172_s9 = sshll.u32 %s164_s8, 4  ;;  %s173_s9 = int_to_ptr.vmem [resolvable:$true] %s172_s9 }
  0x2b   : > { %s161_s28 = scalar_lea.sflag [#allocation5], %s19830_s22  ;;  %s19696_s30 = scalar_lea.hbm %s19885_s7, 64 }
  0x2c   : > { %s22516_s29 = scalar_select %p19878_p1, 1, 0 }
  0x2d   : > { %p19697_p2 = scmp.ne.s32.totalorder %s19885_s7, %s19696_s30  ;;  %s19701_s11 = scalar_lea.hbm %s22494_s2, 128 }
  0x2e   : > { %p19702_p5 = scmp.lt.s32.totalorder %s19885_s7, %s22494_s2  ;;  %p19703_p6 = scmp.lt.s32.totalorder %s19701_s11, %s19696_s30 }
  0x2f   : > { %p19699_p3 = pnand %p19697_p2, %p19670_p11 }
  0x30   : > { %p19704_p10 = por %p19703_p6, %p19702_p5 }
  0x31   : > { %p19700_p4 = pneg %p19699_p3 }
  0x33   : > { %p19705_p12 = pnand %p19704_p10, %p19700_p4 }
  0x35   : > { %19708 = shalt.err (!%p19705_p12)
}
  0x36   : > { %s19709_s19 = scalar_lea.vmem %s173_s9, 64  ;;  %s19767_s22 = smov [#allocation4]  }
  0x37   : > { %p19710_p0 = scmp.ne.s32.totalorder %s173_s9, %s19709_s19  ;;  %s19714_s23 = sshll.u32 %s19767_s22, 4  ;;  %s19715_s23 = int_to_ptr.vmem [resolvable:$false] %s19714_s23 }
  0x38   : > { %s19716_s24 = scalar_lea.vmem %s19715_s23, 128  ;;  %p19717_p2 = scmp.lt.s32.totalorder %s173_s9, %s19715_s23 }
  0x39   : > { %p19712_p13 = pnand %p19710_p0, %p19670_p11  ;;  %p19718_p3 = scmp.lt.s32.totalorder %s19716_s24, %s19709_s19 }
  0x3b   : > { %p19713_p9 = pneg %p19712_p13  ;;  %p19719_p7 = por %p19718_p3, %p19717_p2 }
  0x3d   : > { %p19720_p1 = pnand %p19719_p7, %p19713_p9 }
  0x3f   : > { %19723 = shalt.err (!%p19720_p1)
}
  0x40   : > { %16742 = dma.hbm_to_vmem [thread:$0]  (!%p19834_p8), %s19885_s7, 64, %s173_s9, %s161_s28  }
  0x41   : > { %p22517_p4 = scmp.ne.s32.totalorder %s22516_s29, 0 }
  0x43   : > { %181 = sbr.rel (%p22517_p4) target bundleno = 2209 (0x8a1), region = 32 }
  0x48   : > { %s183_s26 = sand.u32 1, %s19754_s13   ;;  %p22518_p11 = scmp.ne.s32.totalorder %s22513_s21, 0 }
  0x49   : > { %s16731_s27 = smul.u32 15360, %s183_s26  ;;  %s184_s5 = scalar_lea.sflag [#allocation3], %s183_s26 }
  0x4b   : > { %s19909_s6 = scalar_lea.vmem [#allocation2], %s16731_s27 }
  0x4c   : > { %19741 = dma.done.wait (%p22518_p11), %s184_s5, 245760  }
  0x4d   : > { %19743 = vsyncadd (%p22518_p11), %s184_s5, 4294721536  ;;  %s14802_s8 = sshll.u32 %s183_s26, 2  ;;  %s193_s25 = scalar_lea.sflag [#allocation5], %s183_s26 }
  0x4e   : > { %s19915_s30 = scalar_lea.vmem [#allocation4], %s14802_s8 }
  0x4f   : > { %19745 = dma.done.wait (%p22518_p11), %s193_s25, 64  }
  0x50   : > { %19747 = vsyncadd (%p22518_p11), %s193_s25, 4294967232  ;;  %v16780_v0 = vld [vmem:[%s19909_s6 + $0xe4] ss:$16 sps:$4 sm:$0xff]   ;;  %v16784_v2 = vld [vmem:[%s19909_s6 + $0xe0] ss:$16 sps:$4 sm:$0xff]   ;;  %v2161_v36 = vlaneseq  ;;  %s14803_s5 = sshll.u32 %s14793_s16, 2 }
  0x51   : > { %v16782_v1 = vld [vmem:[%s19909_s6 + $0x2e4] ss:$16 sps:$4 sm:$0xff]   ;;  %12216 = vmatprep.subr.bf16.mxu0 %v16780_v0  ;;  %v16785_v3 = vld [vmem:[%s19909_s6 + $0x2e0] ss:$16 sps:$4 sm:$0xff]   ;;  %v19768_v37 = vmov 1966171168  }
  0x52   : > { %12257 = vmatprep.subr.bf16.mxu1 %v16782_v1  ;;  %v16786_v4 = vld [vmem:[%s19909_s6 + $0xc4] ss:$16 sps:$4 sm:$0xff]   ;;  %12217 = vmatpush1.bf16.msra.mxu0 %v16784_v2  ;;  %v16790_v6 = vld [vmem:[%s19909_s6 + $0xc0] ss:$16 sps:$4 sm:$0xff]   ;;  %v2191_v38 = vunpack.c.l.s4 %v19768_v37  ;;  %v19960_v42 = vshrl.u32 %v2161_v36, 7  ;;  %p226_p7 = scmp.lt.s32.totalorder %s14803_s5, 7 }
  0x53   : > { %12258 = vmatpush1.bf16.msra.mxu1 %v16785_v3  ;;  %v16788_v5 = vld [vmem:[%s19909_s6 + $0x2c4] ss:$16 sps:$4 sm:$0xff]   ;;  %12218 = vmatprep.subr.bf16.mxu0 %v16786_v4  ;;  %v16791_v7 = vld [vmem:[%s19909_s6 + $0x2c0] ss:$16 sps:$4 sm:$0xff]  }
  0x54   : > { %12259 = vmatprep.subr.bf16.mxu1 %v16788_v5  ;;  %v16792_v8 = vld [vmem:[%s19909_s6 + $0xa4] ss:$16 sps:$4 sm:$0xff]   ;;  %v16796_v10 = vld [vmem:[%s19909_s6 + $0xa0] ss:$16 sps:$4 sm:$0xff]   ;;  %v2192_v43 = vunpack.c.0.s8 %v2191_v38  ;;  %s22556_s5 = smov (!%p226_p7, %s14803_s5), 7 }
  0x55   : > { %v16794_v9 = vld [vmem:[%s19909_s6 + $0x2a4] ss:$16 sps:$4 sm:$0xff]   ;;  %v16797_v11 = vld [vmem:[%s19909_s6 + $0x2a0] ss:$16 sps:$4 sm:$0xff]   ;;  %s14804_s15 = sshll.u32 %s22556_s5, 1 }
  0x56   : > { %12219 = vmatpush1.bf16.msra.mxu0 %v16790_v6  ;;  %v16798_v12 = vld [vmem:[%s19909_s6 + $0x84] ss:$16 sps:$4 sm:$0xff]   ;;  %v16802_v14 = vld [vmem:[%s19909_s6 + $0x80] ss:$16 sps:$4 sm:$0xff]   ;;  %v19968_v49 = vsub.s32 %v2192_v43, %v19960_v42  ;;  %s229_s8 = scalar_lea.vmem %s22495_s3, %s14804_s15 }
  0x57   : > { %12260 = vmatpush1.bf16.msra.mxu1 %v16791_v7  ;;  %12220 = vmatprep.subr.bf16.mxu0 %v16792_v8  ;;  %v16800_v13 = vld [vmem:[%s19909_s6 + $0x284] ss:$16 sps:$4 sm:$0xff]   ;;  %v16803_v15 = vld [vmem:[%s19909_s6 + $0x280] ss:$16 sps:$4 sm:$0xff]  }
  0x58   : > { %12261 = vmatprep.subr.bf16.mxu1 %v16794_v9  ;;  %v16804_v16 = vld [vmem:[%s19909_s6 + $0x64] ss:$16 sps:$4 sm:$0xff]   ;;  %v16808_v18 = vld [vmem:[%s19909_s6 + $0x60] ss:$16 sps:$4 sm:$0xff]  }
  0x59   : > { %v16806_v17 = vld [vmem:[%s19909_s6 + $0x264] ss:$16 sps:$4 sm:$0xff]   ;;  %v16809_v19 = vld [vmem:[%s19909_s6 + $0x260] ss:$16 sps:$4 sm:$0xff]  }
  0x5a   : > { %12221 = vmatpush1.bf16.msra.mxu0 %v16796_v10  ;;  %v16810_v20 = vld [vmem:[%s19909_s6 + $0x44] ss:$16 sps:$4 sm:$0xff]   ;;  %v16814_v22 = vld [vmem:[%s19909_s6 + $0x40] ss:$16 sps:$4 sm:$0xff]  }
  0x5b   : > { %12262 = vmatpush1.bf16.msra.mxu1 %v16797_v11  ;;  %12222 = vmatprep.subr.bf16.mxu0 %v16798_v12  ;;  %v16812_v21 = vld [vmem:[%s19909_s6 + $0x244] ss:$16 sps:$4 sm:$0xff]   ;;  %v16815_v23 = vld [vmem:[%s19909_s6 + $0x240] ss:$16 sps:$4 sm:$0xff]  }
  0x5c   : > { %12263 = vmatprep.subr.bf16.mxu1 %v16800_v13  ;;  %v16816_v24 = vld [vmem:[%s19909_s6 + $0x24] ss:$16 sps:$4 sm:$0xff]   ;;  %v16820_v26 = vld [vmem:[%s19909_s6 + $0x20] ss:$16 sps:$4 sm:$0xff]  }
  0x5d   : > { %v16818_v25 = vld [vmem:[%s19909_s6 + $0x224] ss:$16 sps:$4 sm:$0xff]   ;;  %v16821_v27 = vld [vmem:[%s19909_s6 + $0x220] ss:$16 sps:$4 sm:$0xff]  }
  0x5e   : > { %12223 = vmatpush1.bf16.msra.mxu0 %v16802_v14  ;;  %v16822_v28 = vld [vmem:[%s19909_s6 + $0x4] ss:$16 sps:$4 sm:$0xff]   ;;  %v16826_v30 = vld [vmem:[%s19909_s6] ss:$16 sps:$4 sm:$0xff]  }
  0x5f   : > { %12264 = vmatpush1.bf16.msra.mxu1 %v16803_v15  ;;  %12224 = vmatprep.subr.bf16.mxu0 %v16804_v16  ;;  %v16824_v29 = vld [vmem:[%s19909_s6 + $0x204] ss:$16 sps:$4 sm:$0xff]   ;;  %v16827_v31 = vld [vmem:[%s19909_s6 + $0x200] ss:$16 sps:$4 sm:$0xff]  }
  0x60   : > { %12265 = vmatprep.subr.bf16.mxu1 %v16806_v17  ;;  %v16828_v32 = vld [vmem:[%s19909_s6 + $0x1e4] ss:$16 sps:$4 sm:$0xff]   ;;  %v16832_v34 = vld [vmem:[%s19909_s6 + $0x1e0] ss:$16 sps:$4 sm:$0xff]  }
  0x61   : > { %v16830_v33 = vld [vmem:[%s19909_s6 + $0x3e4] ss:$16 sps:$4 sm:$0xff]   ;;  %v16833_v35 = vld [vmem:[%s19909_s6 + $0x3e0] ss:$16 sps:$4 sm:$0xff]  }
  0x62   : > { %12225 = vmatpush1.bf16.msra.mxu0 %v16808_v18  ;;  %v16834_v39 = vld [vmem:[%s19909_s6 + $0x1c4] ss:$16 sps:$4 sm:$0xff]   ;;  %v16838_v41 = vld [vmem:[%s19909_s6 + $0x1c0] ss:$16 sps:$4 sm:$0xff]  }
  0x63   : > { %12266 = vmatpush1.bf16.msra.mxu1 %v16809_v19  ;;  %12226 = vmatprep.subr.bf16.mxu0 %v16810_v20  ;;  %v16836_v40 = vld [vmem:[%s19909_s6 + $0x3c4] ss:$16 sps:$4 sm:$0xff]   ;;  %v16839_v44 = vld [vmem:[%s19909_s6 + $0x3c0] ss:$16 sps:$4 sm:$0xff]  }
  0x64   : > { %12267 = vmatprep.subr.bf16.mxu1 %v16812_v21  ;;  %v16840_v45 = vld [vmem:[%s19909_s6 + $0x1a4] ss:$16 sps:$4 sm:$0xff]   ;;  %v16844_v47 = vld [vmem:[%s19909_s6 + $0x1a0] ss:$16 sps:$4 sm:$0xff]  }
  0x65   : > { %v16842_v46 = vld [vmem:[%s19909_s6 + $0x3a4] ss:$16 sps:$4 sm:$0xff]   ;;  %v16845_v48 = vld [vmem:[%s19909_s6 + $0x3a0] ss:$16 sps:$4 sm:$0xff]  }
  0x66   : > { %12227 = vmatpush1.bf16.msra.mxu0 %v16814_v22  ;;  %v16846_v50 = vld [vmem:[%s19909_s6 + $0x184] ss:$16 sps:$4 sm:$0xff]   ;;  %v16850_v53 = vld [vmem:[%s19909_s6 + $0x180] ss:$16 sps:$4 sm:$0xff]  }
  0x67   : > { %12268 = vmatpush1.bf16.msra.mxu1 %v16815_v23  ;;  %12228 = vmatprep.subr.bf16.mxu0 %v16816_v24  ;;  %v16848_v51 = vld [vmem:[%s19909_s6 + $0x384] ss:$16 sps:$4 sm:$0xff]   ;;  %v16851_v55 = vld [vmem:[%s19909_s6 + $0x380] ss:$16 sps:$4 sm:$0xff]  }
  0x68   : > { %12269 = vmatprep.subr.bf16.mxu1 %v16818_v25  ;;  %v231_v52 = vld [vmem:[%s22492_s0] sm:$0xff] }
  0x69   : > { %v2196_v54 = vrot.slane %v231_v52, %v19968_v49  ;;  %v16852_v56 = vld [vmem:[%s19909_s6 + $0x164] ss:$16 sps:$4 sm:$0xff]   ;;  %v16856_v59 = vld [vmem:[%s19909_s6 + $0x160] ss:$16 sps:$4 sm:$0xff]   ;;  %v2189_v1 = vcombine.high %v231_v52, %v231_v52 }
  0x6a   : > { %12229 = vmatpush1.bf16.msra.mxu0 %v16820_v26  ;;  %v16854_v57 = vld [vmem:[%s19909_s6 + $0x364] ss:$16 sps:$4 sm:$0xff]   ;;  %v16857_v61 = vld [vmem:[%s19909_s6 + $0x360] ss:$16 sps:$4 sm:$0xff]  }
  0x6b   : > { %12270 = vmatpush1.bf16.msra.mxu1 %v16821_v27  ;;  %12230 = vmatprep.subr.bf16.mxu0 %v16822_v28  ;;  %v2204_v58 = vcombine.high %v2196_v54, %v2196_v54  ;;  %v16858_v62 = vld [vmem:[%s19909_s6 + $0x144] ss:$16 sps:$4 sm:$0xff]   ;;  %v16862_v2 = vld [vmem:[%s19909_s6 + $0x140] ss:$16 sps:$4 sm:$0xff]   ;;  %v19998_v6 = vrot.slane %v2189_v1, %v19968_v49  ;;  %v20008_v13 = vrot.slane %v2196_v54, %v19968_v49 }
  0x6c   : > { %12271 = vmatprep.subr.bf16.mxu1 %v16824_v29  ;;  %v16860_v63 = vld [vmem:[%s19909_s6 + $0x344] ss:$16 sps:$4 sm:$0xff]   ;;  %v16863_v3 = vld [vmem:[%s19909_s6 + $0x340] ss:$16 sps:$4 sm:$0xff]  }
  0x6d   : > { %v19982_v60 = vrot.slane %v2204_v58, %v19968_v49  ;;  %v16864_v4 = vld [vmem:[%s19909_s6 + $0x124] ss:$16 sps:$4 sm:$0xff]   ;;  %v16868_v7 = vld [vmem:[%s19909_s6 + $0x120] ss:$16 sps:$4 sm:$0xff]   ;;  %v2205_v11 = vcombine.high %v19998_v6, %v19998_v6  ;;  %v20018_v18 = vcombine.high %v20008_v13, %v20008_v13 }
  0x6e   : > { %12231 = vmatpush1.bf16.msra.mxu0 %v16826_v30  ;;  %v16866_v5 = vld [vmem:[%s19909_s6 + $0x324] ss:$16 sps:$4 sm:$0xff]   ;;  %v16869_v8 = vld [vmem:[%s19909_s6 + $0x320] ss:$16 sps:$4 sm:$0xff]  }
  0x6f   : > { %12272 = vmatpush1.bf16.msra.mxu1 %v16827_v31  ;;  %12232 = vmatprep.subr.bf16.mxu0 %v16828_v32  ;;  %v19989_v0 = vcombine.high %v19982_v60, %v19982_v60  ;;  %v16870_v9 = vld [vmem:[%s19909_s6 + $0x104] ss:$16 sps:$4 sm:$0xff]   ;;  %v16874_v12 = vld [vmem:[%s19909_s6 + $0x100] ss:$16 sps:$4 sm:$0xff]   ;;  %v20014_v17 = vrot.slane %v2205_v11, %v19968_v49 }
  0x70   : > { %12273 = vmatprep.subr.bf16.mxu1 %v16830_v33  ;;  %12248 = vmatprep.mubr.bf16.mxu0 %v19982_v60  ;;  %v16872_v10 = vld [vmem:[%s19909_s6 + $0x304] ss:$16 sps:$4 sm:$0xff]   ;;  %v16875_v14 = vld [vmem:[%s19909_s6 + $0x300] ss:$16 sps:$4 sm:$0xff]  }
  0x71   : > { %12289 = vmatprep.mubr.bf16.mxu1 %v19989_v0  ;;  %v16878_v15 = vld [vmem:[%s19909_s6 + $0x4e4] ss:$16 sps:$4 sm:$0xff]   ;;  %v16876_v19 = vld [vmem:[%s19909_s6 + $0x4e0] ss:$16 sps:$4 sm:$0xff]   ;;  %v20026_v23 = vcombine.high %v20014_v17, %v20014_v17 }
  0x72   : > { %12233 = vmatpush2.bf16.msra.mxu0 %v16832_v34  ;;  %v16881_v16 = vld [vmem:[%s19909_s6 + $0x6e4] ss:$16 sps:$4 sm:$0xff]   ;;  %v16879_v20 = vld [vmem:[%s19909_s6 + $0x6e0] ss:$16 sps:$4 sm:$0xff]  }
  0x73   : > { %12274 = vmatpush2.bf16.msra.mxu1 %v16833_v35  ;;  %12234 = vmatprep.subr.bf16.mxu0 %v16834_v39  ;;  %v16884_v21 = vld [vmem:[%s19909_s6 + $0x4c4] ss:$16 sps:$4 sm:$0xff]   ;;  %v16882_v24 = vld [vmem:[%s19909_s6 + $0x4c0] ss:$16 sps:$4 sm:$0xff]  }
  0x74   : > { %12275 = vmatprep.subr.bf16.mxu1 %v16836_v40  ;;  %v16887_v22 = vld [vmem:[%s19909_s6 + $0x6c4] ss:$16 sps:$4 sm:$0xff]   ;;  %v16885_v25 = vld [vmem:[%s19909_s6 + $0x6c0] ss:$16 sps:$4 sm:$0xff]  }
  0x75   : > { %v16890_v26 = vld [vmem:[%s19909_s6 + $0x4a4] ss:$16 sps:$4 sm:$0xff]   ;;  %v16888_v28 = vld [vmem:[%s19909_s6 + $0x4a0] ss:$16 sps:$4 sm:$0xff]  }
  0x76   : > { %12235 = vmatpush2.bf16.msra.mxu0 %v16838_v41  ;;  %v16893_v27 = vld [vmem:[%s19909_s6 + $0x6a4] ss:$16 sps:$4 sm:$0xff]   ;;  %v16891_v29 = vld [vmem:[%s19909_s6 + $0x6a0] ss:$16 sps:$4 sm:$0xff]  }
  0x77   : > { %12276 = vmatpush2.bf16.msra.mxu1 %v16839_v44  ;;  %12236 = vmatprep.subr.bf16.mxu0 %v16840_v45  ;;  %v16896_v30 = vld [vmem:[%s19909_s6 + $0x484] ss:$16 sps:$4 sm:$0xff]   ;;  %v16894_v32 = vld [vmem:[%s19909_s6 + $0x480] ss:$16 sps:$4 sm:$0xff]  }
  0x78   : > { %12277 = vmatprep.subr.bf16.mxu1 %v16842_v46  ;;  %v16899_v31 = vld [vmem:[%s19909_s6 + $0x684] ss:$16 sps:$4 sm:$0xff]   ;;  %v16897_v33 = vld [vmem:[%s19909_s6 + $0x680] ss:$16 sps:$4 sm:$0xff]  }
  0x79   : > { %v16902_v34 = vld [vmem:[%s19909_s6 + $0x464] ss:$16 sps:$4 sm:$0xff]   ;;  %v16900_v36 = vld [vmem:[%s19909_s6 + $0x460] ss:$16 sps:$4 sm:$0xff]  }
  0x7a   : > { %12237 = vmatpush2.bf16.msra.mxu0 %v16844_v47  ;;  %v16905_v35 = vld [vmem:[%s19909_s6 + $0x664] ss:$16 sps:$4 sm:$0xff]   ;;  %v16903_v37 = vld [vmem:[%s19909_s6 + $0x660] ss:$16 sps:$4 sm:$0xff]  }
  0x7b   : > { %12278 = vmatpush2.bf16.msra.mxu1 %v16845_v48  ;;  %12238 = vmatprep.subr.bf16.mxu0 %v16846_v50  ;;  %v16908_v38 = vld [vmem:[%s19909_s6 + $0x444] ss:$16 sps:$4 sm:$0xff]   ;;  %v16906_v40 = vld [vmem:[%s19909_s6 + $0x440] ss:$16 sps:$4 sm:$0xff]  }
  0x7c   : > { %12279 = vmatprep.subr.bf16.mxu1 %v16848_v51  ;;  %v16911_v39 = vld [vmem:[%s19909_s6 + $0x644] ss:$16 sps:$4 sm:$0xff]   ;;  %v16909_v41 = vld [vmem:[%s19909_s6 + $0x640] ss:$16 sps:$4 sm:$0xff]  }
  0x7d   : > { %v16914_v43 = vld [vmem:[%s19909_s6 + $0x424] ss:$16 sps:$4 sm:$0xff]   ;;  %v16912_v45 = vld [vmem:[%s19909_s6 + $0x420] ss:$16 sps:$4 sm:$0xff]  }
  0x7e   : > { %12239 = vmatpush2.bf16.msra.mxu0 %v16850_v53  ;;  %v16917_v44 = vld [vmem:[%s19909_s6 + $0x624] ss:$16 sps:$4 sm:$0xff]   ;;  %v16915_v46 = vld [vmem:[%s19909_s6 + $0x620] ss:$16 sps:$4 sm:$0xff]  }
  0x7f   : > { %12280 = vmatpush2.bf16.msra.mxu1 %v16851_v55  ;;  %12240 = vmatprep.subr.bf16.mxu0 %v16852_v56  ;;  %v16920_v47 = vld [vmem:[%s19909_s6 + $0x404] ss:$16 sps:$4 sm:$0xff]   ;;  %v16918_v50 = vld [vmem:[%s19909_s6 + $0x400] ss:$16 sps:$4 sm:$0xff]  }
  0x80   : > { %12281 = vmatprep.subr.bf16.mxu1 %v16854_v57  ;;  %v16923_v48 = vld [vmem:[%s19909_s6 + $0x604] ss:$16 sps:$4 sm:$0xff]   ;;  %v16921_v51 = vld [vmem:[%s19909_s6 + $0x600] ss:$16 sps:$4 sm:$0xff]  }
  0x81   : > { %v16926_v52 = vld [vmem:[%s19909_s6 + $0x5e4] ss:$16 sps:$4 sm:$0xff]   ;;  %v16924_v54 = vld [vmem:[%s19909_s6 + $0x5e0] ss:$16 sps:$4 sm:$0xff]  }
  0x82   : > { %12241 = vmatpush2.bf16.msra.mxu0 %v16856_v59  ;;  %v16929_v53 = vld [vmem:[%s19909_s6 + $0x7e4] ss:$16 sps:$4 sm:$0xff]   ;;  %v16927_v55 = vld [vmem:[%s19909_s6 + $0x7e0] ss:$16 sps:$4 sm:$0xff]  }
  0x83   : > { %12282 = vmatpush2.bf16.msra.mxu1 %v16857_v61  ;;  %12242 = vmatprep.subr.bf16.mxu0 %v16858_v62  ;;  %v16932_v56 = vld [vmem:[%s19909_s6 + $0x5c4] ss:$16 sps:$4 sm:$0xff]   ;;  %v16930_v58 = vld [vmem:[%s19909_s6 + $0x5c0] ss:$16 sps:$4 sm:$0xff]  }
  0x84   : > { %12283 = vmatprep.subr.bf16.mxu1 %v16860_v63  ;;  %v16935_v57 = vld [vmem:[%s19909_s6 + $0x7c4] ss:$16 sps:$4 sm:$0xff]   ;;  %v16933_v59 = vld [vmem:[%s19909_s6 + $0x7c0] ss:$16 sps:$4 sm:$0xff]  }
  0x85   : > { %v16938_v61 = vld [vmem:[%s19909_s6 + $0x5a4] ss:$16 sps:$4 sm:$0xff]   ;;  %v16936_v63 = vld [vmem:[%s19909_s6 + $0x5a0] ss:$16 sps:$4 sm:$0xff]  }
  0x86   : > { %12243 = vmatpush2.bf16.msra.mxu0 %v16862_v2  ;;  %v16941_v62 = vld [vmem:[%s19909_s6 + $0x7a4] ss:$16 sps:$4 sm:$0xff]   ;;  %v16939_v1 = vld [vmem:[%s19909_s6 + $0x7a0] ss:$16 sps:$4 sm:$0xff]  }
  0x87   : > { %12284 = vmatpush2.bf16.msra.mxu1 %v16863_v3  ;;  %12244 = vmatprep.subr.bf16.mxu0 %v16864_v4  ;;  %v16944_v2 = vld [vmem:[%s19909_s6 + $0x584] ss:$16 sps:$4 sm:$0xff]   ;;  %v16942_v4 = vld [vmem:[%s19909_s6 + $0x580] ss:$16 sps:$4 sm:$0xff]  }
  0x88   : > { %12285 = vmatprep.subr.bf16.mxu1 %v16866_v5  ;;  %v16947_v3 = vld [vmem:[%s19909_s6 + $0x784] ss:$16 sps:$4 sm:$0xff]   ;;  %v16945_v5 = vld [vmem:[%s19909_s6 + $0x780] ss:$16 sps:$4 sm:$0xff]  }
  0x89   : > { %v16956_v11 = vld [vmem:[%s19909_s6 + $0x544] ss:$16 sps:$4 sm:$0xff]  }
  0x8a   : > { %12245 = vmatpush2.bf16.msra.mxu0 %v16868_v7  ;;  %v16950_v7 = vld [vmem:[%s19909_s6 + $0x564] ss:$16 sps:$4 sm:$0xff]  }
  0x8b   : > { %12286 = vmatpush2.bf16.msra.mxu1 %v16869_v8  ;;  %12246 = vmatprep.subr.bf16.mxu0 %v16870_v9  ;;  %v16953_v8 = vld [vmem:[%s19909_s6 + $0x764] ss:$16 sps:$4 sm:$0xff]   ;;  %v16948_v9 = vld [vmem:[%s19909_s6 + $0x560] ss:$16 sps:$4 sm:$0xff]  }
  0x8c   : > { %12287 = vmatprep.subr.bf16.mxu1 %v16872_v10  ;;  %v16951_v10 = vld [vmem:[%s19909_s6 + $0x760] ss:$16 sps:$4 sm:$0xff]  }
  0x8e   : > { %12247 = vmatpush2.bf16.msra.mxu0 %v16874_v12  ;;  %v16959_v12 = vld [vmem:[%s19909_s6 + $0x744] ss:$16 sps:$4 sm:$0xff]  }
  0x8f   : > { %12288 = vmatpush2.bf16.msra.mxu1 %v16875_v14  ;;  %12298 = vmatprep.subr.bf16.mxu0 %v16878_v15  ;;  %v16954_v14 = vld [vmem:[%s19909_s6 + $0x540] ss:$16 sps:$4 sm:$0xff]  }
  0x90   : > { %12339 = vmatprep.subr.bf16.mxu1 %v16881_v16  ;;  %v16957_v15 = vld [vmem:[%s19909_s6 + $0x740] ss:$16 sps:$4 sm:$0xff]   ;;  %v16962_v16 = vld [vmem:[%s19909_s6 + $0x524] ss:$16 sps:$4 sm:$0xff]  }
  0x91   : > { %12249 = vmatmul.mubr.bf16.vlgmr.msra.gmra.mxu0 %v20008_v13 }
  0x92   : > { %12290 = vmatmul.mubr.bf16.vlgmr.msra.gmra.mxu1 %v20018_v18  ;;  %12299 = vmatpush1.bf16.msra.mxu0 %v16876_v19  ;;  %v16965_v19 = vld [vmem:[%s19909_s6 + $0x724] ss:$16 sps:$4 sm:$0xff]  }
  0x93   : > { %12340 = vmatpush1.bf16.msra.mxu1 %v16879_v20  ;;  %12300 = vmatprep.subr.bf16.mxu0 %v16884_v21  ;;  %v16960_v20 = vld [vmem:[%s19909_s6 + $0x520] ss:$16 sps:$4 sm:$0xff]  }
  0x94   : > { %12341 = vmatprep.subr.bf16.mxu1 %v16887_v22  ;;  %12330 = vmatprep.mubr.bf16.mxu0 %v20014_v17  ;;  %v16963_v21 = vld [vmem:[%s19909_s6 + $0x720] ss:$16 sps:$4 sm:$0xff]   ;;  %v16968_v22 = vld [vmem:[%s19909_s6 + $0x504] ss:$16 sps:$4 sm:$0xff]  }
  0x95   : > { %12371 = vmatprep.mubr.bf16.mxu1 %v20026_v23 }
  0x96   : > { %12301 = vmatpush1.bf16.msra.mxu0 %v16882_v24  ;;  %v16971_v24 = vld [vmem:[%s19909_s6 + $0x704] ss:$16 sps:$4 sm:$0xff]  }
  0x97   : > { %12342 = vmatpush1.bf16.msra.mxu1 %v16885_v25  ;;  %12302 = vmatprep.subr.bf16.mxu0 %v16890_v26  ;;  %v16966_v25 = vld [vmem:[%s19909_s6 + $0x500] ss:$16 sps:$4 sm:$0xff]   ;;  %v20091_v26 = vrot.slane %v19998_v6, %v19968_v49 }
  0x98   : > { %12343 = vmatprep.subr.bf16.mxu1 %v16893_v27  ;;  %v16969_v27 = vld [vmem:[%s19909_s6 + $0x700] ss:$16 sps:$4 sm:$0xff]  }
  0x99   : > { %v16976_v6 = vld [vmem:[%s19909_s6 + $0xae0] ss:$16 sps:$4 sm:$0xff]  }
  0x9a   : > { %12303 = vmatpush1.bf16.msra.mxu0 %v16888_v28  ;;  %v16975_v28 = vld [vmem:[%s19909_s6 + $0x8e4] ss:$16 sps:$4 sm:$0xff]  }
  0x9b   : > { %12344 = vmatpush1.bf16.msra.mxu1 %v16891_v29  ;;  %12304 = vmatprep.subr.bf16.mxu0 %v16896_v30  ;;  %v16978_v29 = vld [vmem:[%s19909_s6 + $0xae4] ss:$16 sps:$4 sm:$0xff]   ;;  %v20098_v30 = vcombine.high %v20091_v26, %v20091_v26 }
  0x9c   : > { %12345 = vmatprep.subr.bf16.mxu1 %v16899_v31  ;;  %v16973_v31 = vld [vmem:[%s19909_s6 + $0x8e0] ss:$16 sps:$4 sm:$0xff]  }
  0x9e   : > { %12305 = vmatpush1.bf16.msra.mxu0 %v16894_v32  ;;  %v20105_v32 = vld [vmem:[%s22492_s0 + $0x8] sm:$0xff] }
  0x9f   : > { %12346 = vmatpush1.bf16.msra.mxu1 %v16897_v33  ;;  %12306 = vmatprep.subr.bf16.mxu0 %v16902_v34  ;;  %v16981_v33 = vld [vmem:[%s19909_s6 + $0x8c4] ss:$16 sps:$4 sm:$0xff]  }
  0xa0   : > { %12347 = vmatprep.subr.bf16.mxu1 %v16905_v35  ;;  %v16984_v34 = vld [vmem:[%s19909_s6 + $0xac4] ss:$16 sps:$4 sm:$0xff]   ;;  %v20111_v35 = vrot.slane %v20105_v32, %v19968_v49 }
  0xa2   : > { %12307 = vmatpush1.bf16.msra.mxu0 %v16900_v36  ;;  %v2253_v36 = vcombine.high %v20111_v35, %v20111_v35 }
  0xa3   : > { %12348 = vmatpush1.bf16.msra.mxu1 %v16903_v37  ;;  %12308 = vmatprep.subr.bf16.mxu0 %v16908_v38  ;;  %v16979_v37 = vld [vmem:[%s19909_s6 + $0x8c0] ss:$16 sps:$4 sm:$0xff]  }
  0xa4   : > { %12349 = vmatprep.subr.bf16.mxu1 %v16911_v39  ;;  %v16982_v38 = vld [vmem:[%s19909_s6 + $0xac0] ss:$16 sps:$4 sm:$0xff]   ;;  %v16987_v39 = vld [vmem:[%s19909_s6 + $0x8a4] ss:$16 sps:$4 sm:$0xff]  }
  0xa6   : > { %12309 = vmatpush1.bf16.msra.mxu0 %v16906_v40  ;;  %v16990_v40 = vld [vmem:[%s19909_s6 + $0xaa4] ss:$16 sps:$4 sm:$0xff]  }
  0xa7   : > { %12350 = vmatpush1.bf16.msra.mxu1 %v16909_v41  ;;  %12310 = vmatprep.subr.bf16.mxu0 %v16914_v43  ;;  %v20122_v41 = vrot.slane %v2253_v36, %v19968_v49  ;;  %v17051_v36 = vld [vmem:[%s19909_s6 + $0x940] ss:$16 sps:$4 sm:$0xff]  }
  0xa8   : > { %12351 = vmatprep.subr.bf16.mxu1 %v16917_v44  ;;  %v16985_v44 = vld [vmem:[%s19909_s6 + $0x8a0] ss:$16 sps:$4 sm:$0xff]  }
  0xa9   : > { %v20127_v43 = vcombine.high %v20122_v41, %v20122_v41 }
  0xaa   : > { %12311 = vmatpush1.bf16.msra.mxu0 %v16912_v45  ;;  %v16988_v45 = vld [vmem:[%s19909_s6 + $0xaa0] ss:$16 sps:$4 sm:$0xff]  }
  0xab   : > { %12352 = vmatpush1.bf16.msra.mxu1 %v16915_v46  ;;  %12312 = vmatprep.subr.bf16.mxu0 %v16920_v47  ;;  %v16993_v46 = vld [vmem:[%s19909_s6 + $0x884] ss:$16 sps:$4 sm:$0xff]  }
  0xac   : > { %12353 = vmatprep.subr.bf16.mxu1 %v16923_v48  ;;  %v16996_v47 = vld [vmem:[%s19909_s6 + $0xa84] ss:$16 sps:$4 sm:$0xff]   ;;  %v16991_v48 = vld [vmem:[%s19909_s6 + $0x880] ss:$16 sps:$4 sm:$0xff]  }
  0xae   : > { %12313 = vmatpush1.bf16.msra.mxu0 %v16918_v50  ;;  %v16994_v50 = vld [vmem:[%s19909_s6 + $0xa80] ss:$16 sps:$4 sm:$0xff]  }
  0xaf   : > { %12354 = vmatpush1.bf16.msra.mxu1 %v16921_v51  ;;  %12314 = vmatprep.subr.bf16.mxu0 %v16926_v52  ;;  %v16999_v51 = vld [vmem:[%s19909_s6 + $0x864] ss:$16 sps:$4 sm:$0xff]  }
  0xb0   : > { %12355 = vmatprep.subr.bf16.mxu1 %v16929_v53  ;;  %v17002_v52 = vld [vmem:[%s19909_s6 + $0xa64] ss:$16 sps:$4 sm:$0xff]   ;;  %v16997_v53 = vld [vmem:[%s19909_s6 + $0x860] ss:$16 sps:$4 sm:$0xff]  }
  0xb2   : > { %12315 = vmatpush2.bf16.msra.mxu0 %v16924_v54  ;;  %v17000_v54 = vld [vmem:[%s19909_s6 + $0xa60] ss:$16 sps:$4 sm:$0xff]  }
  0xb3   : > { %12356 = vmatpush2.bf16.msra.mxu1 %v16927_v55  ;;  %12316 = vmatprep.subr.bf16.mxu0 %v16932_v56  ;;  %v17005_v55 = vld [vmem:[%s19909_s6 + $0x844] ss:$16 sps:$4 sm:$0xff]  }
  0xb4   : > { %12357 = vmatprep.subr.bf16.mxu1 %v16935_v57  ;;  %v17008_v56 = vld [vmem:[%s19909_s6 + $0xa44] ss:$16 sps:$4 sm:$0xff]   ;;  %v17003_v57 = vld [vmem:[%s19909_s6 + $0x840] ss:$16 sps:$4 sm:$0xff]  }
  0xb6   : > { %12317 = vmatpush2.bf16.msra.mxu0 %v16930_v58  ;;  %v17006_v58 = vld [vmem:[%s19909_s6 + $0xa40] ss:$16 sps:$4 sm:$0xff]  }
  0xb7   : > { %12358 = vmatpush2.bf16.msra.mxu1 %v16933_v59  ;;  %12318 = vmatprep.subr.bf16.mxu0 %v16938_v61  ;;  %v17011_v59 = vld [vmem:[%s19909_s6 + $0x824] ss:$16 sps:$4 sm:$0xff]  }
  0xb8   : > { %12359 = vmatprep.subr.bf16.mxu1 %v16941_v62  ;;  %v17014_v61 = vld [vmem:[%s19909_s6 + $0xa24] ss:$16 sps:$4 sm:$0xff]   ;;  %v17009_v62 = vld [vmem:[%s19909_s6 + $0x820] ss:$16 sps:$4 sm:$0xff]  }
  0xba   : > { %12319 = vmatpush2.bf16.msra.mxu0 %v16936_v63  ;;  %v17012_v63 = vld [vmem:[%s19909_s6 + $0xa20] ss:$16 sps:$4 sm:$0xff]  }
  0xbb   : > { %12360 = vmatpush2.bf16.msra.mxu1 %v16939_v1  ;;  %12320 = vmatprep.subr.bf16.mxu0 %v16944_v2  ;;  %v17017_v1 = vld [vmem:[%s19909_s6 + $0x804] ss:$16 sps:$4 sm:$0xff]  }
  0xbc   : > { %12361 = vmatprep.subr.bf16.mxu1 %v16947_v3  ;;  %v17020_v2 = vld [vmem:[%s19909_s6 + $0xa04] ss:$16 sps:$4 sm:$0xff]   ;;  %v17015_v3 = vld [vmem:[%s19909_s6 + $0x800] ss:$16 sps:$4 sm:$0xff]  }
  0xbe   : > { %12321 = vmatpush2.bf16.msra.mxu0 %v16942_v4  ;;  %v17018_v4 = vld [vmem:[%s19909_s6 + $0xa00] ss:$16 sps:$4 sm:$0xff]  }
  0xbf   : > { %12362 = vmatpush2.bf16.msra.mxu1 %v16945_v5  ;;  %12322 = vmatprep.subr.bf16.mxu0 %v16950_v7  ;;  %v17023_v5 = vld [vmem:[%s19909_s6 + $0x9e4] ss:$16 sps:$4 sm:$0xff]  }
  0xc0   : > { %12363 = vmatprep.subr.bf16.mxu1 %v16953_v8  ;;  %v17026_v7 = vld [vmem:[%s19909_s6 + $0xbe4] ss:$16 sps:$4 sm:$0xff]   ;;  %v17021_v8 = vld [vmem:[%s19909_s6 + $0x9e0] ss:$16 sps:$4 sm:$0xff]  }
  0xc2   : > { %12323 = vmatpush2.bf16.msra.mxu0 %v16948_v9  ;;  %v17024_v9 = vld [vmem:[%s19909_s6 + $0xbe0] ss:$16 sps:$4 sm:$0xff]  }
  0xc3   : > { %12364 = vmatpush2.bf16.msra.mxu1 %v16951_v10  ;;  %12324 = vmatprep.subr.bf16.mxu0 %v16956_v11  ;;  %v17029_v10 = vld [vmem:[%s19909_s6 + $0x9c4] ss:$16 sps:$4 sm:$0xff]  }
  0xc4   : > { %12365 = vmatprep.subr.bf16.mxu1 %v16959_v12  ;;  %v17032_v11 = vld [vmem:[%s19909_s6 + $0xbc4] ss:$16 sps:$4 sm:$0xff]   ;;  %v17027_v12 = vld [vmem:[%s19909_s6 + $0x9c0] ss:$16 sps:$4 sm:$0xff]  }
  0xc6   : > { %12325 = vmatpush2.bf16.msra.mxu0 %v16954_v14  ;;  %v17030_v14 = vld [vmem:[%s19909_s6 + $0xbc0] ss:$16 sps:$4 sm:$0xff]  }
  0xc7   : > { %12366 = vmatpush2.bf16.msra.mxu1 %v16957_v15  ;;  %12326 = vmatprep.subr.bf16.mxu0 %v16962_v16  ;;  %v17035_v15 = vld [vmem:[%s19909_s6 + $0x9a4] ss:$16 sps:$4 sm:$0xff]  }
  0xc8   : > { %12367 = vmatprep.subr.bf16.mxu1 %v16965_v19  ;;  %v17038_v16 = vld [vmem:[%s19909_s6 + $0xba4] ss:$16 sps:$4 sm:$0xff]   ;;  %v17033_v19 = vld [vmem:[%s19909_s6 + $0x9a0] ss:$16 sps:$4 sm:$0xff]  }
  0xca   : > { %12327 = vmatpush2.bf16.msra.mxu0 %v16960_v20  ;;  %v17036_v20 = vld [vmem:[%s19909_s6 + $0xba0] ss:$16 sps:$4 sm:$0xff]  }
  0xcb   : > { %12368 = vmatpush2.bf16.msra.mxu1 %v16963_v21  ;;  %12328 = vmatprep.subr.bf16.mxu0 %v16968_v22  ;;  %v17041_v21 = vld [vmem:[%s19909_s6 + $0x984] ss:$16 sps:$4 sm:$0xff]  }
  0xcc   : > { %12369 = vmatprep.subr.bf16.mxu1 %v16971_v24  ;;  %v17044_v22 = vld [vmem:[%s19909_s6 + $0xb84] ss:$16 sps:$4 sm:$0xff]   ;;  %v17039_v24 = vld [vmem:[%s19909_s6 + $0x980] ss:$16 sps:$4 sm:$0xff]  }
  0xce   : > { %12329 = vmatpush2.bf16.msra.mxu0 %v16966_v25  ;;  %v17042_v25 = vld [vmem:[%s19909_s6 + $0xb80] ss:$16 sps:$4 sm:$0xff]  }
  0xcf   : > { %12370 = vmatpush2.bf16.msra.mxu1 %v16969_v27  ;;  %12380 = vmatprep.subr.bf16.mxu0 %v16975_v28  ;;  %v17047_v27 = vld [vmem:[%s19909_s6 + $0x964] ss:$16 sps:$4 sm:$0xff]  }
  0xd0   : > { %12421 = vmatprep.subr.bf16.mxu1 %v16978_v29  ;;  %v17050_v28 = vld [vmem:[%s19909_s6 + $0xb64] ss:$16 sps:$4 sm:$0xff]   ;;  %v17045_v29 = vld [vmem:[%s19909_s6 + $0x960] ss:$16 sps:$4 sm:$0xff]  }
  0xd1   : > { %12331 = vmatmul.mubr.bf16.vlgmr.msra.gmra.mxu0 %v20091_v26 }
  0xd2   : > { %12372 = vmatmul.mubr.bf16.vlgmr.msra.gmra.mxu1 %v20098_v30  ;;  %12381 = vmatpush1.bf16.msra.mxu0 %v16973_v31  ;;  %v17048_v31 = vld [vmem:[%s19909_s6 + $0xb60] ss:$16 sps:$4 sm:$0xff]  }
  0xd3   : > { %12422 = vmatpush1.bf16.msra.mxu1 %v16976_v6  ;;  %12382 = vmatprep.subr.bf16.mxu0 %v16981_v33  ;;  %v17053_v6 = vld [vmem:[%s19909_s6 + $0x944] ss:$16 sps:$4 sm:$0xff]  }
  0xd4   : > { %12423 = vmatprep.subr.bf16.mxu1 %v16984_v34  ;;  %12412 = vmatprep.mubr.bf16.mxu0 %v20122_v41  ;;  %v17056_v33 = vld [vmem:[%s19909_s6 + $0xb44] ss:$16 sps:$4 sm:$0xff]   ;;  %v2238_v34 = vcombine.high %v20105_v32, %v20105_v32  ;;  %v17060_v32 = vld [vmem:[%s19909_s6 + $0xb20] ss:$16 sps:$4 sm:$0xff]  }
  0xd5   : > { %12453 = vmatprep.mubr.bf16.mxu1 %v20127_v43 }
  0xd6   : > { %12383 = vmatpush1.bf16.msra.mxu0 %v16979_v37  ;;  %v17054_v37 = vld [vmem:[%s19909_s6 + $0xb40] ss:$16 sps:$4 sm:$0xff]  }
  0xd7   : > { %12424 = vmatpush1.bf16.msra.mxu1 %v16982_v38  ;;  %12384 = vmatprep.subr.bf16.mxu0 %v16987_v39  ;;  %v17059_v38 = vld [vmem:[%s19909_s6 + $0x924] ss:$16 sps:$4 sm:$0xff]  }
  0xd8   : > { %12425 = vmatprep.subr.bf16.mxu1 %v16990_v40  ;;  %v17062_v39 = vld [vmem:[%s19909_s6 + $0xb24] ss:$16 sps:$4 sm:$0xff]   ;;  %v20181_v40 = vrot.slane %v2238_v34, %v19968_v49  ;;  %v17120_v34 = vld [vmem:[%s19909_s6 + $0xfe0] ss:$16 sps:$4 sm:$0xff]  }
  0xda   : > { %12385 = vmatpush1.bf16.msra.mxu0 %v16985_v44  ;;  %v17057_v44 = vld [vmem:[%s19909_s6 + $0x920] ss:$16 sps:$4 sm:$0xff]  }
  0xdb   : > { %12426 = vmatpush1.bf16.msra.mxu1 %v16988_v45  ;;  %12386 = vmatprep.subr.bf16.mxu0 %v16993_v46  ;;  %v17065_v45 = vld [vmem:[%s19909_s6 + $0x904] ss:$16 sps:$4 sm:$0xff]  }
  0xdc   : > { %12427 = vmatprep.subr.bf16.mxu1 %v16996_v47  ;;  %v17068_v46 = vld [vmem:[%s19909_s6 + $0xb04] ss:$16 sps:$4 sm:$0xff]   ;;  %v2254_v47 = vcombine.high %v20181_v40, %v20181_v40 }
  0xde   : > { %12387 = vmatpush1.bf16.msra.mxu0 %v16991_v48  ;;  %v17063_v48 = vld [vmem:[%s19909_s6 + $0x900] ss:$16 sps:$4 sm:$0xff]  }
  0xdf   : > { %12428 = vmatpush1.bf16.msra.mxu1 %v16994_v50  ;;  %12388 = vmatprep.subr.bf16.mxu0 %v16999_v51  ;;  %v20192_v50 = vrot.slane %v20111_v35, %v19968_v49  ;;  %v17066_v51 = vld [vmem:[%s19909_s6 + $0xb00] ss:$16 sps:$4 sm:$0xff]  }
  0xe0   : > { %12429 = vmatprep.subr.bf16.mxu1 %v17002_v52  ;;  %v17071_v52 = vld [vmem:[%s19909_s6 + $0xce4] ss:$16 sps:$4 sm:$0xff]   ;;  %v17069_v35 = vld [vmem:[%s19909_s6 + $0xce0] ss:$16 sps:$4 sm:$0xff]  }
  0xe2   : > { %12389 = vmatpush1.bf16.msra.mxu0 %v16997_v53  ;;  %v17074_v53 = vld [vmem:[%s19909_s6 + $0xee4] ss:$16 sps:$4 sm:$0xff]  }
  0xe3   : > { %12430 = vmatpush1.bf16.msra.mxu1 %v17000_v54  ;;  %12390 = vmatprep.subr.bf16.mxu0 %v17005_v55  ;;  %v20198_v54 = vrot.slane %v2254_v47, %v19968_v49  ;;  %v20202_v55 = vcombine.high %v20192_v50, %v20192_v50  ;;  %v17137_v47 = vld [vmem:[%s19909_s6 + $0xd84] ss:$16 sps:$4 sm:$0xff]  }
  0xe4   : > { %12431 = vmatprep.subr.bf16.mxu1 %v17008_v56  ;;  %v17072_v56 = vld [vmem:[%s19909_s6 + $0xee0] ss:$16 sps:$4 sm:$0xff]  }
  0xe6   : > { %12391 = vmatpush1.bf16.msra.mxu0 %v17003_v57  ;;  %v17077_v57 = vld [vmem:[%s19909_s6 + $0xcc4] ss:$16 sps:$4 sm:$0xff]  }
  0xe7   : > { %12432 = vmatpush1.bf16.msra.mxu1 %v17006_v58  ;;  %12392 = vmatprep.subr.bf16.mxu0 %v17011_v59  ;;  %v17080_v58 = vld [vmem:[%s19909_s6 + $0xec4] ss:$16 sps:$4 sm:$0xff]   ;;  %v20210_v59 = vcombine.high %v20198_v54, %v20198_v54 }
  0xe8   : > { %12433 = vmatprep.subr.bf16.mxu1 %v17014_v61  ;;  %v17075_v61 = vld [vmem:[%s19909_s6 + $0xcc0] ss:$16 sps:$4 sm:$0xff]  }
  0xea   : > { %12393 = vmatpush1.bf16.msra.mxu0 %v17009_v62  ;;  %v17078_v62 = vld [vmem:[%s19909_s6 + $0xec0] ss:$16 sps:$4 sm:$0xff]  }
  0xeb   : > { %12434 = vmatpush1.bf16.msra.mxu1 %v17012_v63  ;;  %12394 = vmatprep.subr.bf16.mxu0 %v17017_v1  ;;  %v17083_v63 = vld [vmem:[%s19909_s6 + $0xca4] ss:$16 sps:$4 sm:$0xff]  }
  0xec   : > { %12435 = vmatprep.subr.bf16.mxu1 %v17020_v2  ;;  %v17086_v1 = vld [vmem:[%s19909_s6 + $0xea4] ss:$16 sps:$4 sm:$0xff]   ;;  %v17081_v2 = vld [vmem:[%s19909_s6 + $0xca0] ss:$16 sps:$4 sm:$0xff]  }
  0xee   : > { %12395 = vmatpush1.bf16.msra.mxu0 %v17015_v3  ;;  %v17084_v3 = vld [vmem:[%s19909_s6 + $0xea0] ss:$16 sps:$4 sm:$0xff]  }
  0xef   : > { %12436 = vmatpush1.bf16.msra.mxu1 %v17018_v4  ;;  %12396 = vmatprep.subr.bf16.mxu0 %v17023_v5  ;;  %v17089_v4 = vld [vmem:[%s19909_s6 + $0xc84] ss:$16 sps:$4 sm:$0xff]  }
  0xf0   : > { %12437 = vmatprep.subr.bf16.mxu1 %v17026_v7  ;;  %v17092_v5 = vld [vmem:[%s19909_s6 + $0xe84] ss:$16 sps:$4 sm:$0xff]   ;;  %v17087_v7 = vld [vmem:[%s19909_s6 + $0xc80] ss:$16 sps:$4 sm:$0xff]  }
  0xf2   : > { %12397 = vmatpush2.bf16.msra.mxu0 %v17021_v8  ;;  %v17090_v8 = vld [vmem:[%s19909_s6 + $0xe80] ss:$16 sps:$4 sm:$0xff]  }
  0xf3   : > { %12438 = vmatpush2.bf16.msra.mxu1 %v17024_v9  ;;  %12398 = vmatprep.subr.bf16.mxu0 %v17029_v10  ;;  %v17095_v9 = vld [vmem:[%s19909_s6 + $0xc64] ss:$16 sps:$4 sm:$0xff]  }
  0xf4   : > { %12439 = vmatprep.subr.bf16.mxu1 %v17032_v11  ;;  %v17098_v10 = vld [vmem:[%s19909_s6 + $0xe64] ss:$16 sps:$4 sm:$0xff]   ;;  %v17093_v11 = vld [vmem:[%s19909_s6 + $0xc60] ss:$16 sps:$4 sm:$0xff]  }
  0xf6   : > { %12399 = vmatpush2.bf16.msra.mxu0 %v17027_v12  ;;  %v17096_v12 = vld [vmem:[%s19909_s6 + $0xe60] ss:$16 sps:$4 sm:$0xff]  }
  0xf7   : > { %12440 = vmatpush2.bf16.msra.mxu1 %v17030_v14  ;;  %12400 = vmatprep.subr.bf16.mxu0 %v17035_v15  ;;  %v17101_v14 = vld [vmem:[%s19909_s6 + $0xc44] ss:$16 sps:$4 sm:$0xff]  }
  0xf8   : > { %12441 = vmatprep.subr.bf16.mxu1 %v17038_v16  ;;  %v17104_v15 = vld [vmem:[%s19909_s6 + $0xe44] ss:$16 sps:$4 sm:$0xff]   ;;  %v17099_v16 = vld [vmem:[%s19909_s6 + $0xc40] ss:$16 sps:$4 sm:$0xff]  }
  0xfa   : > { %12401 = vmatpush2.bf16.msra.mxu0 %v17033_v19  ;;  %v17102_v19 = vld [vmem:[%s19909_s6 + $0xe40] ss:$16 sps:$4 sm:$0xff]  }
  0xfb   : > { %12442 = vmatpush2.bf16.msra.mxu1 %v17036_v20  ;;  %12402 = vmatprep.subr.bf16.mxu0 %v17041_v21  ;;  %v17107_v20 = vld [vmem:[%s19909_s6 + $0xc24] ss:$16 sps:$4 sm:$0xff]  }
  0xfc   : > { %12443 = vmatprep.subr.bf16.mxu1 %v17044_v22  ;;  %v17110_v21 = vld [vmem:[%s19909_s6 + $0xe24] ss:$16 sps:$4 sm:$0xff]   ;;  %v17105_v22 = vld [vmem:[%s19909_s6 + $0xc20] ss:$16 sps:$4 sm:$0xff]  }
  0xfe   : > { %12403 = vmatpush2.bf16.msra.mxu0 %v17039_v24  ;;  %v17108_v24 = vld [vmem:[%s19909_s6 + $0xe20] ss:$16 sps:$4 sm:$0xff]  }
  0xff   : > { %12444 = vmatpush2.bf16.msra.mxu1 %v17042_v25  ;;  %12404 = vmatprep.subr.bf16.mxu0 %v17047_v27  ;;  %v17113_v25 = vld [vmem:[%s19909_s6 + $0xc04] ss:$16 sps:$4 sm:$0xff]  }
 0x100   : > { %12445 = vmatprep.subr.bf16.mxu1 %v17050_v28  ;;  %v17116_v27 = vld [vmem:[%s19909_s6 + $0xe04] ss:$16 sps:$4 sm:$0xff]   ;;  %v17111_v28 = vld [vmem:[%s19909_s6 + $0xc00] ss:$16 sps:$4 sm:$0xff]  }
 0x102   : > { %12405 = vmatpush2.bf16.msra.mxu0 %v17045_v29  ;;  %v17114_v29 = vld [vmem:[%s19909_s6 + $0xe00] ss:$16 sps:$4 sm:$0xff]  }
 0x103   : > { %12446 = vmatpush2.bf16.msra.mxu1 %v17048_v31  ;;  %12406 = vmatprep.subr.bf16.mxu0 %v17053_v6  ;;  %v17119_v31 = vld [vmem:[%s19909_s6 + $0xde4] ss:$16 sps:$4 sm:$0xff]  }
 0x104   : > { %12447 = vmatprep.subr.bf16.mxu1 %v17056_v33  ;;  %v17122_v6 = vld [vmem:[%s19909_s6 + $0xfe4] ss:$16 sps:$4 sm:$0xff]   ;;  %v17117_v33 = vld [vmem:[%s19909_s6 + $0xde0] ss:$16 sps:$4 sm:$0xff]  }
 0x106   : > { %12407 = vmatpush2.bf16.msra.mxu0 %v17051_v36  ;;  %v17125_v36 = vld [vmem:[%s19909_s6 + $0xdc4] ss:$16 sps:$4 sm:$0xff]  }
 0x107   : > { %12448 = vmatpush2.bf16.msra.mxu1 %v17054_v37  ;;  %12408 = vmatprep.subr.bf16.mxu0 %v17059_v38  ;;  %v17128_v37 = vld [vmem:[%s19909_s6 + $0xfc4] ss:$16 sps:$4 sm:$0xff]   ;;  %v17123_v38 = vld [vmem:[%s19909_s6 + $0xdc0] ss:$16 sps:$4 sm:$0xff]  }
 0x108   : > { %12449 = vmatprep.subr.bf16.mxu1 %v17062_v39  ;;  %v17126_v39 = vld [vmem:[%s19909_s6 + $0xfc0] ss:$16 sps:$4 sm:$0xff]  }
 0x10a   : > { %12409 = vmatpush2.bf16.msra.mxu0 %v17057_v44  ;;  %v17131_v44 = vld [vmem:[%s19909_s6 + $0xda4] ss:$16 sps:$4 sm:$0xff]  }
 0x10b   : > { %12450 = vmatpush2.bf16.msra.mxu1 %v17060_v32  ;;  %12410 = vmatprep.subr.bf16.mxu0 %v17065_v45  ;;  %v17134_v32 = vld [vmem:[%s19909_s6 + $0xfa4] ss:$16 sps:$4 sm:$0xff]   ;;  %v17129_v45 = vld [vmem:[%s19909_s6 + $0xda0] ss:$16 sps:$4 sm:$0xff]  }
 0x10c   : > { %12451 = vmatprep.subr.bf16.mxu1 %v17068_v46  ;;  %v17132_v46 = vld [vmem:[%s19909_s6 + $0xfa0] ss:$16 sps:$4 sm:$0xff]  }
 0x10e   : > { %12411 = vmatpush2.bf16.msra.mxu0 %v17063_v48  ;;  %v17140_v48 = vld [vmem:[%s19909_s6 + $0xf84] ss:$16 sps:$4 sm:$0xff]  }
 0x10f   : > { %12452 = vmatpush2.bf16.msra.mxu1 %v17066_v51  ;;  %12462 = vmatprep.subr.bf16.mxu0 %v17071_v52  ;;  %v17135_v51 = vld [vmem:[%s19909_s6 + $0xd80] ss:$16 sps:$4 sm:$0xff]  }
 0x110   : > { %12503 = vmatprep.subr.bf16.mxu1 %v17074_v53  ;;  %v17138_v52 = vld [vmem:[%s19909_s6 + $0xf80] ss:$16 sps:$4 sm:$0xff]   ;;  %v17143_v53 = vld [vmem:[%s19909_s6 + $0xd64] ss:$16 sps:$4 sm:$0xff]  }
 0x111   : > { %12413 = vmatmul.mubr.bf16.vlgmr.msra.gmra.mxu0 %v20192_v50 }
 0x112   : > { %12454 = vmatmul.mubr.bf16.vlgmr.msra.gmra.mxu1 %v20202_v55  ;;  %12463 = vmatpush1.bf16.msra.mxu0 %v17069_v35  ;;  %v17146_v35 = vld [vmem:[%s19909_s6 + $0xf64] ss:$16 sps:$4 sm:$0xff]  }
 0x113   : > { %12504 = vmatpush1.bf16.msra.mxu1 %v17072_v56  ;;  %12464 = vmatprep.subr.bf16.mxu0 %v17077_v57  ;;  %v17141_v56 = vld [vmem:[%s19909_s6 + $0xd60] ss:$16 sps:$4 sm:$0xff]  }
 0x114   : > { %12505 = vmatprep.subr.bf16.mxu1 %v17080_v58  ;;  %12494 = vmatprep.mubr.bf16.mxu0 %v20198_v54  ;;  %v17144_v57 = vld [vmem:[%s19909_s6 + $0xf60] ss:$16 sps:$4 sm:$0xff]   ;;  %v17149_v58 = vld [vmem:[%s19909_s6 + $0xd44] ss:$16 sps:$4 sm:$0xff]  }
 0x115   : > { %12535 = vmatprep.mubr.bf16.mxu1 %v20210_v59 }
 0x116   : > { %12465 = vmatpush1.bf16.msra.mxu0 %v17075_v61  ;;  %v17152_v61 = vld [vmem:[%s19909_s6 + $0xf44] ss:$16 sps:$4 sm:$0xff]  }
 0x117   : > { %12506 = vmatpush1.bf16.msra.mxu1 %v17078_v62  ;;  %12466 = vmatprep.subr.bf16.mxu0 %v17083_v63  ;;  %v17147_v62 = vld [vmem:[%s19909_s6 + $0xd40] ss:$16 sps:$4 sm:$0xff]  }
 0x118   : > { %12507 = vmatprep.subr.bf16.mxu1 %v17086_v1  ;;  %v17150_v63 = vld [vmem:[%s19909_s6 + $0xf40] ss:$16 sps:$4 sm:$0xff]  }
 0x119   : > { %v20269_v1 = vld [vmem:[%s22492_s0 + $0x10] sm:$0xff] }
 0x11a   : > { %12467 = vmatpush1.bf16.msra.mxu0 %v17081_v2  ;;  %v17155_v2 = vld [vmem:[%s19909_s6 + $0xd24] ss:$16 sps:$4 sm:$0xff]  }
 0x11b   : > { %12508 = vmatpush1.bf16.msra.mxu1 %v17084_v3  ;;  %12468 = vmatprep.subr.bf16.mxu0 %v17089_v4  ;;  %v17158_v3 = vld [vmem:[%s19909_s6 + $0xf24] ss:$16 sps:$4 sm:$0xff]   ;;  %v20275_v4 = vrot.slane %v20269_v1, %v19968_v49 }
 0x11c   : > { %12509 = vmatprep.subr.bf16.mxu1 %v17092_v5  ;;  %v17153_v5 = vld [vmem:[%s19909_s6 + $0xd20] ss:$16 sps:$4 sm:$0xff]  }
 0x11e   : > { %12469 = vmatpush1.bf16.msra.mxu0 %v17087_v7  ;;  %v17156_v7 = vld [vmem:[%s19909_s6 + $0xf20] ss:$16 sps:$4 sm:$0xff]  }
 0x11f   : > { %12510 = vmatpush1.bf16.msra.mxu1 %v17090_v8  ;;  %12470 = vmatprep.subr.bf16.mxu0 %v17095_v9  ;;  %v17161_v8 = vld [vmem:[%s19909_s6 + $0xd04] ss:$16 sps:$4 sm:$0xff]  }
 0x120   : > { %12511 = vmatprep.subr.bf16.mxu1 %v17098_v10  ;;  %v17164_v9 = vld [vmem:[%s19909_s6 + $0xf04] ss:$16 sps:$4 sm:$0xff]   ;;  %v17159_v10 = vld [vmem:[%s19909_s6 + $0xd00] ss:$16 sps:$4 sm:$0xff]  }
 0x122   : > { %12471 = vmatpush1.bf16.msra.mxu0 %v17093_v11  ;;  %v2302_v11 = vcombine.high %v20275_v4, %v20275_v4 }
 0x123   : > { %12512 = vmatpush1.bf16.msra.mxu1 %v17096_v12  ;;  %12472 = vmatprep.subr.bf16.mxu0 %v17101_v14  ;;  %v17162_v12 = vld [vmem:[%s19909_s6 + $0xf00] ss:$16 sps:$4 sm:$0xff]  }
 0x124   : > { %12513 = vmatprep.subr.bf16.mxu1 %v17104_v15  ;;  %v2159_v14 = vld [vmem:[%s19915_s30] sm:$0xf]  ;;  %v20288_v15 = vrot.slane %v20181_v40, %v19968_v49 }
 0x125   : > { %v17166_v40 = vld [vmem:[%s19909_s6 + $0x10e0] ss:$16 sps:$4 sm:$0xff]  }
 0x126   : > { %12473 = vmatpush1.bf16.msra.mxu0 %v17099_v16  ;;  %v2163_v16 = vsub.s32 0, %v19960_v42 }
 0x127   : > { %12514 = vmatpush1.bf16.msra.mxu1 %v17102_v19  ;;  %12474 = vmatprep.subr.bf16.mxu0 %v17107_v20  ;;  %v17168_v19 = vld [vmem:[%s19909_s6 + $0x10e4] ss:$16 sps:$4 sm:$0xff]  }
 0x128   : > { %12515 = vmatprep.subr.bf16.mxu1 %v17110_v21  ;;  %v17171_v20 = vld [vmem:[%s19909_s6 + $0x12e4] ss:$16 sps:$4 sm:$0xff]   ;;  %v2167_v21 = vsub.s32 1, %v19960_v42 }
 0x12a   : > { %12475 = vmatpush1.bf16.msra.mxu0 %v17105_v22  ;;  %v20295_v22 = vrot.slane %v2302_v11, %v19968_v49  ;;  %v17199_v11 = vld [vmem:[%s19909_s6 + $0x1240] ss:$16 sps:$4 sm:$0xff]  }
 0x12b   : > { %12516 = vmatpush1.bf16.msra.mxu1 %v17108_v24  ;;  %12476 = vmatprep.subr.bf16.mxu0 %v17113_v25  ;;  %v20299_v24 = vcombine.high %v20288_v15, %v20288_v15  ;;  %v17169_v25 = vld [vmem:[%s19909_s6 + $0x12e0] ss:$16 sps:$4 sm:$0xff]  }
 0x12c   : > { %12517 = vmatprep.subr.bf16.mxu1 %v17116_v27  ;;  %v2164_v27 = vrot.slane %v2159_v14, %v2163_v16  ;;  %v17202_v16 = vld [vmem:[%s19909_s6 + $0x1020] ss:$16 sps:$4 sm:$0xff]  }
 0x12e   : > { %12477 = vmatpush1.bf16.msra.mxu0 %v17111_v28  ;;  %v17174_v28 = vld [vmem:[%s19909_s6 + $0x10c4] ss:$16 sps:$4 sm:$0xff]  }
 0x12f   : > { %12518 = vmatpush1.bf16.msra.mxu1 %v17114_v29  ;;  %12478 = vmatprep.subr.bf16.mxu0 %v17119_v31  ;;  %v17177_v29 = vld [vmem:[%s19909_s6 + $0x12c4] ss:$16 sps:$4 sm:$0xff]   ;;  %v2168_v31 = vrot.slane %v2159_v14, %v2167_v21 }
 0x130   : > { %12519 = vmatprep.subr.bf16.mxu1 %v17122_v6  ;;  %v20307_v6 = vcombine.high %v20295_v22, %v20295_v22  ;;  %v17207_v14 = vld [vmem:[%s19909_s6 + $0x1224] ss:$16 sps:$4 sm:$0xff]  }
 0x131   : > { %v17213_v21 = vld [vmem:[%s19909_s6 + $0x1204] ss:$16 sps:$4 sm:$0xff]  }
 0x132   : > { %12479 = vmatpush2.bf16.msra.mxu0 %v17117_v33 }
 0x133   : > { %12520 = vmatpush2.bf16.msra.mxu1 %v17120_v34  ;;  %12480 = vmatprep.subr.bf16.mxu0 %v17125_v36  ;;  %v17172_v36 = vld [vmem:[%s19909_s6 + $0x10c0] ss:$16 sps:$4 sm:$0xff]  }
 0x134   : > { %12521 = vmatprep.subr.bf16.mxu1 %v17128_v37  ;;  %v17175_v37 = vld [vmem:[%s19909_s6 + $0x12c0] ss:$16 sps:$4 sm:$0xff]  }
 0x136   : > { %12481 = vmatpush2.bf16.msra.mxu0 %v17123_v38 }
 0x137   : > { %12522 = vmatpush2.bf16.msra.mxu1 %v17126_v39  ;;  %12482 = vmatprep.subr.bf16.mxu0 %v17131_v44 }
 0x138   : > { %12523 = vmatprep.subr.bf16.mxu1 %v17134_v32  ;;  %v17180_v32 = vld [vmem:[%s19909_s6 + $0x10a4] ss:$16 sps:$4 sm:$0xff]  }
 0x13a   : > { %12483 = vmatpush2.bf16.msra.mxu0 %v17129_v45  ;;  %v17183_v45 = vld [vmem:[%s19909_s6 + $0x12a4] ss:$16 sps:$4 sm:$0xff]  }
 0x13b   : > { %12524 = vmatpush2.bf16.msra.mxu1 %v17132_v46  ;;  %12484 = vmatprep.subr.bf16.mxu0 %v17137_v47 }
 0x13c   : > { %12525 = vmatprep.subr.bf16.mxu1 %v17140_v48  ;;  %v17178_v48 = vld [vmem:[%s19909_s6 + $0x10a0] ss:$16 sps:$4 sm:$0xff]  }
 0x13e   : > { %12485 = vmatpush2.bf16.msra.mxu0 %v17135_v51  ;;  %v17181_v51 = vld [vmem:[%s19909_s6 + $0x12a0] ss:$16 sps:$4 sm:$0xff]  }
 0x13f   : > { %12526 = vmatpush2.bf16.msra.mxu1 %v17138_v52  ;;  %12486 = vmatprep.subr.bf16.mxu0 %v17143_v53 }
 0x140   : > { %12527 = vmatprep.subr.bf16.mxu1 %v17146_v35 }
 0x142   : > { %12487 = vmatpush2.bf16.msra.mxu0 %v17141_v56 }
 0x143   : > { %12528 = vmatpush2.bf16.msra.mxu1 %v17144_v57  ;;  %12488 = vmatprep.subr.bf16.mxu0 %v17149_v58  ;;  %v17186_v58 = vld [vmem:[%s19909_s6 + $0x1084] ss:$16 sps:$4 sm:$0xff]  }
 0x144   : > { %12529 = vmatprep.subr.bf16.mxu1 %v17152_v61  ;;  %v17189_v61 = vld [vmem:[%s19909_s6 + $0x1284] ss:$16 sps:$4 sm:$0xff]  }
 0x146   : > { %12489 = vmatpush2.bf16.msra.mxu0 %v17147_v62  ;;  %v17184_v62 = vld [vmem:[%s19909_s6 + $0x1080] ss:$16 sps:$4 sm:$0xff]  }
 0x147   : > { %12530 = vmatpush2.bf16.msra.mxu1 %v17150_v63  ;;  %12490 = vmatprep.subr.bf16.mxu0 %v17155_v2  ;;  %v17187_v63 = vld [vmem:[%s19909_s6 + $0x1280] ss:$16 sps:$4 sm:$0xff]   ;;  %v17192_v2 = vld [vmem:[%s19909_s6 + $0x1064] ss:$16 sps:$4 sm:$0xff]  }
 0x148   : > { %12531 = vmatprep.subr.bf16.mxu1 %v17158_v3  ;;  %v17195_v3 = vld [vmem:[%s19909_s6 + $0x1264] ss:$16 sps:$4 sm:$0xff]  }
 0x14a   : > { %12491 = vmatpush2.bf16.msra.mxu0 %v17153_v5  ;;  %v17190_v5 = vld [vmem:[%s19909_s6 + $0x1060] ss:$16 sps:$4 sm:$0xff]  }
 0x14b   : > { %12532 = vmatpush2.bf16.msra.mxu1 %v17156_v7  ;;  %12492 = vmatprep.subr.bf16.mxu0 %v17161_v8  ;;  %v17193_v7 = vld [vmem:[%s19909_s6 + $0x1260] ss:$16 sps:$4 sm:$0xff]   ;;  %v17198_v8 = vld [vmem:[%s19909_s6 + $0x1044] ss:$16 sps:$4 sm:$0xff]  }
 0x14c   : > { %12533 = vmatprep.subr.bf16.mxu1 %v17164_v9  ;;  %v17201_v9 = vld [vmem:[%s19909_s6 + $0x1244] ss:$16 sps:$4 sm:$0xff]  }
 0x14e   : > { %12493 = vmatpush2.bf16.msra.mxu0 %v17159_v10  ;;  %v17196_v10 = vld [vmem:[%s19909_s6 + $0x1040] ss:$16 sps:$4 sm:$0xff]  }
 0x14f   : > { %12534 = vmatpush2.bf16.msra.mxu1 %v17162_v12  ;;  %12544 = vmatprep.subr.bf16.mxu0 %v17168_v19  ;;  %v17204_v12 = vld [vmem:[%s19909_s6 + $0x1024] ss:$16 sps:$4 sm:$0xff]   ;;  %v17205_v19 = vld [vmem:[%s19909_s6 + $0x1220] ss:$16 sps:$4 sm:$0xff]  }
 0x150   : > { %12585 = vmatprep.subr.bf16.mxu1 %v17171_v20  ;;  %v17210_v20 = vld [vmem:[%s19909_s6 + $0x1004] ss:$16 sps:$4 sm:$0xff]  }
 0x151   : > { %v12250_v33 = vpop.f32.mrf.mxu0  ;;  %12495 = vmatmul.mubr.bf16.vlgmr.msra.gmra.mxu0 %v20288_v15 }
 0x152   : > { %v12291_v34 = vpop.f32.mrf.mxu1  ;;  %12536 = vmatmul.mubr.bf16.vlgmr.msra.gmra.mxu1 %v20299_v24  ;;  %v12251_v38 = vadd.f32 %v12250_v33, %v2164_v27  ;;  %12545 = vmatpush1.bf16.msra.mxu0 %v17166_v40  ;;  %v17208_v40 = vld [vmem:[%s19909_s6 + $0x1000] ss:$16 sps:$4 sm:$0xff]   ;;  %v17216_v27 = vld [vmem:[%s19909_s6 + $0x11e4] ss:$16 sps:$4 sm:$0xff]  }
 0x153   : > { %12586 = vmatpush1.bf16.msra.mxu1 %v17169_v25  ;;  %v12252_v39 = vpop.f32.mrf.mxu0  ;;  %12546 = vmatprep.subr.bf16.mxu0 %v17174_v28  ;;  %v17211_v25 = vld [vmem:[%s19909_s6 + $0x1200] ss:$16 sps:$4 sm:$0xff]   ;;  %v17219_v28 = vld [vmem:[%s19909_s6 + $0x13e4] ss:$16 sps:$4 sm:$0xff]  }
 0x154   : > { %v12293_v44 = vpop.f32.mrf.mxu1  ;;  %12587 = vmatprep.subr.bf16.mxu1 %v17177_v29  ;;  %v20315_v46 = vadd.f32 %v12291_v34, %v12251_v38  ;;  %v12253_v47 = vadd.f32 %v12252_v39, %v2168_v31  ;;  %12576 = vmatprep.mubr.bf16.mxu0 %v20295_v22  ;;  %v17214_v29 = vld [vmem:[%s19909_s6 + $0x11e0] ss:$16 sps:$4 sm:$0xff]   ;;  %v17222_v33 = vld [vmem:[%s19909_s6 + $0x11c4] ss:$16 sps:$4 sm:$0xff]  }
 0x155   : > { %12617 = vmatprep.mubr.bf16.mxu1 %v20307_v6  ;;  %v12254_v52 = vpop.f32.mrf.mxu0  ;;  %v17217_v31 = vld [vmem:[%s19909_s6 + $0x13e0] ss:$16 sps:$4 sm:$0xff]   ;;  %v17225_v34 = vld [vmem:[%s19909_s6 + $0x13c4] ss:$16 sps:$4 sm:$0xff]  }
 0x156   : > { %v12295_v53 = vpop.f32.mrf.mxu1  ;;  %v20321_v35 = vadd.f32 %v12293_v44, %v12253_v47  ;;  %12547 = vmatpush1.bf16.msra.mxu0 %v17172_v36  ;;  %v17220_v36 = vld [vmem:[%s19909_s6 + $0x11c0] ss:$16 sps:$4 sm:$0xff]   ;;  %v17228_v38 = vld [vmem:[%s19909_s6 + $0x11a4] ss:$16 sps:$4 sm:$0xff]  }
 0x157   : > { %12588 = vmatpush1.bf16.msra.mxu1 %v17175_v37  ;;  %v12255_v56 = vpop.f32.mrf.mxu0  ;;  %12548 = vmatprep.subr.bf16.mxu0 %v17180_v32  ;;  %v17223_v37 = vld [vmem:[%s19909_s6 + $0x13c0] ss:$16 sps:$4 sm:$0xff]   ;;  %v17231_v39 = vld [vmem:[%s19909_s6 + $0x13a4] ss:$16 sps:$4 sm:$0xff]  }
 0x158   : > { %v12296_v57 = vpop.f32.mrf.mxu1  ;;  %12589 = vmatprep.subr.bf16.mxu1 %v17183_v45  ;;  %v17226_v44 = vld [vmem:[%s19909_s6 + $0x11a0] ss:$16 sps:$4 sm:$0xff]   ;;  %v17234_v45 = vld [vmem:[%s19909_s6 + $0x1184] ss:$16 sps:$4 sm:$0xff]  }
 0x159   : > { %v17229_v32 = vld [vmem:[%s19909_s6 + $0x13a0] ss:$16 sps:$4 sm:$0xff]   ;;  %v17237_v47 = vld [vmem:[%s19909_s6 + $0x1384] ss:$16 sps:$4 sm:$0xff]  }
 0x15a   : > { %12549 = vmatpush1.bf16.msra.mxu0 %v17178_v48  ;;  %v17232_v48 = vld [vmem:[%s19909_s6 + $0x1180] ss:$16 sps:$4 sm:$0xff]   ;;  %v17240_v52 = vld [vmem:[%s19909_s6 + $0x1164] ss:$16 sps:$4 sm:$0xff]  }
 0x15b   : > { %12590 = vmatpush1.bf16.msra.mxu1 %v17181_v51  ;;  %12550 = vmatprep.subr.bf16.mxu0 %v17186_v58  ;;  %v17235_v51 = vld [vmem:[%s19909_s6 + $0x1380] ss:$16 sps:$4 sm:$0xff]   ;;  %v17243_v53 = vld [vmem:[%s19909_s6 + $0x1364] ss:$16 sps:$4 sm:$0xff]  }
 0x15c   : > { %12591 = vmatprep.subr.bf16.mxu1 %v17189_v61  ;;  %v17238_v56 = vld [vmem:[%s19909_s6 + $0x1160] ss:$16 sps:$4 sm:$0xff]   ;;  %v17246_v58 = vld [vmem:[%s19909_s6 + $0x1144] ss:$16 sps:$4 sm:$0xff]  }
 0x15d   : > { %v17241_v57 = vld [vmem:[%s19909_s6 + $0x1360] ss:$16 sps:$4 sm:$0xff]   ;;  %v17249_v61 = vld [vmem:[%s19909_s6 + $0x1344] ss:$16 sps:$4 sm:$0xff]  }
 0x15e   : > { %12551 = vmatpush1.bf16.msra.mxu0 %v17184_v62  ;;  %v2287_v62 = vcombine.high %v20269_v1, %v20269_v1  ;;  %v17250_v1 = vld [vmem:[%s19909_s6 + $0x1120] ss:$16 sps:$4 sm:$0xff]  }
 0x15f   : > { %12592 = vmatpush1.bf16.msra.mxu1 %v17187_v63  ;;  %12552 = vmatprep.subr.bf16.mxu0 %v17192_v2  ;;  %v17244_v63 = vld [vmem:[%s19909_s6 + $0x1140] ss:$16 sps:$4 sm:$0xff]  }
 0x160   : > { %12593 = vmatprep.subr.bf16.mxu1 %v17195_v3  ;;  %v17247_v2 = vld [vmem:[%s19909_s6 + $0x1340] ss:$16 sps:$4 sm:$0xff]   ;;  %v17252_v3 = vld [vmem:[%s19909_s6 + $0x1124] ss:$16 sps:$4 sm:$0xff]  }
 0x162   : > { %12553 = vmatpush1.bf16.msra.mxu0 %v17190_v5  ;;  %v17255_v5 = vld [vmem:[%s19909_s6 + $0x1324] ss:$16 sps:$4 sm:$0xff]  }
 0x163   : > { %12594 = vmatpush1.bf16.msra.mxu1 %v17193_v7  ;;  %12554 = vmatprep.subr.bf16.mxu0 %v17198_v8  ;;  %v20372_v7 = vrot.slane %v2287_v62, %v19968_v49  ;;  %v17253_v8 = vld [vmem:[%s19909_s6 + $0x1320] ss:$16 sps:$4 sm:$0xff]  }
 0x164   : > { %12595 = vmatprep.subr.bf16.mxu1 %v17201_v9  ;;  %v17258_v9 = vld [vmem:[%s19909_s6 + $0x1104] ss:$16 sps:$4 sm:$0xff]   ;;  %v17283_v62 = vld [vmem:[%s19909_s6 + $0x1680] ss:$16 sps:$4 sm:$0xff]  }
 0x166   : > { %12555 = vmatpush1.bf16.msra.mxu0 %v17196_v10  ;;  %v17261_v10 = vld [vmem:[%s19909_s6 + $0x1304] ss:$16 sps:$4 sm:$0xff]  }
 0x167   : > { %12596 = vmatpush1.bf16.msra.mxu1 %v17199_v11  ;;  %12556 = vmatprep.subr.bf16.mxu0 %v17204_v12  ;;  %v2303_v11 = vcombine.high %v20372_v7, %v20372_v7  ;;  %v20382_v12 = vrot.slane %v20275_v4, %v19968_v49 }
 0x168   : > { %12597 = vmatprep.subr.bf16.mxu1 %v17207_v14  ;;  %v17256_v14 = vld [vmem:[%s19909_s6 + $0x1100] ss:$16 sps:$4 sm:$0xff]  }
 0x169   : > { %v20395_v4 = vcombine.high %v20382_v12, %v20382_v12 }
 0x16a   : > { %12557 = vmatpush1.bf16.msra.mxu0 %v17202_v16  ;;  %v17259_v16 = vld [vmem:[%s19909_s6 + $0x1300] ss:$16 sps:$4 sm:$0xff]  }
 0x16b   : > { %12598 = vmatpush1.bf16.msra.mxu1 %v17205_v19  ;;  %12558 = vmatprep.subr.bf16.mxu0 %v17210_v20  ;;  %v17264_v19 = vld [vmem:[%s19909_s6 + $0x14e4] ss:$16 sps:$4 sm:$0xff]  }
 0x16c   : > { %12599 = vmatprep.subr.bf16.mxu1 %v17213_v21  ;;  %v17267_v20 = vld [vmem:[%s19909_s6 + $0x16e4] ss:$16 sps:$4 sm:$0xff]   ;;  %v17262_v21 = vld [vmem:[%s19909_s6 + $0x14e0] ss:$16 sps:$4 sm:$0xff]  }
 0x16e   : > { %12559 = vmatpush1.bf16.msra.mxu0 %v17208_v40  ;;  %v17265_v40 = vld [vmem:[%s19909_s6 + $0x16e0] ss:$16 sps:$4 sm:$0xff]  }
 0x16f   : > { %12600 = vmatpush1.bf16.msra.mxu1 %v17211_v25  ;;  %12560 = vmatprep.subr.bf16.mxu0 %v17216_v27  ;;  %v20391_v25 = vrot.slane %v2303_v11, %v19968_v49  ;;  %v17270_v27 = vld [vmem:[%s19909_s6 + $0x14c4] ss:$16 sps:$4 sm:$0xff]  }
 0x170   : > { %12601 = vmatprep.subr.bf16.mxu1 %v17219_v28  ;;  %v17273_v28 = vld [vmem:[%s19909_s6 + $0x16c4] ss:$16 sps:$4 sm:$0xff]  }
 0x171   : > { %v17300_v11 = vld [vmem:[%s19909_s6 + $0x1424] ss:$16 sps:$4 sm:$0xff]  }
 0x172   : > { %12561 = vmatpush2.bf16.msra.mxu0 %v17214_v29  ;;  %v17268_v29 = vld [vmem:[%s19909_s6 + $0x14c0] ss:$16 sps:$4 sm:$0xff]  }
 0x173   : > { %12602 = vmatpush2.bf16.msra.mxu1 %v17217_v31  ;;  %12562 = vmatprep.subr.bf16.mxu0 %v17222_v33  ;;  %v17271_v31 = vld [vmem:[%s19909_s6 + $0x16c0] ss:$16 sps:$4 sm:$0xff]   ;;  %v20403_v33 = vcombine.high %v20391_v25, %v20391_v25 }
 0x174   : > { %12603 = vmatprep.subr.bf16.mxu1 %v17225_v34 }
 0x176   : > { %12563 = vmatpush2.bf16.msra.mxu0 %v17220_v36 }
 0x177   : > { %12604 = vmatpush2.bf16.msra.mxu1 %v17223_v37  ;;  %12564 = vmatprep.subr.bf16.mxu0 %v17228_v38 }
 0x178   : > { %12605 = vmatprep.subr.bf16.mxu1 %v17231_v39 }
 0x17a   : > { %12565 = vmatpush2.bf16.msra.mxu0 %v17226_v44  ;;  %v17276_v44 = vld [vmem:[%s19909_s6 + $0x14a4] ss:$16 sps:$4 sm:$0xff]  }
 0x17b   : > { %12606 = vmatpush2.bf16.msra.mxu1 %v17229_v32  ;;  %12566 = vmatprep.subr.bf16.mxu0 %v17234_v45  ;;  %v17279_v32 = vld [vmem:[%s19909_s6 + $0x16a4] ss:$16 sps:$4 sm:$0xff]  }
 0x17c   : > { %12607 = vmatprep.subr.bf16.mxu1 %v17237_v47 }
 0x17e   : > { %12567 = vmatpush2.bf16.msra.mxu0 %v17232_v48  ;;  %v17274_v48 = vld [vmem:[%s19909_s6 + $0x14a0] ss:$16 sps:$4 sm:$0xff]  }
 0x17f   : > { %12608 = vmatpush2.bf16.msra.mxu1 %v17235_v51  ;;  %12568 = vmatprep.subr.bf16.mxu0 %v17240_v52  ;;  %v17277_v51 = vld [vmem:[%s19909_s6 + $0x16a0] ss:$16 sps:$4 sm:$0xff]  }
 0x180   : > { %12609 = vmatprep.subr.bf16.mxu1 %v17243_v53 }
 0x182   : > { %12569 = vmatpush2.bf16.msra.mxu0 %v17238_v56 }
 0x183   : > { %12610 = vmatpush2.bf16.msra.mxu1 %v17241_v57  ;;  %12570 = vmatprep.subr.bf16.mxu0 %v17246_v58  ;;  %v17285_v58 = vld [vmem:[%s19909_s6 + $0x1684] ss:$16 sps:$4 sm:$0xff]  }
 0x184   : > { %12611 = vmatprep.subr.bf16.mxu1 %v17249_v61  ;;  %v17280_v61 = vld [vmem:[%s19909_s6 + $0x1480] ss:$16 sps:$4 sm:$0xff]  }
 0x186   : > { %12571 = vmatpush2.bf16.msra.mxu0 %v17244_v63  ;;  %v17288_v63 = vld [vmem:[%s19909_s6 + $0x1464] ss:$16 sps:$4 sm:$0xff]  }
 0x187   : > { %12612 = vmatpush2.bf16.msra.mxu1 %v17247_v2  ;;  %12572 = vmatprep.subr.bf16.mxu0 %v17252_v3  ;;  %v17291_v2 = vld [vmem:[%s19909_s6 + $0x1664] ss:$16 sps:$4 sm:$0xff]   ;;  %v17286_v3 = vld [vmem:[%s19909_s6 + $0x1460] ss:$16 sps:$4 sm:$0xff]  }
 0x188   : > { %12613 = vmatprep.subr.bf16.mxu1 %v17255_v5  ;;  %v17289_v5 = vld [vmem:[%s19909_s6 + $0x1660] ss:$16 sps:$4 sm:$0xff]  }
 0x18a   : > { %12573 = vmatpush2.bf16.msra.mxu0 %v17250_v1  ;;  %v17294_v1 = vld [vmem:[%s19909_s6 + $0x1444] ss:$16 sps:$4 sm:$0xff]  }
 0x18b   : > { %12614 = vmatpush2.bf16.msra.mxu1 %v17253_v8  ;;  %12574 = vmatprep.subr.bf16.mxu0 %v17258_v9  ;;  %v17297_v8 = vld [vmem:[%s19909_s6 + $0x1644] ss:$16 sps:$4 sm:$0xff]   ;;  %v17292_v9 = vld [vmem:[%s19909_s6 + $0x1440] ss:$16 sps:$4 sm:$0xff]  }
 0x18c   : > { %12615 = vmatprep.subr.bf16.mxu1 %v17261_v10  ;;  %v17295_v10 = vld [vmem:[%s19909_s6 + $0x1640] ss:$16 sps:$4 sm:$0xff]  }
 0x18e   : > { %12575 = vmatpush2.bf16.msra.mxu0 %v17256_v14  ;;  %v17303_v14 = vld [vmem:[%s19909_s6 + $0x1624] ss:$16 sps:$4 sm:$0xff]  }
 0x18f   : > { %12616 = vmatpush2.bf16.msra.mxu1 %v17259_v16  ;;  %12626 = vmatprep.subr.bf16.mxu0 %v17264_v19  ;;  %v17298_v16 = vld [vmem:[%s19909_s6 + $0x1420] ss:$16 sps:$4 sm:$0xff]  }
 0x190   : > { %12667 = vmatprep.subr.bf16.mxu1 %v17267_v20  ;;  %v17301_v19 = vld [vmem:[%s19909_s6 + $0x1620] ss:$16 sps:$4 sm:$0xff]   ;;  %v17306_v20 = vld [vmem:[%s19909_s6 + $0x1404] ss:$16 sps:$4 sm:$0xff]  }
 0x191   : > { %v12332_v34 = vpop.f32.mrf.mxu0  ;;  %12577 = vmatmul.mubr.bf16.vlgmr.msra.gmra.mxu0 %v20382_v12 }
 0x192   : > { %v12373_v36 = vpop.f32.mrf.mxu1  ;;  %12618 = vmatmul.mubr.bf16.vlgmr.msra.gmra.mxu1 %v20395_v4  ;;  %v12333_v37 = vadd.f32 %v12332_v34, %v20315_v46  ;;  %12627 = vmatpush1.bf16.msra.mxu0 %v17262_v21  ;;  %v17309_v21 = vld [vmem:[%s19909_s6 + $0x1604] ss:$16 sps:$4 sm:$0xff]   ;;  %v17313_v34 = vld [vmem:[%s19909_s6 + $0x17e0] ss:$16 sps:$4 sm:$0xff]  }
 0x193   : > { %12668 = vmatpush1.bf16.msra.mxu1 %v17265_v40  ;;  %v12334_v38 = vpop.f32.mrf.mxu0  ;;  %12628 = vmatprep.subr.bf16.mxu0 %v17270_v27  ;;  %v17304_v40 = vld [vmem:[%s19909_s6 + $0x1400] ss:$16 sps:$4 sm:$0xff]  }
 0x194   : > { %v12375_v39 = vpop.f32.mrf.mxu1  ;;  %12669 = vmatprep.subr.bf16.mxu1 %v17273_v28  ;;  %v20410_v45 = vadd.f32 %v12373_v36, %v12333_v37  ;;  %v12335_v47 = vadd.f32 %v12334_v38, %v20321_v35  ;;  %12658 = vmatprep.mubr.bf16.mxu0 %v20391_v25  ;;  %v17282_v35 = vld [vmem:[%s19909_s6 + $0x1484] ss:$16 sps:$4 sm:$0xff]   ;;  %v17307_v27 = vld [vmem:[%s19909_s6 + $0x1600] ss:$16 sps:$4 sm:$0xff]  }
 0x195   : > { %12699 = vmatprep.mubr.bf16.mxu1 %v20403_v33  ;;  %v12336_v46 = vpop.f32.mrf.mxu0  ;;  %v17312_v28 = vld [vmem:[%s19909_s6 + $0x15e4] ss:$16 sps:$4 sm:$0xff]   ;;  %v17316_v38 = vld [vmem:[%s19909_s6 + $0x15c0] ss:$16 sps:$4 sm:$0xff]  }
 0x196   : > { %v12377_v52 = vpop.f32.mrf.mxu1  ;;  %v20417_v53 = vadd.f32 %v12375_v39, %v12335_v47  ;;  %12629 = vmatpush1.bf16.msra.mxu0 %v17268_v29  ;;  %v17315_v29 = vld [vmem:[%s19909_s6 + $0x17e4] ss:$16 sps:$4 sm:$0xff]   ;;  %v17319_v39 = vld [vmem:[%s19909_s6 + $0x17c0] ss:$16 sps:$4 sm:$0xff]  }
 0x197   : > { %12670 = vmatpush1.bf16.msra.mxu1 %v17271_v31  ;;  %v12337_v56 = vpop.f32.mrf.mxu0  ;;  %12630 = vmatprep.subr.bf16.mxu0 %v17276_v44  ;;  %v17310_v31 = vld [vmem:[%s19909_s6 + $0x15e0] ss:$16 sps:$4 sm:$0xff]   ;;  %v17318_v36 = vld [vmem:[%s19909_s6 + $0x15c4] ss:$16 sps:$4 sm:$0xff]  }
 0x198   : > { %v12378_v57 = vpop.f32.mrf.mxu1  ;;  %12671 = vmatprep.subr.bf16.mxu1 %v17279_v32  ;;  %v17321_v37 = vld [vmem:[%s19909_s6 + $0x17c4] ss:$16 sps:$4 sm:$0xff]   ;;  %v17322_v47 = vld [vmem:[%s19909_s6 + $0x15a0] ss:$16 sps:$4 sm:$0xff]  }
 0x199   : > { %v17324_v44 = vld [vmem:[%s19909_s6 + $0x15a4] ss:$16 sps:$4 sm:$0xff]   ;;  %v17328_v52 = vld [vmem:[%s19909_s6 + $0x1580] ss:$16 sps:$4 sm:$0xff]  }
 0x19a   : > { %12631 = vmatpush1.bf16.msra.mxu0 %v17274_v48  ;;  %v17327_v32 = vld [vmem:[%s19909_s6 + $0x17a4] ss:$16 sps:$4 sm:$0xff]   ;;  %v17325_v48 = vld [vmem:[%s19909_s6 + $0x17a0] ss:$16 sps:$4 sm:$0xff]  }
 0x19b   : > { %12672 = vmatpush1.bf16.msra.mxu1 %v17277_v51  ;;  %12632 = vmatprep.subr.bf16.mxu0 %v17282_v35  ;;  %v17330_v51 = vld [vmem:[%s19909_s6 + $0x1584] ss:$16 sps:$4 sm:$0xff]   ;;  %v17331_v56 = vld [vmem:[%s19909_s6 + $0x1780] ss:$16 sps:$4 sm:$0xff]  }
 0x19c   : > { %12673 = vmatprep.subr.bf16.mxu1 %v17285_v58  ;;  %v17333_v46 = vld [vmem:[%s19909_s6 + $0x1784] ss:$16 sps:$4 sm:$0xff]   ;;  %v17334_v58 = vld [vmem:[%s19909_s6 + $0x1560] ss:$16 sps:$4 sm:$0xff]  }
 0x19d   : > { %v17336_v57 = vld [vmem:[%s19909_s6 + $0x1564] ss:$16 sps:$4 sm:$0xff]  }
 0x19e   : > { %12633 = vmatpush1.bf16.msra.mxu0 %v17280_v61  ;;  %v17339_v35 = vld [vmem:[%s19909_s6 + $0x1764] ss:$16 sps:$4 sm:$0xff]   ;;  %v17337_v61 = vld [vmem:[%s19909_s6 + $0x1760] ss:$16 sps:$4 sm:$0xff]  }
 0x19f   : > { %12674 = vmatpush1.bf16.msra.mxu1 %v17283_v62  ;;  %12634 = vmatprep.subr.bf16.mxu0 %v17288_v63  ;;  %v17342_v62 = vld [vmem:[%s19909_s6 + $0x1544] ss:$16 sps:$4 sm:$0xff]  }
 0x1a0   : > { %12675 = vmatprep.subr.bf16.mxu1 %v17291_v2  ;;  %v17345_v63 = vld [vmem:[%s19909_s6 + $0x1744] ss:$16 sps:$4 sm:$0xff]   ;;  %v20464_v2 = vld [vmem:[%s22492_s0 + $0x18] sm:$0xff] }
 0x1a2   : > { %12635 = vmatpush1.bf16.msra.mxu0 %v17286_v3  ;;  %v17340_v3 = vld [vmem:[%s19909_s6 + $0x1540] ss:$16 sps:$4 sm:$0xff]  }
 0x1a3   : > { %12676 = vmatpush1.bf16.msra.mxu1 %v17289_v5  ;;  %12636 = vmatprep.subr.bf16.mxu0 %v17294_v1  ;;  %v17343_v5 = vld [vmem:[%s19909_s6 + $0x1740] ss:$16 sps:$4 sm:$0xff]   ;;  %v17348_v1 = vld [vmem:[%s19909_s6 + $0x1524] ss:$16 sps:$4 sm:$0xff]  }
 0x1a4   : > { %12677 = vmatprep.subr.bf16.mxu1 %v17297_v8  ;;  %v17351_v8 = vld [vmem:[%s19909_s6 + $0x1724] ss:$16 sps:$4 sm:$0xff]  }
 0x1a6   : > { %12637 = vmatpush1.bf16.msra.mxu0 %v17292_v9  ;;  %v20472_v9 = vrot.slane %v20464_v2, %v19968_v49 }
 0x1a7   : > { %12678 = vmatpush1.bf16.msra.mxu1 %v17295_v10  ;;  %12638 = vmatprep.subr.bf16.mxu0 %v17300_v11  ;;  %v17346_v10 = vld [vmem:[%s19909_s6 + $0x1520] ss:$16 sps:$4 sm:$0xff]  }
 0x1a8   : > { %12679 = vmatprep.subr.bf16.mxu1 %v17303_v14  ;;  %v17349_v11 = vld [vmem:[%s19909_s6 + $0x1720] ss:$16 sps:$4 sm:$0xff]   ;;  %v17354_v14 = vld [vmem:[%s19909_s6 + $0x1504] ss:$16 sps:$4 sm:$0xff]  }
 0x1aa   : > { %12639 = vmatpush1.bf16.msra.mxu0 %v17298_v16  ;;  %v17357_v16 = vld [vmem:[%s19909_s6 + $0x1704] ss:$16 sps:$4 sm:$0xff]  }
 0x1ab   : > { %12680 = vmatpush1.bf16.msra.mxu1 %v17301_v19  ;;  %12640 = vmatprep.subr.bf16.mxu0 %v17306_v20  ;;  %v2351_v19 = vcombine.high %v20472_v9, %v20472_v9  ;;  %v20482_v20 = vrot.slane %v20372_v7, %v19968_v49 }
 0x1ac   : > { %12681 = vmatprep.subr.bf16.mxu1 %v17309_v21  ;;  %v17352_v21 = vld [vmem:[%s19909_s6 + $0x1500] ss:$16 sps:$4 sm:$0xff]  }
 0x1ad   : > { %v20495_v7 = vcombine.high %v20482_v20, %v20482_v20 }
 0x1ae   : > { %12641 = vmatpush1.bf16.msra.mxu0 %v17304_v40  ;;  %v17355_v40 = vld [vmem:[%s19909_s6 + $0x1700] ss:$16 sps:$4 sm:$0xff]  }
 0x1af   : > { %12682 = vmatpush1.bf16.msra.mxu1 %v17307_v27  ;;  %12642 = vmatprep.subr.bf16.mxu0 %v17312_v28  ;;  %v17361_v27 = vld [vmem:[%s19909_s6 + $0x18e4] ss:$16 sps:$4 sm:$0xff]  }
 0x1b0   : > { %12683 = vmatprep.subr.bf16.mxu1 %v17315_v29  ;;  %v17364_v28 = vld [vmem:[%s19909_s6 + $0x1ae4] ss:$16 sps:$4 sm:$0xff]   ;;  %v17359_v29 = vld [vmem:[%s19909_s6 + $0x18e0] ss:$16 sps:$4 sm:$0xff]  }
 0x1b2   : > { %12643 = vmatpush2.bf16.msra.mxu0 %v17310_v31  ;;  %v17362_v31 = vld [vmem:[%s19909_s6 + $0x1ae0] ss:$16 sps:$4 sm:$0xff]  }
 0x1b3   : > { %12684 = vmatpush2.bf16.msra.mxu1 %v17313_v34  ;;  %12644 = vmatprep.subr.bf16.mxu0 %v17318_v36  ;;  %v20491_v34 = vrot.slane %v2351_v19, %v19968_v49  ;;  %v17367_v36 = vld [vmem:[%s19909_s6 + $0x18c4] ss:$16 sps:$4 sm:$0xff]   ;;  %v17386_v19 = vld [vmem:[%s19909_s6 + $0x1a60] ss:$16 sps:$4 sm:$0xff]  }
 0x1b4   : > { %12685 = vmatprep.subr.bf16.mxu1 %v17321_v37  ;;  %v17370_v37 = vld [vmem:[%s19909_s6 + $0x1ac4] ss:$16 sps:$4 sm:$0xff]  }
 0x1b6   : > { %12645 = vmatpush2.bf16.msra.mxu0 %v17316_v38  ;;  %v17365_v38 = vld [vmem:[%s19909_s6 + $0x18c0] ss:$16 sps:$4 sm:$0xff]  }
 0x1b7   : > { %12686 = vmatpush2.bf16.msra.mxu1 %v17319_v39  ;;  %12646 = vmatprep.subr.bf16.mxu0 %v17324_v44  ;;  %v17368_v39 = vld [vmem:[%s19909_s6 + $0x1ac0] ss:$16 sps:$4 sm:$0xff]   ;;  %v20503_v44 = vcombine.high %v20491_v34, %v20491_v34 }
 0x1b8   : > { %12687 = vmatprep.subr.bf16.mxu1 %v17327_v32 }
 0x1ba   : > { %12647 = vmatpush2.bf16.msra.mxu0 %v17322_v47 }
 0x1bb   : > { %12688 = vmatpush2.bf16.msra.mxu1 %v17325_v48  ;;  %12648 = vmatprep.subr.bf16.mxu0 %v17330_v51 }
 0x1bc   : > { %12689 = vmatprep.subr.bf16.mxu1 %v17333_v46 }
 0x1be   : > { %12649 = vmatpush2.bf16.msra.mxu0 %v17328_v52  ;;  %v17373_v52 = vld [vmem:[%s19909_s6 + $0x18a4] ss:$16 sps:$4 sm:$0xff]  }
 0x1bf   : > { %12690 = vmatpush2.bf16.msra.mxu1 %v17331_v56  ;;  %12650 = vmatprep.subr.bf16.mxu0 %v17336_v57  ;;  %v17376_v56 = vld [vmem:[%s19909_s6 + $0x1aa4] ss:$16 sps:$4 sm:$0xff]  }
 0x1c0   : > { %12691 = vmatprep.subr.bf16.mxu1 %v17339_v35 }
 0x1c2   : > { %12651 = vmatpush2.bf16.msra.mxu0 %v17334_v58  ;;  %v17371_v58 = vld [vmem:[%s19909_s6 + $0x18a0] ss:$16 sps:$4 sm:$0xff]  }
 0x1c3   : > { %12692 = vmatpush2.bf16.msra.mxu1 %v17337_v61  ;;  %12652 = vmatprep.subr.bf16.mxu0 %v17342_v62  ;;  %v17374_v61 = vld [vmem:[%s19909_s6 + $0x1aa0] ss:$16 sps:$4 sm:$0xff]  }
 0x1c4   : > { %12693 = vmatprep.subr.bf16.mxu1 %v17345_v63 }
 0x1c6   : > { %12653 = vmatpush2.bf16.msra.mxu0 %v17340_v3 }
 0x1c7   : > { %12694 = vmatpush2.bf16.msra.mxu1 %v17343_v5  ;;  %12654 = vmatprep.subr.bf16.mxu0 %v17348_v1  ;;  %v17382_v1 = vld [vmem:[%s19909_s6 + $0x1a84] ss:$16 sps:$4 sm:$0xff]  }
 0x1c8   : > { %12695 = vmatprep.subr.bf16.mxu1 %v17351_v8  ;;  %v17377_v8 = vld [vmem:[%s19909_s6 + $0x1880] ss:$16 sps:$4 sm:$0xff]  }
 0x1ca   : > { %12655 = vmatpush2.bf16.msra.mxu0 %v17346_v10  ;;  %v17380_v10 = vld [vmem:[%s19909_s6 + $0x1a80] ss:$16 sps:$4 sm:$0xff]  }
 0x1cb   : > { %12696 = vmatpush2.bf16.msra.mxu1 %v17349_v11  ;;  %12656 = vmatprep.subr.bf16.mxu0 %v17354_v14  ;;  %v17385_v11 = vld [vmem:[%s19909_s6 + $0x1864] ss:$16 sps:$4 sm:$0xff]  }
 0x1cc   : > { %12697 = vmatprep.subr.bf16.mxu1 %v17357_v16  ;;  %v17388_v14 = vld [vmem:[%s19909_s6 + $0x1a64] ss:$16 sps:$4 sm:$0xff]   ;;  %v17383_v16 = vld [vmem:[%s19909_s6 + $0x1860] ss:$16 sps:$4 sm:$0xff]  }
 0x1ce   : > { %12657 = vmatpush2.bf16.msra.mxu0 %v17352_v21  ;;  %v17391_v21 = vld [vmem:[%s19909_s6 + $0x1844] ss:$16 sps:$4 sm:$0xff]  }
 0x1cf   : > { %12698 = vmatpush2.bf16.msra.mxu1 %v17355_v40  ;;  %12708 = vmatprep.subr.bf16.mxu0 %v17361_v27  ;;  %v17394_v40 = vld [vmem:[%s19909_s6 + $0x1a44] ss:$16 sps:$4 sm:$0xff]   ;;  %v17389_v27 = vld [vmem:[%s19909_s6 + $0x1840] ss:$16 sps:$4 sm:$0xff]  }
 0x1d0   : > { %12749 = vmatprep.subr.bf16.mxu1 %v17364_v28  ;;  %v17392_v28 = vld [vmem:[%s19909_s6 + $0x1a40] ss:$16 sps:$4 sm:$0xff]  }
 0x1d1   : > { %v12414_v32 = vpop.f32.mrf.mxu0  ;;  %12659 = vmatmul.mubr.bf16.vlgmr.msra.gmra.mxu0 %v20482_v20 }
 0x1d2   : > { %v12455_v47 = vpop.f32.mrf.mxu1  ;;  %12700 = vmatmul.mubr.bf16.vlgmr.msra.gmra.mxu1 %v20495_v7  ;;  %v12415_v48 = vadd.f32 %v12414_v32, %v20410_v45  ;;  %12709 = vmatpush1.bf16.msra.mxu0 %v17359_v29  ;;  %v17397_v29 = vld [vmem:[%s19909_s6 + $0x1824] ss:$16 sps:$4 sm:$0xff]   ;;  %v17401_v32 = vld [vmem:[%s19909_s6 + $0x1800] ss:$16 sps:$4 sm:$0xff]  }
 0x1d3   : > { %12750 = vmatpush1.bf16.msra.mxu1 %v17362_v31  ;;  %v12416_v51 = vpop.f32.mrf.mxu0  ;;  %12710 = vmatprep.subr.bf16.mxu0 %v17367_v36  ;;  %v17400_v31 = vld [vmem:[%s19909_s6 + $0x1a24] ss:$16 sps:$4 sm:$0xff]   ;;  %v17395_v36 = vld [vmem:[%s19909_s6 + $0x1820] ss:$16 sps:$4 sm:$0xff]  }
 0x1d4   : > { %v12457_v46 = vpop.f32.mrf.mxu1  ;;  %12751 = vmatprep.subr.bf16.mxu1 %v17370_v37  ;;  %v20510_v57 = vadd.f32 %v12455_v47, %v12415_v48  ;;  %v12417_v35 = vadd.f32 %v12416_v51, %v20417_v53  ;;  %12740 = vmatprep.mubr.bf16.mxu0 %v20491_v34  ;;  %v17379_v53 = vld [vmem:[%s19909_s6 + $0x1884] ss:$16 sps:$4 sm:$0xff]   ;;  %v17398_v37 = vld [vmem:[%s19909_s6 + $0x1a20] ss:$16 sps:$4 sm:$0xff]  }
 0x1d5   : > { %12781 = vmatprep.mubr.bf16.mxu1 %v20503_v44  ;;  %v12418_v45 = vpop.f32.mrf.mxu0  ;;  %v17404_v47 = vld [vmem:[%s19909_s6 + $0x1a00] ss:$16 sps:$4 sm:$0xff]   ;;  %v17409_v48 = vld [vmem:[%s19909_s6 + $0x19e4] ss:$16 sps:$4 sm:$0xff]  }
 0x1d6   : > { %v12459_v62 = vpop.f32.mrf.mxu1  ;;  %v20517_v63 = vadd.f32 %v12457_v46, %v12417_v35  ;;  %12711 = vmatpush1.bf16.msra.mxu0 %v17365_v38  ;;  %v17403_v38 = vld [vmem:[%s19909_s6 + $0x1804] ss:$16 sps:$4 sm:$0xff]   ;;  %v17407_v46 = vld [vmem:[%s19909_s6 + $0x19e0] ss:$16 sps:$4 sm:$0xff]  }
 0x1d7   : > { %12752 = vmatpush1.bf16.msra.mxu1 %v17368_v39  ;;  %v12419_v3 = vpop.f32.mrf.mxu0  ;;  %12712 = vmatprep.subr.bf16.mxu0 %v17373_v52  ;;  %v17406_v39 = vld [vmem:[%s19909_s6 + $0x1a04] ss:$16 sps:$4 sm:$0xff]   ;;  %v17410_v52 = vld [vmem:[%s19909_s6 + $0x1be0] ss:$16 sps:$4 sm:$0xff]  }
 0x1d8   : > { %v12460_v5 = vpop.f32.mrf.mxu1  ;;  %12753 = vmatprep.subr.bf16.mxu1 %v17376_v56  ;;  %v17412_v51 = vld [vmem:[%s19909_s6 + $0x1be4] ss:$16 sps:$4 sm:$0xff]   ;;  %v17419_v3 = vld [vmem:[%s19909_s6 + $0x19a0] ss:$16 sps:$4 sm:$0xff]  }
 0x1d9   : > { %v17415_v56 = vld [vmem:[%s19909_s6 + $0x19c4] ss:$16 sps:$4 sm:$0xff]   ;;  %v17422_v5 = vld [vmem:[%s19909_s6 + $0x1ba0] ss:$16 sps:$4 sm:$0xff]  }
 0x1da   : > { %12713 = vmatpush1.bf16.msra.mxu0 %v17371_v58  ;;  %v17418_v35 = vld [vmem:[%s19909_s6 + $0x1bc4] ss:$16 sps:$4 sm:$0xff]   ;;  %v17413_v58 = vld [vmem:[%s19909_s6 + $0x19c0] ss:$16 sps:$4 sm:$0xff]  }
 0x1db   : > { %12754 = vmatpush1.bf16.msra.mxu1 %v17374_v61  ;;  %12714 = vmatprep.subr.bf16.mxu0 %v17379_v53  ;;  %v17416_v61 = vld [vmem:[%s19909_s6 + $0x1bc0] ss:$16 sps:$4 sm:$0xff]   ;;  %v17421_v45 = vld [vmem:[%s19909_s6 + $0x19a4] ss:$16 sps:$4 sm:$0xff]  }
 0x1dc   : > { %12755 = vmatprep.subr.bf16.mxu1 %v17382_v1  ;;  %v17424_v62 = vld [vmem:[%s19909_s6 + $0x1ba4] ss:$16 sps:$4 sm:$0xff]  }
 0x1dd   : > { %v17427_v53 = vld [vmem:[%s19909_s6 + $0x1984] ss:$16 sps:$4 sm:$0xff]  }
 0x1de   : > { %12715 = vmatpush1.bf16.msra.mxu0 %v17377_v8  ;;  %v17430_v1 = vld [vmem:[%s19909_s6 + $0x1b84] ss:$16 sps:$4 sm:$0xff]   ;;  %v17425_v8 = vld [vmem:[%s19909_s6 + $0x1980] ss:$16 sps:$4 sm:$0xff]  }
 0x1df   : > { %12756 = vmatpush1.bf16.msra.mxu1 %v17380_v10  ;;  %12716 = vmatprep.subr.bf16.mxu0 %v17385_v11  ;;  %v17428_v10 = vld [vmem:[%s19909_s6 + $0x1b80] ss:$16 sps:$4 sm:$0xff]   ;;  %v17433_v11 = vld [vmem:[%s19909_s6 + $0x1964] ss:$16 sps:$4 sm:$0xff]  }
 0x1e0   : > { %12757 = vmatprep.subr.bf16.mxu1 %v17388_v14  ;;  %v17436_v14 = vld [vmem:[%s19909_s6 + $0x1b64] ss:$16 sps:$4 sm:$0xff]  }
 0x1e2   : > { %12717 = vmatpush1.bf16.msra.mxu0 %v17383_v16  ;;  %v17431_v16 = vld [vmem:[%s19909_s6 + $0x1960] ss:$16 sps:$4 sm:$0xff]  }
 0x1e3   : > { %12758 = vmatpush1.bf16.msra.mxu1 %v17386_v19  ;;  %12718 = vmatprep.subr.bf16.mxu0 %v17391_v21  ;;  %v17434_v19 = vld [vmem:[%s19909_s6 + $0x1b60] ss:$16 sps:$4 sm:$0xff]   ;;  %v17439_v21 = vld [vmem:[%s19909_s6 + $0x1944] ss:$16 sps:$4 sm:$0xff]  }
 0x1e4   : > { %12759 = vmatprep.subr.bf16.mxu1 %v17394_v40  ;;  %v17442_v40 = vld [vmem:[%s19909_s6 + $0x1b44] ss:$16 sps:$4 sm:$0xff]  }
 0x1e6   : > { %12719 = vmatpush1.bf16.msra.mxu0 %v17389_v27  ;;  %v2336_v27 = vcombine.high %v20464_v2, %v20464_v2  ;;  %v17443_v2 = vld [vmem:[%s19909_s6 + $0x1920] ss:$16 sps:$4 sm:$0xff]  }
 0x1e7   : > { %12760 = vmatpush1.bf16.msra.mxu1 %v17392_v28  ;;  %12720 = vmatprep.subr.bf16.mxu0 %v17397_v29  ;;  %v17437_v28 = vld [vmem:[%s19909_s6 + $0x1940] ss:$16 sps:$4 sm:$0xff]  }
 0x1e8   : > { %12761 = vmatprep.subr.bf16.mxu1 %v17400_v31  ;;  %v17440_v29 = vld [vmem:[%s19909_s6 + $0x1b40] ss:$16 sps:$4 sm:$0xff]   ;;  %v17445_v31 = vld [vmem:[%s19909_s6 + $0x1924] ss:$16 sps:$4 sm:$0xff]  }
 0x1ea   : > { %12721 = vmatpush1.bf16.msra.mxu0 %v17395_v36  ;;  %v17448_v36 = vld [vmem:[%s19909_s6 + $0x1b24] ss:$16 sps:$4 sm:$0xff]  }
 0x1eb   : > { %12762 = vmatpush1.bf16.msra.mxu1 %v17398_v37  ;;  %12722 = vmatprep.subr.bf16.mxu0 %v17403_v38  ;;  %v20568_v37 = vrot.slane %v2336_v27, %v19968_v49  ;;  %v17446_v38 = vld [vmem:[%s19909_s6 + $0x1b20] ss:$16 sps:$4 sm:$0xff]  }
 0x1ec   : > { %12763 = vmatprep.subr.bf16.mxu1 %v17406_v39  ;;  %v17451_v39 = vld [vmem:[%s19909_s6 + $0x1904] ss:$16 sps:$4 sm:$0xff]   ;;  %v17467_v27 = vld [vmem:[%s19909_s6 + $0x1ca0] ss:$16 sps:$4 sm:$0xff]  }
 0x1ee   : > { %12723 = vmatpush1.bf16.msra.mxu0 %v17401_v32  ;;  %v17454_v32 = vld [vmem:[%s19909_s6 + $0x1b04] ss:$16 sps:$4 sm:$0xff]  }
 0x1ef   : > { %12764 = vmatpush1.bf16.msra.mxu1 %v17404_v47  ;;  %12724 = vmatprep.subr.bf16.mxu0 %v17409_v48  ;;  %v2352_v47 = vcombine.high %v20568_v37, %v20568_v37  ;;  %v20578_v48 = vrot.slane %v20472_v9, %v19968_v49 }
 0x1f0   : > { %12765 = vmatprep.subr.bf16.mxu1 %v17412_v51  ;;  %v17449_v51 = vld [vmem:[%s19909_s6 + $0x1900] ss:$16 sps:$4 sm:$0xff]  }
 0x1f1   : > { %v20591_v9 = vcombine.high %v20578_v48, %v20578_v48 }
 0x1f2   : > { %12725 = vmatpush2.bf16.msra.mxu0 %v17407_v46  ;;  %v17452_v46 = vld [vmem:[%s19909_s6 + $0x1b00] ss:$16 sps:$4 sm:$0xff]  }
 0x1f3   : > { %12766 = vmatpush2.bf16.msra.mxu1 %v17410_v52  ;;  %12726 = vmatprep.subr.bf16.mxu0 %v17415_v56  ;;  %v17457_v52 = vld [vmem:[%s19909_s6 + $0x1ce4] ss:$16 sps:$4 sm:$0xff]  }
 0x1f4   : > { %12767 = vmatprep.subr.bf16.mxu1 %v17418_v35  ;;  %v17460_v56 = vld [vmem:[%s19909_s6 + $0x1ee4] ss:$16 sps:$4 sm:$0xff]   ;;  %v17455_v35 = vld [vmem:[%s19909_s6 + $0x1ce0] ss:$16 sps:$4 sm:$0xff]  }
 0x1f6   : > { %12727 = vmatpush2.bf16.msra.mxu0 %v17413_v58  ;;  %v17458_v58 = vld [vmem:[%s19909_s6 + $0x1ee0] ss:$16 sps:$4 sm:$0xff]  }
 0x1f7   : > { %12768 = vmatpush2.bf16.msra.mxu1 %v17416_v61  ;;  %12728 = vmatprep.subr.bf16.mxu0 %v17421_v45  ;;  %v20587_v61 = vrot.slane %v2352_v47, %v19968_v49  ;;  %v17463_v45 = vld [vmem:[%s19909_s6 + $0x1cc4] ss:$16 sps:$4 sm:$0xff]  }
 0x1f8   : > { %12769 = vmatprep.subr.bf16.mxu1 %v17424_v62  ;;  %v17466_v62 = vld [vmem:[%s19909_s6 + $0x1ec4] ss:$16 sps:$4 sm:$0xff]  }
 0x1f9   : > { %v17481_v47 = vld [vmem:[%s19909_s6 + $0x1c64] ss:$16 sps:$4 sm:$0xff]  }
 0x1fa   : > { %12729 = vmatpush2.bf16.msra.mxu0 %v17419_v3  ;;  %v17461_v3 = vld [vmem:[%s19909_s6 + $0x1cc0] ss:$16 sps:$4 sm:$0xff]  }
 0x1fb   : > { %12770 = vmatpush2.bf16.msra.mxu1 %v17422_v5  ;;  %12730 = vmatprep.subr.bf16.mxu0 %v17427_v53  ;;  %v17464_v5 = vld [vmem:[%s19909_s6 + $0x1ec0] ss:$16 sps:$4 sm:$0xff]   ;;  %v20599_v53 = vcombine.high %v20587_v61, %v20587_v61 }
 0x1fc   : > { %12771 = vmatprep.subr.bf16.mxu1 %v17430_v1 }
 0x1fe   : > { %12731 = vmatpush2.bf16.msra.mxu0 %v17425_v8 }
 0x1ff   : > { %12772 = vmatpush2.bf16.msra.mxu1 %v17428_v10  ;;  %12732 = vmatprep.subr.bf16.mxu0 %v17433_v11 }
 0x200   : > { %12773 = vmatprep.subr.bf16.mxu1 %v17436_v14 }
 0x202   : > { %12733 = vmatpush2.bf16.msra.mxu0 %v17431_v16  ;;  %v17469_v16 = vld [vmem:[%s19909_s6 + $0x1ca4] ss:$16 sps:$4 sm:$0xff]  }
 0x203   : > { %12774 = vmatpush2.bf16.msra.mxu1 %v17434_v19  ;;  %12734 = vmatprep.subr.bf16.mxu0 %v17439_v21  ;;  %v17472_v19 = vld [vmem:[%s19909_s6 + $0x1ea4] ss:$16 sps:$4 sm:$0xff]  }
 0x204   : > { %12775 = vmatprep.subr.bf16.mxu1 %v17442_v40 }
 0x206   : > { %12735 = vmatpush2.bf16.msra.mxu0 %v17437_v28  ;;  %v17470_v28 = vld [vmem:[%s19909_s6 + $0x1ea0] ss:$16 sps:$4 sm:$0xff]  }
 0x207   : > { %12776 = vmatpush2.bf16.msra.mxu1 %v17440_v29  ;;  %12736 = vmatprep.subr.bf16.mxu0 %v17445_v31 }
 0x208   : > { %12777 = vmatprep.subr.bf16.mxu1 %v17448_v36 }
 0x20a   : > { %12737 = vmatpush2.bf16.msra.mxu0 %v17443_v2 }
 0x20b   : > { %12778 = vmatpush2.bf16.msra.mxu1 %v17446_v38  ;;  %12738 = vmatprep.subr.bf16.mxu0 %v17451_v39  ;;  %v17478_v38 = vld [vmem:[%s19909_s6 + $0x1e84] ss:$16 sps:$4 sm:$0xff]   ;;  %v17473_v39 = vld [vmem:[%s19909_s6 + $0x1c80] ss:$16 sps:$4 sm:$0xff]  }
 0x20c   : > { %12779 = vmatprep.subr.bf16.mxu1 %v17454_v32  ;;  %v17476_v32 = vld [vmem:[%s19909_s6 + $0x1e80] ss:$16 sps:$4 sm:$0xff]  }
 0x20e   : > { %12739 = vmatpush2.bf16.msra.mxu0 %v17449_v51  ;;  %v17484_v51 = vld [vmem:[%s19909_s6 + $0x1e64] ss:$16 sps:$4 sm:$0xff]  }
 0x20f   : > { %12780 = vmatpush2.bf16.msra.mxu1 %v17452_v46  ;;  %12790 = vmatprep.subr.bf16.mxu0 %v17457_v52  ;;  %v17479_v46 = vld [vmem:[%s19909_s6 + $0x1c60] ss:$16 sps:$4 sm:$0xff]  }
 0x210   : > { %12831 = vmatprep.subr.bf16.mxu1 %v17460_v56  ;;  %v17482_v52 = vld [vmem:[%s19909_s6 + $0x1e60] ss:$16 sps:$4 sm:$0xff]   ;;  %v17487_v56 = vld [vmem:[%s19909_s6 + $0x1c44] ss:$16 sps:$4 sm:$0xff]  }
 0x211   : > { %v12496_v1 = vpop.f32.mrf.mxu0  ;;  %12741 = vmatmul.mubr.bf16.vlgmr.msra.gmra.mxu0 %v20578_v48 }
 0x212   : > { %v12537_v8 = vpop.f32.mrf.mxu1  ;;  %12782 = vmatmul.mubr.bf16.vlgmr.msra.gmra.mxu1 %v20591_v9  ;;  %v12497_v10 = vadd.f32 %v12496_v1, %v20510_v57  ;;  %12791 = vmatpush1.bf16.msra.mxu0 %v17455_v35  ;;  %v17490_v35 = vld [vmem:[%s19909_s6 + $0x1e44] ss:$16 sps:$4 sm:$0xff]   ;;  %v17494_v1 = vld [vmem:[%s19909_s6 + $0x1e20] ss:$16 sps:$4 sm:$0xff]  }
 0x213   : > { %12832 = vmatpush1.bf16.msra.mxu1 %v17458_v58  ;;  %v12498_v11 = vpop.f32.mrf.mxu0  ;;  %12792 = vmatprep.subr.bf16.mxu0 %v17463_v45  ;;  %v17485_v58 = vld [vmem:[%s19909_s6 + $0x1c40] ss:$16 sps:$4 sm:$0xff]  }
 0x214   : > { %v12539_v14 = vpop.f32.mrf.mxu1  ;;  %12833 = vmatprep.subr.bf16.mxu1 %v17466_v62  ;;  %v20606_v21 = vadd.f32 %v12537_v8, %v12497_v10  ;;  %v12499_v40 = vadd.f32 %v12498_v11, %v20517_v63  ;;  %12822 = vmatprep.mubr.bf16.mxu0 %v20587_v61  ;;  %v17475_v63 = vld [vmem:[%s19909_s6 + $0x1c84] ss:$16 sps:$4 sm:$0xff]   ;;  %v17488_v45 = vld [vmem:[%s19909_s6 + $0x1e40] ss:$16 sps:$4 sm:$0xff]  }
 0x215   : > { %12863 = vmatprep.mubr.bf16.mxu1 %v20599_v53  ;;  %v12500_v57 = vpop.f32.mrf.mxu0  ;;  %v17493_v62 = vld [vmem:[%s19909_s6 + $0x1c24] ss:$16 sps:$4 sm:$0xff]   ;;  %v17497_v11 = vld [vmem:[%s19909_s6 + $0x1c00] ss:$16 sps:$4 sm:$0xff]  }
 0x216   : > { %v12541_v29 = vpop.f32.mrf.mxu1  ;;  %v20613_v31 = vadd.f32 %v12539_v14, %v12499_v40  ;;  %12793 = vmatpush1.bf16.msra.mxu0 %v17461_v3  ;;  %v17496_v3 = vld [vmem:[%s19909_s6 + $0x1e24] ss:$16 sps:$4 sm:$0xff]   ;;  %v17500_v14 = vld [vmem:[%s19909_s6 + $0x1e00] ss:$16 sps:$4 sm:$0xff]  }
 0x217   : > { %12834 = vmatpush1.bf16.msra.mxu1 %v17464_v5  ;;  %v12501_v36 = vpop.f32.mrf.mxu0  ;;  %12794 = vmatprep.subr.bf16.mxu0 %v17469_v16  ;;  %v17491_v5 = vld [vmem:[%s19909_s6 + $0x1c20] ss:$16 sps:$4 sm:$0xff]   ;;  %v17499_v8 = vld [vmem:[%s19909_s6 + $0x1c04] ss:$16 sps:$4 sm:$0xff]  }
 0x218   : > { %v12542_v2 = vpop.f32.mrf.mxu1  ;;  %12835 = vmatprep.subr.bf16.mxu1 %v17472_v19  ;;  %v17502_v10 = vld [vmem:[%s19909_s6 + $0x1e04] ss:$16 sps:$4 sm:$0xff]   ;;  %v17503_v40 = vld [vmem:[%s19909_s6 + $0x1de0] ss:$16 sps:$4 sm:$0xff]  }
 0x219   : > { %v17505_v16 = vld [vmem:[%s19909_s6 + $0x1de4] ss:$16 sps:$4 sm:$0xff]   ;;  %v17509_v29 = vld [vmem:[%s19909_s6 + $0x1dc0] ss:$16 sps:$4 sm:$0xff]  }
 0x21a   : > { %12795 = vmatpush1.bf16.msra.mxu0 %v17467_v27  ;;  %v17508_v19 = vld [vmem:[%s19909_s6 + $0x1fe4] ss:$16 sps:$4 sm:$0xff]   ;;  %v17506_v27 = vld [vmem:[%s19909_s6 + $0x1fe0] ss:$16 sps:$4 sm:$0xff]  }
 0x21b   : > { %12836 = vmatpush1.bf16.msra.mxu1 %v17470_v28  ;;  %12796 = vmatprep.subr.bf16.mxu0 %v17475_v63  ;;  %v17511_v28 = vld [vmem:[%s19909_s6 + $0x1dc4] ss:$16 sps:$4 sm:$0xff]   ;;  %v17512_v36 = vld [vmem:[%s19909_s6 + $0x1fc0] ss:$16 sps:$4 sm:$0xff]  }
 0x21c   : > { %12837 = vmatprep.subr.bf16.mxu1 %v17478_v38  ;;  %v17514_v57 = vld [vmem:[%s19909_s6 + $0x1fc4] ss:$16 sps:$4 sm:$0xff]   ;;  %v17515_v38 = vld [vmem:[%s19909_s6 + $0x1da0] ss:$16 sps:$4 sm:$0xff]  }
 0x21d   : > { %v17517_v2 = vld [vmem:[%s19909_s6 + $0x1da4] ss:$16 sps:$4 sm:$0xff]  }
 0x21e   : > { %12797 = vmatpush1.bf16.msra.mxu0 %v17473_v39  ;;  %v17520_v63 = vld [vmem:[%s19909_s6 + $0x1fa4] ss:$16 sps:$4 sm:$0xff]   ;;  %v17518_v39 = vld [vmem:[%s19909_s6 + $0x1fa0] ss:$16 sps:$4 sm:$0xff]  }
 0x21f   : > { %12838 = vmatpush1.bf16.msra.mxu1 %v17476_v32  ;;  %12798 = vmatprep.subr.bf16.mxu0 %v17481_v47  ;;  %v17523_v32 = vld [vmem:[%s19909_s6 + $0x1d84] ss:$16 sps:$4 sm:$0xff]  }
 0x220   : > { %12839 = vmatprep.subr.bf16.mxu1 %v17484_v51  ;;  %v17526_v47 = vld [vmem:[%s19909_s6 + $0x1f84] ss:$16 sps:$4 sm:$0xff]   ;;  %v17521_v51 = vld [vmem:[%s19909_s6 + $0x1d80] ss:$16 sps:$4 sm:$0xff]  }
 0x222   : > { %12799 = vmatpush1.bf16.msra.mxu0 %v17479_v46  ;;  %v17524_v46 = vld [vmem:[%s19909_s6 + $0x1f80] ss:$16 sps:$4 sm:$0xff]  }
 0x223   : > { %12840 = vmatpush1.bf16.msra.mxu1 %v17482_v52  ;;  %12800 = vmatprep.subr.bf16.mxu0 %v17487_v56  ;;  %v17529_v52 = vld [vmem:[%s19909_s6 + $0x1d64] ss:$16 sps:$4 sm:$0xff]  }
 0x224   : > { %12841 = vmatprep.subr.bf16.mxu1 %v17490_v35  ;;  %v17532_v56 = vld [vmem:[%s19909_s6 + $0x1f64] ss:$16 sps:$4 sm:$0xff]   ;;  %v17527_v35 = vld [vmem:[%s19909_s6 + $0x1d60] ss:$16 sps:$4 sm:$0xff]  }
 0x226   : > { %12801 = vmatpush1.bf16.msra.mxu0 %v17485_v58  ;;  %v17530_v58 = vld [vmem:[%s19909_s6 + $0x1f60] ss:$16 sps:$4 sm:$0xff]  }
 0x227   : > { %12842 = vmatpush1.bf16.msra.mxu1 %v17488_v45  ;;  %12802 = vmatprep.subr.bf16.mxu0 %v17493_v62  ;;  %v17535_v45 = vld [vmem:[%s19909_s6 + $0x1d44] ss:$16 sps:$4 sm:$0xff]  }
 0x228   : > { %12843 = vmatprep.subr.bf16.mxu1 %v17496_v3  ;;  %v17538_v62 = vld [vmem:[%s19909_s6 + $0x1f44] ss:$16 sps:$4 sm:$0xff]  }
 0x229   : > { %v20660_v3 = vld [vmem:[%s22492_s0 + $0x20] sm:$0xff] }
 0x22a   : > { %12803 = vmatpush1.bf16.msra.mxu0 %v17491_v5  ;;  %v17533_v5 = vld [vmem:[%s19909_s6 + $0x1d40] ss:$16 sps:$4 sm:$0xff]  }
 0x22b   : > { %12844 = vmatpush1.bf16.msra.mxu1 %v17494_v1  ;;  %12804 = vmatprep.subr.bf16.mxu0 %v17499_v8  ;;  %v17536_v1 = vld [vmem:[%s19909_s6 + $0x1f40] ss:$16 sps:$4 sm:$0xff]   ;;  %v17541_v8 = vld [vmem:[%s19909_s6 + $0x1d24] ss:$16 sps:$4 sm:$0xff]  }
 0x22c   : > { %12845 = vmatprep.subr.bf16.mxu1 %v17502_v10  ;;  %v17544_v10 = vld [vmem:[%s19909_s6 + $0x1f24] ss:$16 sps:$4 sm:$0xff]  }
 0x22e   : > { %12805 = vmatpush1.bf16.msra.mxu0 %v17497_v11  ;;  %v20668_v11 = vrot.slane %v20660_v3, %v19968_v49 }
 0x22f   : > { %12846 = vmatpush1.bf16.msra.mxu1 %v17500_v14  ;;  %12806 = vmatprep.subr.bf16.mxu0 %v17505_v16  ;;  %v17539_v14 = vld [vmem:[%s19909_s6 + $0x1d20] ss:$16 sps:$4 sm:$0xff]  }
 0x230   : > { %12847 = vmatprep.subr.bf16.mxu1 %v17508_v19  ;;  %v17542_v16 = vld [vmem:[%s19909_s6 + $0x1f20] ss:$16 sps:$4 sm:$0xff]   ;;  %v17547_v19 = vld [vmem:[%s19909_s6 + $0x1d04] ss:$16 sps:$4 sm:$0xff]  }
 0x232   : > { %12807 = vmatpush2.bf16.msra.mxu0 %v17503_v40  ;;  %v17550_v40 = vld [vmem:[%s19909_s6 + $0x1f04] ss:$16 sps:$4 sm:$0xff]  }
 0x233   : > { %12848 = vmatpush2.bf16.msra.mxu1 %v17506_v27  ;;  %12808 = vmatprep.subr.bf16.mxu0 %v17511_v28  ;;  %v2400_v27 = vcombine.high %v20668_v11, %v20668_v11  ;;  %v20678_v28 = vrot.slane %v20568_v37, %v19968_v49 }
 0x234   : > { %12849 = vmatprep.subr.bf16.mxu1 %v17514_v57  ;;  %v17545_v57 = vld [vmem:[%s19909_s6 + $0x1d00] ss:$16 sps:$4 sm:$0xff]  }
 0x235   : > { %v20691_v37 = vcombine.high %v20678_v28, %v20678_v28 }
 0x236   : > { %12809 = vmatpush2.bf16.msra.mxu0 %v17509_v29  ;;  %v17548_v29 = vld [vmem:[%s19909_s6 + $0x1f00] ss:$16 sps:$4 sm:$0xff]  }
 0x237   : > { %12850 = vmatpush2.bf16.msra.mxu1 %v17512_v36  ;;  %12810 = vmatprep.subr.bf16.mxu0 %v17517_v2  ;;  %v17554_v36 = vld [vmem:[%s19909_s6 + $0x20e4] ss:$16 sps:$4 sm:$0xff]  }
 0x238   : > { %12851 = vmatprep.subr.bf16.mxu1 %v17520_v63  ;;  %v17557_v2 = vld [vmem:[%s19909_s6 + $0x22e4] ss:$16 sps:$4 sm:$0xff]   ;;  %v17552_v63 = vld [vmem:[%s19909_s6 + $0x20e0] ss:$16 sps:$4 sm:$0xff]  }
 0x23a   : > { %12811 = vmatpush2.bf16.msra.mxu0 %v17515_v38  ;;  %v17555_v38 = vld [vmem:[%s19909_s6 + $0x22e0] ss:$16 sps:$4 sm:$0xff]  }
 0x23b   : > { %12852 = vmatpush2.bf16.msra.mxu1 %v17518_v39  ;;  %12812 = vmatprep.subr.bf16.mxu0 %v17523_v32  ;;  %v20687_v39 = vrot.slane %v2400_v27, %v19968_v49  ;;  %v17560_v32 = vld [vmem:[%s19909_s6 + $0x20c4] ss:$16 sps:$4 sm:$0xff]  }
 0x23c   : > { %12853 = vmatprep.subr.bf16.mxu1 %v17526_v47  ;;  %v17563_v47 = vld [vmem:[%s19909_s6 + $0x22c4] ss:$16 sps:$4 sm:$0xff]  }
 0x23e   : > { %12813 = vmatpush2.bf16.msra.mxu0 %v17521_v51  ;;  %v17558_v51 = vld [vmem:[%s19909_s6 + $0x20c0] ss:$16 sps:$4 sm:$0xff]  }
 0x23f   : > { %12854 = vmatpush2.bf16.msra.mxu1 %v17524_v46  ;;  %12814 = vmatprep.subr.bf16.mxu0 %v17529_v52  ;;  %v17561_v46 = vld [vmem:[%s19909_s6 + $0x22c0] ss:$16 sps:$4 sm:$0xff]   ;;  %v20699_v52 = vcombine.high %v20687_v39, %v20687_v39 }
 0x240   : > { %12855 = vmatprep.subr.bf16.mxu1 %v17532_v56 }
 0x242   : > { %12815 = vmatpush2.bf16.msra.mxu0 %v17527_v35 }
 0x243   : > { %12856 = vmatpush2.bf16.msra.mxu1 %v17530_v58  ;;  %12816 = vmatprep.subr.bf16.mxu0 %v17535_v45 }
 0x244   : > { %12857 = vmatprep.subr.bf16.mxu1 %v17538_v62 }
 0x246   : > { %12817 = vmatpush2.bf16.msra.mxu0 %v17533_v5  ;;  %v17566_v5 = vld [vmem:[%s19909_s6 + $0x20a4] ss:$16 sps:$4 sm:$0xff]  }
 0x247   : > { %12858 = vmatpush2.bf16.msra.mxu1 %v17536_v1  ;;  %12818 = vmatprep.subr.bf16.mxu0 %v17541_v8  ;;  %v17569_v1 = vld [vmem:[%s19909_s6 + $0x22a4] ss:$16 sps:$4 sm:$0xff]  }
 0x248   : > { %12859 = vmatprep.subr.bf16.mxu1 %v17544_v10 }
 0x24a   : > { %12819 = vmatpush2.bf16.msra.mxu0 %v17539_v14  ;;  %v17564_v14 = vld [vmem:[%s19909_s6 + $0x20a0] ss:$16 sps:$4 sm:$0xff]  }
 0x24b   : > { %12860 = vmatpush2.bf16.msra.mxu1 %v17542_v16  ;;  %12820 = vmatprep.subr.bf16.mxu0 %v17547_v19  ;;  %v17567_v16 = vld [vmem:[%s19909_s6 + $0x22a0] ss:$16 sps:$4 sm:$0xff]  }
 0x24c   : > { %12861 = vmatprep.subr.bf16.mxu1 %v17550_v40 }
 0x24e   : > { %12821 = vmatpush2.bf16.msra.mxu0 %v17545_v57 }
 0x24f   : > { %12862 = vmatpush2.bf16.msra.mxu1 %v17548_v29  ;;  %12872 = vmatprep.subr.bf16.mxu0 %v17554_v36  ;;  %v17575_v29 = vld [vmem:[%s19909_s6 + $0x2284] ss:$16 sps:$4 sm:$0xff]   ;;  %v17570_v36 = vld [vmem:[%s19909_s6 + $0x2080] ss:$16 sps:$4 sm:$0xff]  }
 0x250   : > { %12913 = vmatprep.subr.bf16.mxu1 %v17557_v2  ;;  %v17573_v2 = vld [vmem:[%s19909_s6 + $0x2280] ss:$16 sps:$4 sm:$0xff]  }
 0x251   : > { %v12578_v56 = vpop.f32.mrf.mxu0  ;;  %12823 = vmatmul.mubr.bf16.vlgmr.msra.gmra.mxu0 %v20678_v28 }
 0x252   : > { %v12619_v35 = vpop.f32.mrf.mxu1  ;;  %12864 = vmatmul.mubr.bf16.vlgmr.msra.gmra.mxu1 %v20691_v37  ;;  %v12579_v58 = vadd.f32 %v12578_v56, %v20606_v21  ;;  %12873 = vmatpush1.bf16.msra.mxu0 %v17552_v63  ;;  %v17578_v63 = vld [vmem:[%s19909_s6 + $0x2064] ss:$16 sps:$4 sm:$0xff]   ;;  %v17582_v56 = vld [vmem:[%s19909_s6 + $0x2040] ss:$16 sps:$4 sm:$0xff]  }
 0x253   : > { %12914 = vmatpush1.bf16.msra.mxu1 %v17555_v38  ;;  %v12580_v45 = vpop.f32.mrf.mxu0  ;;  %12874 = vmatprep.subr.bf16.mxu0 %v17560_v32  ;;  %v17581_v38 = vld [vmem:[%s19909_s6 + $0x2264] ss:$16 sps:$4 sm:$0xff]   ;;  %v17576_v32 = vld [vmem:[%s19909_s6 + $0x2060] ss:$16 sps:$4 sm:$0xff]  }
 0x254   : > { %v12621_v62 = vpop.f32.mrf.mxu1  ;;  %12915 = vmatprep.subr.bf16.mxu1 %v17563_v47  ;;  %v20706_v8 = vadd.f32 %v12619_v35, %v12579_v58  ;;  %v12581_v10 = vadd.f32 %v12580_v45, %v20613_v31  ;;  %12904 = vmatprep.mubr.bf16.mxu0 %v20687_v39  ;;  %v17572_v31 = vld [vmem:[%s19909_s6 + $0x2084] ss:$16 sps:$4 sm:$0xff]   ;;  %v17579_v47 = vld [vmem:[%s19909_s6 + $0x2260] ss:$16 sps:$4 sm:$0xff]  }
 0x255   : > { %12945 = vmatprep.mubr.bf16.mxu1 %v20699_v52  ;;  %v12582_v21 = vpop.f32.mrf.mxu0  ;;  %v17585_v35 = vld [vmem:[%s19909_s6 + $0x2240] ss:$16 sps:$4 sm:$0xff]   ;;  %v17590_v58 = vld [vmem:[%s19909_s6 + $0x2024] ss:$16 sps:$4 sm:$0xff]  }
 0x256   : > { %v12623_v19 = vpop.f32.mrf.mxu1  ;;  %v20713_v40 = vadd.f32 %v12621_v62, %v12581_v10  ;;  %12875 = vmatpush1.bf16.msra.mxu0 %v17558_v51  ;;  %v17584_v51 = vld [vmem:[%s19909_s6 + $0x2044] ss:$16 sps:$4 sm:$0xff]   ;;  %v17588_v62 = vld [vmem:[%s19909_s6 + $0x2020] ss:$16 sps:$4 sm:$0xff]  }
 0x257   : > { %12916 = vmatpush1.bf16.msra.mxu1 %v17561_v46  ;;  %v12583_v27 = vpop.f32.mrf.mxu0  ;;  %12876 = vmatprep.subr.bf16.mxu0 %v17566_v5  ;;  %v17587_v46 = vld [vmem:[%s19909_s6 + $0x2244] ss:$16 sps:$4 sm:$0xff]   ;;  %v17591_v5 = vld [vmem:[%s19909_s6 + $0x2220] ss:$16 sps:$4 sm:$0xff]  }
 0x258   : > { %v12624_v57 = vpop.f32.mrf.mxu1  ;;  %12917 = vmatprep.subr.bf16.mxu1 %v17569_v1  ;;  %v17593_v45 = vld [vmem:[%s19909_s6 + $0x2224] ss:$16 sps:$4 sm:$0xff]   ;;  %v17600_v27 = vld [vmem:[%s19909_s6 + $0x21e0] ss:$16 sps:$4 sm:$0xff]  }
 0x259   : > { %v17596_v1 = vld [vmem:[%s19909_s6 + $0x2004] ss:$16 sps:$4 sm:$0xff]   ;;  %v17603_v57 = vld [vmem:[%s19909_s6 + $0x23e0] ss:$16 sps:$4 sm:$0xff]  }
 0x25a   : > { %12877 = vmatpush1.bf16.msra.mxu0 %v17564_v14  ;;  %v17599_v10 = vld [vmem:[%s19909_s6 + $0x2204] ss:$16 sps:$4 sm:$0xff]   ;;  %v17594_v14 = vld [vmem:[%s19909_s6 + $0x2000] ss:$16 sps:$4 sm:$0xff]  }
 0x25b   : > { %12918 = vmatpush1.bf16.msra.mxu1 %v17567_v16  ;;  %12878 = vmatprep.subr.bf16.mxu0 %v17572_v31  ;;  %v17597_v16 = vld [vmem:[%s19909_s6 + $0x2200] ss:$16 sps:$4 sm:$0xff]   ;;  %v17602_v21 = vld [vmem:[%s19909_s6 + $0x21e4] ss:$16 sps:$4 sm:$0xff]  }
 0x25c   : > { %12919 = vmatprep.subr.bf16.mxu1 %v17575_v29  ;;  %v17605_v19 = vld [vmem:[%s19909_s6 + $0x23e4] ss:$16 sps:$4 sm:$0xff]  }
 0x25d   : > { %v17608_v31 = vld [vmem:[%s19909_s6 + $0x21c4] ss:$16 sps:$4 sm:$0xff]  }
 0x25e   : > { %12879 = vmatpush1.bf16.msra.mxu0 %v17570_v36  ;;  %v17611_v29 = vld [vmem:[%s19909_s6 + $0x23c4] ss:$16 sps:$4 sm:$0xff]   ;;  %v17606_v36 = vld [vmem:[%s19909_s6 + $0x21c0] ss:$16 sps:$4 sm:$0xff]  }
 0x25f   : > { %12920 = vmatpush1.bf16.msra.mxu1 %v17573_v2  ;;  %12880 = vmatprep.subr.bf16.mxu0 %v17578_v63  ;;  %v17609_v2 = vld [vmem:[%s19909_s6 + $0x23c0] ss:$16 sps:$4 sm:$0xff]   ;;  %v17614_v63 = vld [vmem:[%s19909_s6 + $0x21a4] ss:$16 sps:$4 sm:$0xff]  }
 0x260   : > { %12921 = vmatprep.subr.bf16.mxu1 %v17581_v38  ;;  %v17617_v38 = vld [vmem:[%s19909_s6 + $0x23a4] ss:$16 sps:$4 sm:$0xff]  }
 0x262   : > { %12881 = vmatpush1.bf16.msra.mxu0 %v17576_v32  ;;  %v17612_v32 = vld [vmem:[%s19909_s6 + $0x21a0] ss:$16 sps:$4 sm:$0xff]  }
 0x263   : > { %12922 = vmatpush1.bf16.msra.mxu1 %v17579_v47  ;;  %12882 = vmatprep.subr.bf16.mxu0 %v17584_v51  ;;  %v17615_v47 = vld [vmem:[%s19909_s6 + $0x23a0] ss:$16 sps:$4 sm:$0xff]   ;;  %v17620_v51 = vld [vmem:[%s19909_s6 + $0x2184] ss:$16 sps:$4 sm:$0xff]  }
 0x264   : > { %12923 = vmatprep.subr.bf16.mxu1 %v17587_v46  ;;  %v17623_v46 = vld [vmem:[%s19909_s6 + $0x2384] ss:$16 sps:$4 sm:$0xff]  }
 0x266   : > { %12883 = vmatpush1.bf16.msra.mxu0 %v17582_v56  ;;  %v17618_v56 = vld [vmem:[%s19909_s6 + $0x2180] ss:$16 sps:$4 sm:$0xff]  }
 0x267   : > { %12924 = vmatpush1.bf16.msra.mxu1 %v17585_v35  ;;  %12884 = vmatprep.subr.bf16.mxu0 %v17590_v58  ;;  %v17621_v35 = vld [vmem:[%s19909_s6 + $0x2380] ss:$16 sps:$4 sm:$0xff]   ;;  %v17626_v58 = vld [vmem:[%s19909_s6 + $0x2164] ss:$16 sps:$4 sm:$0xff]  }
 0x268   : > { %12925 = vmatprep.subr.bf16.mxu1 %v17593_v45  ;;  %v17629_v45 = vld [vmem:[%s19909_s6 + $0x2364] ss:$16 sps:$4 sm:$0xff]  }
 0x26a   : > { %12885 = vmatpush1.bf16.msra.mxu0 %v17588_v62  ;;  %v17624_v62 = vld [vmem:[%s19909_s6 + $0x2160] ss:$16 sps:$4 sm:$0xff]  }
 0x26b   : > { %12926 = vmatpush1.bf16.msra.mxu1 %v17591_v5  ;;  %12886 = vmatprep.subr.bf16.mxu0 %v17596_v1  ;;  %v17627_v5 = vld [vmem:[%s19909_s6 + $0x2360] ss:$16 sps:$4 sm:$0xff]   ;;  %v17632_v1 = vld [vmem:[%s19909_s6 + $0x2144] ss:$16 sps:$4 sm:$0xff]  }
 0x26c   : > { %12927 = vmatprep.subr.bf16.mxu1 %v17599_v10  ;;  %v17635_v10 = vld [vmem:[%s19909_s6 + $0x2344] ss:$16 sps:$4 sm:$0xff]  }
 0x26e   : > { %12887 = vmatpush1.bf16.msra.mxu0 %v17594_v14  ;;  %v2385_v14 = vcombine.high %v20660_v3, %v20660_v3  ;;  %v17636_v3 = vld [vmem:[%s19909_s6 + $0x2120] ss:$16 sps:$4 sm:$0xff]  }
 0x26f   : > { %12928 = vmatpush1.bf16.msra.mxu1 %v17597_v16  ;;  %12888 = vmatprep.subr.bf16.mxu0 %v17602_v21  ;;  %v17630_v16 = vld [vmem:[%s19909_s6 + $0x2140] ss:$16 sps:$4 sm:$0xff]  }
 0x270   : > { %12929 = vmatprep.subr.bf16.mxu1 %v17605_v19  ;;  %v17633_v21 = vld [vmem:[%s19909_s6 + $0x2340] ss:$16 sps:$4 sm:$0xff]   ;;  %v17638_v19 = vld [vmem:[%s19909_s6 + $0x2124] ss:$16 sps:$4 sm:$0xff]  }
 0x272   : > { %12889 = vmatpush2.bf16.msra.mxu0 %v17600_v27  ;;  %v17641_v27 = vld [vmem:[%s19909_s6 + $0x2324] ss:$16 sps:$4 sm:$0xff]  }
 0x273   : > { %12930 = vmatpush2.bf16.msra.mxu1 %v17603_v57  ;;  %12890 = vmatprep.subr.bf16.mxu0 %v17608_v31  ;;  %v20764_v57 = vrot.slane %v2385_v14, %v19968_v49  ;;  %v17639_v31 = vld [vmem:[%s19909_s6 + $0x2320] ss:$16 sps:$4 sm:$0xff]  }
 0x274   : > { %12931 = vmatprep.subr.bf16.mxu1 %v17611_v29  ;;  %v17644_v29 = vld [vmem:[%s19909_s6 + $0x2104] ss:$16 sps:$4 sm:$0xff]  }
 0x276   : > { %12891 = vmatpush2.bf16.msra.mxu0 %v17606_v36  ;;  %v17647_v36 = vld [vmem:[%s19909_s6 + $0x2304] ss:$16 sps:$4 sm:$0xff]  }
 0x277   : > { %12932 = vmatpush2.bf16.msra.mxu1 %v17609_v2  ;;  %12892 = vmatprep.subr.bf16.mxu0 %v17614_v63  ;;  %v2401_v2 = vcombine.high %v20764_v57, %v20764_v57  ;;  %v20774_v63 = vrot.slane %v20668_v11, %v19968_v49 }
 0x278   : > { %12933 = vmatprep.subr.bf16.mxu1 %v17617_v38  ;;  %v17642_v38 = vld [vmem:[%s19909_s6 + $0x2100] ss:$16 sps:$4 sm:$0xff]  }
 0x279   : > { %v20787_v11 = vcombine.high %v20774_v63, %v20774_v63 }
 0x27a   : > { %12893 = vmatpush2.bf16.msra.mxu0 %v17612_v32  ;;  %v17645_v32 = vld [vmem:[%s19909_s6 + $0x2300] ss:$16 sps:$4 sm:$0xff]  }
 0x27b   : > { %12934 = vmatpush2.bf16.msra.mxu1 %v17615_v47  ;;  %12894 = vmatprep.subr.bf16.mxu0 %v17620_v51  ;;  %v17650_v47 = vld [vmem:[%s19909_s6 + $0x24e4] ss:$16 sps:$4 sm:$0xff]  }
 0x27c   : > { %12935 = vmatprep.subr.bf16.mxu1 %v17623_v46  ;;  %v17653_v51 = vld [vmem:[%s19909_s6 + $0x26e4] ss:$16 sps:$4 sm:$0xff]   ;;  %v17648_v46 = vld [vmem:[%s19909_s6 + $0x24e0] ss:$16 sps:$4 sm:$0xff]  }
 0x27e   : > { %12895 = vmatpush2.bf16.msra.mxu0 %v17618_v56  ;;  %v17651_v56 = vld [vmem:[%s19909_s6 + $0x26e0] ss:$16 sps:$4 sm:$0xff]  }
 0x27f   : > { %12936 = vmatpush2.bf16.msra.mxu1 %v17621_v35  ;;  %12896 = vmatprep.subr.bf16.mxu0 %v17626_v58  ;;  %v20783_v35 = vrot.slane %v2401_v2, %v19968_v49  ;;  %v17656_v58 = vld [vmem:[%s19909_s6 + $0x24c4] ss:$16 sps:$4 sm:$0xff]   ;;  %v17663_v2 = vld [vmem:[%s19909_s6 + $0x26a0] ss:$16 sps:$4 sm:$0xff]  }
 0x280   : > { %12937 = vmatprep.subr.bf16.mxu1 %v17629_v45  ;;  %v17659_v45 = vld [vmem:[%s19909_s6 + $0x26c4] ss:$16 sps:$4 sm:$0xff]  }
 0x282   : > { %12897 = vmatpush2.bf16.msra.mxu0 %v17624_v62  ;;  %v17654_v62 = vld [vmem:[%s19909_s6 + $0x24c0] ss:$16 sps:$4 sm:$0xff]  }
 0x283   : > { %12938 = vmatpush2.bf16.msra.mxu1 %v17627_v5  ;;  %12898 = vmatprep.subr.bf16.mxu0 %v17632_v1  ;;  %v17657_v5 = vld [vmem:[%s19909_s6 + $0x26c0] ss:$16 sps:$4 sm:$0xff]   ;;  %v20795_v1 = vcombine.high %v20783_v35, %v20783_v35 }
 0x284   : > { %12939 = vmatprep.subr.bf16.mxu1 %v17635_v10 }
 0x286   : > { %12899 = vmatpush2.bf16.msra.mxu0 %v17630_v16 }
 0x287   : > { %12940 = vmatpush2.bf16.msra.mxu1 %v17633_v21  ;;  %12900 = vmatprep.subr.bf16.mxu0 %v17638_v19 }
 0x288   : > { %12941 = vmatprep.subr.bf16.mxu1 %v17641_v27  ;;  %v17662_v27 = vld [vmem:[%s19909_s6 + $0x24a4] ss:$16 sps:$4 sm:$0xff]  }
 0x28a   : > { %12901 = vmatpush2.bf16.msra.mxu0 %v17636_v3  ;;  %v17665_v3 = vld [vmem:[%s19909_s6 + $0x26a4] ss:$16 sps:$4 sm:$0xff]  }
 0x28b   : > { %12942 = vmatpush2.bf16.msra.mxu1 %v17639_v31  ;;  %12902 = vmatprep.subr.bf16.mxu0 %v17644_v29 }
 0x28c   : > { %12943 = vmatprep.subr.bf16.mxu1 %v17647_v36  ;;  %v17660_v36 = vld [vmem:[%s19909_s6 + $0x24a0] ss:$16 sps:$4 sm:$0xff]  }
 0x28e   : > { %12903 = vmatpush2.bf16.msra.mxu0 %v17642_v38 }
 0x28f   : > { %12944 = vmatpush2.bf16.msra.mxu1 %v17645_v32  ;;  %12954 = vmatprep.subr.bf16.mxu0 %v17650_v47 }
 0x290   : > { %12995 = vmatprep.subr.bf16.mxu1 %v17653_v51 }
 0x291   : > { %v12660_v10 = vpop.f32.mrf.mxu0  ;;  %12905 = vmatmul.mubr.bf16.vlgmr.msra.gmra.mxu0 %v20774_v63 }
 0x292   : > { %v12701_v14 = vpop.f32.mrf.mxu1  ;;  %12946 = vmatmul.mubr.bf16.vlgmr.msra.gmra.mxu1 %v20787_v11  ;;  %v12661_v16 = vadd.f32 %v12660_v10, %v20706_v8  ;;  %12955 = vmatpush1.bf16.msra.mxu0 %v17648_v46  ;;  %v17671_v46 = vld [vmem:[%s19909_s6 + $0x2684] ss:$16 sps:$4 sm:$0xff]   ;;  %v17675_v10 = vld [vmem:[%s19909_s6 + $0x2660] ss:$16 sps:$4 sm:$0xff]  }
 0x293   : > { %12996 = vmatpush1.bf16.msra.mxu1 %v17651_v56  ;;  %v12662_v21 = vpop.f32.mrf.mxu0  ;;  %12956 = vmatprep.subr.bf16.mxu0 %v17656_v58  ;;  %v17666_v56 = vld [vmem:[%s19909_s6 + $0x2480] ss:$16 sps:$4 sm:$0xff]  }
 0x294   : > { %v12703_v19 = vpop.f32.mrf.mxu1  ;;  %12997 = vmatprep.subr.bf16.mxu1 %v17659_v45  ;;  %v20802_v31 = vadd.f32 %v12701_v14, %v12661_v16  ;;  %v12663_v29 = vadd.f32 %v12662_v21, %v20713_v40  ;;  %12986 = vmatprep.mubr.bf16.mxu0 %v20783_v35  ;;  %v17668_v40 = vld [vmem:[%s19909_s6 + $0x2484] ss:$16 sps:$4 sm:$0xff]   ;;  %v17669_v58 = vld [vmem:[%s19909_s6 + $0x2680] ss:$16 sps:$4 sm:$0xff]  }
 0x295   : > { %13027 = vmatprep.mubr.bf16.mxu1 %v20795_v1  ;;  %v12664_v8 = vpop.f32.mrf.mxu0  ;;  %v17674_v45 = vld [vmem:[%s19909_s6 + $0x2464] ss:$16 sps:$4 sm:$0xff]   ;;  %v17678_v21 = vld [vmem:[%s19909_s6 + $0x2440] ss:$16 sps:$4 sm:$0xff]  }
 0x296   : > { %v12705_v38 = vpop.f32.mrf.mxu1  ;;  %v20809_v32 = vadd.f32 %v12703_v19, %v12663_v29  ;;  %12957 = vmatpush1.bf16.msra.mxu0 %v17654_v62  ;;  %v17677_v62 = vld [vmem:[%s19909_s6 + $0x2664] ss:$16 sps:$4 sm:$0xff]   ;;  %v17681_v19 = vld [vmem:[%s19909_s6 + $0x2640] ss:$16 sps:$4 sm:$0xff]  }
 0x297   : > { %12998 = vmatpush1.bf16.msra.mxu1 %v17657_v5  ;;  %v12665_v47 = vpop.f32.mrf.mxu0  ;;  %12958 = vmatprep.subr.bf16.mxu0 %v17662_v27  ;;  %v17672_v5 = vld [vmem:[%s19909_s6 + $0x2460] ss:$16 sps:$4 sm:$0xff]   ;;  %v17680_v14 = vld [vmem:[%s19909_s6 + $0x2444] ss:$16 sps:$4 sm:$0xff]  }
 0x298   : > { %v12706_v51 = vpop.f32.mrf.mxu1  ;;  %12999 = vmatprep.subr.bf16.mxu1 %v17665_v3  ;;  %v17683_v16 = vld [vmem:[%s19909_s6 + $0x2644] ss:$16 sps:$4 sm:$0xff]   ;;  %v17684_v29 = vld [vmem:[%s19909_s6 + $0x2420] ss:$16 sps:$4 sm:$0xff]  }
 0x299   : > { %v17686_v27 = vld [vmem:[%s19909_s6 + $0x2424] ss:$16 sps:$4 sm:$0xff]   ;;  %v17690_v38 = vld [vmem:[%s19909_s6 + $0x2400] ss:$16 sps:$4 sm:$0xff]  }
 0x29a   : > { %12959 = vmatpush1.bf16.msra.mxu0 %v17660_v36  ;;  %v17689_v3 = vld [vmem:[%s19909_s6 + $0x2624] ss:$16 sps:$4 sm:$0xff]   ;;  %v17687_v36 = vld [vmem:[%s19909_s6 + $0x2620] ss:$16 sps:$4 sm:$0xff]  }
 0x29b   : > { %13000 = vmatpush1.bf16.msra.mxu1 %v17663_v2  ;;  %12960 = vmatprep.subr.bf16.mxu0 %v17668_v40  ;;  %v17692_v2 = vld [vmem:[%s19909_s6 + $0x2404] ss:$16 sps:$4 sm:$0xff]   ;;  %v17693_v47 = vld [vmem:[%s19909_s6 + $0x2600] ss:$16 sps:$4 sm:$0xff]  }
 0x29c   : > { %13001 = vmatprep.subr.bf16.mxu1 %v17671_v46  ;;  %v17695_v8 = vld [vmem:[%s19909_s6 + $0x2604] ss:$16 sps:$4 sm:$0xff]   ;;  %v17696_v46 = vld [vmem:[%s19909_s6 + $0x25e0] ss:$16 sps:$4 sm:$0xff]  }
 0x29d   : > { %v17698_v51 = vld [vmem:[%s19909_s6 + $0x25e4] ss:$16 sps:$4 sm:$0xff]  }
 0x29e   : > { %12961 = vmatpush1.bf16.msra.mxu0 %v17666_v56  ;;  %v17701_v40 = vld [vmem:[%s19909_s6 + $0x27e4] ss:$16 sps:$4 sm:$0xff]   ;;  %v17699_v56 = vld [vmem:[%s19909_s6 + $0x27e0] ss:$16 sps:$4 sm:$0xff]  }
 0x29f   : > { %13002 = vmatpush1.bf16.msra.mxu1 %v17669_v58  ;;  %12962 = vmatprep.subr.bf16.mxu0 %v17674_v45  ;;  %v17704_v58 = vld [vmem:[%s19909_s6 + $0x25c4] ss:$16 sps:$4 sm:$0xff]  }
 0x2a0   : > { %13003 = vmatprep.subr.bf16.mxu1 %v17677_v62  ;;  %v17707_v45 = vld [vmem:[%s19909_s6 + $0x27c4] ss:$16 sps:$4 sm:$0xff]   ;;  %v17702_v62 = vld [vmem:[%s19909_s6 + $0x25c0] ss:$16 sps:$4 sm:$0xff]  }
 0x2a2   : > { %12963 = vmatpush1.bf16.msra.mxu0 %v17672_v5  ;;  %v17705_v5 = vld [vmem:[%s19909_s6 + $0x27c0] ss:$16 sps:$4 sm:$0xff]  }
 0x2a3   : > { %13004 = vmatpush1.bf16.msra.mxu1 %v17675_v10  ;;  %12964 = vmatprep.subr.bf16.mxu0 %v17680_v14  ;;  %v17710_v10 = vld [vmem:[%s19909_s6 + $0x25a4] ss:$16 sps:$4 sm:$0xff]  }
 0x2a4   : > { %13005 = vmatprep.subr.bf16.mxu1 %v17683_v16  ;;  %v17713_v14 = vld [vmem:[%s19909_s6 + $0x27a4] ss:$16 sps:$4 sm:$0xff]   ;;  %v17708_v16 = vld [vmem:[%s19909_s6 + $0x25a0] ss:$16 sps:$4 sm:$0xff]  }
 0x2a6   : > { %12965 = vmatpush1.bf16.msra.mxu0 %v17678_v21  ;;  %v17711_v21 = vld [vmem:[%s19909_s6 + $0x27a0] ss:$16 sps:$4 sm:$0xff]  }
 0x2a7   : > { %13006 = vmatpush1.bf16.msra.mxu1 %v17681_v19  ;;  %12966 = vmatprep.subr.bf16.mxu0 %v17686_v27  ;;  %v17716_v19 = vld [vmem:[%s19909_s6 + $0x2584] ss:$16 sps:$4 sm:$0xff]  }
 0x2a8   : > { %13007 = vmatprep.subr.bf16.mxu1 %v17689_v3  ;;  %v17719_v27 = vld [vmem:[%s19909_s6 + $0x2784] ss:$16 sps:$4 sm:$0xff]   ;;  %v17714_v3 = vld [vmem:[%s19909_s6 + $0x2580] ss:$16 sps:$4 sm:$0xff]  }
 0x2aa   : > { %12967 = vmatpush1.bf16.msra.mxu0 %v17684_v29  ;;  %v17717_v29 = vld [vmem:[%s19909_s6 + $0x2780] ss:$16 sps:$4 sm:$0xff]  }
 0x2ab   : > { %13008 = vmatpush1.bf16.msra.mxu1 %v17687_v36  ;;  %12968 = vmatprep.subr.bf16.mxu0 %v17692_v2  ;;  %v17722_v36 = vld [vmem:[%s19909_s6 + $0x2564] ss:$16 sps:$4 sm:$0xff]  }
 0x2ac   : > { %13009 = vmatprep.subr.bf16.mxu1 %v17695_v8  ;;  %v17725_v2 = vld [vmem:[%s19909_s6 + $0x2764] ss:$16 sps:$4 sm:$0xff]   ;;  %v17720_v8 = vld [vmem:[%s19909_s6 + $0x2560] ss:$16 sps:$4 sm:$0xff]  }
 0x2ae   : > { %12969 = vmatpush1.bf16.msra.mxu0 %v17690_v38  ;;  %v17723_v38 = vld [vmem:[%s19909_s6 + $0x2760] ss:$16 sps:$4 sm:$0xff]  }
 0x2af   : > { %13010 = vmatpush1.bf16.msra.mxu1 %v17693_v47  ;;  %12970 = vmatprep.subr.bf16.mxu0 %v17698_v51  ;;  %v17728_v47 = vld [vmem:[%s19909_s6 + $0x2544] ss:$16 sps:$4 sm:$0xff]  }
 0x2b0   : > { %13011 = vmatprep.subr.bf16.mxu1 %v17701_v40  ;;  %v17731_v51 = vld [vmem:[%s19909_s6 + $0x2744] ss:$16 sps:$4 sm:$0xff]   ;;  %v20856_v40 = vld [vmem:[%s22492_s0 + $0x28] sm:$0xff] }
 0x2b2   : > { %12971 = vmatpush2.bf16.msra.mxu0 %v17696_v46  ;;  %v17726_v46 = vld [vmem:[%s19909_s6 + $0x2540] ss:$16 sps:$4 sm:$0xff]  }
 0x2b3   : > { %13012 = vmatpush2.bf16.msra.mxu1 %v17699_v56  ;;  %12972 = vmatprep.subr.bf16.mxu0 %v17704_v58  ;;  %v17729_v56 = vld [vmem:[%s19909_s6 + $0x2740] ss:$16 sps:$4 sm:$0xff]   ;;  %v17734_v58 = vld [vmem:[%s19909_s6 + $0x2524] ss:$16 sps:$4 sm:$0xff]  }
 0x2b4   : > { %13013 = vmatprep.subr.bf16.mxu1 %v17707_v45  ;;  %v17737_v45 = vld [vmem:[%s19909_s6 + $0x2724] ss:$16 sps:$4 sm:$0xff]  }
 0x2b6   : > { %12973 = vmatpush2.bf16.msra.mxu0 %v17702_v62  ;;  %v20864_v62 = vrot.slane %v20856_v40, %v19968_v49 }
 0x2b7   : > { %13014 = vmatpush2.bf16.msra.mxu1 %v17705_v5  ;;  %12974 = vmatprep.subr.bf16.mxu0 %v17710_v10  ;;  %v17732_v5 = vld [vmem:[%s19909_s6 + $0x2520] ss:$16 sps:$4 sm:$0xff]  }
 0x2b8   : > { %13015 = vmatprep.subr.bf16.mxu1 %v17713_v14  ;;  %v17735_v10 = vld [vmem:[%s19909_s6 + $0x2720] ss:$16 sps:$4 sm:$0xff]   ;;  %v17740_v14 = vld [vmem:[%s19909_s6 + $0x2504] ss:$16 sps:$4 sm:$0xff]  }
 0x2ba   : > { %12975 = vmatpush2.bf16.msra.mxu0 %v17708_v16  ;;  %v17743_v16 = vld [vmem:[%s19909_s6 + $0x2704] ss:$16 sps:$4 sm:$0xff]  }
 0x2bb   : > { %13016 = vmatpush2.bf16.msra.mxu1 %v17711_v21  ;;  %12976 = vmatprep.subr.bf16.mxu0 %v17716_v19  ;;  %v2449_v21 = vcombine.high %v20864_v62, %v20864_v62  ;;  %v20874_v19 = vrot.slane %v20764_v57, %v19968_v49 }
 0x2bc   : > { %13017 = vmatprep.subr.bf16.mxu1 %v17719_v27  ;;  %v17738_v27 = vld [vmem:[%s19909_s6 + $0x2500] ss:$16 sps:$4 sm:$0xff]  }
 0x2bd   : > { %22519 = vst [vmem:[#allocation8_spill] sm:$0xff] %v20874_v19  ;;  %v20887_v57 = vcombine.high %v20874_v19, %v20874_v19 }
 0x2be   : > { %12977 = vmatpush2.bf16.msra.mxu0 %v17714_v3  ;;  %v17741_v3 = vld [vmem:[%s19909_s6 + $0x2700] ss:$16 sps:$4 sm:$0xff]  }
 0x2bf   : > { %13018 = vmatpush2.bf16.msra.mxu1 %v17717_v29  ;;  %12978 = vmatprep.subr.bf16.mxu0 %v17722_v36  ;;  %v17747_v29 = vld [vmem:[%s19909_s6 + $0x28e4] ss:$16 sps:$4 sm:$0xff]   ;;  %22521 = vst [vmem:[#allocation10_spill] sm:$0xff] %v20887_v57 }
 0x2c0   : > { %13019 = vmatprep.subr.bf16.mxu1 %v17725_v2  ;;  %v17750_v36 = vld [vmem:[%s19909_s6 + $0x2ae4] ss:$16 sps:$4 sm:$0xff]   ;;  %v17745_v2 = vld [vmem:[%s19909_s6 + $0x28e0] ss:$16 sps:$4 sm:$0xff]  }
 0x2c2   : > { %12979 = vmatpush2.bf16.msra.mxu0 %v17720_v8  ;;  %v17748_v8 = vld [vmem:[%s19909_s6 + $0x2ae0] ss:$16 sps:$4 sm:$0xff]  }
 0x2c3   : > { %13020 = vmatpush2.bf16.msra.mxu1 %v17723_v38  ;;  %12980 = vmatprep.subr.bf16.mxu0 %v17728_v47  ;;  %v20883_v38 = vrot.slane %v2449_v21, %v19968_v49  ;;  %v17753_v47 = vld [vmem:[%s19909_s6 + $0x28c4] ss:$16 sps:$4 sm:$0xff]  }
 0x2c4   : > { %13021 = vmatprep.subr.bf16.mxu1 %v17731_v51  ;;  %v17756_v51 = vld [vmem:[%s19909_s6 + $0x2ac4] ss:$16 sps:$4 sm:$0xff]  }
 0x2c5   : > { %22520 = vst [vmem:[#allocation9_spill] sm:$0xff] %v20883_v38  ;;  %v17759_v21 = vld [vmem:[%s19909_s6 + $0x28a4] ss:$16 sps:$4 sm:$0xff]  }
 0x2c6   : > { %12981 = vmatpush2.bf16.msra.mxu0 %v17726_v46  ;;  %v17751_v46 = vld [vmem:[%s19909_s6 + $0x28c0] ss:$16 sps:$4 sm:$0xff]  }
 0x2c7   : > { %13022 = vmatpush2.bf16.msra.mxu1 %v17729_v56  ;;  %12982 = vmatprep.subr.bf16.mxu0 %v17734_v58  ;;  %v17754_v56 = vld [vmem:[%s19909_s6 + $0x2ac0] ss:$16 sps:$4 sm:$0xff]   ;;  %v20895_v58 = vcombine.high %v20883_v38, %v20883_v38 }
 0x2c8   : > { %13023 = vmatprep.subr.bf16.mxu1 %v17737_v45 }
 0x2c9   : > { %22522 = vst [vmem:[#allocation11_spill] sm:$0xff] %v20895_v58 }
 0x2ca   : > { %12983 = vmatpush2.bf16.msra.mxu0 %v17732_v5 }
 0x2cb   : > { %13024 = vmatpush2.bf16.msra.mxu1 %v17735_v10  ;;  %12984 = vmatprep.subr.bf16.mxu0 %v17740_v14 }
 0x2cc   : > { %13025 = vmatprep.subr.bf16.mxu1 %v17743_v16 }
 0x2ce   : > { %12985 = vmatpush2.bf16.msra.mxu0 %v17738_v27  ;;  %v17762_v27 = vld [vmem:[%s19909_s6 + $0x2aa4] ss:$16 sps:$4 sm:$0xff]  }
 0x2cf   : > { %13026 = vmatpush2.bf16.msra.mxu1 %v17741_v3  ;;  %13036 = vmatprep.subr.bf16.mxu0 %v17747_v29 }
 0x2d0   : > { %13077 = vmatprep.subr.bf16.mxu1 %v17750_v36  ;;  %v17757_v36 = vld [vmem:[%s19909_s6 + $0x28a0] ss:$16 sps:$4 sm:$0xff]  }
 0x2d1   : > { %v12742_v45 = vpop.f32.mrf.mxu0  ;;  %12987 = vmatmul.mubr.bf16.vlgmr.msra.gmra.mxu0 %v20874_v19  ;;  %v17760_v19 = vld [vmem:[%s19909_s6 + $0x2aa0] ss:$16 sps:$4 sm:$0xff]  }
 0x2d2   : > { %v12783_v5 = vpop.f32.mrf.mxu1  ;;  %13028 = vmatmul.mubr.bf16.vlgmr.msra.gmra.mxu1 %v20887_v57  ;;  %v12743_v10 = vadd.f32 %v12742_v45, %v20802_v31  ;;  %13037 = vmatpush1.bf16.msra.mxu0 %v17745_v2  ;;  %v17768_v45 = vld [vmem:[%s19909_s6 + $0x2a84] ss:$16 sps:$4 sm:$0xff]   ;;  %v17950_v57 = vld [vmem:[%s19909_s6 + $0x30a0] ss:$16 sps:$4 sm:$0xff]  }
 0x2d3   : > { %13078 = vmatpush1.bf16.msra.mxu1 %v17748_v8  ;;  %v12744_v14 = vpop.f32.mrf.mxu0  ;;  %13038 = vmatprep.subr.bf16.mxu0 %v17753_v47 }
 0x2d4   : > { %v12785_v16 = vpop.f32.mrf.mxu1  ;;  %13079 = vmatprep.subr.bf16.mxu1 %v17756_v51  ;;  %v20902_v3 = vadd.f32 %v12783_v5, %v12743_v10  ;;  %v12745_v29 = vadd.f32 %v12744_v14, %v20809_v32  ;;  %13068 = vmatprep.mubr.bf16.mxu0 %v20883_v38  ;;  %v17765_v32 = vld [vmem:[%s19909_s6 + $0x2884] ss:$16 sps:$4 sm:$0xff]   ;;  %v17763_v5 = vld [vmem:[%s19909_s6 + $0x2880] ss:$16 sps:$4 sm:$0xff]  }
 0x2d5   : > { %13109 = vmatprep.mubr.bf16.mxu1 %v20895_v58  ;;  %v12746_v31 = vpop.f32.mrf.mxu0  ;;  %v17766_v10 = vld [vmem:[%s19909_s6 + $0x2a80] ss:$16 sps:$4 sm:$0xff]  }
 0x2d6   : > { %v12787_v2 = vpop.f32.mrf.mxu1  ;;  %v20909_v8 = vadd.f32 %v12785_v16, %v12745_v29  ;;  %13039 = vmatpush1.bf16.msra.mxu0 %v17751_v46  ;;  %v17771_v46 = vld [vmem:[%s19909_s6 + $0x2864] ss:$16 sps:$4 sm:$0xff]   ;;  %v17769_v14 = vld [vmem:[%s19909_s6 + $0x2860] ss:$16 sps:$4 sm:$0xff]  }
 0x2d7   : > { %13080 = vmatpush1.bf16.msra.mxu1 %v17754_v56  ;;  %v12747_v47 = vpop.f32.mrf.mxu0  ;;  %13040 = vmatprep.subr.bf16.mxu0 %v17759_v21  ;;  %v17774_v56 = vld [vmem:[%s19909_s6 + $0x2a64] ss:$16 sps:$4 sm:$0xff]   ;;  %v17772_v16 = vld [vmem:[%s19909_s6 + $0x2a60] ss:$16 sps:$4 sm:$0xff]  }
 0x2d8   : > { %v12788_v51 = vpop.f32.mrf.mxu1  ;;  %13081 = vmatprep.subr.bf16.mxu1 %v17762_v27  ;;  %v17777_v21 = vld [vmem:[%s19909_s6 + $0x2844] ss:$16 sps:$4 sm:$0xff]   ;;  %v17775_v27 = vld [vmem:[%s19909_s6 + $0x2840] ss:$16 sps:$4 sm:$0xff]  }
 0x2d9   : > { %v17778_v29 = vld [vmem:[%s19909_s6 + $0x2a40] ss:$16 sps:$4 sm:$0xff]   ;;  %v17786_v31 = vld [vmem:[%s19909_s6 + $0x2a24] ss:$16 sps:$4 sm:$0xff]  }
 0x2da   : > { %13041 = vmatpush1.bf16.msra.mxu0 %v17757_v36  ;;  %v17783_v36 = vld [vmem:[%s19909_s6 + $0x2824] ss:$16 sps:$4 sm:$0xff]   ;;  %v17781_v2 = vld [vmem:[%s19909_s6 + $0x2820] ss:$16 sps:$4 sm:$0xff]  }
 0x2db   : > { %13082 = vmatpush1.bf16.msra.mxu1 %v17760_v19  ;;  %13042 = vmatprep.subr.bf16.mxu0 %v17765_v32  ;;  %v17780_v19 = vld [vmem:[%s19909_s6 + $0x2a44] ss:$16 sps:$4 sm:$0xff]   ;;  %v17784_v47 = vld [vmem:[%s19909_s6 + $0x2a20] ss:$16 sps:$4 sm:$0xff]  }
 0x2dc   : > { %13083 = vmatprep.subr.bf16.mxu1 %v17768_v45  ;;  %v17789_v51 = vld [vmem:[%s19909_s6 + $0x2804] ss:$16 sps:$4 sm:$0xff]   ;;  %v17787_v45 = vld [vmem:[%s19909_s6 + $0x2800] ss:$16 sps:$4 sm:$0xff]  }
 0x2dd   : > { %v17792_v32 = vld [vmem:[%s19909_s6 + $0x2a04] ss:$16 sps:$4 sm:$0xff]   ;;  %v17853_v38 = vld [vmem:[%s19909_s6 + $0x2ca0] ss:$16 sps:$4 sm:$0xff]  }
 0x2de   : > { %13043 = vmatpush1.bf16.msra.mxu0 %v17763_v5  ;;  %v17790_v5 = vld [vmem:[%s19909_s6 + $0x2a00] ss:$16 sps:$4 sm:$0xff]  }
 0x2df   : > { %13084 = vmatpush1.bf16.msra.mxu1 %v17766_v10  ;;  %13044 = vmatprep.subr.bf16.mxu0 %v17771_v46  ;;  %v17795_v10 = vld [vmem:[%s19909_s6 + $0x29e4] ss:$16 sps:$4 sm:$0xff]  }
 0x2e0   : > { %13085 = vmatprep.subr.bf16.mxu1 %v17774_v56  ;;  %v17798_v46 = vld [vmem:[%s19909_s6 + $0x2be4] ss:$16 sps:$4 sm:$0xff]   ;;  %v17793_v56 = vld [vmem:[%s19909_s6 + $0x29e0] ss:$16 sps:$4 sm:$0xff]  }
 0x2e2   : > { %13045 = vmatpush1.bf16.msra.mxu0 %v17769_v14  ;;  %v17796_v14 = vld [vmem:[%s19909_s6 + $0x2be0] ss:$16 sps:$4 sm:$0xff]  }
 0x2e3   : > { %13086 = vmatpush1.bf16.msra.mxu1 %v17772_v16  ;;  %13046 = vmatprep.subr.bf16.mxu0 %v17777_v21  ;;  %v17801_v16 = vld [vmem:[%s19909_s6 + $0x29c4] ss:$16 sps:$4 sm:$0xff]  }
 0x2e4   : > { %13087 = vmatprep.subr.bf16.mxu1 %v17780_v19  ;;  %v17804_v21 = vld [vmem:[%s19909_s6 + $0x2bc4] ss:$16 sps:$4 sm:$0xff]   ;;  %v17799_v19 = vld [vmem:[%s19909_s6 + $0x29c0] ss:$16 sps:$4 sm:$0xff]  }
 0x2e6   : > { %13047 = vmatpush1.bf16.msra.mxu0 %v17775_v27  ;;  %v17802_v27 = vld [vmem:[%s19909_s6 + $0x2bc0] ss:$16 sps:$4 sm:$0xff]  }
 0x2e7   : > { %13088 = vmatpush1.bf16.msra.mxu1 %v17778_v29  ;;  %13048 = vmatprep.subr.bf16.mxu0 %v17783_v36  ;;  %v17807_v29 = vld [vmem:[%s19909_s6 + $0x29a4] ss:$16 sps:$4 sm:$0xff]  }
 0x2e8   : > { %13089 = vmatprep.subr.bf16.mxu1 %v17786_v31  ;;  %v17810_v36 = vld [vmem:[%s19909_s6 + $0x2ba4] ss:$16 sps:$4 sm:$0xff]   ;;  %v17805_v31 = vld [vmem:[%s19909_s6 + $0x29a0] ss:$16 sps:$4 sm:$0xff]  }
 0x2ea   : > { %13049 = vmatpush1.bf16.msra.mxu0 %v17781_v2  ;;  %v17808_v2 = vld [vmem:[%s19909_s6 + $0x2ba0] ss:$16 sps:$4 sm:$0xff]  }
 0x2eb   : > { %13090 = vmatpush1.bf16.msra.mxu1 %v17784_v47  ;;  %13050 = vmatprep.subr.bf16.mxu0 %v17789_v51  ;;  %v17813_v47 = vld [vmem:[%s19909_s6 + $0x2984] ss:$16 sps:$4 sm:$0xff]  }
 0x2ec   : > { %13091 = vmatprep.subr.bf16.mxu1 %v17792_v32  ;;  %v17816_v51 = vld [vmem:[%s19909_s6 + $0x2b84] ss:$16 sps:$4 sm:$0xff]   ;;  %v17811_v32 = vld [vmem:[%s19909_s6 + $0x2980] ss:$16 sps:$4 sm:$0xff]  }
 0x2ee   : > { %13051 = vmatpush1.bf16.msra.mxu0 %v17787_v45  ;;  %v17814_v45 = vld [vmem:[%s19909_s6 + $0x2b80] ss:$16 sps:$4 sm:$0xff]  }
 0x2ef   : > { %13092 = vmatpush1.bf16.msra.mxu1 %v17790_v5  ;;  %13052 = vmatprep.subr.bf16.mxu0 %v17795_v10  ;;  %v17819_v5 = vld [vmem:[%s19909_s6 + $0x2964] ss:$16 sps:$4 sm:$0xff]  }
 0x2f0   : > { %13093 = vmatprep.subr.bf16.mxu1 %v17798_v46  ;;  %v17822_v10 = vld [vmem:[%s19909_s6 + $0x2b64] ss:$16 sps:$4 sm:$0xff]   ;;  %v17817_v46 = vld [vmem:[%s19909_s6 + $0x2960] ss:$16 sps:$4 sm:$0xff]  }
 0x2f2   : > { %13053 = vmatpush2.bf16.msra.mxu0 %v17793_v56  ;;  %v17820_v56 = vld [vmem:[%s19909_s6 + $0x2b60] ss:$16 sps:$4 sm:$0xff]  }
 0x2f3   : > { %13094 = vmatpush2.bf16.msra.mxu1 %v17796_v14  ;;  %13054 = vmatprep.subr.bf16.mxu0 %v17801_v16  ;;  %v17825_v14 = vld [vmem:[%s19909_s6 + $0x2944] ss:$16 sps:$4 sm:$0xff]  }
 0x2f4   : > { %13095 = vmatprep.subr.bf16.mxu1 %v17804_v21  ;;  %v17828_v16 = vld [vmem:[%s19909_s6 + $0x2b44] ss:$16 sps:$4 sm:$0xff]   ;;  %v2434_v21 = vcombine.high %v20856_v40, %v20856_v40  ;;  %v17829_v40 = vld [vmem:[%s19909_s6 + $0x2920] ss:$16 sps:$4 sm:$0xff]  }
 0x2f6   : > { %13055 = vmatpush2.bf16.msra.mxu0 %v17799_v19  ;;  %v17823_v19 = vld [vmem:[%s19909_s6 + $0x2940] ss:$16 sps:$4 sm:$0xff]  }
 0x2f7   : > { %13096 = vmatpush2.bf16.msra.mxu1 %v17802_v27  ;;  %13056 = vmatprep.subr.bf16.mxu0 %v17807_v29  ;;  %v17826_v27 = vld [vmem:[%s19909_s6 + $0x2b40] ss:$16 sps:$4 sm:$0xff]   ;;  %v17831_v29 = vld [vmem:[%s19909_s6 + $0x2924] ss:$16 sps:$4 sm:$0xff]  }
 0x2f8   : > { %13097 = vmatprep.subr.bf16.mxu1 %v17810_v36  ;;  %v17834_v36 = vld [vmem:[%s19909_s6 + $0x2b24] ss:$16 sps:$4 sm:$0xff]  }
 0x2fa   : > { %13057 = vmatpush2.bf16.msra.mxu0 %v17805_v31  ;;  %v20960_v31 = vrot.slane %v2434_v21, %v19968_v49 }
 0x2fb   : > { %13098 = vmatpush2.bf16.msra.mxu1 %v17808_v2  ;;  %13058 = vmatprep.subr.bf16.mxu0 %v17813_v47  ;;  %v17832_v2 = vld [vmem:[%s19909_s6 + $0x2b20] ss:$16 sps:$4 sm:$0xff]   ;;  %v17837_v47 = vld [vmem:[%s19909_s6 + $0x2904] ss:$16 sps:$4 sm:$0xff]  }
 0x2fc   : > { %13099 = vmatprep.subr.bf16.mxu1 %v17816_v51  ;;  %v17840_v51 = vld [vmem:[%s19909_s6 + $0x2b04] ss:$16 sps:$4 sm:$0xff]  }
 0x2fe   : > { %13059 = vmatpush2.bf16.msra.mxu0 %v17811_v32  ;;  %v2450_v32 = vcombine.high %v20960_v31, %v20960_v31 }
 0x2ff   : > { %13100 = vmatpush2.bf16.msra.mxu1 %v17814_v45  ;;  %13060 = vmatprep.subr.bf16.mxu0 %v17819_v5  ;;  %v20970_v45 = vrot.slane %v20864_v62, %v19968_v49  ;;  %v17835_v5 = vld [vmem:[%s19909_s6 + $0x2900] ss:$16 sps:$4 sm:$0xff]  }
 0x300   : > { %13101 = vmatprep.subr.bf16.mxu1 %v17822_v10  ;;  %v17838_v10 = vld [vmem:[%s19909_s6 + $0x2b00] ss:$16 sps:$4 sm:$0xff]   ;;  %v20979_v21 = vrot.slane %v2450_v32, %v19968_v49 }
 0x301   : > { %22523 = vst [vmem:[#allocation12_spill] sm:$0xff] %v20970_v45  ;;  %v20983_v62 = vcombine.high %v20970_v45, %v20970_v45 }
 0x302   : > { %13061 = vmatpush2.bf16.msra.mxu0 %v17817_v46  ;;  %v17843_v46 = vld [vmem:[%s19909_s6 + $0x2ce4] ss:$16 sps:$4 sm:$0xff]   ;;  %22524 = vst [vmem:[#allocation13_spill] sm:$0xff] %v20979_v21 }
 0x303   : > { %13102 = vmatpush2.bf16.msra.mxu1 %v17820_v56  ;;  %13062 = vmatprep.subr.bf16.mxu0 %v17825_v14  ;;  %v17846_v56 = vld [vmem:[%s19909_s6 + $0x2ee4] ss:$16 sps:$4 sm:$0xff]   ;;  %v17841_v14 = vld [vmem:[%s19909_s6 + $0x2ce0] ss:$16 sps:$4 sm:$0xff]   ;;  %22525 = vst [vmem:[#allocation14_spill] sm:$0xff] %v20983_v62 }
 0x304   : > { %13103 = vmatprep.subr.bf16.mxu1 %v17828_v16  ;;  %v17844_v16 = vld [vmem:[%s19909_s6 + $0x2ee0] ss:$16 sps:$4 sm:$0xff]  }
 0x306   : > { %13063 = vmatpush2.bf16.msra.mxu0 %v17823_v19  ;;  %v17849_v19 = vld [vmem:[%s19909_s6 + $0x2cc4] ss:$16 sps:$4 sm:$0xff]  }
 0x307   : > { %13104 = vmatpush2.bf16.msra.mxu1 %v17826_v27  ;;  %13064 = vmatprep.subr.bf16.mxu0 %v17831_v29  ;;  %v17852_v27 = vld [vmem:[%s19909_s6 + $0x2ec4] ss:$16 sps:$4 sm:$0xff]   ;;  %v17847_v29 = vld [vmem:[%s19909_s6 + $0x2cc0] ss:$16 sps:$4 sm:$0xff]  }
 0x308   : > { %13105 = vmatprep.subr.bf16.mxu1 %v17834_v36  ;;  %v17850_v36 = vld [vmem:[%s19909_s6 + $0x2ec0] ss:$16 sps:$4 sm:$0xff]  }
 0x30a   : > { %13065 = vmatpush2.bf16.msra.mxu0 %v17829_v40  ;;  %v20991_v40 = vcombine.high %v20979_v21, %v20979_v21 }
 0x30b   : > { %13106 = vmatpush2.bf16.msra.mxu1 %v17832_v2  ;;  %13066 = vmatprep.subr.bf16.mxu0 %v17837_v47 }
 0x30c   : > { %13107 = vmatprep.subr.bf16.mxu1 %v17840_v51  ;;  %22526 = vst [vmem:[#allocation15_spill] sm:$0xff] %v20991_v40 }
 0x30e   : > { %13067 = vmatpush2.bf16.msra.mxu0 %v17835_v5 }
 0x30f   : > { %13108 = vmatpush2.bf16.msra.mxu1 %v17838_v10  ;;  %13118 = vmatprep.subr.bf16.mxu0 %v17843_v46  ;;  %v17855_v10 = vld [vmem:[%s19909_s6 + $0x2ca4] ss:$16 sps:$4 sm:$0xff]  }
 0x310   : > { %13159 = vmatprep.subr.bf16.mxu1 %v17846_v56  ;;  %v17858_v46 = vld [vmem:[%s19909_s6 + $0x2ea4] ss:$16 sps:$4 sm:$0xff]  }
 0x311   : > { %v12824_v2 = vpop.f32.mrf.mxu0  ;;  %13069 = vmatmul.mubr.bf16.vlgmr.msra.gmra.mxu0 %v20970_v45  ;;  %v17856_v45 = vld [vmem:[%s19909_s6 + $0x2ea0] ss:$16 sps:$4 sm:$0xff]  }
 0x312   : > { %v12865_v47 = vpop.f32.mrf.mxu1  ;;  %13110 = vmatmul.mubr.bf16.vlgmr.msra.gmra.mxu1 %v20983_v62  ;;  %v12825_v51 = vadd.f32 %v12824_v2, %v20902_v3  ;;  %13119 = vmatpush1.bf16.msra.mxu0 %v17841_v14  ;;  %v17864_v2 = vld [vmem:[%s19909_s6 + $0x2e84] ss:$16 sps:$4 sm:$0xff]  }
 0x313   : > { %13160 = vmatpush1.bf16.msra.mxu1 %v17844_v16  ;;  %v12826_v32 = vpop.f32.mrf.mxu0  ;;  %13120 = vmatprep.subr.bf16.mxu0 %v17849_v19 }
 0x314   : > { %v12867_v5 = vpop.f32.mrf.mxu1  ;;  %13161 = vmatprep.subr.bf16.mxu1 %v17852_v27  ;;  %v20998_v56 = vadd.f32 %v12865_v47, %v12825_v51  ;;  %v12827_v58 = vadd.f32 %v12826_v32, %v20909_v8  ;;  %13150 = vmatprep.mubr.bf16.mxu0 %v20979_v21  ;;  %v17861_v8 = vld [vmem:[%s19909_s6 + $0x2c84] ss:$16 sps:$4 sm:$0xff]   ;;  %v17859_v47 = vld [vmem:[%s19909_s6 + $0x2c80] ss:$16 sps:$4 sm:$0xff]  }
 0x315   : > { %13191 = vmatprep.mubr.bf16.mxu1 %v20991_v40  ;;  %v12828_v3 = vpop.f32.mrf.mxu0  ;;  %v17862_v51 = vld [vmem:[%s19909_s6 + $0x2e80] ss:$16 sps:$4 sm:$0xff]   ;;  %v17955_v40 = vld [vmem:[%s19909_s6 + $0x32a4] ss:$16 sps:$4 sm:$0xff]  }
 0x316   : > { %v12869_v14 = vpop.f32.mrf.mxu1  ;;  %v21005_v16 = vadd.f32 %v12867_v5, %v12827_v58  ;;  %13121 = vmatpush1.bf16.msra.mxu0 %v17847_v29  ;;  %v17867_v58 = vld [vmem:[%s19909_s6 + $0x2c64] ss:$16 sps:$4 sm:$0xff]   ;;  %v17868_v32 = vld [vmem:[%s19909_s6 + $0x2e60] ss:$16 sps:$4 sm:$0xff]  }
 0x317   : > { %13162 = vmatpush1.bf16.msra.mxu1 %v17850_v36  ;;  %v12829_v19 = vpop.f32.mrf.mxu0  ;;  %13122 = vmatprep.subr.bf16.mxu0 %v17855_v10  ;;  %v17870_v29 = vld [vmem:[%s19909_s6 + $0x2e64] ss:$16 sps:$4 sm:$0xff]   ;;  %v17865_v36 = vld [vmem:[%s19909_s6 + $0x2c60] ss:$16 sps:$4 sm:$0xff]  }
 0x318   : > { %v12870_v27 = vpop.f32.mrf.mxu1  ;;  %13163 = vmatprep.subr.bf16.mxu1 %v17858_v46  ;;  %v17871_v5 = vld [vmem:[%s19909_s6 + $0x2c40] ss:$16 sps:$4 sm:$0xff]   ;;  %v17879_v46 = vld [vmem:[%s19909_s6 + $0x2c24] ss:$16 sps:$4 sm:$0xff]  }
 0x319   : > { %v17874_v10 = vld [vmem:[%s19909_s6 + $0x2e40] ss:$16 sps:$4 sm:$0xff]   ;;  %v17882_v3 = vld [vmem:[%s19909_s6 + $0x2e24] ss:$16 sps:$4 sm:$0xff]  }
 0x31a   : > { %13123 = vmatpush1.bf16.msra.mxu0 %v17853_v38  ;;  %v17873_v38 = vld [vmem:[%s19909_s6 + $0x2c44] ss:$16 sps:$4 sm:$0xff]   ;;  %v17877_v14 = vld [vmem:[%s19909_s6 + $0x2c20] ss:$16 sps:$4 sm:$0xff]  }
 0x31b   : > { %13164 = vmatpush1.bf16.msra.mxu1 %v17856_v45  ;;  %13124 = vmatprep.subr.bf16.mxu0 %v17861_v8  ;;  %v17876_v45 = vld [vmem:[%s19909_s6 + $0x2e44] ss:$16 sps:$4 sm:$0xff]   ;;  %v17880_v19 = vld [vmem:[%s19909_s6 + $0x2e20] ss:$16 sps:$4 sm:$0xff]  }
 0x31c   : > { %13165 = vmatprep.subr.bf16.mxu1 %v17864_v2  ;;  %v17885_v27 = vld [vmem:[%s19909_s6 + $0x2c04] ss:$16 sps:$4 sm:$0xff]   ;;  %v17883_v2 = vld [vmem:[%s19909_s6 + $0x2c00] ss:$16 sps:$4 sm:$0xff]  }
 0x31d   : > { %v17888_v8 = vld [vmem:[%s19909_s6 + $0x2e04] ss:$16 sps:$4 sm:$0xff]  }
 0x31e   : > { %13125 = vmatpush1.bf16.msra.mxu0 %v17859_v47  ;;  %v17886_v47 = vld [vmem:[%s19909_s6 + $0x2e00] ss:$16 sps:$4 sm:$0xff]  }
 0x31f   : > { %13166 = vmatpush1.bf16.msra.mxu1 %v17862_v51  ;;  %13126 = vmatprep.subr.bf16.mxu0 %v17867_v58  ;;  %v17891_v51 = vld [vmem:[%s19909_s6 + $0x2de4] ss:$16 sps:$4 sm:$0xff]  }
 0x320   : > { %13167 = vmatprep.subr.bf16.mxu1 %v17870_v29  ;;  %v17894_v58 = vld [vmem:[%s19909_s6 + $0x2fe4] ss:$16 sps:$4 sm:$0xff]   ;;  %v17889_v29 = vld [vmem:[%s19909_s6 + $0x2de0] ss:$16 sps:$4 sm:$0xff]  }
 0x322   : > { %13127 = vmatpush1.bf16.msra.mxu0 %v17865_v36  ;;  %v17892_v36 = vld [vmem:[%s19909_s6 + $0x2fe0] ss:$16 sps:$4 sm:$0xff]  }
 0x323   : > { %13168 = vmatpush1.bf16.msra.mxu1 %v17868_v32  ;;  %13128 = vmatprep.subr.bf16.mxu0 %v17873_v38  ;;  %v17897_v32 = vld [vmem:[%s19909_s6 + $0x2dc4] ss:$16 sps:$4 sm:$0xff]  }
 0x324   : > { %13169 = vmatprep.subr.bf16.mxu1 %v17876_v45  ;;  %v17900_v38 = vld [vmem:[%s19909_s6 + $0x2fc4] ss:$16 sps:$4 sm:$0xff]   ;;  %v17895_v45 = vld [vmem:[%s19909_s6 + $0x2dc0] ss:$16 sps:$4 sm:$0xff]  }
 0x326   : > { %13129 = vmatpush1.bf16.msra.mxu0 %v17871_v5  ;;  %v17898_v5 = vld [vmem:[%s19909_s6 + $0x2fc0] ss:$16 sps:$4 sm:$0xff]  }
 0x327   : > { %13170 = vmatpush1.bf16.msra.mxu1 %v17874_v10  ;;  %13130 = vmatprep.subr.bf16.mxu0 %v17879_v46  ;;  %v17903_v10 = vld [vmem:[%s19909_s6 + $0x2da4] ss:$16 sps:$4 sm:$0xff]  }
 0x328   : > { %13171 = vmatprep.subr.bf16.mxu1 %v17882_v3  ;;  %v17906_v46 = vld [vmem:[%s19909_s6 + $0x2fa4] ss:$16 sps:$4 sm:$0xff]   ;;  %v17901_v3 = vld [vmem:[%s19909_s6 + $0x2da0] ss:$16 sps:$4 sm:$0xff]  }
 0x32a   : > { %13131 = vmatpush1.bf16.msra.mxu0 %v17877_v14  ;;  %v17904_v14 = vld [vmem:[%s19909_s6 + $0x2fa0] ss:$16 sps:$4 sm:$0xff]  }
 0x32b   : > { %13172 = vmatpush1.bf16.msra.mxu1 %v17880_v19  ;;  %13132 = vmatprep.subr.bf16.mxu0 %v17885_v27  ;;  %v17909_v19 = vld [vmem:[%s19909_s6 + $0x2d84] ss:$16 sps:$4 sm:$0xff]  }
 0x32c   : > { %13173 = vmatprep.subr.bf16.mxu1 %v17888_v8  ;;  %v17912_v27 = vld [vmem:[%s19909_s6 + $0x2f84] ss:$16 sps:$4 sm:$0xff]   ;;  %v17907_v8 = vld [vmem:[%s19909_s6 + $0x2d80] ss:$16 sps:$4 sm:$0xff]  }
 0x32e   : > { %13133 = vmatpush1.bf16.msra.mxu0 %v17883_v2  ;;  %v17910_v2 = vld [vmem:[%s19909_s6 + $0x2f80] ss:$16 sps:$4 sm:$0xff]  }
 0x32f   : > { %13174 = vmatpush1.bf16.msra.mxu1 %v17886_v47  ;;  %13134 = vmatprep.subr.bf16.mxu0 %v17891_v51  ;;  %v17915_v47 = vld [vmem:[%s19909_s6 + $0x2d64] ss:$16 sps:$4 sm:$0xff]  }
 0x330   : > { %13175 = vmatprep.subr.bf16.mxu1 %v17894_v58  ;;  %v17918_v51 = vld [vmem:[%s19909_s6 + $0x2f64] ss:$16 sps:$4 sm:$0xff]   ;;  %v17913_v58 = vld [vmem:[%s19909_s6 + $0x2d60] ss:$16 sps:$4 sm:$0xff]  }
 0x332   : > { %13135 = vmatpush2.bf16.msra.mxu0 %v17889_v29  ;;  %v17916_v29 = vld [vmem:[%s19909_s6 + $0x2f60] ss:$16 sps:$4 sm:$0xff]  }
 0x333   : > { %13176 = vmatpush2.bf16.msra.mxu1 %v17892_v36  ;;  %13136 = vmatprep.subr.bf16.mxu0 %v17897_v32  ;;  %v17921_v36 = vld [vmem:[%s19909_s6 + $0x2d44] ss:$16 sps:$4 sm:$0xff]  }
 0x334   : > { %13177 = vmatprep.subr.bf16.mxu1 %v17900_v38  ;;  %v17924_v32 = vld [vmem:[%s19909_s6 + $0x2f44] ss:$16 sps:$4 sm:$0xff]  }
 0x335   : > { %v21052_v38 = vld [vmem:[%s22492_s0 + $0x30] sm:$0xff] }
 0x336   : > { %13137 = vmatpush2.bf16.msra.mxu0 %v17895_v45  ;;  %v17919_v45 = vld [vmem:[%s19909_s6 + $0x2d40] ss:$16 sps:$4 sm:$0xff]  }
 0x337   : > { %13178 = vmatpush2.bf16.msra.mxu1 %v17898_v5  ;;  %13138 = vmatprep.subr.bf16.mxu0 %v17903_v10  ;;  %v17922_v5 = vld [vmem:[%s19909_s6 + $0x2f40] ss:$16 sps:$4 sm:$0xff]   ;;  %v17927_v10 = vld [vmem:[%s19909_s6 + $0x2d24] ss:$16 sps:$4 sm:$0xff]  }
 0x338   : > { %13179 = vmatprep.subr.bf16.mxu1 %v17906_v46  ;;  %v17930_v46 = vld [vmem:[%s19909_s6 + $0x2f24] ss:$16 sps:$4 sm:$0xff]  }
 0x33a   : > { %13139 = vmatpush2.bf16.msra.mxu0 %v17901_v3  ;;  %v21060_v3 = vrot.slane %v21052_v38, %v19968_v49 }
 0x33b   : > { %13180 = vmatpush2.bf16.msra.mxu1 %v17904_v14  ;;  %13140 = vmatprep.subr.bf16.mxu0 %v17909_v19  ;;  %v17925_v14 = vld [vmem:[%s19909_s6 + $0x2d20] ss:$16 sps:$4 sm:$0xff]  }
 0x33c   : > { %13181 = vmatprep.subr.bf16.mxu1 %v17912_v27  ;;  %v17928_v19 = vld [vmem:[%s19909_s6 + $0x2f20] ss:$16 sps:$4 sm:$0xff]   ;;  %v17933_v27 = vld [vmem:[%s19909_s6 + $0x2d04] ss:$16 sps:$4 sm:$0xff]  }
 0x33e   : > { %13141 = vmatpush2.bf16.msra.mxu0 %v17907_v8  ;;  %v17936_v8 = vld [vmem:[%s19909_s6 + $0x2f04] ss:$16 sps:$4 sm:$0xff]  }
 0x33f   : > { %13182 = vmatpush2.bf16.msra.mxu1 %v17910_v2  ;;  %13142 = vmatprep.subr.bf16.mxu0 %v17915_v47  ;;  %v2498_v2 = vcombine.high %v21060_v3, %v21060_v3  ;;  %v21070_v47 = vrot.slane %v20960_v31, %v19968_v49 }
 0x340   : > { %13183 = vmatprep.subr.bf16.mxu1 %v17918_v51  ;;  %v17931_v51 = vld [vmem:[%s19909_s6 + $0x2d00] ss:$16 sps:$4 sm:$0xff]  }
 0x341   : > { %22527 = vst [vmem:[#allocation16_spill] sm:$0xff] %v21070_v47  ;;  %v21083_v31 = vcombine.high %v21070_v47, %v21070_v47 }
 0x342   : > { %13143 = vmatpush2.bf16.msra.mxu0 %v17913_v58  ;;  %v17934_v58 = vld [vmem:[%s19909_s6 + $0x2f00] ss:$16 sps:$4 sm:$0xff]  }
 0x343   : > { %13184 = vmatpush2.bf16.msra.mxu1 %v17916_v29  ;;  %13144 = vmatprep.subr.bf16.mxu0 %v17921_v36  ;;  %v17940_v29 = vld [vmem:[%s19909_s6 + $0x30e4] ss:$16 sps:$4 sm:$0xff]  }
 0x344   : > { %13185 = vmatprep.subr.bf16.mxu1 %v17924_v32  ;;  %v17943_v36 = vld [vmem:[%s19909_s6 + $0x32e4] ss:$16 sps:$4 sm:$0xff]   ;;  %v17938_v32 = vld [vmem:[%s19909_s6 + $0x30e0] ss:$16 sps:$4 sm:$0xff]  }
 0x346   : > { %13145 = vmatpush2.bf16.msra.mxu0 %v17919_v45  ;;  %v17941_v45 = vld [vmem:[%s19909_s6 + $0x32e0] ss:$16 sps:$4 sm:$0xff]  }
 0x347   : > { %13186 = vmatpush2.bf16.msra.mxu1 %v17922_v5  ;;  %13146 = vmatprep.subr.bf16.mxu0 %v17927_v10  ;;  %v21079_v5 = vrot.slane %v2498_v2, %v19968_v49  ;;  %v17946_v10 = vld [vmem:[%s19909_s6 + $0x30c4] ss:$16 sps:$4 sm:$0xff]  }
 0x348   : > { %13187 = vmatprep.subr.bf16.mxu1 %v17930_v46  ;;  %v17949_v46 = vld [vmem:[%s19909_s6 + $0x32c4] ss:$16 sps:$4 sm:$0xff]  }
 0x349   : > { %22528 = vst [vmem:[#allocation17_spill] sm:$0xff] %v21079_v5 }
 0x34a   : > { %13147 = vmatpush2.bf16.msra.mxu0 %v17925_v14  ;;  %v17944_v14 = vld [vmem:[%s19909_s6 + $0x30c0] ss:$16 sps:$4 sm:$0xff]  }
 0x34b   : > { %13188 = vmatpush2.bf16.msra.mxu1 %v17928_v19  ;;  %13148 = vmatprep.subr.bf16.mxu0 %v17933_v27  ;;  %v17947_v19 = vld [vmem:[%s19909_s6 + $0x32c0] ss:$16 sps:$4 sm:$0xff]   ;;  %v21091_v27 = vcombine.high %v21079_v5, %v21079_v5 }
 0x34c   : > { %13189 = vmatprep.subr.bf16.mxu1 %v17936_v8 }
 0x34d   : > { %22529 = vst [vmem:[#allocation18_spill] sm:$0xff] %v21091_v27 }
 0x34e   : > { %13149 = vmatpush2.bf16.msra.mxu0 %v17931_v51 }
 0x34f   : > { %13190 = vmatpush2.bf16.msra.mxu1 %v17934_v58  ;;  %13200 = vmatprep.subr.bf16.mxu0 %v17940_v29 }
 0x350   : > { %13241 = vmatprep.subr.bf16.mxu1 %v17943_v36  ;;  %v17952_v36 = vld [vmem:[%s19909_s6 + $0x30a4] ss:$16 sps:$4 sm:$0xff]  }
 0x351   : > { %v12906_v8 = vpop.f32.mrf.mxu0  ;;  %13151 = vmatmul.mubr.bf16.vlgmr.msra.gmra.mxu0 %v21070_v47  ;;  %v17953_v47 = vld [vmem:[%s19909_s6 + $0x32a0] ss:$16 sps:$4 sm:$0xff]  }
 0x352   : > { %v12947_v2 = vpop.f32.mrf.mxu1  ;;  %13192 = vmatmul.mubr.bf16.vlgmr.msra.gmra.mxu1 %v21083_v31  ;;  %v12907_v51 = vadd.f32 %v12906_v8, %v20998_v56  ;;  %13201 = vmatpush1.bf16.msra.mxu0 %v17938_v32  ;;  %v17961_v8 = vld [vmem:[%s19909_s6 + $0x3284] ss:$16 sps:$4 sm:$0xff]  }
 0x353   : > { %13242 = vmatpush1.bf16.msra.mxu1 %v17941_v45  ;;  %v12908_v58 = vpop.f32.mrf.mxu0  ;;  %13202 = vmatprep.subr.bf16.mxu0 %v17946_v10 }
 0x354   : > { %v12949_v29 = vpop.f32.mrf.mxu1  ;;  %13243 = vmatprep.subr.bf16.mxu1 %v17949_v46  ;;  %v21098_v21 = vadd.f32 %v12947_v2, %v12907_v51  ;;  %v12909_v62 = vadd.f32 %v12908_v58, %v21005_v16  ;;  %13232 = vmatprep.mubr.bf16.mxu0 %v21079_v5  ;;  %v17958_v16 = vld [vmem:[%s19909_s6 + $0x3084] ss:$16 sps:$4 sm:$0xff]   ;;  %v17956_v2 = vld [vmem:[%s19909_s6 + $0x3080] ss:$16 sps:$4 sm:$0xff]  }
 0x355   : > { %13273 = vmatprep.mubr.bf16.mxu1 %v21091_v27  ;;  %v12910_v56 = vpop.f32.mrf.mxu0  ;;  %v17959_v51 = vld [vmem:[%s19909_s6 + $0x3280] ss:$16 sps:$4 sm:$0xff]  }
 0x356   : > { %v12951_v32 = vpop.f32.mrf.mxu1  ;;  %v21105_v45 = vadd.f32 %v12949_v29, %v12909_v62  ;;  %13203 = vmatpush1.bf16.msra.mxu0 %v17944_v14  ;;  %v17964_v62 = vld [vmem:[%s19909_s6 + $0x3064] ss:$16 sps:$4 sm:$0xff]   ;;  %v17968_v58 = vld [vmem:[%s19909_s6 + $0x3040] ss:$16 sps:$4 sm:$0xff]  }
 0x357   : > { %13244 = vmatpush1.bf16.msra.mxu1 %v17947_v19  ;;  %v12911_v10 = vpop.f32.mrf.mxu0  ;;  %13204 = vmatprep.subr.bf16.mxu0 %v17952_v36  ;;  %v17967_v14 = vld [vmem:[%s19909_s6 + $0x3264] ss:$16 sps:$4 sm:$0xff]   ;;  %v17962_v19 = vld [vmem:[%s19909_s6 + $0x3060] ss:$16 sps:$4 sm:$0xff]  }
 0x358   : > { %v12952_v46 = vpop.f32.mrf.mxu1  ;;  %13245 = vmatprep.subr.bf16.mxu1 %v17955_v40  ;;  %v17965_v40 = vld [vmem:[%s19909_s6 + $0x3260] ss:$16 sps:$4 sm:$0xff]   ;;  %v17976_v36 = vld [vmem:[%s19909_s6 + $0x3024] ss:$16 sps:$4 sm:$0xff]  }
 0x359   : > { %v17971_v29 = vld [vmem:[%s19909_s6 + $0x3240] ss:$16 sps:$4 sm:$0xff]   ;;  %v17979_v56 = vld [vmem:[%s19909_s6 + $0x3224] ss:$16 sps:$4 sm:$0xff]  }
 0x35a   : > { %13205 = vmatpush1.bf16.msra.mxu0 %v17950_v57  ;;  %v17970_v57 = vld [vmem:[%s19909_s6 + $0x3044] ss:$16 sps:$4 sm:$0xff]   ;;  %v17974_v32 = vld [vmem:[%s19909_s6 + $0x3020] ss:$16 sps:$4 sm:$0xff]  }
 0x35b   : > { %13246 = vmatpush1.bf16.msra.mxu1 %v17953_v47  ;;  %13206 = vmatprep.subr.bf16.mxu0 %v17958_v16  ;;  %v17973_v47 = vld [vmem:[%s19909_s6 + $0x3244] ss:$16 sps:$4 sm:$0xff]   ;;  %v17977_v10 = vld [vmem:[%s19909_s6 + $0x3220] ss:$16 sps:$4 sm:$0xff]  }
 0x35c   : > { %13247 = vmatprep.subr.bf16.mxu1 %v17961_v8  ;;  %v17982_v46 = vld [vmem:[%s19909_s6 + $0x3004] ss:$16 sps:$4 sm:$0xff]   ;;  %v17980_v8 = vld [vmem:[%s19909_s6 + $0x3000] ss:$16 sps:$4 sm:$0xff]  }
 0x35d   : > { %v17985_v16 = vld [vmem:[%s19909_s6 + $0x3204] ss:$16 sps:$4 sm:$0xff]   ;;  %v18046_v5 = vld [vmem:[%s19909_s6 + $0x34a0] ss:$16 sps:$4 sm:$0xff]  }
 0x35e   : > { %13207 = vmatpush1.bf16.msra.mxu0 %v17956_v2  ;;  %v17983_v2 = vld [vmem:[%s19909_s6 + $0x3200] ss:$16 sps:$4 sm:$0xff]  }
 0x35f   : > { %13248 = vmatpush1.bf16.msra.mxu1 %v17959_v51  ;;  %13208 = vmatprep.subr.bf16.mxu0 %v17964_v62  ;;  %v17988_v51 = vld [vmem:[%s19909_s6 + $0x31e4] ss:$16 sps:$4 sm:$0xff]  }
 0x360   : > { %13249 = vmatprep.subr.bf16.mxu1 %v17967_v14  ;;  %v17991_v62 = vld [vmem:[%s19909_s6 + $0x33e4] ss:$16 sps:$4 sm:$0xff]   ;;  %v17986_v14 = vld [vmem:[%s19909_s6 + $0x31e0] ss:$16 sps:$4 sm:$0xff]  }
 0x362   : > { %13209 = vmatpush1.bf16.msra.mxu0 %v17962_v19  ;;  %v17989_v19 = vld [vmem:[%s19909_s6 + $0x33e0] ss:$16 sps:$4 sm:$0xff]  }
 0x363   : > { %13250 = vmatpush1.bf16.msra.mxu1 %v17965_v40  ;;  %13210 = vmatprep.subr.bf16.mxu0 %v17970_v57  ;;  %v17994_v40 = vld [vmem:[%s19909_s6 + $0x31c4] ss:$16 sps:$4 sm:$0xff]  }
 0x364   : > { %13251 = vmatprep.subr.bf16.mxu1 %v17973_v47  ;;  %v17997_v57 = vld [vmem:[%s19909_s6 + $0x33c4] ss:$16 sps:$4 sm:$0xff]   ;;  %v17992_v47 = vld [vmem:[%s19909_s6 + $0x31c0] ss:$16 sps:$4 sm:$0xff]  }
 0x366   : > { %13211 = vmatpush1.bf16.msra.mxu0 %v17968_v58  ;;  %v17995_v58 = vld [vmem:[%s19909_s6 + $0x33c0] ss:$16 sps:$4 sm:$0xff]  }
 0x367   : > { %13252 = vmatpush1.bf16.msra.mxu1 %v17971_v29  ;;  %13212 = vmatprep.subr.bf16.mxu0 %v17976_v36  ;;  %v18000_v29 = vld [vmem:[%s19909_s6 + $0x31a4] ss:$16 sps:$4 sm:$0xff]  }
 0x368   : > { %13253 = vmatprep.subr.bf16.mxu1 %v17979_v56  ;;  %v18003_v36 = vld [vmem:[%s19909_s6 + $0x33a4] ss:$16 sps:$4 sm:$0xff]   ;;  %v17998_v56 = vld [vmem:[%s19909_s6 + $0x31a0] ss:$16 sps:$4 sm:$0xff]  }
 0x36a   : > { %13213 = vmatpush1.bf16.msra.mxu0 %v17974_v32  ;;  %v18001_v32 = vld [vmem:[%s19909_s6 + $0x33a0] ss:$16 sps:$4 sm:$0xff]  }
 0x36b   : > { %13254 = vmatpush1.bf16.msra.mxu1 %v17977_v10  ;;  %13214 = vmatprep.subr.bf16.mxu0 %v17982_v46  ;;  %v18006_v10 = vld [vmem:[%s19909_s6 + $0x3184] ss:$16 sps:$4 sm:$0xff]  }
 0x36c   : > { %13255 = vmatprep.subr.bf16.mxu1 %v17985_v16  ;;  %v18009_v46 = vld [vmem:[%s19909_s6 + $0x3384] ss:$16 sps:$4 sm:$0xff]   ;;  %v18004_v16 = vld [vmem:[%s19909_s6 + $0x3180] ss:$16 sps:$4 sm:$0xff]  }
 0x36e   : > { %13215 = vmatpush1.bf16.msra.mxu0 %v17980_v8  ;;  %v18007_v8 = vld [vmem:[%s19909_s6 + $0x3380] ss:$16 sps:$4 sm:$0xff]  }
 0x36f   : > { %13256 = vmatpush1.bf16.msra.mxu1 %v17983_v2  ;;  %13216 = vmatprep.subr.bf16.mxu0 %v17988_v51  ;;  %v18012_v2 = vld [vmem:[%s19909_s6 + $0x3164] ss:$16 sps:$4 sm:$0xff]  }
 0x370   : > { %13257 = vmatprep.subr.bf16.mxu1 %v17991_v62  ;;  %v18015_v51 = vld [vmem:[%s19909_s6 + $0x3364] ss:$16 sps:$4 sm:$0xff]   ;;  %v18010_v62 = vld [vmem:[%s19909_s6 + $0x3160] ss:$16 sps:$4 sm:$0xff]  }
 0x372   : > { %13217 = vmatpush2.bf16.msra.mxu0 %v17986_v14  ;;  %v18013_v14 = vld [vmem:[%s19909_s6 + $0x3360] ss:$16 sps:$4 sm:$0xff]  }
 0x373   : > { %13258 = vmatpush2.bf16.msra.mxu1 %v17989_v19  ;;  %13218 = vmatprep.subr.bf16.mxu0 %v17994_v40  ;;  %v18018_v19 = vld [vmem:[%s19909_s6 + $0x3144] ss:$16 sps:$4 sm:$0xff]  }
 0x374   : > { %13259 = vmatprep.subr.bf16.mxu1 %v17997_v57  ;;  %v18021_v40 = vld [vmem:[%s19909_s6 + $0x3344] ss:$16 sps:$4 sm:$0xff]   ;;  %v2483_v57 = vcombine.high %v21052_v38, %v21052_v38  ;;  %v18022_v38 = vld [vmem:[%s19909_s6 + $0x3120] ss:$16 sps:$4 sm:$0xff]  }
 0x376   : > { %13219 = vmatpush2.bf16.msra.mxu0 %v17992_v47  ;;  %v18016_v47 = vld [vmem:[%s19909_s6 + $0x3140] ss:$16 sps:$4 sm:$0xff]  }
 0x377   : > { %13260 = vmatpush2.bf16.msra.mxu1 %v17995_v58  ;;  %13220 = vmatprep.subr.bf16.mxu0 %v18000_v29  ;;  %v18019_v58 = vld [vmem:[%s19909_s6 + $0x3340] ss:$16 sps:$4 sm:$0xff]   ;;  %v18024_v29 = vld [vmem:[%s19909_s6 + $0x3124] ss:$16 sps:$4 sm:$0xff]  }
 0x378   : > { %13261 = vmatprep.subr.bf16.mxu1 %v18003_v36  ;;  %v18027_v36 = vld [vmem:[%s19909_s6 + $0x3324] ss:$16 sps:$4 sm:$0xff]  }
 0x37a   : > { %13221 = vmatpush2.bf16.msra.mxu0 %v17998_v56  ;;  %v21156_v56 = vrot.slane %v2483_v57, %v19968_v49 }
 0x37b   : > { %13262 = vmatpush2.bf16.msra.mxu1 %v18001_v32  ;;  %13222 = vmatprep.subr.bf16.mxu0 %v18006_v10  ;;  %v18025_v32 = vld [vmem:[%s19909_s6 + $0x3320] ss:$16 sps:$4 sm:$0xff]   ;;  %v18030_v10 = vld [vmem:[%s19909_s6 + $0x3104] ss:$16 sps:$4 sm:$0xff]  }
 0x37c   : > { %13263 = vmatprep.subr.bf16.mxu1 %v18009_v46  ;;  %v18033_v46 = vld [vmem:[%s19909_s6 + $0x3304] ss:$16 sps:$4 sm:$0xff]  }
 0x37e   : > { %13223 = vmatpush2.bf16.msra.mxu0 %v18004_v16  ;;  %v2499_v16 = vcombine.high %v21156_v56, %v21156_v56 }
 0x37f   : > { %13264 = vmatpush2.bf16.msra.mxu1 %v18007_v8  ;;  %13224 = vmatprep.subr.bf16.mxu0 %v18012_v2  ;;  %v21166_v8 = vrot.slane %v21060_v3, %v19968_v49  ;;  %v18028_v2 = vld [vmem:[%s19909_s6 + $0x3100] ss:$16 sps:$4 sm:$0xff]  }
 0x380   : > { %13265 = vmatprep.subr.bf16.mxu1 %v18015_v51  ;;  %v18031_v51 = vld [vmem:[%s19909_s6 + $0x3300] ss:$16 sps:$4 sm:$0xff]   ;;  %v21175_v57 = vrot.slane %v2499_v16, %v19968_v49 }
 0x381   : > { %22530 = vst [vmem:[#allocation19_spill] sm:$0xff] %v21166_v8  ;;  %v21179_v3 = vcombine.high %v21166_v8, %v21166_v8 }
 0x382   : > { %13225 = vmatpush2.bf16.msra.mxu0 %v18010_v62  ;;  %v18036_v62 = vld [vmem:[%s19909_s6 + $0x34e4] ss:$16 sps:$4 sm:$0xff]   ;;  %22531 = vst [vmem:[#allocation20_spill] sm:$0xff] %v21175_v57 }
 0x383   : > { %13266 = vmatpush2.bf16.msra.mxu1 %v18013_v14  ;;  %13226 = vmatprep.subr.bf16.mxu0 %v18018_v19  ;;  %v18039_v14 = vld [vmem:[%s19909_s6 + $0x36e4] ss:$16 sps:$4 sm:$0xff]   ;;  %v18034_v19 = vld [vmem:[%s19909_s6 + $0x34e0] ss:$16 sps:$4 sm:$0xff]   ;;  %22532 = vst [vmem:[#allocation21_spill] sm:$0xff] %v21179_v3 }
 0x384   : > { %13267 = vmatprep.subr.bf16.mxu1 %v18021_v40  ;;  %v18037_v40 = vld [vmem:[%s19909_s6 + $0x36e0] ss:$16 sps:$4 sm:$0xff]  }
 0x386   : > { %13227 = vmatpush2.bf16.msra.mxu0 %v18016_v47  ;;  %v18042_v47 = vld [vmem:[%s19909_s6 + $0x34c4] ss:$16 sps:$4 sm:$0xff]  }
 0x387   : > { %13268 = vmatpush2.bf16.msra.mxu1 %v18019_v58  ;;  %13228 = vmatprep.subr.bf16.mxu0 %v18024_v29  ;;  %v18045_v58 = vld [vmem:[%s19909_s6 + $0x36c4] ss:$16 sps:$4 sm:$0xff]   ;;  %v18040_v29 = vld [vmem:[%s19909_s6 + $0x34c0] ss:$16 sps:$4 sm:$0xff]  }
 0x388   : > { %13269 = vmatprep.subr.bf16.mxu1 %v18027_v36  ;;  %v18043_v36 = vld [vmem:[%s19909_s6 + $0x36c0] ss:$16 sps:$4 sm:$0xff]  }
 0x38a   : > { %13229 = vmatpush2.bf16.msra.mxu0 %v18022_v38  ;;  %v21187_v38 = vcombine.high %v21175_v57, %v21175_v57 }
 0x38b   : > { %13270 = vmatpush2.bf16.msra.mxu1 %v18025_v32  ;;  %13230 = vmatprep.subr.bf16.mxu0 %v18030_v10 }
 0x38c   : > { %13271 = vmatprep.subr.bf16.mxu1 %v18033_v46  ;;  %22533 = vst [vmem:[#allocation22_spill] sm:$0xff] %v21187_v38 }
 0x38e   : > { %13231 = vmatpush2.bf16.msra.mxu0 %v18028_v2 }
 0x38f   : > { %13272 = vmatpush2.bf16.msra.mxu1 %v18031_v51  ;;  %13282 = vmatprep.subr.bf16.mxu0 %v18036_v62  ;;  %v18048_v51 = vld [vmem:[%s19909_s6 + $0x34a4] ss:$16 sps:$4 sm:$0xff]  }
 0x390   : > { %13323 = vmatprep.subr.bf16.mxu1 %v18039_v14  ;;  %v18051_v62 = vld [vmem:[%s19909_s6 + $0x36a4] ss:$16 sps:$4 sm:$0xff]  }
 0x391   : > { %v12988_v32 = vpop.f32.mrf.mxu0  ;;  %13233 = vmatmul.mubr.bf16.vlgmr.msra.gmra.mxu0 %v21166_v8  ;;  %v18049_v8 = vld [vmem:[%s19909_s6 + $0x36a0] ss:$16 sps:$4 sm:$0xff]  }
 0x392   : > { %v13029_v10 = vpop.f32.mrf.mxu1  ;;  %13274 = vmatmul.mubr.bf16.vlgmr.msra.gmra.mxu1 %v21179_v3  ;;  %v12989_v46 = vadd.f32 %v12988_v32, %v21098_v21  ;;  %13283 = vmatpush1.bf16.msra.mxu0 %v18034_v19  ;;  %v18057_v32 = vld [vmem:[%s19909_s6 + $0x3684] ss:$16 sps:$4 sm:$0xff]   ;;  %v18143_v3 = vld [vmem:[%s19909_s6 + $0x38a0] ss:$16 sps:$4 sm:$0xff]  }
 0x393   : > { %13324 = vmatpush1.bf16.msra.mxu1 %v18037_v40  ;;  %v12990_v16 = vpop.f32.mrf.mxu0  ;;  %13284 = vmatprep.subr.bf16.mxu0 %v18042_v47 }
 0x394   : > { %v13031_v2 = vpop.f32.mrf.mxu1  ;;  %13325 = vmatprep.subr.bf16.mxu1 %v18045_v58  ;;  %v21194_v14 = vadd.f32 %v13029_v10, %v12989_v46  ;;  %v12991_v27 = vadd.f32 %v12990_v16, %v21105_v45  ;;  %13314 = vmatprep.mubr.bf16.mxu0 %v21175_v57  ;;  %v18054_v45 = vld [vmem:[%s19909_s6 + $0x3484] ss:$16 sps:$4 sm:$0xff]   ;;  %v18052_v10 = vld [vmem:[%s19909_s6 + $0x3480] ss:$16 sps:$4 sm:$0xff]  }
 0x395   : > { %13355 = vmatprep.mubr.bf16.mxu1 %v21187_v38  ;;  %v12992_v21 = vpop.f32.mrf.mxu0  ;;  %v18055_v46 = vld [vmem:[%s19909_s6 + $0x3680] ss:$16 sps:$4 sm:$0xff]  }
 0x396   : > { %v13033_v19 = vpop.f32.mrf.mxu1  ;;  %v21201_v40 = vadd.f32 %v13031_v2, %v12991_v27  ;;  %13285 = vmatpush1.bf16.msra.mxu0 %v18040_v29  ;;  %v18060_v27 = vld [vmem:[%s19909_s6 + $0x3464] ss:$16 sps:$4 sm:$0xff]   ;;  %v18061_v16 = vld [vmem:[%s19909_s6 + $0x3660] ss:$16 sps:$4 sm:$0xff]  }
 0x397   : > { %13326 = vmatpush1.bf16.msra.mxu1 %v18043_v36  ;;  %v12993_v47 = vpop.f32.mrf.mxu0  ;;  %13286 = vmatprep.subr.bf16.mxu0 %v18048_v51  ;;  %v18063_v29 = vld [vmem:[%s19909_s6 + $0x3664] ss:$16 sps:$4 sm:$0xff]   ;;  %v18058_v36 = vld [vmem:[%s19909_s6 + $0x3460] ss:$16 sps:$4 sm:$0xff]  }
 0x398   : > { %v13034_v58 = vpop.f32.mrf.mxu1  ;;  %13327 = vmatprep.subr.bf16.mxu1 %v18051_v62  ;;  %v18064_v2 = vld [vmem:[%s19909_s6 + $0x3440] ss:$16 sps:$4 sm:$0xff]   ;;  %v18072_v62 = vld [vmem:[%s19909_s6 + $0x3424] ss:$16 sps:$4 sm:$0xff]  }
 0x399   : > { %v18067_v51 = vld [vmem:[%s19909_s6 + $0x3640] ss:$16 sps:$4 sm:$0xff]   ;;  %v18075_v21 = vld [vmem:[%s19909_s6 + $0x3624] ss:$16 sps:$4 sm:$0xff]  }
 0x39a   : > { %13287 = vmatpush1.bf16.msra.mxu0 %v18046_v5  ;;  %v18066_v5 = vld [vmem:[%s19909_s6 + $0x3444] ss:$16 sps:$4 sm:$0xff]   ;;  %v18070_v19 = vld [vmem:[%s19909_s6 + $0x3420] ss:$16 sps:$4 sm:$0xff]  }
 0x39b   : > { %13328 = vmatpush1.bf16.msra.mxu1 %v18049_v8  ;;  %13288 = vmatprep.subr.bf16.mxu0 %v18054_v45  ;;  %v18069_v8 = vld [vmem:[%s19909_s6 + $0x3644] ss:$16 sps:$4 sm:$0xff]   ;;  %v18073_v47 = vld [vmem:[%s19909_s6 + $0x3620] ss:$16 sps:$4 sm:$0xff]  }
 0x39c   : > { %13329 = vmatprep.subr.bf16.mxu1 %v18057_v32  ;;  %v18078_v58 = vld [vmem:[%s19909_s6 + $0x3404] ss:$16 sps:$4 sm:$0xff]   ;;  %v18076_v32 = vld [vmem:[%s19909_s6 + $0x3400] ss:$16 sps:$4 sm:$0xff]  }
 0x39d   : > { %v18081_v45 = vld [vmem:[%s19909_s6 + $0x3604] ss:$16 sps:$4 sm:$0xff]  }
 0x39e   : > { %13289 = vmatpush1.bf16.msra.mxu0 %v18052_v10  ;;  %v18079_v10 = vld [vmem:[%s19909_s6 + $0x3600] ss:$16 sps:$4 sm:$0xff]  }
 0x39f   : > { %13330 = vmatpush1.bf16.msra.mxu1 %v18055_v46  ;;  %13290 = vmatprep.subr.bf16.mxu0 %v18060_v27  ;;  %v18084_v46 = vld [vmem:[%s19909_s6 + $0x35e4] ss:$16 sps:$4 sm:$0xff]  }
 0x3a0   : > { %13331 = vmatprep.subr.bf16.mxu1 %v18063_v29  ;;  %v18087_v27 = vld [vmem:[%s19909_s6 + $0x37e4] ss:$16 sps:$4 sm:$0xff]   ;;  %v18082_v29 = vld [vmem:[%s19909_s6 + $0x35e0] ss:$16 sps:$4 sm:$0xff]  }
 0x3a2   : > { %13291 = vmatpush1.bf16.msra.mxu0 %v18058_v36  ;;  %v18085_v36 = vld [vmem:[%s19909_s6 + $0x37e0] ss:$16 sps:$4 sm:$0xff]  }
 0x3a3   : > { %13332 = vmatpush1.bf16.msra.mxu1 %v18061_v16  ;;  %13292 = vmatprep.subr.bf16.mxu0 %v18066_v5  ;;  %v18090_v16 = vld [vmem:[%s19909_s6 + $0x35c4] ss:$16 sps:$4 sm:$0xff]  }
 0x3a4   : > { %13333 = vmatprep.subr.bf16.mxu1 %v18069_v8  ;;  %v18093_v5 = vld [vmem:[%s19909_s6 + $0x37c4] ss:$16 sps:$4 sm:$0xff]   ;;  %v18088_v8 = vld [vmem:[%s19909_s6 + $0x35c0] ss:$16 sps:$4 sm:$0xff]  }
 0x3a6   : > { %13293 = vmatpush1.bf16.msra.mxu0 %v18064_v2  ;;  %v18091_v2 = vld [vmem:[%s19909_s6 + $0x37c0] ss:$16 sps:$4 sm:$0xff]  }
 0x3a7   : > { %13334 = vmatpush1.bf16.msra.mxu1 %v18067_v51  ;;  %13294 = vmatprep.subr.bf16.mxu0 %v18072_v62  ;;  %v18096_v51 = vld [vmem:[%s19909_s6 + $0x35a4] ss:$16 sps:$4 sm:$0xff]  }
 0x3a8   : > { %13335 = vmatprep.subr.bf16.mxu1 %v18075_v21  ;;  %v18099_v62 = vld [vmem:[%s19909_s6 + $0x37a4] ss:$16 sps:$4 sm:$0xff]   ;;  %v18094_v21 = vld [vmem:[%s19909_s6 + $0x35a0] ss:$16 sps:$4 sm:$0xff]  }
 0x3aa   : > { %13295 = vmatpush1.bf16.msra.mxu0 %v18070_v19  ;;  %v18097_v19 = vld [vmem:[%s19909_s6 + $0x37a0] ss:$16 sps:$4 sm:$0xff]  }
 0x3ab   : > { %13336 = vmatpush1.bf16.msra.mxu1 %v18073_v47  ;;  %13296 = vmatprep.subr.bf16.mxu0 %v18078_v58  ;;  %v18102_v47 = vld [vmem:[%s19909_s6 + $0x3584] ss:$16 sps:$4 sm:$0xff]  }
 0x3ac   : > { %13337 = vmatprep.subr.bf16.mxu1 %v18081_v45  ;;  %v18105_v58 = vld [vmem:[%s19909_s6 + $0x3784] ss:$16 sps:$4 sm:$0xff]   ;;  %v18100_v45 = vld [vmem:[%s19909_s6 + $0x3580] ss:$16 sps:$4 sm:$0xff]  }
 0x3ae   : > { %13297 = vmatpush1.bf16.msra.mxu0 %v18076_v32  ;;  %v18103_v32 = vld [vmem:[%s19909_s6 + $0x3780] ss:$16 sps:$4 sm:$0xff]  }
 0x3af   : > { %13338 = vmatpush1.bf16.msra.mxu1 %v18079_v10  ;;  %13298 = vmatprep.subr.bf16.mxu0 %v18084_v46  ;;  %v18108_v10 = vld [vmem:[%s19909_s6 + $0x3564] ss:$16 sps:$4 sm:$0xff]  }
 0x3b0   : > { %13339 = vmatprep.subr.bf16.mxu1 %v18087_v27  ;;  %v18111_v46 = vld [vmem:[%s19909_s6 + $0x3764] ss:$16 sps:$4 sm:$0xff]   ;;  %v18106_v27 = vld [vmem:[%s19909_s6 + $0x3560] ss:$16 sps:$4 sm:$0xff]  }
 0x3b2   : > { %13299 = vmatpush2.bf16.msra.mxu0 %v18082_v29  ;;  %v18109_v29 = vld [vmem:[%s19909_s6 + $0x3760] ss:$16 sps:$4 sm:$0xff]  }
 0x3b3   : > { %13340 = vmatpush2.bf16.msra.mxu1 %v18085_v36  ;;  %13300 = vmatprep.subr.bf16.mxu0 %v18090_v16  ;;  %v18114_v36 = vld [vmem:[%s19909_s6 + $0x3544] ss:$16 sps:$4 sm:$0xff]  }
 0x3b4   : > { %13341 = vmatprep.subr.bf16.mxu1 %v18093_v5  ;;  %v18117_v16 = vld [vmem:[%s19909_s6 + $0x3744] ss:$16 sps:$4 sm:$0xff]   ;;  %v18112_v5 = vld [vmem:[%s19909_s6 + $0x3540] ss:$16 sps:$4 sm:$0xff]  }
 0x3b6   : > { %13301 = vmatpush2.bf16.msra.mxu0 %v18088_v8  ;;  %v18115_v8 = vld [vmem:[%s19909_s6 + $0x3740] ss:$16 sps:$4 sm:$0xff]  }
 0x3b7   : > { %13342 = vmatpush2.bf16.msra.mxu1 %v18091_v2  ;;  %13302 = vmatprep.subr.bf16.mxu0 %v18096_v51  ;;  %v18120_v2 = vld [vmem:[%s19909_s6 + $0x3524] ss:$16 sps:$4 sm:$0xff]  }
 0x3b8   : > { %13343 = vmatprep.subr.bf16.mxu1 %v18099_v62  ;;  %v18123_v51 = vld [vmem:[%s19909_s6 + $0x3724] ss:$16 sps:$4 sm:$0xff]   ;;  %v21252_v62 = vld.sshfl [vmem:[%s22492_s0 + $0x38] sm:$0x33 pattern:$0x75316420] }
 0x3ba   : > { %13303 = vmatpush2.bf16.msra.mxu0 %v18094_v21  ;;  %v18118_v21 = vld [vmem:[%s19909_s6 + $0x3520] ss:$16 sps:$4 sm:$0xff]  }
 0x3bb   : > { %13344 = vmatpush2.bf16.msra.mxu1 %v18097_v19  ;;  %13304 = vmatprep.subr.bf16.mxu0 %v18102_v47  ;;  %v18121_v19 = vld [vmem:[%s19909_s6 + $0x3720] ss:$16 sps:$4 sm:$0xff]   ;;  %v18126_v47 = vld [vmem:[%s19909_s6 + $0x3504] ss:$16 sps:$4 sm:$0xff]  }
 0x3bc   : > { %13345 = vmatprep.subr.bf16.mxu1 %v18105_v58  ;;  %v18129_v58 = vld [vmem:[%s19909_s6 + $0x3704] ss:$16 sps:$4 sm:$0xff]  }
 0x3be   : > { %13305 = vmatpush2.bf16.msra.mxu0 %v18100_v45  ;;  %v2539_v45 = vcombine.high %v21252_v62, %v21252_v62 }
 0x3bf   : > { %13346 = vmatpush2.bf16.msra.mxu1 %v18103_v32  ;;  %13306 = vmatprep.subr.bf16.mxu0 %v18108_v10  ;;  %v21262_v32 = vrot.slane %v21156_v56, %v19968_v49  ;;  %v18124_v10 = vld [vmem:[%s19909_s6 + $0x3500] ss:$16 sps:$4 sm:$0xff]  }
 0x3c0   : > { %13347 = vmatprep.subr.bf16.mxu1 %v18111_v46  ;;  %v18127_v46 = vld [vmem:[%s19909_s6 + $0x3700] ss:$16 sps:$4 sm:$0xff]  }
 0x3c1   : > { %22534 = vst [vmem:[#allocation23_spill] sm:$0xff] %v21262_v32  ;;  %v21275_v56 = vcombine.high %v21262_v32, %v21262_v32 }
 0x3c2   : > { %13307 = vmatpush2.bf16.msra.mxu0 %v18106_v27  ;;  %v18133_v27 = vld [vmem:[%s19909_s6 + $0x38e4] ss:$16 sps:$4 sm:$0xff]  }
 0x3c3   : > { %13348 = vmatpush2.bf16.msra.mxu1 %v18109_v29  ;;  %13308 = vmatprep.subr.bf16.mxu0 %v18114_v36  ;;  %v18136_v29 = vld [vmem:[%s19909_s6 + $0x3ae4] ss:$16 sps:$4 sm:$0xff]   ;;  %v18131_v36 = vld [vmem:[%s19909_s6 + $0x38e0] ss:$16 sps:$4 sm:$0xff]  }
 0x3c4   : > { %13349 = vmatprep.subr.bf16.mxu1 %v18117_v16  ;;  %v18134_v16 = vld [vmem:[%s19909_s6 + $0x3ae0] ss:$16 sps:$4 sm:$0xff]  }
 0x3c6   : > { %13309 = vmatpush2.bf16.msra.mxu0 %v18112_v5  ;;  %v21271_v5 = vrot.slane %v2539_v45, %v19968_v49 }
 0x3c7   : > { %13350 = vmatpush2.bf16.msra.mxu1 %v18115_v8  ;;  %13310 = vmatprep.subr.bf16.mxu0 %v18120_v2  ;;  %v18139_v8 = vld [vmem:[%s19909_s6 + $0x38c4] ss:$16 sps:$4 sm:$0xff]  }
 0x3c8   : > { %13351 = vmatprep.subr.bf16.mxu1 %v18123_v51  ;;  %v18142_v2 = vld [vmem:[%s19909_s6 + $0x3ac4] ss:$16 sps:$4 sm:$0xff]   ;;  %v18137_v51 = vld [vmem:[%s19909_s6 + $0x38c0] ss:$16 sps:$4 sm:$0xff]  }
 0x3ca   : > { %13311 = vmatpush2.bf16.msra.mxu0 %v18118_v21  ;;  %v18140_v21 = vld [vmem:[%s19909_s6 + $0x3ac0] ss:$16 sps:$4 sm:$0xff]  }
 0x3cb   : > { %13352 = vmatpush2.bf16.msra.mxu1 %v18121_v19  ;;  %13312 = vmatprep.subr.bf16.mxu0 %v18126_v47  ;;  %v21283_v19 = vcombine.high %v21271_v5, %v21271_v5 }
 0x3cc   : > { %13353 = vmatprep.subr.bf16.mxu1 %v18129_v58 }
 0x3ce   : > { %13313 = vmatpush2.bf16.msra.mxu0 %v18124_v10 }
 0x3cf   : > { %13354 = vmatpush2.bf16.msra.mxu1 %v18127_v46  ;;  %13364 = vmatprep.subr.bf16.mxu0 %v18133_v27  ;;  %v18145_v27 = vld [vmem:[%s19909_s6 + $0x38a4] ss:$16 sps:$4 sm:$0xff]  }
 0x3d0   : > { %13405 = vmatprep.subr.bf16.mxu1 %v18136_v29  ;;  %v18148_v29 = vld [vmem:[%s19909_s6 + $0x3aa4] ss:$16 sps:$4 sm:$0xff]  }
 0x3d1   : > { %v13070_v47 = vpop.f32.mrf.mxu0  ;;  %13315 = vmatmul.mubr.bf16.vlgmr.msra.gmra.mxu0 %v21262_v32  ;;  %v18146_v32 = vld [vmem:[%s19909_s6 + $0x3aa0] ss:$16 sps:$4 sm:$0xff]  }
 0x3d2   : > { %v13111_v58 = vpop.f32.mrf.mxu1  ;;  %13356 = vmatmul.mubr.bf16.vlgmr.msra.gmra.mxu1 %v21275_v56  ;;  %v13071_v45 = vadd.f32 %v13070_v47, %v21194_v14  ;;  %13365 = vmatpush1.bf16.msra.mxu0 %v18131_v36  ;;  %v18154_v47 = vld [vmem:[%s19909_s6 + $0x3a84] ss:$16 sps:$4 sm:$0xff]  }
 0x3d3   : > { %13406 = vmatpush1.bf16.msra.mxu1 %v18134_v16  ;;  %v13072_v10 = vpop.f32.mrf.mxu0  ;;  %13366 = vmatprep.subr.bf16.mxu0 %v18139_v8 }
 0x3d4   : > { %v13113_v46 = vpop.f32.mrf.mxu1  ;;  %13407 = vmatprep.subr.bf16.mxu1 %v18142_v2  ;;  %v21290_v38 = vadd.f32 %v13111_v58, %v13071_v45  ;;  %v13073_v57 = vadd.f32 %v13072_v10, %v21201_v40  ;;  %13396 = vmatprep.mubr.bf16.mxu0 %v21271_v5  ;;  %v18151_v40 = vld [vmem:[%s19909_s6 + $0x3884] ss:$16 sps:$4 sm:$0xff]   ;;  %v18149_v58 = vld [vmem:[%s19909_s6 + $0x3880] ss:$16 sps:$4 sm:$0xff]  }
 0x3d5   : > { %13437 = vmatprep.mubr.bf16.mxu1 %v21283_v19  ;;  %v13074_v14 = vpop.f32.mrf.mxu0  ;;  %v18152_v45 = vld [vmem:[%s19909_s6 + $0x3a80] ss:$16 sps:$4 sm:$0xff]  }
 0x3d6   : > { %v13115_v36 = vpop.f32.mrf.mxu1  ;;  %v21297_v16 = vadd.f32 %v13113_v46, %v13073_v57  ;;  %13367 = vmatpush1.bf16.msra.mxu0 %v18137_v51  ;;  %v18157_v57 = vld [vmem:[%s19909_s6 + $0x3864] ss:$16 sps:$4 sm:$0xff]   ;;  %v18158_v10 = vld [vmem:[%s19909_s6 + $0x3a60] ss:$16 sps:$4 sm:$0xff]  }
 0x3d7   : > { %13408 = vmatpush1.bf16.msra.mxu1 %v18140_v21  ;;  %v13075_v8 = vpop.f32.mrf.mxu0  ;;  %13368 = vmatprep.subr.bf16.mxu0 %v18145_v27  ;;  %v18160_v51 = vld [vmem:[%s19909_s6 + $0x3a64] ss:$16 sps:$4 sm:$0xff]   ;;  %v18155_v21 = vld [vmem:[%s19909_s6 + $0x3860] ss:$16 sps:$4 sm:$0xff]  }
 0x3d8   : > { %v13116_v2 = vpop.f32.mrf.mxu1  ;;  %13409 = vmatprep.subr.bf16.mxu1 %v18148_v29  ;;  %v18161_v46 = vld [vmem:[%s19909_s6 + $0x3840] ss:$16 sps:$4 sm:$0xff]   ;;  %v18169_v29 = vld [vmem:[%s19909_s6 + $0x3824] ss:$16 sps:$4 sm:$0xff]  }
 0x3d9   : > { %v18164_v27 = vld [vmem:[%s19909_s6 + $0x3a40] ss:$16 sps:$4 sm:$0xff]   ;;  %v18172_v14 = vld [vmem:[%s19909_s6 + $0x3a24] ss:$16 sps:$4 sm:$0xff]  }
 0x3da   : > { %13369 = vmatpush1.bf16.msra.mxu0 %v18143_v3  ;;  %v18163_v3 = vld [vmem:[%s19909_s6 + $0x3844] ss:$16 sps:$4 sm:$0xff]   ;;  %v18167_v36 = vld [vmem:[%s19909_s6 + $0x3820] ss:$16 sps:$4 sm:$0xff]  }
 0x3db   : > { %13410 = vmatpush1.bf16.msra.mxu1 %v18146_v32  ;;  %13370 = vmatprep.subr.bf16.mxu0 %v18151_v40  ;;  %v18166_v32 = vld [vmem:[%s19909_s6 + $0x3a44] ss:$16 sps:$4 sm:$0xff]   ;;  %v18170_v8 = vld [vmem:[%s19909_s6 + $0x3a20] ss:$16 sps:$4 sm:$0xff]  }
 0x3dc   : > { %13411 = vmatprep.subr.bf16.mxu1 %v18154_v47  ;;  %v18175_v2 = vld [vmem:[%s19909_s6 + $0x3804] ss:$16 sps:$4 sm:$0xff]   ;;  %v18173_v47 = vld [vmem:[%s19909_s6 + $0x3800] ss:$16 sps:$4 sm:$0xff]  }
 0x3dd   : > { %v18178_v40 = vld [vmem:[%s19909_s6 + $0x3a04] ss:$16 sps:$4 sm:$0xff]  }
 0x3de   : > { %13371 = vmatpush1.bf16.msra.mxu0 %v18149_v58  ;;  %v18176_v58 = vld [vmem:[%s19909_s6 + $0x3a00] ss:$16 sps:$4 sm:$0xff]  }
 0x3df   : > { %13412 = vmatpush1.bf16.msra.mxu1 %v18152_v45  ;;  %13372 = vmatprep.subr.bf16.mxu0 %v18157_v57  ;;  %v18181_v45 = vld [vmem:[%s19909_s6 + $0x39e4] ss:$16 sps:$4 sm:$0xff]  }
 0x3e0   : > { %13413 = vmatprep.subr.bf16.mxu1 %v18160_v51  ;;  %v18184_v57 = vld [vmem:[%s19909_s6 + $0x3be4] ss:$16 sps:$4 sm:$0xff]   ;;  %v18179_v51 = vld [vmem:[%s19909_s6 + $0x39e0] ss:$16 sps:$4 sm:$0xff]  }
 0x3e2   : > { %13373 = vmatpush1.bf16.msra.mxu0 %v18155_v21  ;;  %v18182_v21 = vld [vmem:[%s19909_s6 + $0x3be0] ss:$16 sps:$4 sm:$0xff]  }
 0x3e3   : > { %13414 = vmatpush1.bf16.msra.mxu1 %v18158_v10  ;;  %13374 = vmatprep.subr.bf16.mxu0 %v18163_v3  ;;  %v18187_v10 = vld [vmem:[%s19909_s6 + $0x39c4] ss:$16 sps:$4 sm:$0xff]  }
 0x3e4   : > { %13415 = vmatprep.subr.bf16.mxu1 %v18166_v32  ;;  %v18190_v3 = vld [vmem:[%s19909_s6 + $0x3bc4] ss:$16 sps:$4 sm:$0xff]   ;;  %v18185_v32 = vld [vmem:[%s19909_s6 + $0x39c0] ss:$16 sps:$4 sm:$0xff]  }
 0x3e6   : > { %13375 = vmatpush1.bf16.msra.mxu0 %v18161_v46  ;;  %v18188_v46 = vld [vmem:[%s19909_s6 + $0x3bc0] ss:$16 sps:$4 sm:$0xff]  }
 0x3e7   : > { %13416 = vmatpush1.bf16.msra.mxu1 %v18164_v27  ;;  %13376 = vmatprep.subr.bf16.mxu0 %v18169_v29  ;;  %v18193_v27 = vld [vmem:[%s19909_s6 + $0x39a4] ss:$16 sps:$4 sm:$0xff]  }
 0x3e8   : > { %13417 = vmatprep.subr.bf16.mxu1 %v18172_v14  ;;  %v18196_v29 = vld [vmem:[%s19909_s6 + $0x3ba4] ss:$16 sps:$4 sm:$0xff]   ;;  %v18191_v14 = vld [vmem:[%s19909_s6 + $0x39a0] ss:$16 sps:$4 sm:$0xff]  }
 0x3ea   : > { %13377 = vmatpush1.bf16.msra.mxu0 %v18167_v36  ;;  %v18194_v36 = vld [vmem:[%s19909_s6 + $0x3ba0] ss:$16 sps:$4 sm:$0xff]  }
 0x3eb   : > { %13418 = vmatpush1.bf16.msra.mxu1 %v18170_v8  ;;  %13378 = vmatprep.subr.bf16.mxu0 %v18175_v2  ;;  %v18199_v8 = vld [vmem:[%s19909_s6 + $0x3984] ss:$16 sps:$4 sm:$0xff]  }
 0x3ec   : > { %13419 = vmatprep.subr.bf16.mxu1 %v18178_v40  ;;  %v18202_v2 = vld [vmem:[%s19909_s6 + $0x3b84] ss:$16 sps:$4 sm:$0xff]   ;;  %v18197_v40 = vld [vmem:[%s19909_s6 + $0x3980] ss:$16 sps:$4 sm:$0xff]  }
 0x3ee   : > { %13379 = vmatpush1.bf16.msra.mxu0 %v18173_v47  ;;  %v18200_v47 = vld [vmem:[%s19909_s6 + $0x3b80] ss:$16 sps:$4 sm:$0xff]  }
 0x3ef   : > { %13420 = vmatpush1.bf16.msra.mxu1 %v18176_v58  ;;  %13380 = vmatprep.subr.bf16.mxu0 %v18181_v45  ;;  %v18205_v58 = vld [vmem:[%s19909_s6 + $0x3964] ss:$16 sps:$4 sm:$0xff]  }
 0x3f0   : > { %13421 = vmatprep.subr.bf16.mxu1 %v18184_v57  ;;  %v18208_v45 = vld [vmem:[%s19909_s6 + $0x3b64] ss:$16 sps:$4 sm:$0xff]   ;;  %v18203_v57 = vld [vmem:[%s19909_s6 + $0x3960] ss:$16 sps:$4 sm:$0xff]  }
 0x3f2   : > { %13381 = vmatpush2.bf16.msra.mxu0 %v18179_v51  ;;  %v18206_v51 = vld [vmem:[%s19909_s6 + $0x3b60] ss:$16 sps:$4 sm:$0xff]  }
 0x3f3   : > { %13422 = vmatpush2.bf16.msra.mxu1 %v18182_v21  ;;  %13382 = vmatprep.subr.bf16.mxu0 %v18187_v10  ;;  %v18211_v21 = vld [vmem:[%s19909_s6 + $0x3944] ss:$16 sps:$4 sm:$0xff]  }
 0x3f4   : > { %13423 = vmatprep.subr.bf16.mxu1 %v18190_v3  ;;  %v18214_v10 = vld [vmem:[%s19909_s6 + $0x3b44] ss:$16 sps:$4 sm:$0xff]   ;;  %v18209_v3 = vld [vmem:[%s19909_s6 + $0x3940] ss:$16 sps:$4 sm:$0xff]  }
 0x3f6   : > { %13383 = vmatpush2.bf16.msra.mxu0 %v18185_v32  ;;  %v18212_v32 = vld [vmem:[%s19909_s6 + $0x3b40] ss:$16 sps:$4 sm:$0xff]  }
 0x3f7   : > { %13424 = vmatpush2.bf16.msra.mxu1 %v18188_v46  ;;  %13384 = vmatprep.subr.bf16.mxu0 %v18193_v27  ;;  %v18217_v46 = vld [vmem:[%s19909_s6 + $0x3924] ss:$16 sps:$4 sm:$0xff]  }
 0x3f8   : > { %13425 = vmatprep.subr.bf16.mxu1 %v18196_v29  ;;  %v18220_v27 = vld [vmem:[%s19909_s6 + $0x3b24] ss:$16 sps:$4 sm:$0xff]   ;;  %v18215_v29 = vld [vmem:[%s19909_s6 + $0x3920] ss:$16 sps:$4 sm:$0xff]  }
 0x3fa   : > { %13385 = vmatpush2.bf16.msra.mxu0 %v18191_v14  ;;  %v18218_v14 = vld [vmem:[%s19909_s6 + $0x3b20] ss:$16 sps:$4 sm:$0xff]  }
 0x3fb   : > { %13426 = vmatpush2.bf16.msra.mxu1 %v18194_v36  ;;  %13386 = vmatprep.subr.bf16.mxu0 %v18199_v8  ;;  %v18223_v36 = vld [vmem:[%s19909_s6 + $0x3904] ss:$16 sps:$4 sm:$0xff]  }
 0x3fc   : > { %13427 = vmatprep.subr.bf16.mxu1 %v18202_v2  ;;  %v18226_v8 = vld [vmem:[%s19909_s6 + $0x3b04] ss:$16 sps:$4 sm:$0xff]   ;;  %v21351_v2 = vrot.slane %v21252_v62, %v19968_v49  ;;  %v18235_v49 = vld [vmem:[%s19909_s6 + $0xcc] ss:$16 sps:$4 sm:$0xff]  }
 0x3fd   : > { %v18238_v62 = vld [vmem:[%s19909_s6 + $0x2cc] ss:$16 sps:$4 sm:$0xff]  }
 0x3fe   : > { %13387 = vmatpush2.bf16.msra.mxu0 %v18197_v40  ;;  %v18221_v40 = vld [vmem:[%s19909_s6 + $0x3900] ss:$16 sps:$4 sm:$0xff]  }
 0x3ff   : > { %13428 = vmatpush2.bf16.msra.mxu1 %v18200_v47  ;;  %13388 = vmatprep.subr.bf16.mxu0 %v18205_v58  ;;  %v18224_v47 = vld [vmem:[%s19909_s6 + $0x3b00] ss:$16 sps:$4 sm:$0xff]   ;;  %v18229_v58 = vld [vmem:[%s19909_s6 + $0xec] ss:$16 sps:$4 sm:$0xff]  }
 0x400   : > { %13429 = vmatprep.subr.bf16.mxu1 %v18208_v45  ;;  %v18232_v45 = vld [vmem:[%s19909_s6 + $0x2ec] ss:$16 sps:$4 sm:$0xff]  }
 0x402   : > { %13389 = vmatpush2.bf16.msra.mxu0 %v18203_v57  ;;  %v18227_v57 = vld [vmem:[%s19909_s6 + $0xe8] ss:$16 sps:$4 sm:$0xff]  }
 0x403   : > { %13430 = vmatpush2.bf16.msra.mxu1 %v18206_v51  ;;  %13390 = vmatprep.subr.bf16.mxu0 %v18211_v21  ;;  %v18230_v51 = vld [vmem:[%s19909_s6 + $0x2e8] ss:$16 sps:$4 sm:$0xff]   ;;  %v21361_v21 = vcombine.high %v21351_v2, %v21351_v2 }
 0x404   : > { %13431 = vmatprep.subr.bf16.mxu1 %v18214_v10  ;;  %v18233_v10 = vld [vmem:[%s19909_s6 + $0xc8] ss:$16 sps:$4 sm:$0xff]  }
 0x406   : > { %13391 = vmatpush2.bf16.msra.mxu0 %v18209_v3  ;;  %v18236_v3 = vld [vmem:[%s19909_s6 + $0x2c8] ss:$16 sps:$4 sm:$0xff]  }
 0x407   : > { %13432 = vmatpush2.bf16.msra.mxu1 %v18212_v32  ;;  %13392 = vmatprep.subr.bf16.mxu0 %v18217_v46 }
 0x408   : > { %13433 = vmatprep.subr.bf16.mxu1 %v18220_v27 }
 0x40a   : > { %13393 = vmatpush2.bf16.msra.mxu0 %v18215_v29 }
 0x40b   : > { %13434 = vmatpush2.bf16.msra.mxu1 %v18218_v14  ;;  %13394 = vmatprep.subr.bf16.mxu0 %v18223_v36  ;;  %v18241_v36 = vld [vmem:[%s19909_s6 + $0xac] ss:$16 sps:$4 sm:$0xff]  }
 0x40c   : > { %13435 = vmatprep.subr.bf16.mxu1 %v18226_v8  ;;  %v18244_v8 = vld [vmem:[%s19909_s6 + $0x2ac] ss:$16 sps:$4 sm:$0xff]  }
 0x40e   : > { %13395 = vmatpush2.bf16.msra.mxu0 %v18221_v40 }
 0x40f   : > { %13436 = vmatpush2.bf16.msra.mxu1 %v18224_v47  ;;  %13446 = vmatprep.subr.bf16.mxu0 %v18229_v58  ;;  %v18239_v58 = vld [vmem:[%s19909_s6 + $0xa8] ss:$16 sps:$4 sm:$0xff]  }
 0x410   : > { %13487 = vmatprep.subr.bf16.mxu1 %v18232_v45  ;;  %v18242_v45 = vld [vmem:[%s19909_s6 + $0x2a8] ss:$16 sps:$4 sm:$0xff]  }
 0x411   : > { %v13152_v32 = vpop.f32.mrf.mxu0  ;;  %13397 = vmatmul.mubr.bf16.vlgmr.msra.gmra.mxu0 %v21351_v2 }
 0x412   : > { %v13193_v46 = vpop.f32.mrf.mxu1  ;;  %13438 = vmatmul.mubr.bf16.vlgmr.msra.gmra.mxu1 %v21361_v21  ;;  %v13153_v27 = vadd.f32 %v13152_v32, %v21290_v38  ;;  %13447 = vmatpush1.bf16.msra.mxu0 %v18227_v57  ;;  %v18248_v32 = vld [vmem:[%s19909_s6 + $0x288] ss:$16 sps:$4 sm:$0xff]  }
 0x413   : > { %13488 = vmatpush1.bf16.msra.mxu1 %v18230_v51  ;;  %v13154_v29 = vpop.f32.mrf.mxu0  ;;  %13448 = vmatprep.subr.bf16.mxu0 %v18235_v49 }
 0x414   : > { %v13195_v14 = vpop.f32.mrf.mxu1  ;;  %13489 = vmatprep.subr.bf16.mxu1 %v18238_v62  ;;  %v21372_v40 = vadd.f32 %v13193_v46, %v13153_v27  ;;  %v13155_v47 = vadd.f32 %v13154_v29, %v21297_v16  ;;  %13478 = vmatprep.mubr.bf16.mxu0 %v19982_v60  ;;  %v18247_v16 = vld [vmem:[%s19909_s6 + $0x8c] ss:$16 sps:$4 sm:$0xff]   ;;  %v18251_v46 = vld [vmem:[%s19909_s6 + $0x68] ss:$16 sps:$4 sm:$0xff]  }
 0x415   : > { %13519 = vmatprep.mubr.bf16.mxu1 %v19989_v0  ;;  %v13156_v38 = vpop.f32.mrf.mxu0  ;;  %v18250_v60 = vld [vmem:[%s19909_s6 + $0x28c] ss:$16 sps:$4 sm:$0xff]   ;;  %v18245_v0 = vld [vmem:[%s19909_s6 + $0x88] ss:$16 sps:$4 sm:$0xff]  }
 0x416   : > { %v13197_v57 = vpop.f32.mrf.mxu1  ;;  %v21379_v51 = vadd.f32 %v13195_v14, %v13155_v47  ;;  %13449 = vmatpush1.bf16.msra.mxu0 %v18233_v10  ;;  %v18253_v10 = vld [vmem:[%s19909_s6 + $0x6c] ss:$16 sps:$4 sm:$0xff]   ;;  %v18254_v27 = vld [vmem:[%s19909_s6 + $0x268] ss:$16 sps:$4 sm:$0xff]  }
 0x417   : > { %13490 = vmatpush1.bf16.msra.mxu1 %v18236_v3  ;;  %v13157_v49 = vpop.f32.mrf.mxu0  ;;  %13450 = vmatprep.subr.bf16.mxu0 %v18241_v36  ;;  %v18256_v3 = vld [vmem:[%s19909_s6 + $0x26c] ss:$16 sps:$4 sm:$0xff]   ;;  %v18257_v36 = vld [vmem:[%s19909_s6 + $0x48] ss:$16 sps:$4 sm:$0xff]  }
 0x418   : > { %v13198_v62 = vpop.f32.mrf.mxu1  ;;  %13491 = vmatprep.subr.bf16.mxu1 %v18244_v8  ;;  %v18259_v29 = vld [vmem:[%s19909_s6 + $0x4c] ss:$16 sps:$4 sm:$0xff]   ;;  %v18260_v8 = vld [vmem:[%s19909_s6 + $0x248] ss:$16 sps:$4 sm:$0xff]  }
 0x419   : > { %v18262_v14 = vld [vmem:[%s19909_s6 + $0x24c] ss:$16 sps:$4 sm:$0xff]   ;;  %v18266_v38 = vld [vmem:[%s19909_s6 + $0x228] ss:$16 sps:$4 sm:$0xff]  }
 0x41a   : > { %13451 = vmatpush1.bf16.msra.mxu0 %v18239_v58  ;;  %v18265_v47 = vld [vmem:[%s19909_s6 + $0x2c] ss:$16 sps:$4 sm:$0xff]   ;;  %v18269_v62 = vld [vmem:[%s19909_s6 + $0x8] ss:$16 sps:$4 sm:$0xff]  }
 0x41b   : > { %13492 = vmatpush1.bf16.msra.mxu1 %v18242_v45  ;;  %13452 = vmatprep.subr.bf16.mxu0 %v18247_v16  ;;  %v18268_v58 = vld [vmem:[%s19909_s6 + $0x22c] ss:$16 sps:$4 sm:$0xff]   ;;  %v18263_v45 = vld [vmem:[%s19909_s6 + $0x28] ss:$16 sps:$4 sm:$0xff]  }
 0x41c   : > { %13493 = vmatprep.subr.bf16.mxu1 %v18250_v60  ;;  %v18271_v57 = vld [vmem:[%s19909_s6 + $0xc] ss:$16 sps:$4 sm:$0xff]   ;;  %v18272_v16 = vld [vmem:[%s19909_s6 + $0x208] ss:$16 sps:$4 sm:$0xff]  }
 0x41d   : > { %v18274_v49 = vld [vmem:[%s19909_s6 + $0x20c] ss:$16 sps:$4 sm:$0xff]  }
 0x41e   : > { %13453 = vmatpush1.bf16.msra.mxu0 %v18245_v0  ;;  %v18277_v60 = vld [vmem:[%s19909_s6 + $0x1ec] ss:$16 sps:$4 sm:$0xff]  }
 0x41f   : > { %13494 = vmatpush1.bf16.msra.mxu1 %v18248_v32  ;;  %13454 = vmatprep.subr.bf16.mxu0 %v18253_v10  ;;  %v18280_v0 = vld [vmem:[%s19909_s6 + $0x3ec] ss:$16 sps:$4 sm:$0xff]   ;;  %v18275_v32 = vld [vmem:[%s19909_s6 + $0x1e8] ss:$16 sps:$4 sm:$0xff]  }
 0x420   : > { %13495 = vmatprep.subr.bf16.mxu1 %v18256_v3  ;;  %v18278_v10 = vld [vmem:[%s19909_s6 + $0x3e8] ss:$16 sps:$4 sm:$0xff]   ;;  %v18283_v3 = vld [vmem:[%s19909_s6 + $0x1cc] ss:$16 sps:$4 sm:$0xff]  }
 0x422   : > { %13455 = vmatpush1.bf16.msra.mxu0 %v18251_v46  ;;  %v18286_v46 = vld [vmem:[%s19909_s6 + $0x3cc] ss:$16 sps:$4 sm:$0xff]  }
 0x423   : > { %13496 = vmatpush1.bf16.msra.mxu1 %v18254_v27  ;;  %13456 = vmatprep.subr.bf16.mxu0 %v18259_v29  ;;  %v18281_v27 = vld [vmem:[%s19909_s6 + $0x1c8] ss:$16 sps:$4 sm:$0xff]  }
 0x424   : > { %13497 = vmatprep.subr.bf16.mxu1 %v18262_v14  ;;  %v18284_v29 = vld [vmem:[%s19909_s6 + $0x3c8] ss:$16 sps:$4 sm:$0xff]   ;;  %v18289_v14 = vld [vmem:[%s19909_s6 + $0x1ac] ss:$16 sps:$4 sm:$0xff]  }
 0x426   : > { %13457 = vmatpush1.bf16.msra.mxu0 %v18257_v36  ;;  %v18292_v36 = vld [vmem:[%s19909_s6 + $0x3ac] ss:$16 sps:$4 sm:$0xff]  }
 0x427   : > { %13498 = vmatpush1.bf16.msra.mxu1 %v18260_v8  ;;  %13458 = vmatprep.subr.bf16.mxu0 %v18265_v47  ;;  %v18287_v8 = vld [vmem:[%s19909_s6 + $0x1a8] ss:$16 sps:$4 sm:$0xff]  }
 0x428   : > { %13499 = vmatprep.subr.bf16.mxu1 %v18268_v58  ;;  %v18290_v47 = vld [vmem:[%s19909_s6 + $0x3a8] ss:$16 sps:$4 sm:$0xff]   ;;  %v18295_v58 = vld [vmem:[%s19909_s6 + $0x18c] ss:$16 sps:$4 sm:$0xff]  }
 0x42a   : > { %13459 = vmatpush1.bf16.msra.mxu0 %v18263_v45  ;;  %v18298_v45 = vld [vmem:[%s19909_s6 + $0x38c] ss:$16 sps:$4 sm:$0xff]  }
 0x42b   : > { %13500 = vmatpush1.bf16.msra.mxu1 %v18266_v38  ;;  %13460 = vmatprep.subr.bf16.mxu0 %v18271_v57  ;;  %v18293_v38 = vld [vmem:[%s19909_s6 + $0x188] ss:$16 sps:$4 sm:$0xff]  }
 0x42c   : > { %13501 = vmatprep.subr.bf16.mxu1 %v18274_v49  ;;  %v18296_v57 = vld [vmem:[%s19909_s6 + $0x388] ss:$16 sps:$4 sm:$0xff]   ;;  %v18301_v49 = vld [vmem:[%s19909_s6 + $0x16c] ss:$16 sps:$4 sm:$0xff]  }
 0x42e   : > { %13461 = vmatpush1.bf16.msra.mxu0 %v18269_v62  ;;  %v18304_v62 = vld [vmem:[%s19909_s6 + $0x36c] ss:$16 sps:$4 sm:$0xff]  }
 0x42f   : > { %13502 = vmatpush1.bf16.msra.mxu1 %v18272_v16  ;;  %13462 = vmatprep.subr.bf16.mxu0 %v18277_v60  ;;  %v18299_v16 = vld [vmem:[%s19909_s6 + $0x168] ss:$16 sps:$4 sm:$0xff]  }
 0x430   : > { %13503 = vmatprep.subr.bf16.mxu1 %v18280_v0  ;;  %v18302_v60 = vld [vmem:[%s19909_s6 + $0x368] ss:$16 sps:$4 sm:$0xff]   ;;  %v18307_v0 = vld [vmem:[%s19909_s6 + $0x14c] ss:$16 sps:$4 sm:$0xff]  }
 0x432   : > { %13463 = vmatpush2.bf16.msra.mxu0 %v18275_v32  ;;  %v18310_v32 = vld [vmem:[%s19909_s6 + $0x34c] ss:$16 sps:$4 sm:$0xff]  }
 0x433   : > { %13504 = vmatpush2.bf16.msra.mxu1 %v18278_v10  ;;  %13464 = vmatprep.subr.bf16.mxu0 %v18283_v3  ;;  %v18305_v10 = vld [vmem:[%s19909_s6 + $0x148] ss:$16 sps:$4 sm:$0xff]  }
 0x434   : > { %13505 = vmatprep.subr.bf16.mxu1 %v18286_v46  ;;  %v18308_v3 = vld [vmem:[%s19909_s6 + $0x348] ss:$16 sps:$4 sm:$0xff]   ;;  %v18313_v46 = vld [vmem:[%s19909_s6 + $0x12c] ss:$16 sps:$4 sm:$0xff]  }
 0x436   : > { %13465 = vmatpush2.bf16.msra.mxu0 %v18281_v27  ;;  %v18316_v27 = vld [vmem:[%s19909_s6 + $0x32c] ss:$16 sps:$4 sm:$0xff]  }
 0x437   : > { %13506 = vmatpush2.bf16.msra.mxu1 %v18284_v29  ;;  %13466 = vmatprep.subr.bf16.mxu0 %v18289_v14  ;;  %v18311_v29 = vld [vmem:[%s19909_s6 + $0x128] ss:$16 sps:$4 sm:$0xff]  }
 0x438   : > { %13507 = vmatprep.subr.bf16.mxu1 %v18292_v36  ;;  %v18314_v14 = vld [vmem:[%s19909_s6 + $0x328] ss:$16 sps:$4 sm:$0xff]   ;;  %v18319_v36 = vld [vmem:[%s19909_s6 + $0x10c] ss:$16 sps:$4 sm:$0xff]  }
 0x43a   : > { %13467 = vmatpush2.bf16.msra.mxu0 %v18287_v8  ;;  %v18322_v8 = vld [vmem:[%s19909_s6 + $0x30c] ss:$16 sps:$4 sm:$0xff]  }
 0x43b   : > { %13508 = vmatpush2.bf16.msra.mxu1 %v18290_v47  ;;  %13468 = vmatprep.subr.bf16.mxu0 %v18295_v58  ;;  %v18317_v47 = vld [vmem:[%s19909_s6 + $0x108] ss:$16 sps:$4 sm:$0xff]  }
 0x43c   : > { %13509 = vmatprep.subr.bf16.mxu1 %v18298_v45  ;;  %v18320_v58 = vld [vmem:[%s19909_s6 + $0x308] ss:$16 sps:$4 sm:$0xff]   ;;  %v18325_v45 = vld [vmem:[%s19909_s6 + $0x4ec] ss:$16 sps:$4 sm:$0xff]  }
 0x43e   : > { %13469 = vmatpush2.bf16.msra.mxu0 %v18293_v38  ;;  %v18328_v38 = vld [vmem:[%s19909_s6 + $0x6ec] ss:$16 sps:$4 sm:$0xff]  }
 0x43f   : > { %13510 = vmatpush2.bf16.msra.mxu1 %v18296_v57  ;;  %13470 = vmatprep.subr.bf16.mxu0 %v18301_v49  ;;  %v18323_v57 = vld [vmem:[%s19909_s6 + $0x4e8] ss:$16 sps:$4 sm:$0xff]  }
 0x440   : > { %13511 = vmatprep.subr.bf16.mxu1 %v18304_v62  ;;  %v18326_v49 = vld [vmem:[%s19909_s6 + $0x6e8] ss:$16 sps:$4 sm:$0xff]   ;;  %v18331_v62 = vld [vmem:[%s19909_s6 + $0x4cc] ss:$16 sps:$4 sm:$0xff]  }
 0x442   : > { %13471 = vmatpush2.bf16.msra.mxu0 %v18299_v16  ;;  %v18334_v16 = vld [vmem:[%s19909_s6 + $0x6cc] ss:$16 sps:$4 sm:$0xff]  }
 0x443   : > { %13512 = vmatpush2.bf16.msra.mxu1 %v18302_v60  ;;  %13472 = vmatprep.subr.bf16.mxu0 %v18307_v0 }
 0x444   : > { %13513 = vmatprep.subr.bf16.mxu1 %v18310_v32 }
 0x446   : > { %13473 = vmatpush2.bf16.msra.mxu0 %v18305_v10  ;;  %v18329_v10 = vld [vmem:[%s19909_s6 + $0x4c8] ss:$16 sps:$4 sm:$0xff]  }
 0x447   : > { %13514 = vmatpush2.bf16.msra.mxu1 %v18308_v3  ;;  %13474 = vmatprep.subr.bf16.mxu0 %v18313_v46  ;;  %v18332_v3 = vld [vmem:[%s19909_s6 + $0x6c8] ss:$16 sps:$4 sm:$0xff]  }
 0x448   : > { %13515 = vmatprep.subr.bf16.mxu1 %v18316_v27 }
 0x44a   : > { %13475 = vmatpush2.bf16.msra.mxu0 %v18311_v29  ;;  %v18337_v29 = vld [vmem:[%s19909_s6 + $0x4ac] ss:$16 sps:$4 sm:$0xff]  }
 0x44b   : > { %13516 = vmatpush2.bf16.msra.mxu1 %v18314_v14  ;;  %13476 = vmatprep.subr.bf16.mxu0 %v18319_v36  ;;  %v18340_v14 = vld [vmem:[%s19909_s6 + $0x6ac] ss:$16 sps:$4 sm:$0xff]  }
 0x44c   : > { %13517 = vmatprep.subr.bf16.mxu1 %v18322_v8 }
 0x44e   : > { %13477 = vmatpush2.bf16.msra.mxu0 %v18317_v47  ;;  %v18335_v47 = vld [vmem:[%s19909_s6 + $0x4a8] ss:$16 sps:$4 sm:$0xff]  }
 0x44f   : > { %13518 = vmatpush2.bf16.msra.mxu1 %v18320_v58  ;;  %13528 = vmatprep.subr.bf16.mxu0 %v18325_v45  ;;  %v18338_v58 = vld [vmem:[%s19909_s6 + $0x6a8] ss:$16 sps:$4 sm:$0xff]  }
 0x450   : > { %13569 = vmatprep.subr.bf16.mxu1 %v18328_v38 }
 0x451   : > { %v13234_v60 = vpop.f32.mrf.mxu0  ;;  %13479 = vmatmul.mubr.bf16.vlgmr.msra.gmra.mxu0 %v20008_v13 }
 0x452   : > { %v13275_v0 = vpop.f32.mrf.mxu1  ;;  %13520 = vmatmul.mubr.bf16.vlgmr.msra.gmra.mxu1 %v20018_v18  ;;  %v13235_v32 = vadd.f32 %v13234_v60, %v21372_v40  ;;  %13529 = vmatpush1.bf16.msra.mxu0 %v18323_v57  ;;  %v18344_v57 = vld [vmem:[%s19909_s6 + $0x688] ss:$16 sps:$4 sm:$0xff]  }
 0x453   : > { %13570 = vmatpush1.bf16.msra.mxu1 %v18326_v49  ;;  %v13236_v46 = vpop.f32.mrf.mxu0  ;;  %13530 = vmatprep.subr.bf16.mxu0 %v18331_v62  ;;  %v18349_v49 = vld [vmem:[%s19909_s6 + $0x46c] ss:$16 sps:$4 sm:$0xff]   ;;  %v18350_v60 = vld [vmem:[%s19909_s6 + $0x668] ss:$16 sps:$4 sm:$0xff]  }
 0x454   : > { %v13277_v27 = vpop.f32.mrf.mxu1  ;;  %13571 = vmatprep.subr.bf16.mxu1 %v18334_v16  ;;  %v21446_v36 = vadd.f32 %v13275_v0, %v13235_v32  ;;  %v13237_v13 = vadd.f32 %v13236_v46, %v21379_v51  ;;  %13560 = vmatprep.mubr.bf16.mxu0 %v20014_v17  ;;  %v18343_v17 = vld [vmem:[%s19909_s6 + $0x48c] ss:$16 sps:$4 sm:$0xff]   ;;  %v18341_v51 = vld [vmem:[%s19909_s6 + $0x488] ss:$16 sps:$4 sm:$0xff]  }
 0x455   : > { %13601 = vmatprep.mubr.bf16.mxu1 %v20026_v23  ;;  %v13238_v18 = vpop.f32.mrf.mxu0  ;;  %v18346_v23 = vld [vmem:[%s19909_s6 + $0x68c] ss:$16 sps:$4 sm:$0xff]   ;;  %v18347_v16 = vld [vmem:[%s19909_s6 + $0x468] ss:$16 sps:$4 sm:$0xff]  }
 0x456   : > { %v13279_v40 = vpop.f32.mrf.mxu1  ;;  %v21451_v8 = vadd.f32 %v13277_v27, %v13237_v13  ;;  %13531 = vmatpush1.bf16.msra.mxu0 %v18329_v10  ;;  %v18352_v62 = vld [vmem:[%s19909_s6 + $0x66c] ss:$16 sps:$4 sm:$0xff]   ;;  %v18353_v10 = vld [vmem:[%s19909_s6 + $0x448] ss:$16 sps:$4 sm:$0xff]  }
 0x457   : > { %13572 = vmatpush1.bf16.msra.mxu1 %v18332_v3  ;;  %v13239_v45 = vpop.f32.mrf.mxu0  ;;  %13532 = vmatprep.subr.bf16.mxu0 %v18337_v29  ;;  %v18355_v0 = vld [vmem:[%s19909_s6 + $0x44c] ss:$16 sps:$4 sm:$0xff]   ;;  %v18356_v3 = vld [vmem:[%s19909_s6 + $0x648] ss:$16 sps:$4 sm:$0xff]  }
 0x458   : > { %v13280_v38 = vpop.f32.mrf.mxu1  ;;  %13573 = vmatprep.subr.bf16.mxu1 %v18340_v14  ;;  %v18358_v32 = vld [vmem:[%s19909_s6 + $0x64c] ss:$16 sps:$4 sm:$0xff]   ;;  %v18359_v29 = vld [vmem:[%s19909_s6 + $0x428] ss:$16 sps:$4 sm:$0xff]  }
 0x459   : > { %v18361_v46 = vld [vmem:[%s19909_s6 + $0x42c] ss:$16 sps:$4 sm:$0xff]   ;;  %v18362_v14 = vld [vmem:[%s19909_s6 + $0x628] ss:$16 sps:$4 sm:$0xff]  }
 0x45a   : > { %13533 = vmatpush1.bf16.msra.mxu0 %v18335_v47  ;;  %v18364_v27 = vld [vmem:[%s19909_s6 + $0x62c] ss:$16 sps:$4 sm:$0xff]   ;;  %v18365_v40 = vld [vmem:[%s19909_s6 + $0x408] ss:$16 sps:$4 sm:$0xff]  }
 0x45b   : > { %13574 = vmatpush1.bf16.msra.mxu1 %v18338_v58  ;;  %13534 = vmatprep.subr.bf16.mxu0 %v18343_v17  ;;  %v18367_v13 = vld [vmem:[%s19909_s6 + $0x40c] ss:$16 sps:$4 sm:$0xff]   ;;  %v18368_v47 = vld [vmem:[%s19909_s6 + $0x608] ss:$16 sps:$4 sm:$0xff]  }
 0x45c   : > { %13575 = vmatprep.subr.bf16.mxu1 %v18346_v23  ;;  %v18370_v18 = vld [vmem:[%s19909_s6 + $0x60c] ss:$16 sps:$4 sm:$0xff]   ;;  %v18371_v38 = vld [vmem:[%s19909_s6 + $0x5e8] ss:$16 sps:$4 sm:$0xff]  }
 0x45d   : > { %v18373_v58 = vld [vmem:[%s19909_s6 + $0x5ec] ss:$16 sps:$4 sm:$0xff]   ;;  %v18374_v17 = vld [vmem:[%s19909_s6 + $0x7e8] ss:$16 sps:$4 sm:$0xff]  }
 0x45e   : > { %13535 = vmatpush1.bf16.msra.mxu0 %v18341_v51  ;;  %v18376_v45 = vld [vmem:[%s19909_s6 + $0x7ec] ss:$16 sps:$4 sm:$0xff]  }
 0x45f   : > { %13576 = vmatpush1.bf16.msra.mxu1 %v18344_v57  ;;  %13536 = vmatprep.subr.bf16.mxu0 %v18349_v49  ;;  %v18379_v23 = vld [vmem:[%s19909_s6 + $0x5cc] ss:$16 sps:$4 sm:$0xff]   ;;  %v18377_v57 = vld [vmem:[%s19909_s6 + $0x5c8] ss:$16 sps:$4 sm:$0xff]  }
 0x460   : > { %13577 = vmatprep.subr.bf16.mxu1 %v18352_v62  ;;  %v18382_v51 = vld [vmem:[%s19909_s6 + $0x7cc] ss:$16 sps:$4 sm:$0xff]   ;;  %v18380_v49 = vld [vmem:[%s19909_s6 + $0x7c8] ss:$16 sps:$4 sm:$0xff]  }
 0x461   : > { %v18385_v62 = vld [vmem:[%s19909_s6 + $0x5ac] ss:$16 sps:$4 sm:$0xff]  }
 0x462   : > { %13537 = vmatpush1.bf16.msra.mxu0 %v18347_v16  ;;  %v18388_v16 = vld [vmem:[%s19909_s6 + $0x7ac] ss:$16 sps:$4 sm:$0xff]  }
 0x463   : > { %13578 = vmatpush1.bf16.msra.mxu1 %v18350_v60  ;;  %13538 = vmatprep.subr.bf16.mxu0 %v18355_v0  ;;  %v18383_v60 = vld [vmem:[%s19909_s6 + $0x5a8] ss:$16 sps:$4 sm:$0xff]  }
 0x464   : > { %13579 = vmatprep.subr.bf16.mxu1 %v18358_v32  ;;  %v18386_v0 = vld [vmem:[%s19909_s6 + $0x7a8] ss:$16 sps:$4 sm:$0xff]   ;;  %v18391_v32 = vld [vmem:[%s19909_s6 + $0x58c] ss:$16 sps:$4 sm:$0xff]  }
 0x466   : > { %13539 = vmatpush1.bf16.msra.mxu0 %v18353_v10  ;;  %v18394_v10 = vld [vmem:[%s19909_s6 + $0x78c] ss:$16 sps:$4 sm:$0xff]  }
 0x467   : > { %13580 = vmatpush1.bf16.msra.mxu1 %v18356_v3  ;;  %13540 = vmatprep.subr.bf16.mxu0 %v18361_v46  ;;  %v18389_v3 = vld [vmem:[%s19909_s6 + $0x588] ss:$16 sps:$4 sm:$0xff]  }
 0x468   : > { %13581 = vmatprep.subr.bf16.mxu1 %v18364_v27  ;;  %v18392_v46 = vld [vmem:[%s19909_s6 + $0x788] ss:$16 sps:$4 sm:$0xff]   ;;  %v18397_v27 = vld [vmem:[%s19909_s6 + $0x56c] ss:$16 sps:$4 sm:$0xff]  }
 0x46a   : > { %13541 = vmatpush1.bf16.msra.mxu0 %v18359_v29  ;;  %v18400_v29 = vld [vmem:[%s19909_s6 + $0x76c] ss:$16 sps:$4 sm:$0xff]  }
 0x46b   : > { %13582 = vmatpush1.bf16.msra.mxu1 %v18362_v14  ;;  %13542 = vmatprep.subr.bf16.mxu0 %v18367_v13  ;;  %v18395_v14 = vld [vmem:[%s19909_s6 + $0x568] ss:$16 sps:$4 sm:$0xff]  }
 0x46c   : > { %13583 = vmatprep.subr.bf16.mxu1 %v18370_v18  ;;  %v18398_v13 = vld [vmem:[%s19909_s6 + $0x768] ss:$16 sps:$4 sm:$0xff]   ;;  %v18403_v18 = vld [vmem:[%s19909_s6 + $0x54c] ss:$16 sps:$4 sm:$0xff]  }
 0x46e   : > { %13543 = vmatpush1.bf16.msra.mxu0 %v18365_v40  ;;  %v18406_v40 = vld [vmem:[%s19909_s6 + $0x74c] ss:$16 sps:$4 sm:$0xff]  }
 0x46f   : > { %13584 = vmatpush1.bf16.msra.mxu1 %v18368_v47  ;;  %13544 = vmatprep.subr.bf16.mxu0 %v18373_v58  ;;  %v18401_v47 = vld [vmem:[%s19909_s6 + $0x548] ss:$16 sps:$4 sm:$0xff]  }
 0x470   : > { %13585 = vmatprep.subr.bf16.mxu1 %v18376_v45  ;;  %v18404_v58 = vld [vmem:[%s19909_s6 + $0x748] ss:$16 sps:$4 sm:$0xff]   ;;  %v18409_v45 = vld [vmem:[%s19909_s6 + $0x52c] ss:$16 sps:$4 sm:$0xff]  }
 0x472   : > { %13545 = vmatpush2.bf16.msra.mxu0 %v18371_v38  ;;  %v18412_v38 = vld [vmem:[%s19909_s6 + $0x72c] ss:$16 sps:$4 sm:$0xff]  }
 0x473   : > { %13586 = vmatpush2.bf16.msra.mxu1 %v18374_v17  ;;  %13546 = vmatprep.subr.bf16.mxu0 %v18379_v23  ;;  %v18407_v17 = vld [vmem:[%s19909_s6 + $0x528] ss:$16 sps:$4 sm:$0xff]  }
 0x474   : > { %13587 = vmatprep.subr.bf16.mxu1 %v18382_v51  ;;  %v18410_v23 = vld [vmem:[%s19909_s6 + $0x728] ss:$16 sps:$4 sm:$0xff]   ;;  %v18415_v51 = vld [vmem:[%s19909_s6 + $0x50c] ss:$16 sps:$4 sm:$0xff]  }
 0x476   : > { %13547 = vmatpush2.bf16.msra.mxu0 %v18377_v57  ;;  %v18418_v57 = vld [vmem:[%s19909_s6 + $0x70c] ss:$16 sps:$4 sm:$0xff]  }
 0x477   : > { %13588 = vmatpush2.bf16.msra.mxu1 %v18380_v49  ;;  %13548 = vmatprep.subr.bf16.mxu0 %v18385_v62  ;;  %v18413_v49 = vld [vmem:[%s19909_s6 + $0x508] ss:$16 sps:$4 sm:$0xff]  }
 0x478   : > { %13589 = vmatprep.subr.bf16.mxu1 %v18388_v16  ;;  %v18416_v62 = vld [vmem:[%s19909_s6 + $0x708] ss:$16 sps:$4 sm:$0xff]   ;;  %v18421_v16 = vld [vmem:[%s19909_s6 + $0x8ec] ss:$16 sps:$4 sm:$0xff]  }
 0x47a   : > { %13549 = vmatpush2.bf16.msra.mxu0 %v18383_v60  ;;  %v18424_v60 = vld [vmem:[%s19909_s6 + $0xaec] ss:$16 sps:$4 sm:$0xff]  }
 0x47b   : > { %13590 = vmatpush2.bf16.msra.mxu1 %v18386_v0  ;;  %13550 = vmatprep.subr.bf16.mxu0 %v18391_v32  ;;  %v18419_v0 = vld [vmem:[%s19909_s6 + $0x8e8] ss:$16 sps:$4 sm:$0xff]  }
 0x47c   : > { %13591 = vmatprep.subr.bf16.mxu1 %v18394_v10  ;;  %v18422_v32 = vld [vmem:[%s19909_s6 + $0xae8] ss:$16 sps:$4 sm:$0xff]   ;;  %v18427_v10 = vld [vmem:[%s19909_s6 + $0x8cc] ss:$16 sps:$4 sm:$0xff]  }
 0x47e   : > { %13551 = vmatpush2.bf16.msra.mxu0 %v18389_v3  ;;  %v18430_v3 = vld [vmem:[%s19909_s6 + $0xacc] ss:$16 sps:$4 sm:$0xff]  }
 0x47f   : > { %13592 = vmatpush2.bf16.msra.mxu1 %v18392_v46  ;;  %13552 = vmatprep.subr.bf16.mxu0 %v18397_v27 }
 0x480   : > { %13593 = vmatprep.subr.bf16.mxu1 %v18400_v29 }
 0x482   : > { %13553 = vmatpush2.bf16.msra.mxu0 %v18395_v14  ;;  %v18425_v14 = vld [vmem:[%s19909_s6 + $0x8c8] ss:$16 sps:$4 sm:$0xff]  }
 0x483   : > { %13594 = vmatpush2.bf16.msra.mxu1 %v18398_v13  ;;  %13554 = vmatprep.subr.bf16.mxu0 %v18403_v18  ;;  %v18428_v13 = vld [vmem:[%s19909_s6 + $0xac8] ss:$16 sps:$4 sm:$0xff]  }
 0x484   : > { %13595 = vmatprep.subr.bf16.mxu1 %v18406_v40 }
 0x486   : > { %13555 = vmatpush2.bf16.msra.mxu0 %v18401_v47  ;;  %v18433_v47 = vld [vmem:[%s19909_s6 + $0x8ac] ss:$16 sps:$4 sm:$0xff]  }
 0x487   : > { %13596 = vmatpush2.bf16.msra.mxu1 %v18404_v58  ;;  %13556 = vmatprep.subr.bf16.mxu0 %v18409_v45  ;;  %v18436_v58 = vld [vmem:[%s19909_s6 + $0xaac] ss:$16 sps:$4 sm:$0xff]  }
 0x488   : > { %13597 = vmatprep.subr.bf16.mxu1 %v18412_v38 }
 0x48a   : > { %13557 = vmatpush2.bf16.msra.mxu0 %v18407_v17  ;;  %v18431_v17 = vld [vmem:[%s19909_s6 + $0x8a8] ss:$16 sps:$4 sm:$0xff]  }
 0x48b   : > { %13598 = vmatpush2.bf16.msra.mxu1 %v18410_v23  ;;  %13558 = vmatprep.subr.bf16.mxu0 %v18415_v51  ;;  %v18434_v23 = vld [vmem:[%s19909_s6 + $0xaa8] ss:$16 sps:$4 sm:$0xff]  }
 0x48c   : > { %13599 = vmatprep.subr.bf16.mxu1 %v18418_v57 }
 0x48e   : > { %13559 = vmatpush2.bf16.msra.mxu0 %v18413_v49  ;;  %v18440_v49 = vld [vmem:[%s19909_s6 + $0xa88] ss:$16 sps:$4 sm:$0xff]  }
 0x48f   : > { %13600 = vmatpush2.bf16.msra.mxu1 %v18416_v62  ;;  %13610 = vmatprep.subr.bf16.mxu0 %v18421_v16  ;;  %v18445_v62 = vld [vmem:[%s19909_s6 + $0x86c] ss:$16 sps:$4 sm:$0xff]  }
 0x490   : > { %13651 = vmatprep.subr.bf16.mxu1 %v18424_v60  ;;  %v18448_v16 = vld [vmem:[%s19909_s6 + $0xa6c] ss:$16 sps:$4 sm:$0xff]   ;;  %v18443_v60 = vld [vmem:[%s19909_s6 + $0x868] ss:$16 sps:$4 sm:$0xff]  }
 0x491   : > { %v13316_v46 = vpop.f32.mrf.mxu0  ;;  %13561 = vmatmul.mubr.bf16.vlgmr.msra.gmra.mxu0 %v20091_v26 }
 0x492   : > { %v13357_v27 = vpop.f32.mrf.mxu1  ;;  %13602 = vmatmul.mubr.bf16.vlgmr.msra.gmra.mxu1 %v20098_v30  ;;  %v13317_v29 = vadd.f32 %v13316_v46, %v21446_v36  ;;  %13611 = vmatpush1.bf16.msra.mxu0 %v18419_v0  ;;  %v18446_v0 = vld [vmem:[%s19909_s6 + $0xa68] ss:$16 sps:$4 sm:$0xff]  }
 0x493   : > { %13652 = vmatpush1.bf16.msra.mxu1 %v18422_v32  ;;  %v13318_v18 = vpop.f32.mrf.mxu0  ;;  %13612 = vmatprep.subr.bf16.mxu0 %v18427_v10  ;;  %v18451_v32 = vld [vmem:[%s19909_s6 + $0x84c] ss:$16 sps:$4 sm:$0xff]   ;;  %v18452_v46 = vld [vmem:[%s19909_s6 + $0xa48] ss:$16 sps:$4 sm:$0xff]  }
 0x494   : > { %v13359_v40 = vpop.f32.mrf.mxu1  ;;  %13653 = vmatprep.subr.bf16.mxu1 %v18430_v3  ;;  %v21520_v45 = vadd.f32 %v13357_v27, %v13317_v29  ;;  %v13319_v26 = vadd.f32 %v13318_v18, %v21451_v8  ;;  %13642 = vmatprep.mubr.bf16.mxu0 %v20122_v41  ;;  %v18439_v41 = vld [vmem:[%s19909_s6 + $0x88c] ss:$16 sps:$4 sm:$0xff]   ;;  %v18437_v8 = vld [vmem:[%s19909_s6 + $0x888] ss:$16 sps:$4 sm:$0xff]  }
 0x495   : > { %13683 = vmatprep.mubr.bf16.mxu1 %v20127_v43  ;;  %v13320_v30 = vpop.f32.mrf.mxu0  ;;  %v18442_v43 = vld [vmem:[%s19909_s6 + $0xa8c] ss:$16 sps:$4 sm:$0xff]   ;;  %v18449_v3 = vld [vmem:[%s19909_s6 + $0x848] ss:$16 sps:$4 sm:$0xff]  }
 0x496   : > { %v13361_v36 = vpop.f32.mrf.mxu1  ;;  %v21525_v38 = vadd.f32 %v13359_v40, %v13319_v26  ;;  %13613 = vmatpush1.bf16.msra.mxu0 %v18425_v14  ;;  %v18454_v10 = vld [vmem:[%s19909_s6 + $0xa4c] ss:$16 sps:$4 sm:$0xff]   ;;  %v18455_v14 = vld [vmem:[%s19909_s6 + $0x828] ss:$16 sps:$4 sm:$0xff]  }
 0x497   : > { %13654 = vmatpush1.bf16.msra.mxu1 %v18428_v13  ;;  %v13321_v51 = vpop.f32.mrf.mxu0  ;;  %13614 = vmatprep.subr.bf16.mxu0 %v18433_v47  ;;  %v18457_v27 = vld [vmem:[%s19909_s6 + $0x82c] ss:$16 sps:$4 sm:$0xff]   ;;  %v18458_v13 = vld [vmem:[%s19909_s6 + $0xa28] ss:$16 sps:$4 sm:$0xff]  }
 0x498   : > { %v13362_v57 = vpop.f32.mrf.mxu1  ;;  %13655 = vmatprep.subr.bf16.mxu1 %v18436_v58  ;;  %v18460_v29 = vld [vmem:[%s19909_s6 + $0xa2c] ss:$16 sps:$4 sm:$0xff]   ;;  %v18461_v47 = vld [vmem:[%s19909_s6 + $0x808] ss:$16 sps:$4 sm:$0xff]  }
 0x499   : > { %v18463_v18 = vld [vmem:[%s19909_s6 + $0x80c] ss:$16 sps:$4 sm:$0xff]   ;;  %v18464_v58 = vld [vmem:[%s19909_s6 + $0xa08] ss:$16 sps:$4 sm:$0xff]  }
 0x49a   : > { %13615 = vmatpush1.bf16.msra.mxu0 %v18431_v17  ;;  %v18466_v40 = vld [vmem:[%s19909_s6 + $0xa0c] ss:$16 sps:$4 sm:$0xff]   ;;  %v18467_v36 = vld [vmem:[%s19909_s6 + $0x9e8] ss:$16 sps:$4 sm:$0xff]  }
 0x49b   : > { %13656 = vmatpush1.bf16.msra.mxu1 %v18434_v23  ;;  %13616 = vmatprep.subr.bf16.mxu0 %v18439_v41  ;;  %v18469_v26 = vld [vmem:[%s19909_s6 + $0x9ec] ss:$16 sps:$4 sm:$0xff]   ;;  %v18470_v17 = vld [vmem:[%s19909_s6 + $0xbe8] ss:$16 sps:$4 sm:$0xff]  }
 0x49c   : > { %13657 = vmatprep.subr.bf16.mxu1 %v18442_v43  ;;  %v18472_v30 = vld [vmem:[%s19909_s6 + $0xbec] ss:$16 sps:$4 sm:$0xff]   ;;  %v18473_v57 = vld [vmem:[%s19909_s6 + $0x9c8] ss:$16 sps:$4 sm:$0xff]  }
 0x49d   : > { %v18475_v23 = vld [vmem:[%s19909_s6 + $0x9cc] ss:$16 sps:$4 sm:$0xff]   ;;  %v18476_v41 = vld [vmem:[%s19909_s6 + $0xbc8] ss:$16 sps:$4 sm:$0xff]  }
 0x49e   : > { %13617 = vmatpush1.bf16.msra.mxu0 %v18437_v8  ;;  %v18478_v51 = vld [vmem:[%s19909_s6 + $0xbcc] ss:$16 sps:$4 sm:$0xff]  }
 0x49f   : > { %13658 = vmatpush1.bf16.msra.mxu1 %v18440_v49  ;;  %13618 = vmatprep.subr.bf16.mxu0 %v18445_v62  ;;  %v18481_v43 = vld [vmem:[%s19909_s6 + $0x9ac] ss:$16 sps:$4 sm:$0xff]   ;;  %v18479_v49 = vld [vmem:[%s19909_s6 + $0x9a8] ss:$16 sps:$4 sm:$0xff]  }
 0x4a0   : > { %13659 = vmatprep.subr.bf16.mxu1 %v18448_v16  ;;  %v18484_v8 = vld [vmem:[%s19909_s6 + $0xbac] ss:$16 sps:$4 sm:$0xff]   ;;  %v18482_v62 = vld [vmem:[%s19909_s6 + $0xba8] ss:$16 sps:$4 sm:$0xff]  }
 0x4a1   : > { %v18487_v16 = vld [vmem:[%s19909_s6 + $0x98c] ss:$16 sps:$4 sm:$0xff]  }
 0x4a2   : > { %13619 = vmatpush1.bf16.msra.mxu0 %v18443_v60  ;;  %v18490_v60 = vld [vmem:[%s19909_s6 + $0xb8c] ss:$16 sps:$4 sm:$0xff]  }
 0x4a3   : > { %13660 = vmatpush1.bf16.msra.mxu1 %v18446_v0  ;;  %13620 = vmatprep.subr.bf16.mxu0 %v18451_v32  ;;  %v18485_v0 = vld [vmem:[%s19909_s6 + $0x988] ss:$16 sps:$4 sm:$0xff]  }
 0x4a4   : > { %13661 = vmatprep.subr.bf16.mxu1 %v18454_v10  ;;  %v18488_v32 = vld [vmem:[%s19909_s6 + $0xb88] ss:$16 sps:$4 sm:$0xff]   ;;  %v18493_v10 = vld [vmem:[%s19909_s6 + $0x96c] ss:$16 sps:$4 sm:$0xff]  }
 0x4a6   : > { %13621 = vmatpush1.bf16.msra.mxu0 %v18449_v3  ;;  %v18496_v3 = vld [vmem:[%s19909_s6 + $0xb6c] ss:$16 sps:$4 sm:$0xff]  }
 0x4a7   : > { %13662 = vmatpush1.bf16.msra.mxu1 %v18452_v46  ;;  %13622 = vmatprep.subr.bf16.mxu0 %v18457_v27  ;;  %v18491_v46 = vld [vmem:[%s19909_s6 + $0x968] ss:$16 sps:$4 sm:$0xff]  }
 0x4a8   : > { %13663 = vmatprep.subr.bf16.mxu1 %v18460_v29  ;;  %v18494_v27 = vld [vmem:[%s19909_s6 + $0xb68] ss:$16 sps:$4 sm:$0xff]   ;;  %v18499_v29 = vld [vmem:[%s19909_s6 + $0x94c] ss:$16 sps:$4 sm:$0xff]  }
 0x4aa   : > { %13623 = vmatpush1.bf16.msra.mxu0 %v18455_v14  ;;  %v18502_v14 = vld [vmem:[%s19909_s6 + $0xb4c] ss:$16 sps:$4 sm:$0xff]  }
 0x4ab   : > { %13664 = vmatpush1.bf16.msra.mxu1 %v18458_v13  ;;  %13624 = vmatprep.subr.bf16.mxu0 %v18463_v18  ;;  %v18497_v13 = vld [vmem:[%s19909_s6 + $0x948] ss:$16 sps:$4 sm:$0xff]  }
 0x4ac   : > { %13665 = vmatprep.subr.bf16.mxu1 %v18466_v40  ;;  %v18500_v18 = vld [vmem:[%s19909_s6 + $0xb48] ss:$16 sps:$4 sm:$0xff]   ;;  %v18505_v40 = vld [vmem:[%s19909_s6 + $0x92c] ss:$16 sps:$4 sm:$0xff]  }
 0x4ae   : > { %13625 = vmatpush1.bf16.msra.mxu0 %v18461_v47  ;;  %v18508_v47 = vld [vmem:[%s19909_s6 + $0xb2c] ss:$16 sps:$4 sm:$0xff]  }
 0x4af   : > { %13666 = vmatpush1.bf16.msra.mxu1 %v18464_v58  ;;  %13626 = vmatprep.subr.bf16.mxu0 %v18469_v26  ;;  %v18503_v58 = vld [vmem:[%s19909_s6 + $0x928] ss:$16 sps:$4 sm:$0xff]  }
 0x4b0   : > { %13667 = vmatprep.subr.bf16.mxu1 %v18472_v30  ;;  %v18506_v26 = vld [vmem:[%s19909_s6 + $0xb28] ss:$16 sps:$4 sm:$0xff]   ;;  %v18511_v30 = vld [vmem:[%s19909_s6 + $0x90c] ss:$16 sps:$4 sm:$0xff]  }
 0x4b2   : > { %13627 = vmatpush2.bf16.msra.mxu0 %v18467_v36  ;;  %v18514_v36 = vld [vmem:[%s19909_s6 + $0xb0c] ss:$16 sps:$4 sm:$0xff]  }
 0x4b3   : > { %13668 = vmatpush2.bf16.msra.mxu1 %v18470_v17  ;;  %13628 = vmatprep.subr.bf16.mxu0 %v18475_v23  ;;  %v18509_v17 = vld [vmem:[%s19909_s6 + $0x908] ss:$16 sps:$4 sm:$0xff]  }
 0x4b4   : > { %13669 = vmatprep.subr.bf16.mxu1 %v18478_v51  ;;  %v18512_v23 = vld [vmem:[%s19909_s6 + $0xb08] ss:$16 sps:$4 sm:$0xff]   ;;  %v18517_v51 = vld [vmem:[%s19909_s6 + $0xcec] ss:$16 sps:$4 sm:$0xff]  }
 0x4b6   : > { %13629 = vmatpush2.bf16.msra.mxu0 %v18473_v57  ;;  %v18520_v57 = vld [vmem:[%s19909_s6 + $0xeec] ss:$16 sps:$4 sm:$0xff]  }
 0x4b7   : > { %13670 = vmatpush2.bf16.msra.mxu1 %v18476_v41  ;;  %13630 = vmatprep.subr.bf16.mxu0 %v18481_v43  ;;  %v18515_v41 = vld [vmem:[%s19909_s6 + $0xce8] ss:$16 sps:$4 sm:$0xff]  }
 0x4b8   : > { %13671 = vmatprep.subr.bf16.mxu1 %v18484_v8  ;;  %v18518_v43 = vld [vmem:[%s19909_s6 + $0xee8] ss:$16 sps:$4 sm:$0xff]   ;;  %v18523_v8 = vld [vmem:[%s19909_s6 + $0xccc] ss:$16 sps:$4 sm:$0xff]  }
 0x4ba   : > { %13631 = vmatpush2.bf16.msra.mxu0 %v18479_v49  ;;  %v18526_v49 = vld [vmem:[%s19909_s6 + $0xecc] ss:$16 sps:$4 sm:$0xff]  }
 0x4bb   : > { %13672 = vmatpush2.bf16.msra.mxu1 %v18482_v62  ;;  %13632 = vmatprep.subr.bf16.mxu0 %v18487_v16 }
 0x4bc   : > { %13673 = vmatprep.subr.bf16.mxu1 %v18490_v60 }
 0x4be   : > { %13633 = vmatpush2.bf16.msra.mxu0 %v18485_v0  ;;  %v18521_v0 = vld [vmem:[%s19909_s6 + $0xcc8] ss:$16 sps:$4 sm:$0xff]  }
 0x4bf   : > { %13674 = vmatpush2.bf16.msra.mxu1 %v18488_v32  ;;  %13634 = vmatprep.subr.bf16.mxu0 %v18493_v10  ;;  %v18524_v32 = vld [vmem:[%s19909_s6 + $0xec8] ss:$16 sps:$4 sm:$0xff]  }
 0x4c0   : > { %13675 = vmatprep.subr.bf16.mxu1 %v18496_v3 }
 0x4c2   : > { %13635 = vmatpush2.bf16.msra.mxu0 %v18491_v46  ;;  %v18529_v46 = vld [vmem:[%s19909_s6 + $0xcac] ss:$16 sps:$4 sm:$0xff]  }
 0x4c3   : > { %13676 = vmatpush2.bf16.msra.mxu1 %v18494_v27  ;;  %13636 = vmatprep.subr.bf16.mxu0 %v18499_v29  ;;  %v18532_v27 = vld [vmem:[%s19909_s6 + $0xeac] ss:$16 sps:$4 sm:$0xff]  }
 0x4c4   : > { %13677 = vmatprep.subr.bf16.mxu1 %v18502_v14 }
 0x4c6   : > { %13637 = vmatpush2.bf16.msra.mxu0 %v18497_v13  ;;  %v18527_v13 = vld [vmem:[%s19909_s6 + $0xca8] ss:$16 sps:$4 sm:$0xff]  }
 0x4c7   : > { %13678 = vmatpush2.bf16.msra.mxu1 %v18500_v18  ;;  %13638 = vmatprep.subr.bf16.mxu0 %v18505_v40  ;;  %v18530_v18 = vld [vmem:[%s19909_s6 + $0xea8] ss:$16 sps:$4 sm:$0xff]  }
 0x4c8   : > { %13679 = vmatprep.subr.bf16.mxu1 %v18508_v47 }
 0x4ca   : > { %13639 = vmatpush2.bf16.msra.mxu0 %v18503_v58 }
 0x4cb   : > { %13680 = vmatpush2.bf16.msra.mxu1 %v18506_v26  ;;  %13640 = vmatprep.subr.bf16.mxu0 %v18511_v30  ;;  %v18533_v30 = vld [vmem:[%s19909_s6 + $0xc88] ss:$16 sps:$4 sm:$0xff]  }
 0x4cc   : > { %13681 = vmatprep.subr.bf16.mxu1 %v18514_v36  ;;  %v18536_v36 = vld [vmem:[%s19909_s6 + $0xe88] ss:$16 sps:$4 sm:$0xff]  }
 0x4ce   : > { %13641 = vmatpush2.bf16.msra.mxu0 %v18509_v17  ;;  %v18541_v17 = vld [vmem:[%s19909_s6 + $0xc6c] ss:$16 sps:$4 sm:$0xff]  }
 0x4cf   : > { %13682 = vmatpush2.bf16.msra.mxu1 %v18512_v23  ;;  %13692 = vmatprep.subr.bf16.mxu0 %v18517_v51  ;;  %v18544_v23 = vld [vmem:[%s19909_s6 + $0xe6c] ss:$16 sps:$4 sm:$0xff]   ;;  %v18539_v51 = vld [vmem:[%s19909_s6 + $0xc68] ss:$16 sps:$4 sm:$0xff]  }
 0x4d0   : > { %13733 = vmatprep.subr.bf16.mxu1 %v18520_v57  ;;  %v18542_v57 = vld [vmem:[%s19909_s6 + $0xe68] ss:$16 sps:$4 sm:$0xff]  }
 0x4d1   : > { %v13398_v62 = vpop.f32.mrf.mxu0  ;;  %13643 = vmatmul.mubr.bf16.vlgmr.msra.gmra.mxu0 %v20192_v50 }
 0x4d2   : > { %v13439_v16 = vpop.f32.mrf.mxu1  ;;  %13684 = vmatmul.mubr.bf16.vlgmr.msra.gmra.mxu1 %v20202_v55  ;;  %v13399_v60 = vadd.f32 %v13398_v62, %v21520_v45  ;;  %13693 = vmatpush1.bf16.msra.mxu0 %v18515_v41  ;;  %v18547_v41 = vld [vmem:[%s19909_s6 + $0xc4c] ss:$16 sps:$4 sm:$0xff]  }
 0x4d3   : > { %13734 = vmatpush1.bf16.msra.mxu1 %v18518_v43  ;;  %v13400_v10 = vpop.f32.mrf.mxu0  ;;  %13694 = vmatprep.subr.bf16.mxu0 %v18523_v8  ;;  %v18550_v43 = vld [vmem:[%s19909_s6 + $0xe4c] ss:$16 sps:$4 sm:$0xff]   ;;  %v18545_v8 = vld [vmem:[%s19909_s6 + $0xc48] ss:$16 sps:$4 sm:$0xff]  }
 0x4d4   : > { %v13441_v3 = vpop.f32.mrf.mxu1  ;;  %13735 = vmatprep.subr.bf16.mxu1 %v18526_v49  ;;  %v13440_v29 = vadd.f32 %v13439_v16, %v13399_v60  ;;  %v13401_v50 = vadd.f32 %v13400_v10, %v21525_v38  ;;  %13724 = vmatprep.mubr.bf16.mxu0 %v20198_v54  ;;  %v18535_v38 = vld [vmem:[%s19909_s6 + $0xc8c] ss:$16 sps:$4 sm:$0xff]   ;;  %v18548_v49 = vld [vmem:[%s19909_s6 + $0xe48] ss:$16 sps:$4 sm:$0xff]  }
 0x4d5   : > { %13765 = vmatprep.mubr.bf16.mxu1 %v20210_v59  ;;  %v13402_v55 = vpop.f32.mrf.mxu0  ;;  %v18538_v54 = vld [vmem:[%s19909_s6 + $0xe8c] ss:$16 sps:$4 sm:$0xff]   ;;  %v18551_v60 = vld [vmem:[%s19909_s6 + $0xc28] ss:$16 sps:$4 sm:$0xff]  }
 0x4d6   : > { %v13443_v45 = vpop.f32.mrf.mxu1  ;;  %v13442_v14 = vadd.f32 %v13441_v3, %v13401_v50  ;;  %13695 = vmatpush1.bf16.msra.mxu0 %v18521_v0  ;;  %v14676_v59 = vmax.f32 %v13440_v29, 0.0  ;;  %v18553_v62 = vld [vmem:[%s19909_s6 + $0xc2c] ss:$16 sps:$4 sm:$0xff]   ;;  %v18554_v0 = vld [vmem:[%s19909_s6 + $0xe28] ss:$16 sps:$4 sm:$0xff]  }
 0x4d7   : > { %13736 = vmatpush1.bf16.msra.mxu1 %v18524_v32  ;;  %v13403_v40 = vpop.f32.mrf.mxu0  ;;  %13696 = vmatprep.subr.bf16.mxu0 %v18529_v46  ;;  %v18556_v16 = vld [vmem:[%s19909_s6 + $0xe2c] ss:$16 sps:$4 sm:$0xff]   ;;  %v18557_v3 = vld [vmem:[%s19909_s6 + $0xc08] ss:$16 sps:$4 sm:$0xff]  }
 0x4d8   : > { %v13444_v47 = vpop.f32.mrf.mxu1  ;;  %13737 = vmatprep.subr.bf16.mxu1 %v18532_v27  ;;  %v14677_v58 = vmax.f32 %v13442_v14, 0.0  ;;  %v18559_v32 = vld [vmem:[%s19909_s6 + $0xc0c] ss:$16 sps:$4 sm:$0xff]   ;;  %v18560_v46 = vld [vmem:[%s19909_s6 + $0xe08] ss:$16 sps:$4 sm:$0xff]  }
 0x4d9   : > { %v18562_v10 = vld [vmem:[%s19909_s6 + $0xe0c] ss:$16 sps:$4 sm:$0xff]   ;;  %v18563_v50 = vld [vmem:[%s19909_s6 + $0xde8] ss:$16 sps:$4 sm:$0xff]  }
 0x4da   : > { %v21601_v26 = vcombine.low %v14676_v59, %v14677_v58  ;;  %13697 = vmatpush1.bf16.msra.mxu0 %v18527_v13  ;;  %v18565_v27 = vld [vmem:[%s19909_s6 + $0xdec] ss:$16 sps:$4 sm:$0xff]   ;;  %v18566_v55 = vld [vmem:[%s19909_s6 + $0xfe8] ss:$16 sps:$4 sm:$0xff]  }
 0x4db   : > { %13738 = vmatpush1.bf16.msra.mxu1 %v18530_v18  ;;  %13698 = vmatprep.subr.bf16.mxu0 %v18535_v38  ;;  %v18568_v29 = vld [vmem:[%s19909_s6 + $0xfec] ss:$16 sps:$4 sm:$0xff]   ;;  %v18569_v13 = vld [vmem:[%s19909_s6 + $0xdc8] ss:$16 sps:$4 sm:$0xff]  }
 0x4dc   : > { %13739 = vmatprep.subr.bf16.mxu1 %v18538_v54  ;;  %v18571_v45 = vld [vmem:[%s19909_s6 + $0xdcc] ss:$16 sps:$4 sm:$0xff]   ;;  %v18572_v18 = vld [vmem:[%s19909_s6 + $0xfc8] ss:$16 sps:$4 sm:$0xff]  }
 0x4dd   : > { %v18574_v14 = vld [vmem:[%s19909_s6 + $0xfcc] ss:$16 sps:$4 sm:$0xff]   ;;  %v18575_v38 = vld [vmem:[%s19909_s6 + $0xda8] ss:$16 sps:$4 sm:$0xff]  }
 0x4de   : > { %13699 = vmatpush1.bf16.msra.mxu0 %v18533_v30  ;;  %v18577_v40 = vld [vmem:[%s19909_s6 + $0xdac] ss:$16 sps:$4 sm:$0xff]   ;;  %v18578_v54 = vld [vmem:[%s19909_s6 + $0xfa8] ss:$16 sps:$4 sm:$0xff]  }
 0x4df   : > { %13740 = vmatpush1.bf16.msra.mxu1 %v18536_v36  ;;  %13700 = vmatprep.subr.bf16.mxu0 %v18541_v17  ;;  %v18580_v47 = vld [vmem:[%s19909_s6 + $0xfac] ss:$16 sps:$4 sm:$0xff]   ;;  %v18581_v30 = vld [vmem:[%s19909_s6 + $0xd88] ss:$16 sps:$4 sm:$0xff]  }
 0x4e0   : > { %13741 = vmatprep.subr.bf16.mxu1 %v18544_v23  ;;  %v18583_v59 = vld [vmem:[%s19909_s6 + $0xd8c] ss:$16 sps:$4 sm:$0xff]   ;;  %v18584_v36 = vld [vmem:[%s19909_s6 + $0xf88] ss:$16 sps:$4 sm:$0xff]  }
 0x4e1   : > { %v18586_v58 = vld [vmem:[%s19909_s6 + $0xf8c] ss:$16 sps:$4 sm:$0xff]  }
 0x4e2   : > { %13701 = vmatpush1.bf16.msra.mxu0 %v18539_v51  ;;  %v18589_v17 = vld [vmem:[%s19909_s6 + $0xd6c] ss:$16 sps:$4 sm:$0xff]   ;;  %v18587_v51 = vld [vmem:[%s19909_s6 + $0xd68] ss:$16 sps:$4 sm:$0xff]  }
 0x4e3   : > { %13742 = vmatpush1.bf16.msra.mxu1 %v18542_v57  ;;  %13702 = vmatprep.subr.bf16.mxu0 %v18547_v41  ;;  %v18592_v23 = vld [vmem:[%s19909_s6 + $0xf6c] ss:$16 sps:$4 sm:$0xff]   ;;  %v18590_v57 = vld [vmem:[%s19909_s6 + $0xf68] ss:$16 sps:$4 sm:$0xff]  }
 0x4e4   : > { %13743 = vmatprep.subr.bf16.mxu1 %v18550_v43  ;;  %v18595_v41 = vld [vmem:[%s19909_s6 + $0xd4c] ss:$16 sps:$4 sm:$0xff]  }
 0x4e5   : > { %v18598_v43 = vld [vmem:[%s19909_s6 + $0xf4c] ss:$16 sps:$4 sm:$0xff]  }
 0x4e6   : > { %13703 = vmatpush1.bf16.msra.mxu0 %v18545_v8  ;;  %v18593_v8 = vld [vmem:[%s19909_s6 + $0xd48] ss:$16 sps:$4 sm:$0xff]  }
 0x4e7   : > { %13744 = vmatpush1.bf16.msra.mxu1 %v18548_v49  ;;  %13704 = vmatprep.subr.bf16.mxu0 %v18553_v62  ;;  %v18596_v49 = vld [vmem:[%s19909_s6 + $0xf48] ss:$16 sps:$4 sm:$0xff]   ;;  %v18601_v62 = vld [vmem:[%s19909_s6 + $0xd2c] ss:$16 sps:$4 sm:$0xff]  }
 0x4e8   : > { %13745 = vmatprep.subr.bf16.mxu1 %v18556_v16  ;;  %v18604_v16 = vld [vmem:[%s19909_s6 + $0xf2c] ss:$16 sps:$4 sm:$0xff]  }
 0x4ea   : > { %13705 = vmatpush1.bf16.msra.mxu0 %v18551_v60  ;;  %v18599_v60 = vld [vmem:[%s19909_s6 + $0xd28] ss:$16 sps:$4 sm:$0xff]  }
 0x4eb   : > { %13746 = vmatpush1.bf16.msra.mxu1 %v18554_v0  ;;  %13706 = vmatprep.subr.bf16.mxu0 %v18559_v32  ;;  %v18602_v0 = vld [vmem:[%s19909_s6 + $0xf28] ss:$16 sps:$4 sm:$0xff]   ;;  %v18607_v32 = vld [vmem:[%s19909_s6 + $0xd0c] ss:$16 sps:$4 sm:$0xff]  }
 0x4ec   : > { %13747 = vmatprep.subr.bf16.mxu1 %v18562_v10  ;;  %v18610_v10 = vld [vmem:[%s19909_s6 + $0xf0c] ss:$16 sps:$4 sm:$0xff]  }
 0x4ee   : > { %13707 = vmatpush1.bf16.msra.mxu0 %v18557_v3  ;;  %v18605_v3 = vld [vmem:[%s19909_s6 + $0xd08] ss:$16 sps:$4 sm:$0xff]  }
 0x4ef   : > { %13748 = vmatpush1.bf16.msra.mxu1 %v18560_v46  ;;  %13708 = vmatprep.subr.bf16.mxu0 %v18565_v27  ;;  %v18608_v46 = vld [vmem:[%s19909_s6 + $0xf08] ss:$16 sps:$4 sm:$0xff]   ;;  %v2171_v27 = vsub.s32 2, %v19960_v42 }
 0x4f0   : > { %13749 = vmatprep.subr.bf16.mxu1 %v18568_v29  ;;  %v18613_v29 = vld [vmem:[%s19909_s6 + $0x10ec] ss:$16 sps:$4 sm:$0xff]  }
 0x4f2   : > { %13709 = vmatpush2.bf16.msra.mxu0 %v18563_v50  ;;  %v18616_v50 = vld [vmem:[%s19909_s6 + $0x12ec] ss:$16 sps:$4 sm:$0xff]  }
 0x4f3   : > { %13750 = vmatpush2.bf16.msra.mxu1 %v18566_v55  ;;  %13710 = vmatprep.subr.bf16.mxu0 %v18571_v45  ;;  %v2175_v55 = vsub.s32 3, %v19960_v42  ;;  %v19667_v45 = vld [vmem:[%s19915_s30] sm:$0xf] }
 0x4f4   : > { %13751 = vmatprep.subr.bf16.mxu1 %v18574_v14  ;;  %v2172_v14 = vrot.slane %v19667_v45, %v2171_v27  ;;  %v18638_v27 = vld [vmem:[%s19909_s6 + $0x1268] ss:$16 sps:$4 sm:$0xff]  }
 0x4f6   : > { %13711 = vmatpush2.bf16.msra.mxu0 %v18569_v13  ;;  %v18611_v13 = vld [vmem:[%s19909_s6 + $0x10e8] ss:$16 sps:$4 sm:$0xff]  }
 0x4f7   : > { %13752 = vmatpush2.bf16.msra.mxu1 %v18572_v18  ;;  %13712 = vmatprep.subr.bf16.mxu0 %v18577_v40  ;;  %v18614_v18 = vld [vmem:[%s19909_s6 + $0x12e8] ss:$16 sps:$4 sm:$0xff]   ;;  %v18619_v40 = vld [vmem:[%s19909_s6 + $0x10cc] ss:$16 sps:$4 sm:$0xff]  }
 0x4f8   : > { %13753 = vmatprep.subr.bf16.mxu1 %v18580_v47  ;;  %v18622_v47 = vld [vmem:[%s19909_s6 + $0x12cc] ss:$16 sps:$4 sm:$0xff]  }
 0x4fa   : > { %13713 = vmatpush2.bf16.msra.mxu0 %v18575_v38  ;;  %v2176_v38 = vrot.slane %v19667_v45, %v2175_v55  ;;  %v18641_v55 = vld [vmem:[%s19909_s6 + $0x1048] ss:$16 sps:$4 sm:$0xff]  }
 0x4fb   : > { %13754 = vmatpush2.bf16.msra.mxu1 %v18578_v54  ;;  %13714 = vmatprep.subr.bf16.mxu0 %v18583_v59  ;;  %v18644_v45 = vld [vmem:[%s19909_s6 + $0x1248] ss:$16 sps:$4 sm:$0xff]  }
 0x4fc   : > { %13755 = vmatprep.subr.bf16.mxu1 %v18586_v58 }
 0x4fe   : > { %13715 = vmatpush2.bf16.msra.mxu0 %v18581_v30  ;;  %v18617_v30 = vld [vmem:[%s19909_s6 + $0x10c8] ss:$16 sps:$4 sm:$0xff]  }
 0x4ff   : > { %13756 = vmatpush2.bf16.msra.mxu1 %v18584_v36  ;;  %13716 = vmatprep.subr.bf16.mxu0 %v18589_v17  ;;  %v18620_v36 = vld [vmem:[%s19909_s6 + $0x12c8] ss:$16 sps:$4 sm:$0xff]  }
 0x500   : > { %13757 = vmatprep.subr.bf16.mxu1 %v18592_v23 }
 0x502   : > { %13717 = vmatpush2.bf16.msra.mxu0 %v18587_v51  ;;  %v18625_v51 = vld [vmem:[%s19909_s6 + $0x10ac] ss:$16 sps:$4 sm:$0xff]  }
 0x503   : > { %13758 = vmatpush2.bf16.msra.mxu1 %v18590_v57  ;;  %13718 = vmatprep.subr.bf16.mxu0 %v18595_v41  ;;  %v18628_v57 = vld [vmem:[%s19909_s6 + $0x12ac] ss:$16 sps:$4 sm:$0xff]  }
 0x504   : > { %13759 = vmatprep.subr.bf16.mxu1 %v18598_v43 }
 0x506   : > { %13719 = vmatpush2.bf16.msra.mxu0 %v18593_v8 }
 0x507   : > { %13760 = vmatpush2.bf16.msra.mxu1 %v18596_v49  ;;  %13720 = vmatprep.subr.bf16.mxu0 %v18601_v62  ;;  %v18623_v49 = vld [vmem:[%s19909_s6 + $0x10a8] ss:$16 sps:$4 sm:$0xff]  }
 0x508   : > { %13761 = vmatprep.subr.bf16.mxu1 %v18604_v16  ;;  %v18626_v62 = vld [vmem:[%s19909_s6 + $0x12a8] ss:$16 sps:$4 sm:$0xff]  }
 0x50a   : > { %13721 = vmatpush2.bf16.msra.mxu0 %v18599_v60 }
 0x50b   : > { %13762 = vmatpush2.bf16.msra.mxu1 %v18602_v0  ;;  %13722 = vmatprep.subr.bf16.mxu0 %v18607_v32  ;;  %v18629_v0 = vld [vmem:[%s19909_s6 + $0x1088] ss:$16 sps:$4 sm:$0xff]  }
 0x50c   : > { %13763 = vmatprep.subr.bf16.mxu1 %v18610_v10  ;;  %v18632_v32 = vld [vmem:[%s19909_s6 + $0x1288] ss:$16 sps:$4 sm:$0xff]   ;;  %v18637_v10 = vld [vmem:[%s19909_s6 + $0x106c] ss:$16 sps:$4 sm:$0xff]  }
 0x50e   : > { %13723 = vmatpush2.bf16.msra.mxu0 %v18605_v3  ;;  %v18640_v3 = vld [vmem:[%s19909_s6 + $0x126c] ss:$16 sps:$4 sm:$0xff]  }
 0x50f   : > { %13764 = vmatpush2.bf16.msra.mxu1 %v18608_v46  ;;  %13774 = vmatprep.subr.bf16.mxu0 %v18613_v29  ;;  %v18635_v46 = vld [vmem:[%s19909_s6 + $0x1068] ss:$16 sps:$4 sm:$0xff]   ;;  %v18643_v29 = vld [vmem:[%s19909_s6 + $0x104c] ss:$16 sps:$4 sm:$0xff]  }
 0x510   : > { %13815 = vmatprep.subr.bf16.mxu1 %v18616_v50  ;;  %v18646_v50 = vld [vmem:[%s19909_s6 + $0x124c] ss:$16 sps:$4 sm:$0xff]  }
 0x511   : > { %v13480_v54 = vpop.f32.mrf.mxu0  ;;  %13725 = vmatmul.mubr.bf16.vlgmr.msra.gmra.mxu0 %v20288_v15 }
 0x512   : > { %v13521_v59 = vpop.f32.mrf.mxu1  ;;  %13766 = vmatmul.mubr.bf16.vlgmr.msra.gmra.mxu1 %v20299_v24  ;;  %v13481_v58 = vadd.f32 %v13480_v54, %v2172_v14  ;;  %13775 = vmatpush1.bf16.msra.mxu0 %v18611_v13  ;;  %v18649_v14 = vld [vmem:[%s19909_s6 + $0x102c] ss:$16 sps:$4 sm:$0xff]   ;;  %v18653_v54 = vld [vmem:[%s19909_s6 + $0x1008] ss:$16 sps:$4 sm:$0xff]  }
 0x513   : > { %13816 = vmatpush1.bf16.msra.mxu1 %v18614_v18  ;;  %v13482_v17 = vpop.f32.mrf.mxu0  ;;  %13776 = vmatprep.subr.bf16.mxu0 %v18619_v40  ;;  %v18652_v13 = vld [vmem:[%s19909_s6 + $0x122c] ss:$16 sps:$4 sm:$0xff]   ;;  %v18647_v18 = vld [vmem:[%s19909_s6 + $0x1028] ss:$16 sps:$4 sm:$0xff]  }
 0x514   : > { %v13523_v23 = vpop.f32.mrf.mxu1  ;;  %13817 = vmatprep.subr.bf16.mxu1 %v18622_v47  ;;  %v21668_v41 = vadd.f32 %v13521_v59, %v13481_v58  ;;  %v13483_v15 = vadd.f32 %v13482_v17, %v2176_v38  ;;  %13806 = vmatprep.mubr.bf16.mxu0 %v20295_v22  ;;  %v18631_v22 = vld [vmem:[%s19909_s6 + $0x108c] ss:$16 sps:$4 sm:$0xff]   ;;  %v18650_v40 = vld [vmem:[%s19909_s6 + $0x1228] ss:$16 sps:$4 sm:$0xff]  }
 0x515   : > { %13847 = vmatprep.mubr.bf16.mxu1 %v20307_v6  ;;  %v13484_v24 = vpop.f32.mrf.mxu0  ;;  %v18634_v6 = vld [vmem:[%s19909_s6 + $0x128c] ss:$16 sps:$4 sm:$0xff]   ;;  %v18656_v59 = vld [vmem:[%s19909_s6 + $0x1208] ss:$16 sps:$4 sm:$0xff]  }
 0x516   : > { %v13525_v43 = vpop.f32.mrf.mxu1  ;;  %v21672_v8 = vadd.f32 %v13523_v23, %v13483_v15  ;;  %13777 = vmatpush1.bf16.msra.mxu0 %v18617_v30  ;;  %v18655_v47 = vld [vmem:[%s19909_s6 + $0x100c] ss:$16 sps:$4 sm:$0xff]   ;;  %v18662_v17 = vld [vmem:[%s19909_s6 + $0x13e8] ss:$16 sps:$4 sm:$0xff]  }
 0x517   : > { %13818 = vmatpush1.bf16.msra.mxu1 %v18620_v36  ;;  %v13485_v16 = vpop.f32.mrf.mxu0  ;;  %13778 = vmatprep.subr.bf16.mxu0 %v18625_v51  ;;  %v18658_v38 = vld [vmem:[%s19909_s6 + $0x120c] ss:$16 sps:$4 sm:$0xff]   ;;  %v18659_v36 = vld [vmem:[%s19909_s6 + $0x11e8] ss:$16 sps:$4 sm:$0xff]  }
 0x518   : > { %v13526_v60 = vpop.f32.mrf.mxu1  ;;  %13819 = vmatprep.subr.bf16.mxu1 %v18628_v57  ;;  %v18661_v58 = vld [vmem:[%s19909_s6 + $0x11ec] ss:$16 sps:$4 sm:$0xff]   ;;  %v18665_v57 = vld [vmem:[%s19909_s6 + $0x11c8] ss:$16 sps:$4 sm:$0xff]  }
 0x519   : > { %v18664_v30 = vld [vmem:[%s19909_s6 + $0x13ec] ss:$16 sps:$4 sm:$0xff]   ;;  %v18668_v15 = vld [vmem:[%s19909_s6 + $0x13c8] ss:$16 sps:$4 sm:$0xff]  }
 0x51a   : > { %13779 = vmatpush1.bf16.msra.mxu0 %v18623_v49  ;;  %v18667_v23 = vld [vmem:[%s19909_s6 + $0x11cc] ss:$16 sps:$4 sm:$0xff]   ;;  %v18671_v49 = vld [vmem:[%s19909_s6 + $0x11a8] ss:$16 sps:$4 sm:$0xff]  }
 0x51b   : > { %13820 = vmatpush1.bf16.msra.mxu1 %v18626_v62  ;;  %13780 = vmatprep.subr.bf16.mxu0 %v18631_v22  ;;  %v18670_v51 = vld [vmem:[%s19909_s6 + $0x13cc] ss:$16 sps:$4 sm:$0xff]   ;;  %v18674_v62 = vld [vmem:[%s19909_s6 + $0x13a8] ss:$16 sps:$4 sm:$0xff]  }
 0x51c   : > { %13821 = vmatprep.subr.bf16.mxu1 %v18634_v6  ;;  %v18673_v24 = vld [vmem:[%s19909_s6 + $0x11ac] ss:$16 sps:$4 sm:$0xff]   ;;  %v18677_v22 = vld [vmem:[%s19909_s6 + $0x1188] ss:$16 sps:$4 sm:$0xff]  }
 0x51d   : > { %v18676_v43 = vld [vmem:[%s19909_s6 + $0x13ac] ss:$16 sps:$4 sm:$0xff]   ;;  %v18680_v6 = vld [vmem:[%s19909_s6 + $0x1388] ss:$16 sps:$4 sm:$0xff]  }
 0x51e   : > { %13781 = vmatpush1.bf16.msra.mxu0 %v18629_v0  ;;  %v18679_v16 = vld [vmem:[%s19909_s6 + $0x118c] ss:$16 sps:$4 sm:$0xff]  }
 0x51f   : > { %13822 = vmatpush1.bf16.msra.mxu1 %v18632_v32  ;;  %13782 = vmatprep.subr.bf16.mxu0 %v18637_v10  ;;  %v18682_v60 = vld [vmem:[%s19909_s6 + $0x138c] ss:$16 sps:$4 sm:$0xff]   ;;  %v18683_v10 = vld [vmem:[%s19909_s6 + $0x1168] ss:$16 sps:$4 sm:$0xff]  }
 0x520   : > { %13823 = vmatprep.subr.bf16.mxu1 %v18640_v3  ;;  %v18685_v0 = vld [vmem:[%s19909_s6 + $0x116c] ss:$16 sps:$4 sm:$0xff]   ;;  %v18686_v3 = vld [vmem:[%s19909_s6 + $0x1368] ss:$16 sps:$4 sm:$0xff]  }
 0x521   : > { %v18688_v32 = vld [vmem:[%s19909_s6 + $0x136c] ss:$16 sps:$4 sm:$0xff]  }
 0x522   : > { %13783 = vmatpush1.bf16.msra.mxu0 %v18635_v46  ;;  %v18691_v46 = vld [vmem:[%s19909_s6 + $0x114c] ss:$16 sps:$4 sm:$0xff]  }
 0x523   : > { %13824 = vmatpush1.bf16.msra.mxu1 %v18638_v27  ;;  %13784 = vmatprep.subr.bf16.mxu0 %v18643_v29  ;;  %v18694_v27 = vld [vmem:[%s19909_s6 + $0x134c] ss:$16 sps:$4 sm:$0xff]   ;;  %v18689_v29 = vld [vmem:[%s19909_s6 + $0x1148] ss:$16 sps:$4 sm:$0xff]  }
 0x524   : > { %13825 = vmatprep.subr.bf16.mxu1 %v18646_v50  ;;  %v18692_v50 = vld [vmem:[%s19909_s6 + $0x1348] ss:$16 sps:$4 sm:$0xff]  }
 0x526   : > { %13785 = vmatpush1.bf16.msra.mxu0 %v18641_v55  ;;  %v18697_v55 = vld [vmem:[%s19909_s6 + $0x112c] ss:$16 sps:$4 sm:$0xff]  }
 0x527   : > { %13826 = vmatpush1.bf16.msra.mxu1 %v18644_v45  ;;  %13786 = vmatprep.subr.bf16.mxu0 %v18649_v14  ;;  %v18700_v45 = vld [vmem:[%s19909_s6 + $0x132c] ss:$16 sps:$4 sm:$0xff]   ;;  %v18695_v14 = vld [vmem:[%s19909_s6 + $0x1128] ss:$16 sps:$4 sm:$0xff]  }
 0x528   : > { %13827 = vmatprep.subr.bf16.mxu1 %v18652_v13  ;;  %v18698_v13 = vld [vmem:[%s19909_s6 + $0x1328] ss:$16 sps:$4 sm:$0xff]  }
 0x52a   : > { %13787 = vmatpush1.bf16.msra.mxu0 %v18647_v18  ;;  %v18703_v18 = vld [vmem:[%s19909_s6 + $0x110c] ss:$16 sps:$4 sm:$0xff]  }
 0x52b   : > { %13828 = vmatpush1.bf16.msra.mxu1 %v18650_v40  ;;  %13788 = vmatprep.subr.bf16.mxu0 %v18655_v47  ;;  %v18706_v40 = vld [vmem:[%s19909_s6 + $0x130c] ss:$16 sps:$4 sm:$0xff]   ;;  %v18701_v47 = vld [vmem:[%s19909_s6 + $0x1108] ss:$16 sps:$4 sm:$0xff]  }
 0x52c   : > { %13829 = vmatprep.subr.bf16.mxu1 %v18658_v38  ;;  %v18704_v38 = vld [vmem:[%s19909_s6 + $0x1308] ss:$16 sps:$4 sm:$0xff]  }
 0x52e   : > { %13789 = vmatpush1.bf16.msra.mxu0 %v18653_v54  ;;  %v18709_v54 = vld [vmem:[%s19909_s6 + $0x14ec] ss:$16 sps:$4 sm:$0xff]  }
 0x52f   : > { %13830 = vmatpush1.bf16.msra.mxu1 %v18656_v59  ;;  %13790 = vmatprep.subr.bf16.mxu0 %v18661_v58  ;;  %v18712_v59 = vld [vmem:[%s19909_s6 + $0x16ec] ss:$16 sps:$4 sm:$0xff]   ;;  %v18707_v58 = vld [vmem:[%s19909_s6 + $0x14e8] ss:$16 sps:$4 sm:$0xff]  }
 0x530   : > { %13831 = vmatprep.subr.bf16.mxu1 %v18664_v30  ;;  %v18710_v30 = vld [vmem:[%s19909_s6 + $0x16e8] ss:$16 sps:$4 sm:$0xff]  }
 0x532   : > { %13791 = vmatpush2.bf16.msra.mxu0 %v18659_v36  ;;  %v18715_v36 = vld [vmem:[%s19909_s6 + $0x14cc] ss:$16 sps:$4 sm:$0xff]  }
 0x533   : > { %13832 = vmatpush2.bf16.msra.mxu1 %v18662_v17  ;;  %13792 = vmatprep.subr.bf16.mxu0 %v18667_v23  ;;  %v18718_v17 = vld [vmem:[%s19909_s6 + $0x16cc] ss:$16 sps:$4 sm:$0xff]  }
 0x534   : > { %13833 = vmatprep.subr.bf16.mxu1 %v18670_v51 }
 0x536   : > { %13793 = vmatpush2.bf16.msra.mxu0 %v18665_v57 }
 0x537   : > { %13834 = vmatpush2.bf16.msra.mxu1 %v18668_v15  ;;  %13794 = vmatprep.subr.bf16.mxu0 %v18673_v24  ;;  %v18713_v15 = vld [vmem:[%s19909_s6 + $0x14c8] ss:$16 sps:$4 sm:$0xff]  }
 0x538   : > { %13835 = vmatprep.subr.bf16.mxu1 %v18676_v43  ;;  %v18716_v24 = vld [vmem:[%s19909_s6 + $0x16c8] ss:$16 sps:$4 sm:$0xff]  }
 0x53a   : > { %13795 = vmatpush2.bf16.msra.mxu0 %v18671_v49 }
 0x53b   : > { %13836 = vmatpush2.bf16.msra.mxu1 %v18674_v62  ;;  %13796 = vmatprep.subr.bf16.mxu0 %v18679_v16  ;;  %v18721_v62 = vld [vmem:[%s19909_s6 + $0x14ac] ss:$16 sps:$4 sm:$0xff]  }
 0x53c   : > { %13837 = vmatprep.subr.bf16.mxu1 %v18682_v60  ;;  %v18724_v16 = vld [vmem:[%s19909_s6 + $0x16ac] ss:$16 sps:$4 sm:$0xff]  }
 0x53e   : > { %13797 = vmatpush2.bf16.msra.mxu0 %v18677_v22 }
 0x53f   : > { %13838 = vmatpush2.bf16.msra.mxu1 %v18680_v6  ;;  %13798 = vmatprep.subr.bf16.mxu0 %v18685_v0  ;;  %v18719_v6 = vld [vmem:[%s19909_s6 + $0x14a8] ss:$16 sps:$4 sm:$0xff]  }
 0x540   : > { %13839 = vmatprep.subr.bf16.mxu1 %v18688_v32  ;;  %v18722_v0 = vld [vmem:[%s19909_s6 + $0x16a8] ss:$16 sps:$4 sm:$0xff]  }
 0x542   : > { %13799 = vmatpush2.bf16.msra.mxu0 %v18683_v10 }
 0x543   : > { %13840 = vmatpush2.bf16.msra.mxu1 %v18686_v3  ;;  %13800 = vmatprep.subr.bf16.mxu0 %v18691_v46  ;;  %v18728_v3 = vld [vmem:[%s19909_s6 + $0x1688] ss:$16 sps:$4 sm:$0xff]   ;;  %v18733_v46 = vld [vmem:[%s19909_s6 + $0x146c] ss:$16 sps:$4 sm:$0xff]  }
 0x544   : > { %13841 = vmatprep.subr.bf16.mxu1 %v18694_v27  ;;  %v18736_v27 = vld [vmem:[%s19909_s6 + $0x166c] ss:$16 sps:$4 sm:$0xff]  }
 0x546   : > { %13801 = vmatpush2.bf16.msra.mxu0 %v18689_v29  ;;  %v18731_v29 = vld [vmem:[%s19909_s6 + $0x1468] ss:$16 sps:$4 sm:$0xff]  }
 0x547   : > { %13842 = vmatpush2.bf16.msra.mxu1 %v18692_v50  ;;  %13802 = vmatprep.subr.bf16.mxu0 %v18697_v55  ;;  %v18734_v50 = vld [vmem:[%s19909_s6 + $0x1668] ss:$16 sps:$4 sm:$0xff]   ;;  %v18739_v55 = vld [vmem:[%s19909_s6 + $0x144c] ss:$16 sps:$4 sm:$0xff]  }
 0x548   : > { %13843 = vmatprep.subr.bf16.mxu1 %v18700_v45  ;;  %v18742_v45 = vld [vmem:[%s19909_s6 + $0x164c] ss:$16 sps:$4 sm:$0xff]  }
 0x54a   : > { %13803 = vmatpush2.bf16.msra.mxu0 %v18695_v14  ;;  %v18737_v14 = vld [vmem:[%s19909_s6 + $0x1448] ss:$16 sps:$4 sm:$0xff]  }
 0x54b   : > { %13844 = vmatpush2.bf16.msra.mxu1 %v18698_v13  ;;  %13804 = vmatprep.subr.bf16.mxu0 %v18703_v18  ;;  %v18740_v13 = vld [vmem:[%s19909_s6 + $0x1648] ss:$16 sps:$4 sm:$0xff]   ;;  %v18745_v18 = vld [vmem:[%s19909_s6 + $0x142c] ss:$16 sps:$4 sm:$0xff]  }
 0x54c   : > { %13845 = vmatprep.subr.bf16.mxu1 %v18706_v40  ;;  %v18748_v40 = vld [vmem:[%s19909_s6 + $0x162c] ss:$16 sps:$4 sm:$0xff]  }
 0x54e   : > { %13805 = vmatpush2.bf16.msra.mxu0 %v18701_v47  ;;  %v18743_v47 = vld [vmem:[%s19909_s6 + $0x1428] ss:$16 sps:$4 sm:$0xff]  }
 0x54f   : > { %13846 = vmatpush2.bf16.msra.mxu1 %v18704_v38  ;;  %13856 = vmatprep.subr.bf16.mxu0 %v18709_v54  ;;  %v18746_v38 = vld [vmem:[%s19909_s6 + $0x1628] ss:$16 sps:$4 sm:$0xff]   ;;  %v18751_v54 = vld [vmem:[%s19909_s6 + $0x140c] ss:$16 sps:$4 sm:$0xff]  }
 0x550   : > { %13897 = vmatprep.subr.bf16.mxu1 %v18712_v59  ;;  %v18754_v59 = vld [vmem:[%s19909_s6 + $0x160c] ss:$16 sps:$4 sm:$0xff]  }
 0x551   : > { %v13562_v23 = vpop.f32.mrf.mxu0  ;;  %13807 = vmatmul.mubr.bf16.vlgmr.msra.gmra.mxu0 %v20382_v12 }
 0x552   : > { %v13603_v51 = vpop.f32.mrf.mxu1  ;;  %13848 = vmatmul.mubr.bf16.vlgmr.msra.gmra.mxu1 %v20395_v4  ;;  %v13563_v57 = vadd.f32 %v13562_v23, %v21668_v41  ;;  %13857 = vmatpush1.bf16.msra.mxu0 %v18707_v58  ;;  %v18749_v58 = vld [vmem:[%s19909_s6 + $0x1408] ss:$16 sps:$4 sm:$0xff]  }
 0x553   : > { %13898 = vmatpush1.bf16.msra.mxu1 %v18710_v30  ;;  %v13564_v43 = vpop.f32.mrf.mxu0  ;;  %13858 = vmatprep.subr.bf16.mxu0 %v18715_v36  ;;  %v18752_v30 = vld [vmem:[%s19909_s6 + $0x1608] ss:$16 sps:$4 sm:$0xff]   ;;  %v18757_v36 = vld [vmem:[%s19909_s6 + $0x15ec] ss:$16 sps:$4 sm:$0xff]  }
 0x554   : > { %v13605_v49 = vpop.f32.mrf.mxu1  ;;  %13899 = vmatprep.subr.bf16.mxu1 %v18718_v17  ;;  %v21741_v60 = vadd.f32 %v13603_v51, %v13563_v57  ;;  %v13565_v12 = vadd.f32 %v13564_v43, %v21672_v8  ;;  %13888 = vmatprep.mubr.bf16.mxu0 %v20391_v25  ;;  %v18727_v25 = vld [vmem:[%s19909_s6 + $0x148c] ss:$16 sps:$4 sm:$0xff]   ;;  %v18725_v8 = vld [vmem:[%s19909_s6 + $0x1488] ss:$16 sps:$4 sm:$0xff]  }
 0x555   : > { %13929 = vmatprep.mubr.bf16.mxu1 %v20403_v33  ;;  %v13566_v4 = vpop.f32.mrf.mxu0  ;;  %v18730_v33 = vld [vmem:[%s19909_s6 + $0x168c] ss:$16 sps:$4 sm:$0xff]   ;;  %v18755_v23 = vld [vmem:[%s19909_s6 + $0x15e8] ss:$16 sps:$4 sm:$0xff]  }
 0x556   : > { %v13607_v41 = vpop.f32.mrf.mxu1  ;;  %v21746_v22 = vadd.f32 %v13605_v49, %v13565_v12  ;;  %13859 = vmatpush1.bf16.msra.mxu0 %v18713_v15  ;;  %v18760_v17 = vld [vmem:[%s19909_s6 + $0x17ec] ss:$16 sps:$4 sm:$0xff]   ;;  %v18758_v51 = vld [vmem:[%s19909_s6 + $0x17e8] ss:$16 sps:$4 sm:$0xff]  }
 0x557   : > { %13900 = vmatpush1.bf16.msra.mxu1 %v18716_v24  ;;  %v13567_v32 = vpop.f32.mrf.mxu0  ;;  %13860 = vmatprep.subr.bf16.mxu0 %v18721_v62  ;;  %v18763_v57 = vld [vmem:[%s19909_s6 + $0x15cc] ss:$16 sps:$4 sm:$0xff]   ;;  %v18761_v24 = vld [vmem:[%s19909_s6 + $0x15c8] ss:$16 sps:$4 sm:$0xff]  }
 0x558   : > { %v13608_v10 = vpop.f32.mrf.mxu1  ;;  %13901 = vmatprep.subr.bf16.mxu1 %v18724_v16  ;;  %v18766_v15 = vld [vmem:[%s19909_s6 + $0x17cc] ss:$16 sps:$4 sm:$0xff]   ;;  %v18764_v43 = vld [vmem:[%s19909_s6 + $0x17c8] ss:$16 sps:$4 sm:$0xff]  }
 0x559   : > { %v18769_v49 = vld [vmem:[%s19909_s6 + $0x15ac] ss:$16 sps:$4 sm:$0xff]   ;;  %v18767_v16 = vld [vmem:[%s19909_s6 + $0x15a8] ss:$16 sps:$4 sm:$0xff]  }
 0x55a   : > { %13861 = vmatpush1.bf16.msra.mxu0 %v18719_v6  ;;  %v18772_v62 = vld [vmem:[%s19909_s6 + $0x17ac] ss:$16 sps:$4 sm:$0xff]   ;;  %v18770_v12 = vld [vmem:[%s19909_s6 + $0x17a8] ss:$16 sps:$4 sm:$0xff]  }
 0x55b   : > { %13902 = vmatpush1.bf16.msra.mxu1 %v18722_v0  ;;  %13862 = vmatprep.subr.bf16.mxu0 %v18727_v25  ;;  %v18775_v4 = vld [vmem:[%s19909_s6 + $0x158c] ss:$16 sps:$4 sm:$0xff]   ;;  %v18773_v6 = vld [vmem:[%s19909_s6 + $0x1588] ss:$16 sps:$4 sm:$0xff]  }
 0x55c   : > { %13903 = vmatprep.subr.bf16.mxu1 %v18730_v33  ;;  %v18778_v41 = vld [vmem:[%s19909_s6 + $0x178c] ss:$16 sps:$4 sm:$0xff]   ;;  %v18776_v0 = vld [vmem:[%s19909_s6 + $0x1788] ss:$16 sps:$4 sm:$0xff]  }
 0x55d   : > { %v18781_v32 = vld [vmem:[%s19909_s6 + $0x156c] ss:$16 sps:$4 sm:$0xff]   ;;  %v18779_v25 = vld [vmem:[%s19909_s6 + $0x1568] ss:$16 sps:$4 sm:$0xff]  }
 0x55e   : > { %13863 = vmatpush1.bf16.msra.mxu0 %v18725_v8  ;;  %v18784_v10 = vld [vmem:[%s19909_s6 + $0x176c] ss:$16 sps:$4 sm:$0xff]   ;;  %v18782_v33 = vld [vmem:[%s19909_s6 + $0x1768] ss:$16 sps:$4 sm:$0xff]  }
 0x55f   : > { %13904 = vmatpush1.bf16.msra.mxu1 %v18728_v3  ;;  %13864 = vmatprep.subr.bf16.mxu0 %v18733_v46  ;;  %v18787_v8 = vld [vmem:[%s19909_s6 + $0x154c] ss:$16 sps:$4 sm:$0xff]   ;;  %v18785_v46 = vld [vmem:[%s19909_s6 + $0x1548] ss:$16 sps:$4 sm:$0xff]  }
 0x560   : > { %13905 = vmatprep.subr.bf16.mxu1 %v18736_v27  ;;  %v18790_v3 = vld [vmem:[%s19909_s6 + $0x174c] ss:$16 sps:$4 sm:$0xff]   ;;  %v18788_v27 = vld [vmem:[%s19909_s6 + $0x1748] ss:$16 sps:$4 sm:$0xff]  }
 0x562   : > { %13865 = vmatpush1.bf16.msra.mxu0 %v18731_v29  ;;  %v18793_v29 = vld [vmem:[%s19909_s6 + $0x152c] ss:$16 sps:$4 sm:$0xff]  }
 0x563   : > { %13906 = vmatpush1.bf16.msra.mxu1 %v18734_v50  ;;  %13866 = vmatprep.subr.bf16.mxu0 %v18739_v55  ;;  %v18796_v50 = vld [vmem:[%s19909_s6 + $0x172c] ss:$16 sps:$4 sm:$0xff]   ;;  %v18791_v55 = vld [vmem:[%s19909_s6 + $0x1528] ss:$16 sps:$4 sm:$0xff]  }
 0x564   : > { %13907 = vmatprep.subr.bf16.mxu1 %v18742_v45  ;;  %v18794_v45 = vld [vmem:[%s19909_s6 + $0x1728] ss:$16 sps:$4 sm:$0xff]  }
 0x566   : > { %13867 = vmatpush1.bf16.msra.mxu0 %v18737_v14  ;;  %v18799_v14 = vld [vmem:[%s19909_s6 + $0x150c] ss:$16 sps:$4 sm:$0xff]  }
 0x567   : > { %13908 = vmatpush1.bf16.msra.mxu1 %v18740_v13  ;;  %13868 = vmatprep.subr.bf16.mxu0 %v18745_v18  ;;  %v18802_v13 = vld [vmem:[%s19909_s6 + $0x170c] ss:$16 sps:$4 sm:$0xff]   ;;  %v18797_v18 = vld [vmem:[%s19909_s6 + $0x1508] ss:$16 sps:$4 sm:$0xff]  }
 0x568   : > { %13909 = vmatprep.subr.bf16.mxu1 %v18748_v40  ;;  %v18800_v40 = vld [vmem:[%s19909_s6 + $0x1708] ss:$16 sps:$4 sm:$0xff]  }
 0x56a   : > { %13869 = vmatpush1.bf16.msra.mxu0 %v18743_v47  ;;  %v18805_v47 = vld [vmem:[%s19909_s6 + $0x18ec] ss:$16 sps:$4 sm:$0xff]  }
 0x56b   : > { %13910 = vmatpush1.bf16.msra.mxu1 %v18746_v38  ;;  %13870 = vmatprep.subr.bf16.mxu0 %v18751_v54  ;;  %v18808_v38 = vld [vmem:[%s19909_s6 + $0x1aec] ss:$16 sps:$4 sm:$0xff]   ;;  %v18803_v54 = vld [vmem:[%s19909_s6 + $0x18e8] ss:$16 sps:$4 sm:$0xff]  }
 0x56c   : > { %13911 = vmatprep.subr.bf16.mxu1 %v18754_v59  ;;  %v18806_v59 = vld [vmem:[%s19909_s6 + $0x1ae8] ss:$16 sps:$4 sm:$0xff]  }
 0x56e   : > { %13871 = vmatpush1.bf16.msra.mxu0 %v18749_v58  ;;  %v18811_v58 = vld [vmem:[%s19909_s6 + $0x18cc] ss:$16 sps:$4 sm:$0xff]  }
 0x56f   : > { %13912 = vmatpush1.bf16.msra.mxu1 %v18752_v30  ;;  %13872 = vmatprep.subr.bf16.mxu0 %v18757_v36  ;;  %v18814_v30 = vld [vmem:[%s19909_s6 + $0x1acc] ss:$16 sps:$4 sm:$0xff]  }
 0x570   : > { %13913 = vmatprep.subr.bf16.mxu1 %v18760_v17 }
 0x572   : > { %13873 = vmatpush2.bf16.msra.mxu0 %v18755_v23 }
 0x573   : > { %13914 = vmatpush2.bf16.msra.mxu1 %v18758_v51  ;;  %13874 = vmatprep.subr.bf16.mxu0 %v18763_v57  ;;  %v18809_v51 = vld [vmem:[%s19909_s6 + $0x18c8] ss:$16 sps:$4 sm:$0xff]  }
 0x574   : > { %13915 = vmatprep.subr.bf16.mxu1 %v18766_v15  ;;  %v18812_v57 = vld [vmem:[%s19909_s6 + $0x1ac8] ss:$16 sps:$4 sm:$0xff]  }
 0x576   : > { %13875 = vmatpush2.bf16.msra.mxu0 %v18761_v24 }
 0x577   : > { %13916 = vmatpush2.bf16.msra.mxu1 %v18764_v43  ;;  %13876 = vmatprep.subr.bf16.mxu0 %v18769_v49  ;;  %v18817_v43 = vld [vmem:[%s19909_s6 + $0x18ac] ss:$16 sps:$4 sm:$0xff]  }
 0x578   : > { %13917 = vmatprep.subr.bf16.mxu1 %v18772_v62  ;;  %v18820_v49 = vld [vmem:[%s19909_s6 + $0x1aac] ss:$16 sps:$4 sm:$0xff]  }
 0x57a   : > { %13877 = vmatpush2.bf16.msra.mxu0 %v18767_v16 }
 0x57b   : > { %13918 = vmatpush2.bf16.msra.mxu1 %v18770_v12  ;;  %13878 = vmatprep.subr.bf16.mxu0 %v18775_v4  ;;  %v18815_v12 = vld [vmem:[%s19909_s6 + $0x18a8] ss:$16 sps:$4 sm:$0xff]  }
 0x57c   : > { %13919 = vmatprep.subr.bf16.mxu1 %v18778_v41  ;;  %v18818_v4 = vld [vmem:[%s19909_s6 + $0x1aa8] ss:$16 sps:$4 sm:$0xff]  }
 0x57e   : > { %13879 = vmatpush2.bf16.msra.mxu0 %v18773_v6 }
 0x57f   : > { %13920 = vmatpush2.bf16.msra.mxu1 %v18776_v0  ;;  %13880 = vmatprep.subr.bf16.mxu0 %v18781_v32  ;;  %v18824_v0 = vld [vmem:[%s19909_s6 + $0x1a88] ss:$16 sps:$4 sm:$0xff]   ;;  %v18829_v32 = vld [vmem:[%s19909_s6 + $0x186c] ss:$16 sps:$4 sm:$0xff]  }
 0x580   : > { %13921 = vmatprep.subr.bf16.mxu1 %v18784_v10  ;;  %v18832_v10 = vld [vmem:[%s19909_s6 + $0x1a6c] ss:$16 sps:$4 sm:$0xff]  }
 0x582   : > { %13881 = vmatpush2.bf16.msra.mxu0 %v18779_v25  ;;  %v18827_v25 = vld [vmem:[%s19909_s6 + $0x1868] ss:$16 sps:$4 sm:$0xff]  }
 0x583   : > { %13922 = vmatpush2.bf16.msra.mxu1 %v18782_v33  ;;  %13882 = vmatprep.subr.bf16.mxu0 %v18787_v8  ;;  %v18830_v33 = vld [vmem:[%s19909_s6 + $0x1a68] ss:$16 sps:$4 sm:$0xff]   ;;  %v18835_v8 = vld [vmem:[%s19909_s6 + $0x184c] ss:$16 sps:$4 sm:$0xff]  }
 0x584   : > { %13923 = vmatprep.subr.bf16.mxu1 %v18790_v3  ;;  %v18838_v3 = vld [vmem:[%s19909_s6 + $0x1a4c] ss:$16 sps:$4 sm:$0xff]  }
 0x586   : > { %13883 = vmatpush2.bf16.msra.mxu0 %v18785_v46  ;;  %v18833_v46 = vld [vmem:[%s19909_s6 + $0x1848] ss:$16 sps:$4 sm:$0xff]  }
 0x587   : > { %13924 = vmatpush2.bf16.msra.mxu1 %v18788_v27  ;;  %13884 = vmatprep.subr.bf16.mxu0 %v18793_v29  ;;  %v18836_v27 = vld [vmem:[%s19909_s6 + $0x1a48] ss:$16 sps:$4 sm:$0xff]   ;;  %v18841_v29 = vld [vmem:[%s19909_s6 + $0x182c] ss:$16 sps:$4 sm:$0xff]  }
 0x588   : > { %13925 = vmatprep.subr.bf16.mxu1 %v18796_v50  ;;  %v18844_v50 = vld [vmem:[%s19909_s6 + $0x1a2c] ss:$16 sps:$4 sm:$0xff]  }
 0x58a   : > { %13885 = vmatpush2.bf16.msra.mxu0 %v18791_v55  ;;  %v18839_v55 = vld [vmem:[%s19909_s6 + $0x1828] ss:$16 sps:$4 sm:$0xff]  }
 0x58b   : > { %13926 = vmatpush2.bf16.msra.mxu1 %v18794_v45  ;;  %13886 = vmatprep.subr.bf16.mxu0 %v18799_v14  ;;  %v18842_v45 = vld [vmem:[%s19909_s6 + $0x1a28] ss:$16 sps:$4 sm:$0xff]   ;;  %v18847_v14 = vld [vmem:[%s19909_s6 + $0x180c] ss:$16 sps:$4 sm:$0xff]  }
 0x58c   : > { %13927 = vmatprep.subr.bf16.mxu1 %v18802_v13  ;;  %v18850_v13 = vld [vmem:[%s19909_s6 + $0x1a0c] ss:$16 sps:$4 sm:$0xff]  }
 0x58e   : > { %13887 = vmatpush2.bf16.msra.mxu0 %v18797_v18  ;;  %v18845_v18 = vld [vmem:[%s19909_s6 + $0x1808] ss:$16 sps:$4 sm:$0xff]  }
 0x58f   : > { %13928 = vmatpush2.bf16.msra.mxu1 %v18800_v40  ;;  %13938 = vmatprep.subr.bf16.mxu0 %v18805_v47  ;;  %v18848_v40 = vld [vmem:[%s19909_s6 + $0x1a08] ss:$16 sps:$4 sm:$0xff]   ;;  %v18853_v47 = vld [vmem:[%s19909_s6 + $0x19ec] ss:$16 sps:$4 sm:$0xff]  }
 0x590   : > { %13979 = vmatprep.subr.bf16.mxu1 %v18808_v38  ;;  %v18856_v38 = vld [vmem:[%s19909_s6 + $0x1bec] ss:$16 sps:$4 sm:$0xff]  }
 0x591   : > { %v13644_v36 = vpop.f32.mrf.mxu0  ;;  %13889 = vmatmul.mubr.bf16.vlgmr.msra.gmra.mxu0 %v20482_v20 }
 0x592   : > { %v13685_v17 = vpop.f32.mrf.mxu1  ;;  %13930 = vmatmul.mubr.bf16.vlgmr.msra.gmra.mxu1 %v20495_v7  ;;  %v13645_v23 = vadd.f32 %v13644_v36, %v21741_v60  ;;  %13939 = vmatpush1.bf16.msra.mxu0 %v18803_v54  ;;  %v18851_v54 = vld [vmem:[%s19909_s6 + $0x19e8] ss:$16 sps:$4 sm:$0xff]  }
 0x593   : > { %13980 = vmatpush1.bf16.msra.mxu1 %v18806_v59  ;;  %v13646_v15 = vpop.f32.mrf.mxu0  ;;  %13940 = vmatprep.subr.bf16.mxu0 %v18811_v58  ;;  %v18854_v59 = vld [vmem:[%s19909_s6 + $0x1be8] ss:$16 sps:$4 sm:$0xff]   ;;  %v18859_v58 = vld [vmem:[%s19909_s6 + $0x19cc] ss:$16 sps:$4 sm:$0xff]  }
 0x594   : > { %v13687_v24 = vpop.f32.mrf.mxu1  ;;  %13981 = vmatprep.subr.bf16.mxu1 %v18814_v30  ;;  %v21815_v62 = vadd.f32 %v13685_v17, %v13645_v23  ;;  %v13647_v20 = vadd.f32 %v13646_v15, %v21746_v22  ;;  %13970 = vmatprep.mubr.bf16.mxu0 %v20491_v34  ;;  %v18823_v34 = vld [vmem:[%s19909_s6 + $0x188c] ss:$16 sps:$4 sm:$0xff]   ;;  %v18821_v22 = vld [vmem:[%s19909_s6 + $0x1888] ss:$16 sps:$4 sm:$0xff]  }
 0x595   : > { %14011 = vmatprep.mubr.bf16.mxu1 %v20503_v44  ;;  %v13648_v7 = vpop.f32.mrf.mxu0  ;;  %v18826_v44 = vld [vmem:[%s19909_s6 + $0x1a8c] ss:$16 sps:$4 sm:$0xff]   ;;  %v18857_v36 = vld [vmem:[%s19909_s6 + $0x19c8] ss:$16 sps:$4 sm:$0xff]  }
 0x596   : > { %v13689_v60 = vpop.f32.mrf.mxu1  ;;  %v21820_v16 = vadd.f32 %v13687_v24, %v13647_v20  ;;  %13941 = vmatpush1.bf16.msra.mxu0 %v18809_v51  ;;  %v18862_v30 = vld [vmem:[%s19909_s6 + $0x1bcc] ss:$16 sps:$4 sm:$0xff]   ;;  %v18860_v17 = vld [vmem:[%s19909_s6 + $0x1bc8] ss:$16 sps:$4 sm:$0xff]  }
 0x597   : > { %13982 = vmatpush1.bf16.msra.mxu1 %v18812_v57  ;;  %v13649_v41 = vpop.f32.mrf.mxu0  ;;  %13942 = vmatprep.subr.bf16.mxu0 %v18817_v43  ;;  %v18865_v23 = vld [vmem:[%s19909_s6 + $0x19ac] ss:$16 sps:$4 sm:$0xff]   ;;  %v18863_v57 = vld [vmem:[%s19909_s6 + $0x19a8] ss:$16 sps:$4 sm:$0xff]  }
 0x598   : > { %v13690_v6 = vpop.f32.mrf.mxu1  ;;  %13983 = vmatprep.subr.bf16.mxu1 %v18820_v49  ;;  %v18868_v51 = vld [vmem:[%s19909_s6 + $0x1bac] ss:$16 sps:$4 sm:$0xff]   ;;  %v18866_v15 = vld [vmem:[%s19909_s6 + $0x1ba8] ss:$16 sps:$4 sm:$0xff]  }
 0x599   : > { %v18871_v24 = vld [vmem:[%s19909_s6 + $0x198c] ss:$16 sps:$4 sm:$0xff]   ;;  %v18869_v49 = vld [vmem:[%s19909_s6 + $0x1988] ss:$16 sps:$4 sm:$0xff]  }
 0x59a   : > { %13943 = vmatpush1.bf16.msra.mxu0 %v18815_v12  ;;  %v18874_v43 = vld [vmem:[%s19909_s6 + $0x1b8c] ss:$16 sps:$4 sm:$0xff]   ;;  %v18872_v20 = vld [vmem:[%s19909_s6 + $0x1b88] ss:$16 sps:$4 sm:$0xff]  }
 0x59b   : > { %13984 = vmatpush1.bf16.msra.mxu1 %v18818_v4  ;;  %13944 = vmatprep.subr.bf16.mxu0 %v18823_v34  ;;  %v18877_v7 = vld [vmem:[%s19909_s6 + $0x196c] ss:$16 sps:$4 sm:$0xff]   ;;  %v18875_v12 = vld [vmem:[%s19909_s6 + $0x1968] ss:$16 sps:$4 sm:$0xff]  }
 0x59c   : > { %13985 = vmatprep.subr.bf16.mxu1 %v18826_v44  ;;  %v18880_v60 = vld [vmem:[%s19909_s6 + $0x1b6c] ss:$16 sps:$4 sm:$0xff]   ;;  %v18878_v4 = vld [vmem:[%s19909_s6 + $0x1b68] ss:$16 sps:$4 sm:$0xff]  }
 0x59d   : > { %v18883_v41 = vld [vmem:[%s19909_s6 + $0x194c] ss:$16 sps:$4 sm:$0xff]   ;;  %v18881_v34 = vld [vmem:[%s19909_s6 + $0x1948] ss:$16 sps:$4 sm:$0xff]  }
 0x59e   : > { %13945 = vmatpush1.bf16.msra.mxu0 %v18821_v22  ;;  %v18886_v6 = vld [vmem:[%s19909_s6 + $0x1b4c] ss:$16 sps:$4 sm:$0xff]   ;;  %v18884_v44 = vld [vmem:[%s19909_s6 + $0x1b48] ss:$16 sps:$4 sm:$0xff]  }
 0x59f   : > { %13986 = vmatpush1.bf16.msra.mxu1 %v18824_v0  ;;  %13946 = vmatprep.subr.bf16.mxu0 %v18829_v32  ;;  %v18889_v22 = vld [vmem:[%s19909_s6 + $0x192c] ss:$16 sps:$4 sm:$0xff]   ;;  %v18887_v32 = vld [vmem:[%s19909_s6 + $0x1928] ss:$16 sps:$4 sm:$0xff]  }
 0x5a0   : > { %13987 = vmatprep.subr.bf16.mxu1 %v18832_v10  ;;  %v18892_v0 = vld [vmem:[%s19909_s6 + $0x1b2c] ss:$16 sps:$4 sm:$0xff]   ;;  %v18890_v10 = vld [vmem:[%s19909_s6 + $0x1b28] ss:$16 sps:$4 sm:$0xff]  }
 0x5a2   : > { %13947 = vmatpush1.bf16.msra.mxu0 %v18827_v25  ;;  %v18895_v25 = vld [vmem:[%s19909_s6 + $0x190c] ss:$16 sps:$4 sm:$0xff]  }
 0x5a3   : > { %13988 = vmatpush1.bf16.msra.mxu1 %v18830_v33  ;;  %13948 = vmatprep.subr.bf16.mxu0 %v18835_v8  ;;  %v18898_v33 = vld [vmem:[%s19909_s6 + $0x1b0c] ss:$16 sps:$4 sm:$0xff]   ;;  %v18893_v8 = vld [vmem:[%s19909_s6 + $0x1908] ss:$16 sps:$4 sm:$0xff]  }
 0x5a4   : > { %13989 = vmatprep.subr.bf16.mxu1 %v18838_v3  ;;  %v18896_v3 = vld [vmem:[%s19909_s6 + $0x1b08] ss:$16 sps:$4 sm:$0xff]  }
 0x5a6   : > { %13949 = vmatpush1.bf16.msra.mxu0 %v18833_v46  ;;  %v18901_v46 = vld [vmem:[%s19909_s6 + $0x1cec] ss:$16 sps:$4 sm:$0xff]  }
 0x5a7   : > { %13990 = vmatpush1.bf16.msra.mxu1 %v18836_v27  ;;  %13950 = vmatprep.subr.bf16.mxu0 %v18841_v29  ;;  %v18904_v27 = vld [vmem:[%s19909_s6 + $0x1eec] ss:$16 sps:$4 sm:$0xff]   ;;  %v18899_v29 = vld [vmem:[%s19909_s6 + $0x1ce8] ss:$16 sps:$4 sm:$0xff]  }
 0x5a8   : > { %13991 = vmatprep.subr.bf16.mxu1 %v18844_v50  ;;  %v18902_v50 = vld [vmem:[%s19909_s6 + $0x1ee8] ss:$16 sps:$4 sm:$0xff]  }
 0x5aa   : > { %13951 = vmatpush1.bf16.msra.mxu0 %v18839_v55  ;;  %v18907_v55 = vld [vmem:[%s19909_s6 + $0x1ccc] ss:$16 sps:$4 sm:$0xff]  }
 0x5ab   : > { %13992 = vmatpush1.bf16.msra.mxu1 %v18842_v45  ;;  %13952 = vmatprep.subr.bf16.mxu0 %v18847_v14  ;;  %v18910_v45 = vld [vmem:[%s19909_s6 + $0x1ecc] ss:$16 sps:$4 sm:$0xff]  }
 0x5ac   : > { %13993 = vmatprep.subr.bf16.mxu1 %v18850_v13 }
 0x5ae   : > { %13953 = vmatpush1.bf16.msra.mxu0 %v18845_v18 }
 0x5af   : > { %13994 = vmatpush1.bf16.msra.mxu1 %v18848_v40  ;;  %13954 = vmatprep.subr.bf16.mxu0 %v18853_v47  ;;  %v18905_v40 = vld [vmem:[%s19909_s6 + $0x1cc8] ss:$16 sps:$4 sm:$0xff]  }
 0x5b0   : > { %13995 = vmatprep.subr.bf16.mxu1 %v18856_v38  ;;  %v18908_v47 = vld [vmem:[%s19909_s6 + $0x1ec8] ss:$16 sps:$4 sm:$0xff]  }
 0x5b2   : > { %13955 = vmatpush2.bf16.msra.mxu0 %v18851_v54 }
 0x5b3   : > { %13996 = vmatpush2.bf16.msra.mxu1 %v18854_v59  ;;  %13956 = vmatprep.subr.bf16.mxu0 %v18859_v58  ;;  %v18913_v59 = vld [vmem:[%s19909_s6 + $0x1cac] ss:$16 sps:$4 sm:$0xff]  }
 0x5b4   : > { %13997 = vmatprep.subr.bf16.mxu1 %v18862_v30  ;;  %v18916_v58 = vld [vmem:[%s19909_s6 + $0x1eac] ss:$16 sps:$4 sm:$0xff]  }
 0x5b6   : > { %13957 = vmatpush2.bf16.msra.mxu0 %v18857_v36 }
 0x5b7   : > { %13998 = vmatpush2.bf16.msra.mxu1 %v18860_v17  ;;  %13958 = vmatprep.subr.bf16.mxu0 %v18865_v23  ;;  %v18911_v17 = vld [vmem:[%s19909_s6 + $0x1ca8] ss:$16 sps:$4 sm:$0xff]  }
 0x5b8   : > { %13999 = vmatprep.subr.bf16.mxu1 %v18868_v51  ;;  %v18914_v23 = vld [vmem:[%s19909_s6 + $0x1ea8] ss:$16 sps:$4 sm:$0xff]  }
 0x5ba   : > { %13959 = vmatpush2.bf16.msra.mxu0 %v18863_v57 }
 0x5bb   : > { %14000 = vmatpush2.bf16.msra.mxu1 %v18866_v15  ;;  %13960 = vmatprep.subr.bf16.mxu0 %v18871_v24  ;;  %v18920_v15 = vld [vmem:[%s19909_s6 + $0x1e88] ss:$16 sps:$4 sm:$0xff]   ;;  %v18925_v24 = vld [vmem:[%s19909_s6 + $0x1c6c] ss:$16 sps:$4 sm:$0xff]  }
 0x5bc   : > { %14001 = vmatprep.subr.bf16.mxu1 %v18874_v43  ;;  %v18928_v43 = vld [vmem:[%s19909_s6 + $0x1e6c] ss:$16 sps:$4 sm:$0xff]  }
 0x5be   : > { %13961 = vmatpush2.bf16.msra.mxu0 %v18869_v49  ;;  %v18923_v49 = vld [vmem:[%s19909_s6 + $0x1c68] ss:$16 sps:$4 sm:$0xff]  }
 0x5bf   : > { %14002 = vmatpush2.bf16.msra.mxu1 %v18872_v20  ;;  %13962 = vmatprep.subr.bf16.mxu0 %v18877_v7  ;;  %v18926_v20 = vld [vmem:[%s19909_s6 + $0x1e68] ss:$16 sps:$4 sm:$0xff]   ;;  %v18931_v7 = vld [vmem:[%s19909_s6 + $0x1c4c] ss:$16 sps:$4 sm:$0xff]  }
 0x5c0   : > { %14003 = vmatprep.subr.bf16.mxu1 %v18880_v60  ;;  %v18934_v60 = vld [vmem:[%s19909_s6 + $0x1e4c] ss:$16 sps:$4 sm:$0xff]  }
 0x5c2   : > { %13963 = vmatpush2.bf16.msra.mxu0 %v18875_v12  ;;  %v18929_v12 = vld [vmem:[%s19909_s6 + $0x1c48] ss:$16 sps:$4 sm:$0xff]  }
 0x5c3   : > { %14004 = vmatpush2.bf16.msra.mxu1 %v18878_v4  ;;  %13964 = vmatprep.subr.bf16.mxu0 %v18883_v41  ;;  %v18932_v4 = vld [vmem:[%s19909_s6 + $0x1e48] ss:$16 sps:$4 sm:$0xff]   ;;  %v18937_v41 = vld [vmem:[%s19909_s6 + $0x1c2c] ss:$16 sps:$4 sm:$0xff]  }
 0x5c4   : > { %14005 = vmatprep.subr.bf16.mxu1 %v18886_v6  ;;  %v18940_v6 = vld [vmem:[%s19909_s6 + $0x1e2c] ss:$16 sps:$4 sm:$0xff]  }
 0x5c6   : > { %13965 = vmatpush2.bf16.msra.mxu0 %v18881_v34  ;;  %v18935_v34 = vld [vmem:[%s19909_s6 + $0x1c28] ss:$16 sps:$4 sm:$0xff]  }
 0x5c7   : > { %14006 = vmatpush2.bf16.msra.mxu1 %v18884_v44  ;;  %13966 = vmatprep.subr.bf16.mxu0 %v18889_v22  ;;  %v18938_v44 = vld [vmem:[%s19909_s6 + $0x1e28] ss:$16 sps:$4 sm:$0xff]   ;;  %v18943_v22 = vld [vmem:[%s19909_s6 + $0x1c0c] ss:$16 sps:$4 sm:$0xff]  }
 0x5c8   : > { %14007 = vmatprep.subr.bf16.mxu1 %v18892_v0  ;;  %v18946_v0 = vld [vmem:[%s19909_s6 + $0x1e0c] ss:$16 sps:$4 sm:$0xff]  }
 0x5ca   : > { %13967 = vmatpush2.bf16.msra.mxu0 %v18887_v32  ;;  %v18941_v32 = vld [vmem:[%s19909_s6 + $0x1c08] ss:$16 sps:$4 sm:$0xff]  }
 0x5cb   : > { %14008 = vmatpush2.bf16.msra.mxu1 %v18890_v10  ;;  %13968 = vmatprep.subr.bf16.mxu0 %v18895_v25  ;;  %v18944_v10 = vld [vmem:[%s19909_s6 + $0x1e08] ss:$16 sps:$4 sm:$0xff]   ;;  %v18949_v25 = vld [vmem:[%s19909_s6 + $0x1dec] ss:$16 sps:$4 sm:$0xff]  }
 0x5cc   : > { %14009 = vmatprep.subr.bf16.mxu1 %v18898_v33  ;;  %v18952_v33 = vld [vmem:[%s19909_s6 + $0x1fec] ss:$16 sps:$4 sm:$0xff]  }
 0x5ce   : > { %13969 = vmatpush2.bf16.msra.mxu0 %v18893_v8  ;;  %v18947_v8 = vld [vmem:[%s19909_s6 + $0x1de8] ss:$16 sps:$4 sm:$0xff]  }
 0x5cf   : > { %14010 = vmatpush2.bf16.msra.mxu1 %v18896_v3  ;;  %14020 = vmatprep.subr.bf16.mxu0 %v18901_v46  ;;  %v18950_v3 = vld [vmem:[%s19909_s6 + $0x1fe8] ss:$16 sps:$4 sm:$0xff]   ;;  %v18955_v46 = vld [vmem:[%s19909_s6 + $0x1dcc] ss:$16 sps:$4 sm:$0xff]  }
 0x5d0   : > { %14061 = vmatprep.subr.bf16.mxu1 %v18904_v27  ;;  %v18958_v27 = vld [vmem:[%s19909_s6 + $0x1fcc] ss:$16 sps:$4 sm:$0xff]  }
 0x5d1   : > { %v13726_v14 = vpop.f32.mrf.mxu0  ;;  %13971 = vmatmul.mubr.bf16.vlgmr.msra.gmra.mxu0 %v20578_v48 }
 0x5d2   : > { %v13767_v13 = vpop.f32.mrf.mxu1  ;;  %14012 = vmatmul.mubr.bf16.vlgmr.msra.gmra.mxu1 %v20591_v9  ;;  %v13727_v18 = vadd.f32 %v13726_v14, %v21815_v62  ;;  %14021 = vmatpush1.bf16.msra.mxu0 %v18899_v29  ;;  %v18953_v29 = vld [vmem:[%s19909_s6 + $0x1dc8] ss:$16 sps:$4 sm:$0xff]  }
 0x5d3   : > { %14062 = vmatpush1.bf16.msra.mxu1 %v18902_v50  ;;  %v13728_v38 = vpop.f32.mrf.mxu0  ;;  %14022 = vmatprep.subr.bf16.mxu0 %v18907_v55  ;;  %v18956_v50 = vld [vmem:[%s19909_s6 + $0x1fc8] ss:$16 sps:$4 sm:$0xff]   ;;  %v18961_v55 = vld [vmem:[%s19909_s6 + $0x1dac] ss:$16 sps:$4 sm:$0xff]  }
 0x5d4   : > { %v13769_v54 = vpop.f32.mrf.mxu1  ;;  %14063 = vmatprep.subr.bf16.mxu1 %v18910_v45  ;;  %v21889_v30 = vadd.f32 %v13767_v13, %v13727_v18  ;;  %v13729_v48 = vadd.f32 %v13728_v38, %v21820_v16  ;;  %14052 = vmatprep.mubr.bf16.mxu0 %v20587_v61  ;;  %v18919_v61 = vld [vmem:[%s19909_s6 + $0x1c8c] ss:$16 sps:$4 sm:$0xff]   ;;  %v18917_v16 = vld [vmem:[%s19909_s6 + $0x1c88] ss:$16 sps:$4 sm:$0xff]  }
 0x5d5   : > { %14093 = vmatprep.mubr.bf16.mxu1 %v20599_v53  ;;  %v13730_v9 = vpop.f32.mrf.mxu0  ;;  %v18922_v53 = vld [vmem:[%s19909_s6 + $0x1e8c] ss:$16 sps:$4 sm:$0xff]   ;;  %v18959_v14 = vld [vmem:[%s19909_s6 + $0x1da8] ss:$16 sps:$4 sm:$0xff]  }
 0x5d6   : > { %v13771_v62 = vpop.f32.mrf.mxu1  ;;  %v21894_v36 = vadd.f32 %v13769_v54, %v13729_v48  ;;  %14023 = vmatpush1.bf16.msra.mxu0 %v18905_v40  ;;  %v18964_v45 = vld [vmem:[%s19909_s6 + $0x1fac] ss:$16 sps:$4 sm:$0xff]   ;;  %v18962_v13 = vld [vmem:[%s19909_s6 + $0x1fa8] ss:$16 sps:$4 sm:$0xff]  }
 0x5d7   : > { %14064 = vmatpush1.bf16.msra.mxu1 %v18908_v47  ;;  %v13731_v51 = vpop.f32.mrf.mxu0  ;;  %14024 = vmatprep.subr.bf16.mxu0 %v18913_v59  ;;  %v18967_v18 = vld [vmem:[%s19909_s6 + $0x1d8c] ss:$16 sps:$4 sm:$0xff]   ;;  %v18965_v47 = vld [vmem:[%s19909_s6 + $0x1d88] ss:$16 sps:$4 sm:$0xff]  }
 0x5d8   : > { %v13772_v57 = vpop.f32.mrf.mxu1  ;;  %14065 = vmatprep.subr.bf16.mxu1 %v18916_v58  ;;  %v18970_v40 = vld [vmem:[%s19909_s6 + $0x1f8c] ss:$16 sps:$4 sm:$0xff]   ;;  %v18968_v38 = vld [vmem:[%s19909_s6 + $0x1f88] ss:$16 sps:$4 sm:$0xff]  }
 0x5d9   : > { %v18973_v54 = vld [vmem:[%s19909_s6 + $0x1d6c] ss:$16 sps:$4 sm:$0xff]   ;;  %v18971_v58 = vld [vmem:[%s19909_s6 + $0x1d68] ss:$16 sps:$4 sm:$0xff]  }
 0x5da   : > { %14025 = vmatpush1.bf16.msra.mxu0 %v18911_v17  ;;  %v18976_v59 = vld [vmem:[%s19909_s6 + $0x1f6c] ss:$16 sps:$4 sm:$0xff]   ;;  %v18974_v48 = vld [vmem:[%s19909_s6 + $0x1f68] ss:$16 sps:$4 sm:$0xff]  }
 0x5db   : > { %14066 = vmatpush1.bf16.msra.mxu1 %v18914_v23  ;;  %14026 = vmatprep.subr.bf16.mxu0 %v18919_v61  ;;  %v18979_v9 = vld [vmem:[%s19909_s6 + $0x1d4c] ss:$16 sps:$4 sm:$0xff]   ;;  %v18977_v17 = vld [vmem:[%s19909_s6 + $0x1d48] ss:$16 sps:$4 sm:$0xff]  }
 0x5dc   : > { %14067 = vmatprep.subr.bf16.mxu1 %v18922_v53  ;;  %v18982_v62 = vld [vmem:[%s19909_s6 + $0x1f4c] ss:$16 sps:$4 sm:$0xff]   ;;  %v18980_v23 = vld [vmem:[%s19909_s6 + $0x1f48] ss:$16 sps:$4 sm:$0xff]  }
 0x5dd   : > { %v18985_v51 = vld [vmem:[%s19909_s6 + $0x1d2c] ss:$16 sps:$4 sm:$0xff]   ;;  %v18983_v61 = vld [vmem:[%s19909_s6 + $0x1d28] ss:$16 sps:$4 sm:$0xff]  }
 0x5de   : > { %14027 = vmatpush1.bf16.msra.mxu0 %v18917_v16  ;;  %v18988_v57 = vld [vmem:[%s19909_s6 + $0x1f2c] ss:$16 sps:$4 sm:$0xff]   ;;  %v18986_v53 = vld [vmem:[%s19909_s6 + $0x1f28] ss:$16 sps:$4 sm:$0xff]  }
 0x5df   : > { %14068 = vmatpush1.bf16.msra.mxu1 %v18920_v15  ;;  %14028 = vmatprep.subr.bf16.mxu0 %v18925_v24  ;;  %v18991_v16 = vld [vmem:[%s19909_s6 + $0x1d0c] ss:$16 sps:$4 sm:$0xff]   ;;  %v18989_v24 = vld [vmem:[%s19909_s6 + $0x1d08] ss:$16 sps:$4 sm:$0xff]  }
 0x5e0   : > { %14069 = vmatprep.subr.bf16.mxu1 %v18928_v43  ;;  %v18994_v15 = vld [vmem:[%s19909_s6 + $0x1f0c] ss:$16 sps:$4 sm:$0xff]   ;;  %v18992_v43 = vld [vmem:[%s19909_s6 + $0x1f08] ss:$16 sps:$4 sm:$0xff]  }
 0x5e2   : > { %14029 = vmatpush1.bf16.msra.mxu0 %v18923_v49  ;;  %v18997_v49 = vld [vmem:[%s19909_s6 + $0x20ec] ss:$16 sps:$4 sm:$0xff]  }
 0x5e3   : > { %14070 = vmatpush1.bf16.msra.mxu1 %v18926_v20  ;;  %14030 = vmatprep.subr.bf16.mxu0 %v18931_v7  ;;  %v19000_v20 = vld [vmem:[%s19909_s6 + $0x22ec] ss:$16 sps:$4 sm:$0xff]   ;;  %v18995_v7 = vld [vmem:[%s19909_s6 + $0x20e8] ss:$16 sps:$4 sm:$0xff]  }
 0x5e4   : > { %14071 = vmatprep.subr.bf16.mxu1 %v18934_v60  ;;  %v18998_v60 = vld [vmem:[%s19909_s6 + $0x22e8] ss:$16 sps:$4 sm:$0xff]  }
 0x5e6   : > { %14031 = vmatpush1.bf16.msra.mxu0 %v18929_v12  ;;  %v19003_v12 = vld [vmem:[%s19909_s6 + $0x20cc] ss:$16 sps:$4 sm:$0xff]  }
 0x5e7   : > { %14072 = vmatpush1.bf16.msra.mxu1 %v18932_v4  ;;  %14032 = vmatprep.subr.bf16.mxu0 %v18937_v41  ;;  %v19006_v4 = vld [vmem:[%s19909_s6 + $0x22cc] ss:$16 sps:$4 sm:$0xff]  }
 0x5e8   : > { %14073 = vmatprep.subr.bf16.mxu1 %v18940_v6 }
 0x5ea   : > { %14033 = vmatpush1.bf16.msra.mxu0 %v18935_v34 }
 0x5eb   : > { %14074 = vmatpush1.bf16.msra.mxu1 %v18938_v44  ;;  %14034 = vmatprep.subr.bf16.mxu0 %v18943_v22  ;;  %v19001_v44 = vld [vmem:[%s19909_s6 + $0x20c8] ss:$16 sps:$4 sm:$0xff]  }
 0x5ec   : > { %14075 = vmatprep.subr.bf16.mxu1 %v18946_v0  ;;  %v19004_v22 = vld [vmem:[%s19909_s6 + $0x22c8] ss:$16 sps:$4 sm:$0xff]  }
 0x5ee   : > { %14035 = vmatpush1.bf16.msra.mxu0 %v18941_v32 }
 0x5ef   : > { %14076 = vmatpush1.bf16.msra.mxu1 %v18944_v10  ;;  %14036 = vmatprep.subr.bf16.mxu0 %v18949_v25  ;;  %v19009_v10 = vld [vmem:[%s19909_s6 + $0x20ac] ss:$16 sps:$4 sm:$0xff]  }
 0x5f0   : > { %14077 = vmatprep.subr.bf16.mxu1 %v18952_v33  ;;  %v19012_v25 = vld [vmem:[%s19909_s6 + $0x22ac] ss:$16 sps:$4 sm:$0xff]  }
 0x5f2   : > { %14037 = vmatpush2.bf16.msra.mxu0 %v18947_v8 }
 0x5f3   : > { %14078 = vmatpush2.bf16.msra.mxu1 %v18950_v3  ;;  %14038 = vmatprep.subr.bf16.mxu0 %v18955_v46  ;;  %v19007_v3 = vld [vmem:[%s19909_s6 + $0x20a8] ss:$16 sps:$4 sm:$0xff]  }
 0x5f4   : > { %14079 = vmatprep.subr.bf16.mxu1 %v18958_v27  ;;  %v19010_v46 = vld [vmem:[%s19909_s6 + $0x22a8] ss:$16 sps:$4 sm:$0xff]  }
 0x5f6   : > { %14039 = vmatpush2.bf16.msra.mxu0 %v18953_v29 }
 0x5f7   : > { %14080 = vmatpush2.bf16.msra.mxu1 %v18956_v50  ;;  %14040 = vmatprep.subr.bf16.mxu0 %v18961_v55  ;;  %v19016_v50 = vld [vmem:[%s19909_s6 + $0x2288] ss:$16 sps:$4 sm:$0xff]   ;;  %v19021_v55 = vld [vmem:[%s19909_s6 + $0x206c] ss:$16 sps:$4 sm:$0xff]  }
 0x5f8   : > { %14081 = vmatprep.subr.bf16.mxu1 %v18964_v45  ;;  %v19024_v45 = vld [vmem:[%s19909_s6 + $0x226c] ss:$16 sps:$4 sm:$0xff]  }
 0x5fa   : > { %14041 = vmatpush2.bf16.msra.mxu0 %v18959_v14  ;;  %v19019_v14 = vld [vmem:[%s19909_s6 + $0x2068] ss:$16 sps:$4 sm:$0xff]  }
 0x5fb   : > { %14082 = vmatpush2.bf16.msra.mxu1 %v18962_v13  ;;  %14042 = vmatprep.subr.bf16.mxu0 %v18967_v18  ;;  %v19022_v13 = vld [vmem:[%s19909_s6 + $0x2268] ss:$16 sps:$4 sm:$0xff]   ;;  %v19027_v18 = vld [vmem:[%s19909_s6 + $0x204c] ss:$16 sps:$4 sm:$0xff]  }
 0x5fc   : > { %14083 = vmatprep.subr.bf16.mxu1 %v18970_v40  ;;  %v19030_v40 = vld [vmem:[%s19909_s6 + $0x224c] ss:$16 sps:$4 sm:$0xff]  }
 0x5fe   : > { %14043 = vmatpush2.bf16.msra.mxu0 %v18965_v47  ;;  %v19025_v47 = vld [vmem:[%s19909_s6 + $0x2048] ss:$16 sps:$4 sm:$0xff]  }
 0x5ff   : > { %14084 = vmatpush2.bf16.msra.mxu1 %v18968_v38  ;;  %14044 = vmatprep.subr.bf16.mxu0 %v18973_v54  ;;  %v19028_v38 = vld [vmem:[%s19909_s6 + $0x2248] ss:$16 sps:$4 sm:$0xff]   ;;  %v19033_v54 = vld [vmem:[%s19909_s6 + $0x202c] ss:$16 sps:$4 sm:$0xff]  }
 0x600   : > { %14085 = vmatprep.subr.bf16.mxu1 %v18976_v59  ;;  %v19036_v59 = vld [vmem:[%s19909_s6 + $0x222c] ss:$16 sps:$4 sm:$0xff]  }
 0x602   : > { %14045 = vmatpush2.bf16.msra.mxu0 %v18971_v58  ;;  %v19031_v58 = vld [vmem:[%s19909_s6 + $0x2028] ss:$16 sps:$4 sm:$0xff]  }
 0x603   : > { %14086 = vmatpush2.bf16.msra.mxu1 %v18974_v48  ;;  %14046 = vmatprep.subr.bf16.mxu0 %v18979_v9  ;;  %v19034_v48 = vld [vmem:[%s19909_s6 + $0x2228] ss:$16 sps:$4 sm:$0xff]   ;;  %v19039_v9 = vld [vmem:[%s19909_s6 + $0x200c] ss:$16 sps:$4 sm:$0xff]  }
 0x604   : > { %14087 = vmatprep.subr.bf16.mxu1 %v18982_v62  ;;  %v19042_v62 = vld [vmem:[%s19909_s6 + $0x220c] ss:$16 sps:$4 sm:$0xff]  }
 0x606   : > { %14047 = vmatpush2.bf16.msra.mxu0 %v18977_v17  ;;  %v19037_v17 = vld [vmem:[%s19909_s6 + $0x2008] ss:$16 sps:$4 sm:$0xff]  }
 0x607   : > { %14088 = vmatpush2.bf16.msra.mxu1 %v18980_v23  ;;  %14048 = vmatprep.subr.bf16.mxu0 %v18985_v51  ;;  %v19040_v23 = vld [vmem:[%s19909_s6 + $0x2208] ss:$16 sps:$4 sm:$0xff]   ;;  %v19045_v51 = vld [vmem:[%s19909_s6 + $0x21ec] ss:$16 sps:$4 sm:$0xff]  }
 0x608   : > { %14089 = vmatprep.subr.bf16.mxu1 %v18988_v57  ;;  %v19048_v57 = vld [vmem:[%s19909_s6 + $0x23ec] ss:$16 sps:$4 sm:$0xff]  }
 0x60a   : > { %14049 = vmatpush2.bf16.msra.mxu0 %v18983_v61  ;;  %v19043_v61 = vld [vmem:[%s19909_s6 + $0x21e8] ss:$16 sps:$4 sm:$0xff]  }
 0x60b   : > { %14090 = vmatpush2.bf16.msra.mxu1 %v18986_v53  ;;  %14050 = vmatprep.subr.bf16.mxu0 %v18991_v16  ;;  %v19046_v53 = vld [vmem:[%s19909_s6 + $0x23e8] ss:$16 sps:$4 sm:$0xff]   ;;  %v19051_v16 = vld [vmem:[%s19909_s6 + $0x21cc] ss:$16 sps:$4 sm:$0xff]  }
 0x60c   : > { %14091 = vmatprep.subr.bf16.mxu1 %v18994_v15  ;;  %v19054_v15 = vld [vmem:[%s19909_s6 + $0x23cc] ss:$16 sps:$4 sm:$0xff]  }
 0x60e   : > { %14051 = vmatpush2.bf16.msra.mxu0 %v18989_v24  ;;  %v19049_v24 = vld [vmem:[%s19909_s6 + $0x21c8] ss:$16 sps:$4 sm:$0xff]  }
 0x60f   : > { %14092 = vmatpush2.bf16.msra.mxu1 %v18992_v43  ;;  %14102 = vmatprep.subr.bf16.mxu0 %v18997_v49  ;;  %v19052_v43 = vld [vmem:[%s19909_s6 + $0x23c8] ss:$16 sps:$4 sm:$0xff]   ;;  %v19057_v49 = vld [vmem:[%s19909_s6 + $0x21ac] ss:$16 sps:$4 sm:$0xff]  }
 0x610   : > { %14143 = vmatprep.subr.bf16.mxu1 %v19000_v20  ;;  %v19060_v20 = vld [vmem:[%s19909_s6 + $0x23ac] ss:$16 sps:$4 sm:$0xff]  }
 0x611   : > { %v13808_v41 = vpop.f32.mrf.mxu0  ;;  %14053 = vmatmul.mubr.bf16.vlgmr.msra.gmra.mxu0 %v20678_v28 }
 0x612   : > { %v13849_v6 = vpop.f32.mrf.mxu1  ;;  %14094 = vmatmul.mubr.bf16.vlgmr.msra.gmra.mxu1 %v20691_v37  ;;  %v13809_v34 = vadd.f32 %v13808_v41, %v21889_v30  ;;  %14103 = vmatpush1.bf16.msra.mxu0 %v18995_v7  ;;  %v19055_v7 = vld [vmem:[%s19909_s6 + $0x21a8] ss:$16 sps:$4 sm:$0xff]  }
 0x613   : > { %14144 = vmatpush1.bf16.msra.mxu1 %v18998_v60  ;;  %v13810_v0 = vpop.f32.mrf.mxu0  ;;  %14104 = vmatprep.subr.bf16.mxu0 %v19003_v12  ;;  %v19058_v60 = vld [vmem:[%s19909_s6 + $0x23a8] ss:$16 sps:$4 sm:$0xff]   ;;  %v19063_v12 = vld [vmem:[%s19909_s6 + $0x218c] ss:$16 sps:$4 sm:$0xff]  }
 0x614   : > { %v13851_v32 = vpop.f32.mrf.mxu1  ;;  %14145 = vmatprep.subr.bf16.mxu1 %v19006_v4  ;;  %v21963_v33 = vadd.f32 %v13849_v6, %v13809_v34  ;;  %v13811_v28 = vadd.f32 %v13810_v0, %v21894_v36  ;;  %14134 = vmatprep.mubr.bf16.mxu0 %v20687_v39  ;;  %v19015_v39 = vld [vmem:[%s19909_s6 + $0x208c] ss:$16 sps:$4 sm:$0xff]   ;;  %v19013_v36 = vld [vmem:[%s19909_s6 + $0x2088] ss:$16 sps:$4 sm:$0xff]  }
 0x615   : > { %14175 = vmatprep.mubr.bf16.mxu1 %v20699_v52  ;;  %v13812_v37 = vpop.f32.mrf.mxu0  ;;  %v19018_v52 = vld [vmem:[%s19909_s6 + $0x228c] ss:$16 sps:$4 sm:$0xff]   ;;  %v19061_v41 = vld [vmem:[%s19909_s6 + $0x2188] ss:$16 sps:$4 sm:$0xff]  }
 0x616   : > { %v13853_v30 = vpop.f32.mrf.mxu1  ;;  %v21968_v8 = vadd.f32 %v13851_v32, %v13811_v28  ;;  %14105 = vmatpush1.bf16.msra.mxu0 %v19001_v44  ;;  %v19066_v4 = vld [vmem:[%s19909_s6 + $0x238c] ss:$16 sps:$4 sm:$0xff]   ;;  %v19064_v6 = vld [vmem:[%s19909_s6 + $0x2388] ss:$16 sps:$4 sm:$0xff]  }
 0x617   : > { %14146 = vmatpush1.bf16.msra.mxu1 %v19004_v22  ;;  %v13813_v27 = vpop.f32.mrf.mxu0  ;;  %14106 = vmatprep.subr.bf16.mxu0 %v19009_v10  ;;  %v19069_v34 = vld [vmem:[%s19909_s6 + $0x216c] ss:$16 sps:$4 sm:$0xff]   ;;  %v19067_v22 = vld [vmem:[%s19909_s6 + $0x2168] ss:$16 sps:$4 sm:$0xff]  }
 0x618   : > { %v13854_v29 = vpop.f32.mrf.mxu1  ;;  %14147 = vmatprep.subr.bf16.mxu1 %v19012_v25  ;;  %v19072_v44 = vld [vmem:[%s19909_s6 + $0x236c] ss:$16 sps:$4 sm:$0xff]   ;;  %v19070_v0 = vld [vmem:[%s19909_s6 + $0x2368] ss:$16 sps:$4 sm:$0xff]  }
 0x619   : > { %v19075_v32 = vld [vmem:[%s19909_s6 + $0x214c] ss:$16 sps:$4 sm:$0xff]   ;;  %v19073_v25 = vld [vmem:[%s19909_s6 + $0x2148] ss:$16 sps:$4 sm:$0xff]  }
 0x61a   : > { %14107 = vmatpush1.bf16.msra.mxu0 %v19007_v3  ;;  %v19078_v10 = vld [vmem:[%s19909_s6 + $0x234c] ss:$16 sps:$4 sm:$0xff]   ;;  %v19076_v28 = vld [vmem:[%s19909_s6 + $0x2348] ss:$16 sps:$4 sm:$0xff]  }
 0x61b   : > { %14148 = vmatpush1.bf16.msra.mxu1 %v19010_v46  ;;  %14108 = vmatprep.subr.bf16.mxu0 %v19015_v39  ;;  %v19081_v37 = vld [vmem:[%s19909_s6 + $0x212c] ss:$16 sps:$4 sm:$0xff]   ;;  %v19079_v3 = vld [vmem:[%s19909_s6 + $0x2128] ss:$16 sps:$4 sm:$0xff]  }
 0x61c   : > { %14149 = vmatprep.subr.bf16.mxu1 %v19018_v52  ;;  %v19084_v30 = vld [vmem:[%s19909_s6 + $0x232c] ss:$16 sps:$4 sm:$0xff]   ;;  %v19082_v46 = vld [vmem:[%s19909_s6 + $0x2328] ss:$16 sps:$4 sm:$0xff]  }
 0x61d   : > { %v19087_v27 = vld [vmem:[%s19909_s6 + $0x210c] ss:$16 sps:$4 sm:$0xff]   ;;  %v19085_v39 = vld [vmem:[%s19909_s6 + $0x2108] ss:$16 sps:$4 sm:$0xff]  }
 0x61e   : > { %14109 = vmatpush1.bf16.msra.mxu0 %v19013_v36  ;;  %v19090_v29 = vld [vmem:[%s19909_s6 + $0x230c] ss:$16 sps:$4 sm:$0xff]   ;;  %v19088_v52 = vld [vmem:[%s19909_s6 + $0x2308] ss:$16 sps:$4 sm:$0xff]  }
 0x61f   : > { %14150 = vmatpush1.bf16.msra.mxu1 %v19016_v50  ;;  %14110 = vmatprep.subr.bf16.mxu0 %v19021_v55  ;;  %v19093_v36 = vld [vmem:[%s19909_s6 + $0x24ec] ss:$16 sps:$4 sm:$0xff]   ;;  %v19091_v55 = vld [vmem:[%s19909_s6 + $0x24e8] ss:$16 sps:$4 sm:$0xff]  }
 0x620   : > { %14151 = vmatprep.subr.bf16.mxu1 %v19024_v45  ;;  %v19096_v50 = vld [vmem:[%s19909_s6 + $0x26ec] ss:$16 sps:$4 sm:$0xff]   ;;  %v19094_v45 = vld [vmem:[%s19909_s6 + $0x26e8] ss:$16 sps:$4 sm:$0xff]  }
 0x622   : > { %14111 = vmatpush1.bf16.msra.mxu0 %v19019_v14  ;;  %v19099_v14 = vld [vmem:[%s19909_s6 + $0x24cc] ss:$16 sps:$4 sm:$0xff]  }
 0x623   : > { %14152 = vmatpush1.bf16.msra.mxu1 %v19022_v13  ;;  %14112 = vmatprep.subr.bf16.mxu0 %v19027_v18  ;;  %v19102_v13 = vld [vmem:[%s19909_s6 + $0x26cc] ss:$16 sps:$4 sm:$0xff]  }
 0x624   : > { %14153 = vmatprep.subr.bf16.mxu1 %v19030_v40 }
 0x626   : > { %14113 = vmatpush1.bf16.msra.mxu0 %v19025_v47 }
 0x627   : > { %14154 = vmatpush1.bf16.msra.mxu1 %v19028_v38  ;;  %14114 = vmatprep.subr.bf16.mxu0 %v19033_v54  ;;  %v19097_v38 = vld [vmem:[%s19909_s6 + $0x24c8] ss:$16 sps:$4 sm:$0xff]  }
 0x628   : > { %14155 = vmatprep.subr.bf16.mxu1 %v19036_v59  ;;  %v19100_v54 = vld [vmem:[%s19909_s6 + $0x26c8] ss:$16 sps:$4 sm:$0xff]  }
 0x62a   : > { %14115 = vmatpush1.bf16.msra.mxu0 %v19031_v58 }
 0x62b   : > { %14156 = vmatpush1.bf16.msra.mxu1 %v19034_v48  ;;  %14116 = vmatprep.subr.bf16.mxu0 %v19039_v9  ;;  %v19105_v48 = vld [vmem:[%s19909_s6 + $0x24ac] ss:$16 sps:$4 sm:$0xff]  }
 0x62c   : > { %14157 = vmatprep.subr.bf16.mxu1 %v19042_v62  ;;  %v19108_v9 = vld [vmem:[%s19909_s6 + $0x26ac] ss:$16 sps:$4 sm:$0xff]  }
 0x62e   : > { %14117 = vmatpush1.bf16.msra.mxu0 %v19037_v17 }
 0x62f   : > { %14158 = vmatpush1.bf16.msra.mxu1 %v19040_v23  ;;  %14118 = vmatprep.subr.bf16.mxu0 %v19045_v51  ;;  %v19103_v23 = vld [vmem:[%s19909_s6 + $0x24a8] ss:$16 sps:$4 sm:$0xff]  }
 0x630   : > { %14159 = vmatprep.subr.bf16.mxu1 %v19048_v57  ;;  %v19106_v51 = vld [vmem:[%s19909_s6 + $0x26a8] ss:$16 sps:$4 sm:$0xff]  }
 0x632   : > { %14119 = vmatpush2.bf16.msra.mxu0 %v19043_v61 }
 0x633   : > { %14160 = vmatpush2.bf16.msra.mxu1 %v19046_v53  ;;  %14120 = vmatprep.subr.bf16.mxu0 %v19051_v16  ;;  %v19112_v53 = vld [vmem:[%s19909_s6 + $0x2688] ss:$16 sps:$4 sm:$0xff]   ;;  %v19117_v16 = vld [vmem:[%s19909_s6 + $0x246c] ss:$16 sps:$4 sm:$0xff]  }
 0x634   : > { %14161 = vmatprep.subr.bf16.mxu1 %v19054_v15  ;;  %v19120_v15 = vld [vmem:[%s19909_s6 + $0x266c] ss:$16 sps:$4 sm:$0xff]  }
 0x636   : > { %14121 = vmatpush2.bf16.msra.mxu0 %v19049_v24  ;;  %v19115_v24 = vld [vmem:[%s19909_s6 + $0x2468] ss:$16 sps:$4 sm:$0xff]  }
 0x637   : > { %14162 = vmatpush2.bf16.msra.mxu1 %v19052_v43  ;;  %14122 = vmatprep.subr.bf16.mxu0 %v19057_v49  ;;  %v19118_v43 = vld [vmem:[%s19909_s6 + $0x2668] ss:$16 sps:$4 sm:$0xff]   ;;  %v19123_v49 = vld [vmem:[%s19909_s6 + $0x244c] ss:$16 sps:$4 sm:$0xff]  }
 0x638   : > { %14163 = vmatprep.subr.bf16.mxu1 %v19060_v20  ;;  %v19126_v20 = vld [vmem:[%s19909_s6 + $0x264c] ss:$16 sps:$4 sm:$0xff]  }
 0x63a   : > { %14123 = vmatpush2.bf16.msra.mxu0 %v19055_v7  ;;  %v19121_v7 = vld [vmem:[%s19909_s6 + $0x2448] ss:$16 sps:$4 sm:$0xff]  }
 0x63b   : > { %14164 = vmatpush2.bf16.msra.mxu1 %v19058_v60  ;;  %14124 = vmatprep.subr.bf16.mxu0 %v19063_v12  ;;  %v19124_v60 = vld [vmem:[%s19909_s6 + $0x2648] ss:$16 sps:$4 sm:$0xff]   ;;  %v19129_v12 = vld [vmem:[%s19909_s6 + $0x242c] ss:$16 sps:$4 sm:$0xff]  }
 0x63c   : > { %14165 = vmatprep.subr.bf16.mxu1 %v19066_v4  ;;  %v19132_v4 = vld [vmem:[%s19909_s6 + $0x262c] ss:$16 sps:$4 sm:$0xff]  }
 0x63e   : > { %14125 = vmatpush2.bf16.msra.mxu0 %v19061_v41  ;;  %v19127_v41 = vld [vmem:[%s19909_s6 + $0x2428] ss:$16 sps:$4 sm:$0xff]  }
 0x63f   : > { %14166 = vmatpush2.bf16.msra.mxu1 %v19064_v6  ;;  %14126 = vmatprep.subr.bf16.mxu0 %v19069_v34  ;;  %v19130_v6 = vld [vmem:[%s19909_s6 + $0x2628] ss:$16 sps:$4 sm:$0xff]   ;;  %v19135_v34 = vld [vmem:[%s19909_s6 + $0x240c] ss:$16 sps:$4 sm:$0xff]  }
 0x640   : > { %14167 = vmatprep.subr.bf16.mxu1 %v19072_v44  ;;  %v19138_v44 = vld [vmem:[%s19909_s6 + $0x260c] ss:$16 sps:$4 sm:$0xff]  }
 0x642   : > { %14127 = vmatpush2.bf16.msra.mxu0 %v19067_v22  ;;  %v19133_v22 = vld [vmem:[%s19909_s6 + $0x2408] ss:$16 sps:$4 sm:$0xff]  }
 0x643   : > { %14168 = vmatpush2.bf16.msra.mxu1 %v19070_v0  ;;  %14128 = vmatprep.subr.bf16.mxu0 %v19075_v32  ;;  %v19136_v0 = vld [vmem:[%s19909_s6 + $0x2608] ss:$16 sps:$4 sm:$0xff]   ;;  %v19141_v32 = vld [vmem:[%s19909_s6 + $0x25ec] ss:$16 sps:$4 sm:$0xff]  }
 0x644   : > { %14169 = vmatprep.subr.bf16.mxu1 %v19078_v10  ;;  %v19144_v10 = vld [vmem:[%s19909_s6 + $0x27ec] ss:$16 sps:$4 sm:$0xff]  }
 0x646   : > { %14129 = vmatpush2.bf16.msra.mxu0 %v19073_v25  ;;  %v19139_v25 = vld [vmem:[%s19909_s6 + $0x25e8] ss:$16 sps:$4 sm:$0xff]  }
 0x647   : > { %14170 = vmatpush2.bf16.msra.mxu1 %v19076_v28  ;;  %14130 = vmatprep.subr.bf16.mxu0 %v19081_v37  ;;  %v19142_v28 = vld [vmem:[%s19909_s6 + $0x27e8] ss:$16 sps:$4 sm:$0xff]   ;;  %v19147_v37 = vld [vmem:[%s19909_s6 + $0x25cc] ss:$16 sps:$4 sm:$0xff]  }
 0x648   : > { %14171 = vmatprep.subr.bf16.mxu1 %v19084_v30  ;;  %v19150_v30 = vld [vmem:[%s19909_s6 + $0x27cc] ss:$16 sps:$4 sm:$0xff]  }
 0x64a   : > { %14131 = vmatpush2.bf16.msra.mxu0 %v19079_v3  ;;  %v19145_v3 = vld [vmem:[%s19909_s6 + $0x25c8] ss:$16 sps:$4 sm:$0xff]  }
 0x64b   : > { %14172 = vmatpush2.bf16.msra.mxu1 %v19082_v46  ;;  %14132 = vmatprep.subr.bf16.mxu0 %v19087_v27  ;;  %v19148_v46 = vld [vmem:[%s19909_s6 + $0x27c8] ss:$16 sps:$4 sm:$0xff]   ;;  %v19153_v27 = vld [vmem:[%s19909_s6 + $0x25ac] ss:$16 sps:$4 sm:$0xff]  }
 0x64c   : > { %14173 = vmatprep.subr.bf16.mxu1 %v19090_v29  ;;  %v19156_v29 = vld [vmem:[%s19909_s6 + $0x27ac] ss:$16 sps:$4 sm:$0xff]  }
 0x64e   : > { %14133 = vmatpush2.bf16.msra.mxu0 %v19085_v39  ;;  %v19151_v39 = vld [vmem:[%s19909_s6 + $0x25a8] ss:$16 sps:$4 sm:$0xff]  }
 0x64f   : > { %14174 = vmatpush2.bf16.msra.mxu1 %v19088_v52  ;;  %14184 = vmatprep.subr.bf16.mxu0 %v19093_v36  ;;  %v19154_v52 = vld [vmem:[%s19909_s6 + $0x27a8] ss:$16 sps:$4 sm:$0xff]   ;;  %v19159_v36 = vld [vmem:[%s19909_s6 + $0x258c] ss:$16 sps:$4 sm:$0xff]  }
 0x650   : > { %14225 = vmatprep.subr.bf16.mxu1 %v19096_v50  ;;  %v19162_v50 = vld [vmem:[%s19909_s6 + $0x278c] ss:$16 sps:$4 sm:$0xff]  }
 0x651   : > { %v13890_v18 = vpop.f32.mrf.mxu0  ;;  %14135 = vmatmul.mubr.bf16.vlgmr.msra.gmra.mxu0 %v20774_v63 }
 0x652   : > { %v13931_v40 = vpop.f32.mrf.mxu1  ;;  %14176 = vmatmul.mubr.bf16.vlgmr.msra.gmra.mxu1 %v20787_v11  ;;  %v13891_v47 = vadd.f32 %v13890_v18, %v21963_v33  ;;  %14185 = vmatpush1.bf16.msra.mxu0 %v19091_v55  ;;  %v19157_v55 = vld [vmem:[%s19909_s6 + $0x2588] ss:$16 sps:$4 sm:$0xff]  }
 0x653   : > { %14226 = vmatpush1.bf16.msra.mxu1 %v19094_v45  ;;  %v13892_v59 = vpop.f32.mrf.mxu0  ;;  %14186 = vmatprep.subr.bf16.mxu0 %v19099_v14  ;;  %v19160_v45 = vld [vmem:[%s19909_s6 + $0x2788] ss:$16 sps:$4 sm:$0xff]   ;;  %v19165_v14 = vld [vmem:[%s19909_s6 + $0x256c] ss:$16 sps:$4 sm:$0xff]  }
 0x654   : > { %v13933_v58 = vpop.f32.mrf.mxu1  ;;  %14227 = vmatprep.subr.bf16.mxu1 %v19102_v13  ;;  %v22037_v62 = vadd.f32 %v13931_v40, %v13891_v47  ;;  %v13893_v63 = vadd.f32 %v13892_v59, %v21968_v8  ;;  %14216 = vmatprep.mubr.bf16.mxu0 %v20783_v35  ;;  %v19111_v35 = vld [vmem:[%s19909_s6 + $0x248c] ss:$16 sps:$4 sm:$0xff]   ;;  %v19109_v8 = vld [vmem:[%s19909_s6 + $0x2488] ss:$16 sps:$4 sm:$0xff]  }
 0x655   : > { %14257 = vmatprep.mubr.bf16.mxu1 %v20795_v1  ;;  %v13894_v11 = vpop.f32.mrf.mxu0  ;;  %v19114_v1 = vld [vmem:[%s19909_s6 + $0x268c] ss:$16 sps:$4 sm:$0xff]   ;;  %v19163_v18 = vld [vmem:[%s19909_s6 + $0x2568] ss:$16 sps:$4 sm:$0xff]  }
 0x656   : > { %v13935_v33 = vpop.f32.mrf.mxu1  ;;  %v22042_v17 = vadd.f32 %v13933_v58, %v13893_v63  ;;  %14187 = vmatpush1.bf16.msra.mxu0 %v19097_v38  ;;  %v19168_v13 = vld [vmem:[%s19909_s6 + $0x276c] ss:$16 sps:$4 sm:$0xff]   ;;  %v19166_v40 = vld [vmem:[%s19909_s6 + $0x2768] ss:$16 sps:$4 sm:$0xff]  }
 0x657   : > { %14228 = vmatpush1.bf16.msra.mxu1 %v19100_v54  ;;  %v13895_v57 = vpop.f32.mrf.mxu0  ;;  %14188 = vmatprep.subr.bf16.mxu0 %v19105_v48  ;;  %v19171_v47 = vld [vmem:[%s19909_s6 + $0x254c] ss:$16 sps:$4 sm:$0xff]   ;;  %v19169_v54 = vld [vmem:[%s19909_s6 + $0x2548] ss:$16 sps:$4 sm:$0xff]  }
 0x658   : > { %v13936_v61 = vpop.f32.mrf.mxu1  ;;  %14229 = vmatprep.subr.bf16.mxu1 %v19108_v9  ;;  %v19174_v38 = vld [vmem:[%s19909_s6 + $0x274c] ss:$16 sps:$4 sm:$0xff]   ;;  %v19172_v59 = vld [vmem:[%s19909_s6 + $0x2748] ss:$16 sps:$4 sm:$0xff]  }
 0x659   : > { %v19177_v58 = vld [vmem:[%s19909_s6 + $0x252c] ss:$16 sps:$4 sm:$0xff]   ;;  %v19175_v9 = vld [vmem:[%s19909_s6 + $0x2528] ss:$16 sps:$4 sm:$0xff]  }
 0x65a   : > { %14189 = vmatpush1.bf16.msra.mxu0 %v19103_v23  ;;  %v19180_v48 = vld [vmem:[%s19909_s6 + $0x272c] ss:$16 sps:$4 sm:$0xff]   ;;  %v19178_v63 = vld [vmem:[%s19909_s6 + $0x2728] ss:$16 sps:$4 sm:$0xff]  }
 0x65b   : > { %14230 = vmatpush1.bf16.msra.mxu1 %v19106_v51  ;;  %14190 = vmatprep.subr.bf16.mxu0 %v19111_v35  ;;  %v19183_v11 = vld [vmem:[%s19909_s6 + $0x250c] ss:$16 sps:$4 sm:$0xff]   ;;  %v19181_v23 = vld [vmem:[%s19909_s6 + $0x2508] ss:$16 sps:$4 sm:$0xff]  }
 0x65c   : > { %14231 = vmatprep.subr.bf16.mxu1 %v19114_v1  ;;  %v19186_v33 = vld [vmem:[%s19909_s6 + $0x270c] ss:$16 sps:$4 sm:$0xff]   ;;  %v19184_v51 = vld [vmem:[%s19909_s6 + $0x2708] ss:$16 sps:$4 sm:$0xff]  }
 0x65d   : > { %v19189_v57 = vld [vmem:[%s19909_s6 + $0x28ec] ss:$16 sps:$4 sm:$0xff]   ;;  %v19187_v35 = vld [vmem:[%s19909_s6 + $0x28e8] ss:$16 sps:$4 sm:$0xff]  }
 0x65e   : > { %14191 = vmatpush1.bf16.msra.mxu0 %v19109_v8  ;;  %v19192_v61 = vld [vmem:[%s19909_s6 + $0x2aec] ss:$16 sps:$4 sm:$0xff]   ;;  %v19190_v1 = vld [vmem:[%s19909_s6 + $0x2ae8] ss:$16 sps:$4 sm:$0xff]  }
 0x65f   : > { %14232 = vmatpush1.bf16.msra.mxu1 %v19112_v53  ;;  %14192 = vmatprep.subr.bf16.mxu0 %v19117_v16  ;;  %v19195_v8 = vld [vmem:[%s19909_s6 + $0x28cc] ss:$16 sps:$4 sm:$0xff]  }
 0x660   : > { %14233 = vmatprep.subr.bf16.mxu1 %v19120_v15  ;;  %v19198_v53 = vld [vmem:[%s19909_s6 + $0x2acc] ss:$16 sps:$4 sm:$0xff]  }
 0x662   : > { %14193 = vmatpush1.bf16.msra.mxu0 %v19115_v24  ;;  %v22535_v24 = vld [vmem:[#allocation8_spill] sm:$0xff] }
 0x663   : > { %14234 = vmatpush1.bf16.msra.mxu1 %v19118_v43  ;;  %14194 = vmatprep.subr.bf16.mxu0 %v19123_v49  ;;  %v22536_v43 = vld [vmem:[#allocation10_spill] sm:$0xff] }
 0x664   : > { %14235 = vmatprep.subr.bf16.mxu1 %v19126_v20  ;;  %v19193_v20 = vld [vmem:[%s19909_s6 + $0x28c8] ss:$16 sps:$4 sm:$0xff]  }
 0x666   : > { %14195 = vmatpush1.bf16.msra.mxu0 %v19121_v7  ;;  %v19196_v7 = vld [vmem:[%s19909_s6 + $0x2ac8] ss:$16 sps:$4 sm:$0xff]  }
 0x667   : > { %14236 = vmatpush1.bf16.msra.mxu1 %v19124_v60  ;;  %14196 = vmatprep.subr.bf16.mxu0 %v19129_v12 }
 0x668   : > { %14237 = vmatprep.subr.bf16.mxu1 %v19132_v4  ;;  %v19201_v4 = vld [vmem:[%s19909_s6 + $0x28ac] ss:$16 sps:$4 sm:$0xff]  }
 0x66a   : > { %14197 = vmatpush1.bf16.msra.mxu0 %v19127_v41  ;;  %v19204_v41 = vld [vmem:[%s19909_s6 + $0x2aac] ss:$16 sps:$4 sm:$0xff]  }
 0x66b   : > { %14238 = vmatpush1.bf16.msra.mxu1 %v19130_v6  ;;  %14198 = vmatprep.subr.bf16.mxu0 %v19135_v34 }
 0x66c   : > { %14239 = vmatprep.subr.bf16.mxu1 %v19138_v44  ;;  %v22537_v44 = vld [vmem:[#allocation9_spill] sm:$0xff] }
 0x66e   : > { %14199 = vmatpush1.bf16.msra.mxu0 %v19133_v22 }
 0x66f   : > { %14240 = vmatpush1.bf16.msra.mxu1 %v19136_v0  ;;  %14200 = vmatprep.subr.bf16.mxu0 %v19141_v32 }
 0x670   : > { %14241 = vmatprep.subr.bf16.mxu1 %v19144_v10  ;;  %v19199_v10 = vld [vmem:[%s19909_s6 + $0x28a8] ss:$16 sps:$4 sm:$0xff]  }
 0x672   : > { %14201 = vmatpush2.bf16.msra.mxu0 %v19139_v25  ;;  %v19202_v25 = vld [vmem:[%s19909_s6 + $0x2aa8] ss:$16 sps:$4 sm:$0xff]  }
 0x673   : > { %14242 = vmatpush2.bf16.msra.mxu1 %v19142_v28  ;;  %14202 = vmatprep.subr.bf16.mxu0 %v19147_v37 }
 0x674   : > { %14243 = vmatprep.subr.bf16.mxu1 %v19150_v30  ;;  %v19210_v30 = vld [vmem:[%s19909_s6 + $0x2a8c] ss:$16 sps:$4 sm:$0xff]  }
 0x676   : > { %14203 = vmatpush2.bf16.msra.mxu0 %v19145_v3  ;;  %v19205_v3 = vld [vmem:[%s19909_s6 + $0x2888] ss:$16 sps:$4 sm:$0xff]  }
 0x677   : > { %14244 = vmatpush2.bf16.msra.mxu1 %v19148_v46  ;;  %14204 = vmatprep.subr.bf16.mxu0 %v19153_v27  ;;  %v19208_v46 = vld [vmem:[%s19909_s6 + $0x2a88] ss:$16 sps:$4 sm:$0xff]   ;;  %v19213_v27 = vld [vmem:[%s19909_s6 + $0x286c] ss:$16 sps:$4 sm:$0xff]  }
 0x678   : > { %14245 = vmatprep.subr.bf16.mxu1 %v19156_v29  ;;  %v19216_v29 = vld [vmem:[%s19909_s6 + $0x2a6c] ss:$16 sps:$4 sm:$0xff]  }
 0x67a   : > { %14205 = vmatpush2.bf16.msra.mxu0 %v19151_v39  ;;  %v19211_v39 = vld [vmem:[%s19909_s6 + $0x2868] ss:$16 sps:$4 sm:$0xff]  }
 0x67b   : > { %14246 = vmatpush2.bf16.msra.mxu1 %v19154_v52  ;;  %14206 = vmatprep.subr.bf16.mxu0 %v19159_v36  ;;  %v19214_v52 = vld [vmem:[%s19909_s6 + $0x2a68] ss:$16 sps:$4 sm:$0xff]   ;;  %v19219_v36 = vld [vmem:[%s19909_s6 + $0x284c] ss:$16 sps:$4 sm:$0xff]  }
 0x67c   : > { %14247 = vmatprep.subr.bf16.mxu1 %v19162_v50  ;;  %v19222_v50 = vld [vmem:[%s19909_s6 + $0x2a4c] ss:$16 sps:$4 sm:$0xff]  }
 0x67e   : > { %14207 = vmatpush2.bf16.msra.mxu0 %v19157_v55  ;;  %v19217_v55 = vld [vmem:[%s19909_s6 + $0x2848] ss:$16 sps:$4 sm:$0xff]  }
 0x67f   : > { %14248 = vmatpush2.bf16.msra.mxu1 %v19160_v45  ;;  %14208 = vmatprep.subr.bf16.mxu0 %v19165_v14  ;;  %v19220_v45 = vld [vmem:[%s19909_s6 + $0x2a48] ss:$16 sps:$4 sm:$0xff]   ;;  %v19225_v14 = vld [vmem:[%s19909_s6 + $0x282c] ss:$16 sps:$4 sm:$0xff]  }
 0x680   : > { %14249 = vmatprep.subr.bf16.mxu1 %v19168_v13  ;;  %v19228_v13 = vld [vmem:[%s19909_s6 + $0x2a2c] ss:$16 sps:$4 sm:$0xff]  }
 0x682   : > { %14209 = vmatpush2.bf16.msra.mxu0 %v19163_v18  ;;  %v19223_v18 = vld [vmem:[%s19909_s6 + $0x2828] ss:$16 sps:$4 sm:$0xff]  }
 0x683   : > { %14250 = vmatpush2.bf16.msra.mxu1 %v19166_v40  ;;  %14210 = vmatprep.subr.bf16.mxu0 %v19171_v47  ;;  %v19226_v40 = vld [vmem:[%s19909_s6 + $0x2a28] ss:$16 sps:$4 sm:$0xff]   ;;  %v19231_v47 = vld [vmem:[%s19909_s6 + $0x280c] ss:$16 sps:$4 sm:$0xff]  }
 0x684   : > { %14251 = vmatprep.subr.bf16.mxu1 %v19174_v38  ;;  %v19234_v38 = vld [vmem:[%s19909_s6 + $0x2a0c] ss:$16 sps:$4 sm:$0xff]  }
 0x686   : > { %14211 = vmatpush2.bf16.msra.mxu0 %v19169_v54  ;;  %v19229_v54 = vld [vmem:[%s19909_s6 + $0x2808] ss:$16 sps:$4 sm:$0xff]  }
 0x687   : > { %14252 = vmatpush2.bf16.msra.mxu1 %v19172_v59  ;;  %14212 = vmatprep.subr.bf16.mxu0 %v19177_v58  ;;  %v19232_v59 = vld [vmem:[%s19909_s6 + $0x2a08] ss:$16 sps:$4 sm:$0xff]   ;;  %v19237_v58 = vld [vmem:[%s19909_s6 + $0x29ec] ss:$16 sps:$4 sm:$0xff]  }
 0x688   : > { %14253 = vmatprep.subr.bf16.mxu1 %v19180_v48  ;;  %v19240_v48 = vld [vmem:[%s19909_s6 + $0x2bec] ss:$16 sps:$4 sm:$0xff]  }
 0x68a   : > { %14213 = vmatpush2.bf16.msra.mxu0 %v19175_v9  ;;  %v19235_v9 = vld [vmem:[%s19909_s6 + $0x29e8] ss:$16 sps:$4 sm:$0xff]  }
 0x68b   : > { %14254 = vmatpush2.bf16.msra.mxu1 %v19178_v63  ;;  %14214 = vmatprep.subr.bf16.mxu0 %v19183_v11  ;;  %v19238_v63 = vld [vmem:[%s19909_s6 + $0x2be8] ss:$16 sps:$4 sm:$0xff]   ;;  %v19243_v11 = vld [vmem:[%s19909_s6 + $0x29cc] ss:$16 sps:$4 sm:$0xff]  }
 0x68c   : > { %14255 = vmatprep.subr.bf16.mxu1 %v19186_v33  ;;  %v19246_v33 = vld [vmem:[%s19909_s6 + $0x2bcc] ss:$16 sps:$4 sm:$0xff]  }
 0x68e   : > { %14215 = vmatpush2.bf16.msra.mxu0 %v19181_v23  ;;  %v19241_v23 = vld [vmem:[%s19909_s6 + $0x29c8] ss:$16 sps:$4 sm:$0xff]  }
 0x68f   : > { %14256 = vmatpush2.bf16.msra.mxu1 %v19184_v51  ;;  %14266 = vmatprep.subr.bf16.mxu0 %v19189_v57  ;;  %v19244_v51 = vld [vmem:[%s19909_s6 + $0x2bc8] ss:$16 sps:$4 sm:$0xff]   ;;  %v19249_v57 = vld [vmem:[%s19909_s6 + $0x29ac] ss:$16 sps:$4 sm:$0xff]  }
 0x690   : > { %14307 = vmatprep.subr.bf16.mxu1 %v19192_v61  ;;  %v19252_v61 = vld [vmem:[%s19909_s6 + $0x2bac] ss:$16 sps:$4 sm:$0xff]  }
 0x691   : > { %v13972_v16 = vpop.f32.mrf.mxu0  ;;  %14217 = vmatmul.mubr.bf16.vlgmr.msra.gmra.mxu0 %v22535_v24  ;;  %v19261_v24 = vld [vmem:[%s19909_s6 + $0x296c] ss:$16 sps:$4 sm:$0xff]  }
 0x692   : > { %v14013_v15 = vpop.f32.mrf.mxu1  ;;  %14258 = vmatmul.mubr.bf16.vlgmr.msra.gmra.mxu1 %v22536_v43  ;;  %v13973_v49 = vadd.f32 %v13972_v16, %v22037_v62  ;;  %14267 = vmatpush1.bf16.msra.mxu0 %v19187_v35  ;;  %v22538_v62 = vld [vmem:[#allocation11_spill] sm:$0xff]  ;;  %v19247_v35 = vld [vmem:[%s19909_s6 + $0x29a8] ss:$16 sps:$4 sm:$0xff]   ;;  %v19264_v43 = vld [vmem:[%s19909_s6 + $0x2b6c] ss:$16 sps:$4 sm:$0xff]  }
 0x693   : > { %14308 = vmatpush1.bf16.msra.mxu1 %v19190_v1  ;;  %v13974_v60 = vpop.f32.mrf.mxu0  ;;  %14268 = vmatprep.subr.bf16.mxu0 %v19195_v8  ;;  %v19250_v1 = vld [vmem:[%s19909_s6 + $0x2ba8] ss:$16 sps:$4 sm:$0xff]   ;;  %v19255_v8 = vld [vmem:[%s19909_s6 + $0x298c] ss:$16 sps:$4 sm:$0xff]  }
 0x694   : > { %v14015_v12 = vpop.f32.mrf.mxu1  ;;  %14309 = vmatprep.subr.bf16.mxu1 %v19198_v53  ;;  %v22111_v6 = vadd.f32 %v14013_v15, %v13973_v49  ;;  %v13975_v34 = vadd.f32 %v13974_v60, %v22042_v17  ;;  %14298 = vmatprep.mubr.bf16.mxu0 %v22537_v44  ;;  %v19207_v17 = vld [vmem:[%s19909_s6 + $0x288c] ss:$16 sps:$4 sm:$0xff]   ;;  %v19253_v16 = vld [vmem:[%s19909_s6 + $0x2988] ss:$16 sps:$4 sm:$0xff]  }
 0x695   : > { %14339 = vmatprep.mubr.bf16.mxu1 %v22538_v62  ;;  %v13976_v22 = vpop.f32.mrf.mxu0  ;;  %v19258_v53 = vld [vmem:[%s19909_s6 + $0x2b8c] ss:$16 sps:$4 sm:$0xff]   ;;  %v19256_v15 = vld [vmem:[%s19909_s6 + $0x2b88] ss:$16 sps:$4 sm:$0xff]  }
 0x696   : > { %v14017_v0 = vpop.f32.mrf.mxu1  ;;  %v22116_v32 = vadd.f32 %v14015_v12, %v13975_v34  ;;  %14269 = vmatpush1.bf16.msra.mxu0 %v19193_v20  ;;  %v19259_v49 = vld [vmem:[%s19909_s6 + $0x2968] ss:$16 sps:$4 sm:$0xff]   ;;  %v19270_v60 = vld [vmem:[%s19909_s6 + $0x2b4c] ss:$16 sps:$4 sm:$0xff]  }
 0x697   : > { %14310 = vmatpush1.bf16.msra.mxu1 %v19196_v7  ;;  %v13977_v28 = vpop.f32.mrf.mxu0  ;;  %14270 = vmatprep.subr.bf16.mxu0 %v19201_v4  ;;  %v19262_v20 = vld [vmem:[%s19909_s6 + $0x2b68] ss:$16 sps:$4 sm:$0xff]   ;;  %v19267_v7 = vld [vmem:[%s19909_s6 + $0x294c] ss:$16 sps:$4 sm:$0xff]  }
 0x698   : > { %v14018_v37 = vpop.f32.mrf.mxu1  ;;  %14311 = vmatprep.subr.bf16.mxu1 %v19204_v41  ;;  %v19265_v12 = vld [vmem:[%s19909_s6 + $0x2948] ss:$16 sps:$4 sm:$0xff]   ;;  %v19273_v41 = vld [vmem:[%s19909_s6 + $0x292c] ss:$16 sps:$4 sm:$0xff]  }
 0x699   : > { %v19268_v4 = vld [vmem:[%s19909_s6 + $0x2b48] ss:$16 sps:$4 sm:$0xff]   ;;  %v19276_v34 = vld [vmem:[%s19909_s6 + $0x2b2c] ss:$16 sps:$4 sm:$0xff]  }
 0x69a   : > { %14271 = vmatpush1.bf16.msra.mxu0 %v19199_v10  ;;  %v19271_v44 = vld [vmem:[%s19909_s6 + $0x2928] ss:$16 sps:$4 sm:$0xff]   ;;  %v19279_v22 = vld [vmem:[%s19909_s6 + $0x290c] ss:$16 sps:$4 sm:$0xff]  }
 0x69b   : > { %14312 = vmatpush1.bf16.msra.mxu1 %v19202_v25  ;;  %14272 = vmatprep.subr.bf16.mxu0 %v19207_v17  ;;  %v19274_v62 = vld [vmem:[%s19909_s6 + $0x2b28] ss:$16 sps:$4 sm:$0xff]   ;;  %v19282_v0 = vld [vmem:[%s19909_s6 + $0x2b0c] ss:$16 sps:$4 sm:$0xff]  }
 0x69c   : > { %14313 = vmatprep.subr.bf16.mxu1 %v19210_v30  ;;  %v19277_v10 = vld [vmem:[%s19909_s6 + $0x2908] ss:$16 sps:$4 sm:$0xff]   ;;  %v19285_v28 = vld [vmem:[%s19909_s6 + $0x2cec] ss:$16 sps:$4 sm:$0xff]  }
 0x69d   : > { %v19280_v25 = vld [vmem:[%s19909_s6 + $0x2b08] ss:$16 sps:$4 sm:$0xff]   ;;  %v19288_v37 = vld [vmem:[%s19909_s6 + $0x2eec] ss:$16 sps:$4 sm:$0xff]  }
 0x69e   : > { %14273 = vmatpush1.bf16.msra.mxu0 %v19205_v3  ;;  %v19283_v17 = vld [vmem:[%s19909_s6 + $0x2ce8] ss:$16 sps:$4 sm:$0xff]   ;;  %v19291_v3 = vld [vmem:[%s19909_s6 + $0x2ccc] ss:$16 sps:$4 sm:$0xff]  }
 0x69f   : > { %14314 = vmatpush1.bf16.msra.mxu1 %v19208_v46  ;;  %14274 = vmatprep.subr.bf16.mxu0 %v19213_v27  ;;  %v19286_v30 = vld [vmem:[%s19909_s6 + $0x2ee8] ss:$16 sps:$4 sm:$0xff]   ;;  %v19294_v46 = vld [vmem:[%s19909_s6 + $0x2ecc] ss:$16 sps:$4 sm:$0xff]  }
 0x6a0   : > { %14315 = vmatprep.subr.bf16.mxu1 %v19216_v29 }
 0x6a2   : > { %14275 = vmatpush1.bf16.msra.mxu0 %v19211_v39  ;;  %v22539_v39 = vld [vmem:[#allocation12_spill] sm:$0xff] }
 0x6a3   : > { %14316 = vmatpush1.bf16.msra.mxu1 %v19214_v52  ;;  %14276 = vmatprep.subr.bf16.mxu0 %v19219_v36  ;;  %v22540_v52 = vld [vmem:[#allocation14_spill] sm:$0xff] }
 0x6a4   : > { %14317 = vmatprep.subr.bf16.mxu1 %v19222_v50  ;;  %v19289_v50 = vld [vmem:[%s19909_s6 + $0x2cc8] ss:$16 sps:$4 sm:$0xff]  }
 0x6a6   : > { %14277 = vmatpush1.bf16.msra.mxu0 %v19217_v55  ;;  %v19292_v55 = vld [vmem:[%s19909_s6 + $0x2ec8] ss:$16 sps:$4 sm:$0xff]  }
 0x6a7   : > { %14318 = vmatpush1.bf16.msra.mxu1 %v19220_v45  ;;  %14278 = vmatprep.subr.bf16.mxu0 %v19225_v14 }
 0x6a8   : > { %14319 = vmatprep.subr.bf16.mxu1 %v19228_v13  ;;  %v19297_v13 = vld [vmem:[%s19909_s6 + $0x2cac] ss:$16 sps:$4 sm:$0xff]  }
 0x6aa   : > { %14279 = vmatpush1.bf16.msra.mxu0 %v19223_v18  ;;  %v19300_v18 = vld [vmem:[%s19909_s6 + $0x2eac] ss:$16 sps:$4 sm:$0xff]  }
 0x6ab   : > { %14320 = vmatpush1.bf16.msra.mxu1 %v19226_v40  ;;  %14280 = vmatprep.subr.bf16.mxu0 %v19231_v47 }
 0x6ac   : > { %14321 = vmatprep.subr.bf16.mxu1 %v19234_v38  ;;  %v22541_v38 = vld [vmem:[#allocation13_spill] sm:$0xff] }
 0x6ae   : > { %14281 = vmatpush1.bf16.msra.mxu0 %v19229_v54 }
 0x6af   : > { %14322 = vmatpush1.bf16.msra.mxu1 %v19232_v59  ;;  %14282 = vmatprep.subr.bf16.mxu0 %v19237_v58 }
 0x6b0   : > { %14323 = vmatprep.subr.bf16.mxu1 %v19240_v48  ;;  %v19295_v48 = vld [vmem:[%s19909_s6 + $0x2ca8] ss:$16 sps:$4 sm:$0xff]  }
 0x6b2   : > { %14283 = vmatpush2.bf16.msra.mxu0 %v19235_v9  ;;  %v19298_v9 = vld [vmem:[%s19909_s6 + $0x2ea8] ss:$16 sps:$4 sm:$0xff]  }
 0x6b3   : > { %14324 = vmatpush2.bf16.msra.mxu1 %v19238_v63  ;;  %14284 = vmatprep.subr.bf16.mxu0 %v19243_v11 }
 0x6b4   : > { %14325 = vmatprep.subr.bf16.mxu1 %v19246_v33  ;;  %v19306_v33 = vld [vmem:[%s19909_s6 + $0x2e8c] ss:$16 sps:$4 sm:$0xff]  }
 0x6b6   : > { %14285 = vmatpush2.bf16.msra.mxu0 %v19241_v23  ;;  %v19301_v23 = vld [vmem:[%s19909_s6 + $0x2c88] ss:$16 sps:$4 sm:$0xff]  }
 0x6b7   : > { %14326 = vmatpush2.bf16.msra.mxu1 %v19244_v51  ;;  %14286 = vmatprep.subr.bf16.mxu0 %v19249_v57  ;;  %v19304_v51 = vld [vmem:[%s19909_s6 + $0x2e88] ss:$16 sps:$4 sm:$0xff]   ;;  %v19309_v57 = vld [vmem:[%s19909_s6 + $0x2c6c] ss:$16 sps:$4 sm:$0xff]  }
 0x6b8   : > { %14327 = vmatprep.subr.bf16.mxu1 %v19252_v61  ;;  %v19312_v61 = vld [vmem:[%s19909_s6 + $0x2e6c] ss:$16 sps:$4 sm:$0xff]  }
 0x6ba   : > { %14287 = vmatpush2.bf16.msra.mxu0 %v19247_v35  ;;  %v19307_v35 = vld [vmem:[%s19909_s6 + $0x2c68] ss:$16 sps:$4 sm:$0xff]  }
 0x6bb   : > { %14328 = vmatpush2.bf16.msra.mxu1 %v19250_v1  ;;  %14288 = vmatprep.subr.bf16.mxu0 %v19255_v8  ;;  %v19310_v1 = vld [vmem:[%s19909_s6 + $0x2e68] ss:$16 sps:$4 sm:$0xff]   ;;  %v19315_v8 = vld [vmem:[%s19909_s6 + $0x2c4c] ss:$16 sps:$4 sm:$0xff]  }
 0x6bc   : > { %14329 = vmatprep.subr.bf16.mxu1 %v19258_v53  ;;  %v19318_v53 = vld [vmem:[%s19909_s6 + $0x2e4c] ss:$16 sps:$4 sm:$0xff]  }
 0x6be   : > { %14289 = vmatpush2.bf16.msra.mxu0 %v19253_v16  ;;  %v19313_v16 = vld [vmem:[%s19909_s6 + $0x2c48] ss:$16 sps:$4 sm:$0xff]  }
 0x6bf   : > { %14330 = vmatpush2.bf16.msra.mxu1 %v19256_v15  ;;  %14290 = vmatprep.subr.bf16.mxu0 %v19261_v24  ;;  %v19316_v15 = vld [vmem:[%s19909_s6 + $0x2e48] ss:$16 sps:$4 sm:$0xff]   ;;  %v19321_v24 = vld [vmem:[%s19909_s6 + $0x2c2c] ss:$16 sps:$4 sm:$0xff]  }
 0x6c0   : > { %14331 = vmatprep.subr.bf16.mxu1 %v19264_v43  ;;  %v19324_v43 = vld [vmem:[%s19909_s6 + $0x2e2c] ss:$16 sps:$4 sm:$0xff]  }
 0x6c2   : > { %14291 = vmatpush2.bf16.msra.mxu0 %v19259_v49  ;;  %v19319_v49 = vld [vmem:[%s19909_s6 + $0x2c28] ss:$16 sps:$4 sm:$0xff]  }
 0x6c3   : > { %14332 = vmatpush2.bf16.msra.mxu1 %v19262_v20  ;;  %14292 = vmatprep.subr.bf16.mxu0 %v19267_v7  ;;  %v19322_v20 = vld [vmem:[%s19909_s6 + $0x2e28] ss:$16 sps:$4 sm:$0xff]   ;;  %v19327_v7 = vld [vmem:[%s19909_s6 + $0x2c0c] ss:$16 sps:$4 sm:$0xff]  }
 0x6c4   : > { %14333 = vmatprep.subr.bf16.mxu1 %v19270_v60  ;;  %v19330_v60 = vld [vmem:[%s19909_s6 + $0x2e0c] ss:$16 sps:$4 sm:$0xff]  }
 0x6c6   : > { %14293 = vmatpush2.bf16.msra.mxu0 %v19265_v12  ;;  %v19325_v12 = vld [vmem:[%s19909_s6 + $0x2c08] ss:$16 sps:$4 sm:$0xff]  }
 0x6c7   : > { %14334 = vmatpush2.bf16.msra.mxu1 %v19268_v4  ;;  %14294 = vmatprep.subr.bf16.mxu0 %v19273_v41  ;;  %v19328_v4 = vld [vmem:[%s19909_s6 + $0x2e08] ss:$16 sps:$4 sm:$0xff]   ;;  %v19333_v41 = vld [vmem:[%s19909_s6 + $0x2dec] ss:$16 sps:$4 sm:$0xff]  }
 0x6c8   : > { %14335 = vmatprep.subr.bf16.mxu1 %v19276_v34  ;;  %v19336_v34 = vld [vmem:[%s19909_s6 + $0x2fec] ss:$16 sps:$4 sm:$0xff]  }
 0x6ca   : > { %14295 = vmatpush2.bf16.msra.mxu0 %v19271_v44  ;;  %v19331_v44 = vld [vmem:[%s19909_s6 + $0x2de8] ss:$16 sps:$4 sm:$0xff]  }
 0x6cb   : > { %14336 = vmatpush2.bf16.msra.mxu1 %v19274_v62  ;;  %14296 = vmatprep.subr.bf16.mxu0 %v19279_v22  ;;  %v19334_v62 = vld [vmem:[%s19909_s6 + $0x2fe8] ss:$16 sps:$4 sm:$0xff]   ;;  %v19339_v22 = vld [vmem:[%s19909_s6 + $0x2dcc] ss:$16 sps:$4 sm:$0xff]  }
 0x6cc   : > { %14337 = vmatprep.subr.bf16.mxu1 %v19282_v0  ;;  %v19342_v0 = vld [vmem:[%s19909_s6 + $0x2fcc] ss:$16 sps:$4 sm:$0xff]  }
 0x6ce   : > { %14297 = vmatpush2.bf16.msra.mxu0 %v19277_v10  ;;  %v19337_v10 = vld [vmem:[%s19909_s6 + $0x2dc8] ss:$16 sps:$4 sm:$0xff]  }
 0x6cf   : > { %14338 = vmatpush2.bf16.msra.mxu1 %v19280_v25  ;;  %14348 = vmatprep.subr.bf16.mxu0 %v19285_v28  ;;  %v19340_v25 = vld [vmem:[%s19909_s6 + $0x2fc8] ss:$16 sps:$4 sm:$0xff]   ;;  %v19345_v28 = vld [vmem:[%s19909_s6 + $0x2dac] ss:$16 sps:$4 sm:$0xff]  }
 0x6d0   : > { %14389 = vmatprep.subr.bf16.mxu1 %v19288_v37  ;;  %v19348_v37 = vld [vmem:[%s19909_s6 + $0x2fac] ss:$16 sps:$4 sm:$0xff]  }
 0x6d1   : > { %v14054_v27 = vpop.f32.mrf.mxu0  ;;  %14299 = vmatmul.mubr.bf16.vlgmr.msra.gmra.mxu0 %v22539_v39  ;;  %v19357_v39 = vld [vmem:[%s19909_s6 + $0x2d6c] ss:$16 sps:$4 sm:$0xff]  }
 0x6d2   : > { %v14095_v29 = vpop.f32.mrf.mxu1  ;;  %14340 = vmatmul.mubr.bf16.vlgmr.msra.gmra.mxu1 %v22540_v52  ;;  %v14055_v36 = vadd.f32 %v14054_v27, %v22111_v6  ;;  %14349 = vmatpush1.bf16.msra.mxu0 %v19283_v17  ;;  %v22542_v6 = vld [vmem:[#allocation15_spill] sm:$0xff]  ;;  %v19343_v17 = vld [vmem:[%s19909_s6 + $0x2da8] ss:$16 sps:$4 sm:$0xff]   ;;  %v19360_v52 = vld [vmem:[%s19909_s6 + $0x2f6c] ss:$16 sps:$4 sm:$0xff]  }
 0x6d3   : > { %14390 = vmatpush1.bf16.msra.mxu1 %v19286_v30  ;;  %v14056_v45 = vpop.f32.mrf.mxu0  ;;  %14350 = vmatprep.subr.bf16.mxu0 %v19291_v3  ;;  %v19346_v30 = vld [vmem:[%s19909_s6 + $0x2fa8] ss:$16 sps:$4 sm:$0xff]   ;;  %v19351_v3 = vld [vmem:[%s19909_s6 + $0x2d8c] ss:$16 sps:$4 sm:$0xff]  }
 0x6d4   : > { %v14097_v14 = vpop.f32.mrf.mxu1  ;;  %14391 = vmatprep.subr.bf16.mxu1 %v19294_v46  ;;  %v22185_v40 = vadd.f32 %v14095_v29, %v14055_v36  ;;  %v14057_v47 = vadd.f32 %v14056_v45, %v22116_v32  ;;  %14380 = vmatprep.mubr.bf16.mxu0 %v22541_v38  ;;  %v19303_v32 = vld [vmem:[%s19909_s6 + $0x2c8c] ss:$16 sps:$4 sm:$0xff]   ;;  %v19349_v27 = vld [vmem:[%s19909_s6 + $0x2d88] ss:$16 sps:$4 sm:$0xff]  }
 0x6d5   : > { %14421 = vmatprep.mubr.bf16.mxu1 %v22542_v6  ;;  %v14058_v54 = vpop.f32.mrf.mxu0  ;;  %v19354_v46 = vld [vmem:[%s19909_s6 + $0x2f8c] ss:$16 sps:$4 sm:$0xff]   ;;  %v19352_v29 = vld [vmem:[%s19909_s6 + $0x2f88] ss:$16 sps:$4 sm:$0xff]  }
 0x6d6   : > { %v14099_v59 = vpop.f32.mrf.mxu1  ;;  %v22190_v58 = vadd.f32 %v14097_v14, %v14057_v47  ;;  %14351 = vmatpush1.bf16.msra.mxu0 %v19289_v50  ;;  %v19355_v36 = vld [vmem:[%s19909_s6 + $0x2d68] ss:$16 sps:$4 sm:$0xff]   ;;  %v19366_v45 = vld [vmem:[%s19909_s6 + $0x2f4c] ss:$16 sps:$4 sm:$0xff]  }
 0x6d7   : > { %14392 = vmatpush1.bf16.msra.mxu1 %v19292_v55  ;;  %v14059_v63 = vpop.f32.mrf.mxu0  ;;  %14352 = vmatprep.subr.bf16.mxu0 %v19297_v13  ;;  %v19358_v50 = vld [vmem:[%s19909_s6 + $0x2f68] ss:$16 sps:$4 sm:$0xff]   ;;  %v19363_v55 = vld [vmem:[%s19909_s6 + $0x2d4c] ss:$16 sps:$4 sm:$0xff]  }
 0x6d8   : > { %v14100_v11 = vpop.f32.mrf.mxu1  ;;  %14393 = vmatprep.subr.bf16.mxu1 %v19300_v18  ;;  %v19361_v14 = vld [vmem:[%s19909_s6 + $0x2d48] ss:$16 sps:$4 sm:$0xff]   ;;  %v19369_v18 = vld [vmem:[%s19909_s6 + $0x2d2c] ss:$16 sps:$4 sm:$0xff]  }
 0x6d9   : > { %v19364_v13 = vld [vmem:[%s19909_s6 + $0x2f48] ss:$16 sps:$4 sm:$0xff]   ;;  %v19372_v47 = vld [vmem:[%s19909_s6 + $0x2f2c] ss:$16 sps:$4 sm:$0xff]  }
 0x6da   : > { %14353 = vmatpush1.bf16.msra.mxu0 %v19295_v48  ;;  %v19367_v38 = vld [vmem:[%s19909_s6 + $0x2d28] ss:$16 sps:$4 sm:$0xff]   ;;  %v19375_v54 = vld [vmem:[%s19909_s6 + $0x2d0c] ss:$16 sps:$4 sm:$0xff]  }
 0x6db   : > { %14394 = vmatpush1.bf16.msra.mxu1 %v19298_v9  ;;  %14354 = vmatprep.subr.bf16.mxu0 %v19303_v32  ;;  %v19370_v6 = vld [vmem:[%s19909_s6 + $0x2f28] ss:$16 sps:$4 sm:$0xff]   ;;  %v19378_v59 = vld [vmem:[%s19909_s6 + $0x2f0c] ss:$16 sps:$4 sm:$0xff]  }
 0x6dc   : > { %14395 = vmatprep.subr.bf16.mxu1 %v19306_v33  ;;  %v19373_v48 = vld [vmem:[%s19909_s6 + $0x2d08] ss:$16 sps:$4 sm:$0xff]   ;;  %v19381_v63 = vld [vmem:[%s19909_s6 + $0x30ec] ss:$16 sps:$4 sm:$0xff]  }
 0x6dd   : > { %v19376_v9 = vld [vmem:[%s19909_s6 + $0x2f08] ss:$16 sps:$4 sm:$0xff]   ;;  %v19384_v11 = vld [vmem:[%s19909_s6 + $0x32ec] ss:$16 sps:$4 sm:$0xff]  }
 0x6de   : > { %14355 = vmatpush1.bf16.msra.mxu0 %v19301_v23  ;;  %v19379_v32 = vld [vmem:[%s19909_s6 + $0x30e8] ss:$16 sps:$4 sm:$0xff]   ;;  %v19387_v23 = vld [vmem:[%s19909_s6 + $0x30cc] ss:$16 sps:$4 sm:$0xff]  }
 0x6df   : > { %14396 = vmatpush1.bf16.msra.mxu1 %v19304_v51  ;;  %14356 = vmatprep.subr.bf16.mxu0 %v19309_v57  ;;  %v19382_v33 = vld [vmem:[%s19909_s6 + $0x32e8] ss:$16 sps:$4 sm:$0xff]   ;;  %v19390_v51 = vld [vmem:[%s19909_s6 + $0x32cc] ss:$16 sps:$4 sm:$0xff]  }
 0x6e0   : > { %14397 = vmatprep.subr.bf16.mxu1 %v19312_v61 }
 0x6e2   : > { %14357 = vmatpush1.bf16.msra.mxu0 %v19307_v35  ;;  %v22543_v35 = vld [vmem:[#allocation16_spill] sm:$0xff] }
 0x6e3   : > { %14398 = vmatpush1.bf16.msra.mxu1 %v19310_v1  ;;  %14358 = vmatprep.subr.bf16.mxu0 %v19315_v8  ;;  %v19385_v8 = vld [vmem:[%s19909_s6 + $0x30c8] ss:$16 sps:$4 sm:$0xff]  }
 0x6e4   : > { %14399 = vmatprep.subr.bf16.mxu1 %v19318_v53  ;;  %v19388_v53 = vld [vmem:[%s19909_s6 + $0x32c8] ss:$16 sps:$4 sm:$0xff]  }
 0x6e6   : > { %14359 = vmatpush1.bf16.msra.mxu0 %v19313_v16 }
 0x6e7   : > { %14400 = vmatpush1.bf16.msra.mxu1 %v19316_v15  ;;  %14360 = vmatprep.subr.bf16.mxu0 %v19321_v24  ;;  %v19393_v24 = vld [vmem:[%s19909_s6 + $0x30ac] ss:$16 sps:$4 sm:$0xff]  }
 0x6e8   : > { %14401 = vmatprep.subr.bf16.mxu1 %v19324_v43  ;;  %v19396_v43 = vld [vmem:[%s19909_s6 + $0x32ac] ss:$16 sps:$4 sm:$0xff]  }
 0x6ea   : > { %14361 = vmatpush1.bf16.msra.mxu0 %v19319_v49 }
 0x6eb   : > { %14402 = vmatpush1.bf16.msra.mxu1 %v19322_v20  ;;  %14362 = vmatprep.subr.bf16.mxu0 %v19327_v7  ;;  %v22544_v20 = vld [vmem:[#allocation17_spill] sm:$0xff] }
 0x6ec   : > { %14403 = vmatprep.subr.bf16.mxu1 %v19330_v60 }
 0x6ee   : > { %14363 = vmatpush1.bf16.msra.mxu0 %v19325_v12 }
 0x6ef   : > { %14404 = vmatpush1.bf16.msra.mxu1 %v19328_v4  ;;  %14364 = vmatprep.subr.bf16.mxu0 %v19333_v41  ;;  %v19391_v4 = vld [vmem:[%s19909_s6 + $0x30a8] ss:$16 sps:$4 sm:$0xff]  }
 0x6f0   : > { %14405 = vmatprep.subr.bf16.mxu1 %v19336_v34  ;;  %v19394_v41 = vld [vmem:[%s19909_s6 + $0x32a8] ss:$16 sps:$4 sm:$0xff]  }
 0x6f2   : > { %14365 = vmatpush2.bf16.msra.mxu0 %v19331_v44 }
 0x6f3   : > { %14406 = vmatpush2.bf16.msra.mxu1 %v19334_v62  ;;  %14366 = vmatprep.subr.bf16.mxu0 %v19339_v22  ;;  %v19402_v62 = vld [vmem:[%s19909_s6 + $0x328c] ss:$16 sps:$4 sm:$0xff]   ;;  %v19397_v22 = vld [vmem:[%s19909_s6 + $0x3088] ss:$16 sps:$4 sm:$0xff]  }
 0x6f4   : > { %14407 = vmatprep.subr.bf16.mxu1 %v19342_v0  ;;  %v19400_v0 = vld [vmem:[%s19909_s6 + $0x3288] ss:$16 sps:$4 sm:$0xff]  }
 0x6f6   : > { %14367 = vmatpush2.bf16.msra.mxu0 %v19337_v10  ;;  %v19405_v10 = vld [vmem:[%s19909_s6 + $0x306c] ss:$16 sps:$4 sm:$0xff]  }
 0x6f7   : > { %14408 = vmatpush2.bf16.msra.mxu1 %v19340_v25  ;;  %14368 = vmatprep.subr.bf16.mxu0 %v19345_v28  ;;  %v19408_v25 = vld [vmem:[%s19909_s6 + $0x326c] ss:$16 sps:$4 sm:$0xff]   ;;  %v19403_v28 = vld [vmem:[%s19909_s6 + $0x3068] ss:$16 sps:$4 sm:$0xff]  }
 0x6f8   : > { %14409 = vmatprep.subr.bf16.mxu1 %v19348_v37  ;;  %v19406_v37 = vld [vmem:[%s19909_s6 + $0x3268] ss:$16 sps:$4 sm:$0xff]  }
 0x6fa   : > { %14369 = vmatpush2.bf16.msra.mxu0 %v19343_v17  ;;  %v19411_v17 = vld [vmem:[%s19909_s6 + $0x304c] ss:$16 sps:$4 sm:$0xff]  }
 0x6fb   : > { %14410 = vmatpush2.bf16.msra.mxu1 %v19346_v30  ;;  %14370 = vmatprep.subr.bf16.mxu0 %v19351_v3  ;;  %v19414_v30 = vld [vmem:[%s19909_s6 + $0x324c] ss:$16 sps:$4 sm:$0xff]   ;;  %v19409_v3 = vld [vmem:[%s19909_s6 + $0x3048] ss:$16 sps:$4 sm:$0xff]  }
 0x6fc   : > { %14411 = vmatprep.subr.bf16.mxu1 %v19354_v46  ;;  %v19412_v46 = vld [vmem:[%s19909_s6 + $0x3248] ss:$16 sps:$4 sm:$0xff]  }
 0x6fe   : > { %14371 = vmatpush2.bf16.msra.mxu0 %v19349_v27  ;;  %v19417_v27 = vld [vmem:[%s19909_s6 + $0x302c] ss:$16 sps:$4 sm:$0xff]  }
 0x6ff   : > { %14412 = vmatpush2.bf16.msra.mxu1 %v19352_v29  ;;  %14372 = vmatprep.subr.bf16.mxu0 %v19357_v39  ;;  %v19420_v29 = vld [vmem:[%s19909_s6 + $0x322c] ss:$16 sps:$4 sm:$0xff]   ;;  %v19415_v39 = vld [vmem:[%s19909_s6 + $0x3028] ss:$16 sps:$4 sm:$0xff]  }
 0x700   : > { %14413 = vmatprep.subr.bf16.mxu1 %v19360_v52  ;;  %v19418_v52 = vld [vmem:[%s19909_s6 + $0x3228] ss:$16 sps:$4 sm:$0xff]  }
 0x702   : > { %14373 = vmatpush2.bf16.msra.mxu0 %v19355_v36  ;;  %v19423_v36 = vld [vmem:[%s19909_s6 + $0x300c] ss:$16 sps:$4 sm:$0xff]  }
 0x703   : > { %14414 = vmatpush2.bf16.msra.mxu1 %v19358_v50  ;;  %14374 = vmatprep.subr.bf16.mxu0 %v19363_v55  ;;  %v19426_v50 = vld [vmem:[%s19909_s6 + $0x320c] ss:$16 sps:$4 sm:$0xff]   ;;  %v19421_v55 = vld [vmem:[%s19909_s6 + $0x3008] ss:$16 sps:$4 sm:$0xff]  }
 0x704   : > { %14415 = vmatprep.subr.bf16.mxu1 %v19366_v45  ;;  %v19424_v45 = vld [vmem:[%s19909_s6 + $0x3208] ss:$16 sps:$4 sm:$0xff]  }
 0x706   : > { %14375 = vmatpush2.bf16.msra.mxu0 %v19361_v14  ;;  %v19429_v14 = vld [vmem:[%s19909_s6 + $0x31ec] ss:$16 sps:$4 sm:$0xff]  }
 0x707   : > { %14416 = vmatpush2.bf16.msra.mxu1 %v19364_v13  ;;  %14376 = vmatprep.subr.bf16.mxu0 %v19369_v18  ;;  %v19432_v13 = vld [vmem:[%s19909_s6 + $0x33ec] ss:$16 sps:$4 sm:$0xff]   ;;  %v19427_v18 = vld [vmem:[%s19909_s6 + $0x31e8] ss:$16 sps:$4 sm:$0xff]  }
 0x708   : > { %14417 = vmatprep.subr.bf16.mxu1 %v19372_v47  ;;  %v19430_v47 = vld [vmem:[%s19909_s6 + $0x33e8] ss:$16 sps:$4 sm:$0xff]  }
 0x70a   : > { %14377 = vmatpush2.bf16.msra.mxu0 %v19367_v38  ;;  %v19435_v38 = vld [vmem:[%s19909_s6 + $0x31cc] ss:$16 sps:$4 sm:$0xff]  }
 0x70b   : > { %14418 = vmatpush2.bf16.msra.mxu1 %v19370_v6  ;;  %14378 = vmatprep.subr.bf16.mxu0 %v19375_v54  ;;  %v19438_v6 = vld [vmem:[%s19909_s6 + $0x33cc] ss:$16 sps:$4 sm:$0xff]   ;;  %v19433_v54 = vld [vmem:[%s19909_s6 + $0x31c8] ss:$16 sps:$4 sm:$0xff]  }
 0x70c   : > { %14419 = vmatprep.subr.bf16.mxu1 %v19378_v59  ;;  %v19436_v59 = vld [vmem:[%s19909_s6 + $0x33c8] ss:$16 sps:$4 sm:$0xff]  }
 0x70e   : > { %14379 = vmatpush2.bf16.msra.mxu0 %v19373_v48  ;;  %v19441_v48 = vld [vmem:[%s19909_s6 + $0x31ac] ss:$16 sps:$4 sm:$0xff]  }
 0x70f   : > { %14420 = vmatpush2.bf16.msra.mxu1 %v19376_v9  ;;  %14430 = vmatprep.subr.bf16.mxu0 %v19381_v63  ;;  %v19444_v9 = vld [vmem:[%s19909_s6 + $0x33ac] ss:$16 sps:$4 sm:$0xff]   ;;  %v19439_v63 = vld [vmem:[%s19909_s6 + $0x31a8] ss:$16 sps:$4 sm:$0xff]  }
 0x710   : > { %14471 = vmatprep.subr.bf16.mxu1 %v19384_v11  ;;  %v19442_v11 = vld [vmem:[%s19909_s6 + $0x33a8] ss:$16 sps:$4 sm:$0xff]  }
 0x711   : > { %v14136_v57 = vpop.f32.mrf.mxu0  ;;  %14381 = vmatmul.mubr.bf16.vlgmr.msra.gmra.mxu0 %v22543_v35  ;;  %v19451_v35 = vld [vmem:[%s19909_s6 + $0x3168] ss:$16 sps:$4 sm:$0xff]  }
 0x712   : > { %v14177_v61 = vpop.f32.mrf.mxu1  ;;  %14422 = vmatmul.mubr.bf16.vlgmr.msra.gmra.mxu1 %v21083_v31  ;;  %v14137_v1 = vadd.f32 %v14136_v57, %v22185_v40  ;;  %14431 = vmatpush1.bf16.msra.mxu0 %v19379_v32  ;;  %v22545_v40 = vld [vmem:[#allocation18_spill] sm:$0xff] }
 0x713   : > { %14472 = vmatpush1.bf16.msra.mxu1 %v19382_v33  ;;  %v14138_v16 = vpop.f32.mrf.mxu0  ;;  %14432 = vmatprep.subr.bf16.mxu0 %v19387_v23  ;;  %v19447_v32 = vld [vmem:[%s19909_s6 + $0x318c] ss:$16 sps:$4 sm:$0xff]   ;;  %v19445_v23 = vld [vmem:[%s19909_s6 + $0x3188] ss:$16 sps:$4 sm:$0xff]  }
 0x714   : > { %v14179_v15 = vpop.f32.mrf.mxu1  ;;  %14473 = vmatprep.subr.bf16.mxu1 %v19390_v51  ;;  %v22259_v49 = vadd.f32 %v14177_v61, %v14137_v1  ;;  %v14139_v31 = vadd.f32 %v14138_v16, %v22190_v58  ;;  %14462 = vmatprep.mubr.bf16.mxu0 %v22544_v20  ;;  %v19399_v58 = vld [vmem:[%s19909_s6 + $0x308c] ss:$16 sps:$4 sm:$0xff]   ;;  %v19448_v51 = vld [vmem:[%s19909_s6 + $0x3388] ss:$16 sps:$4 sm:$0xff]  }
 0x715   : > { %14503 = vmatprep.mubr.bf16.mxu1 %v22545_v40  ;;  %v14140_v7 = vpop.f32.mrf.mxu0  ;;  %v19450_v33 = vld [vmem:[%s19909_s6 + $0x338c] ss:$16 sps:$4 sm:$0xff]   ;;  %v19454_v1 = vld [vmem:[%s19909_s6 + $0x3368] ss:$16 sps:$4 sm:$0xff]  }
 0x716   : > { %v14181_v60 = vpop.f32.mrf.mxu1  ;;  %v22264_v12 = vadd.f32 %v14179_v15, %v14139_v31  ;;  %14433 = vmatpush1.bf16.msra.mxu0 %v19385_v8  ;;  %v19453_v57 = vld [vmem:[%s19909_s6 + $0x316c] ss:$16 sps:$4 sm:$0xff]   ;;  %v19457_v16 = vld [vmem:[%s19909_s6 + $0x3148] ss:$16 sps:$4 sm:$0xff]  }
 0x717   : > { %14474 = vmatpush1.bf16.msra.mxu1 %v19388_v53  ;;  %v14141_v34 = vpop.f32.mrf.mxu0  ;;  %14434 = vmatprep.subr.bf16.mxu0 %v19393_v24  ;;  %v19456_v61 = vld [vmem:[%s19909_s6 + $0x336c] ss:$16 sps:$4 sm:$0xff]   ;;  %v19460_v15 = vld [vmem:[%s19909_s6 + $0x3348] ss:$16 sps:$4 sm:$0xff]  }
 0x718   : > { %v14182_v44 = vpop.f32.mrf.mxu1  ;;  %14475 = vmatprep.subr.bf16.mxu1 %v19396_v43  ;;  %v19459_v8 = vld [vmem:[%s19909_s6 + $0x314c] ss:$16 sps:$4 sm:$0xff]   ;;  %v19463_v31 = vld [vmem:[%s19909_s6 + $0x3128] ss:$16 sps:$4 sm:$0xff]  }
 0x719   : > { %v19462_v53 = vld [vmem:[%s19909_s6 + $0x334c] ss:$16 sps:$4 sm:$0xff]   ;;  %v19466_v20 = vld [vmem:[%s19909_s6 + $0x3328] ss:$16 sps:$4 sm:$0xff]  }
 0x71a   : > { %14435 = vmatpush1.bf16.msra.mxu0 %v19391_v4  ;;  %v19465_v24 = vld [vmem:[%s19909_s6 + $0x312c] ss:$16 sps:$4 sm:$0xff]   ;;  %v19469_v60 = vld [vmem:[%s19909_s6 + $0x3108] ss:$16 sps:$4 sm:$0xff]  }
 0x71b   : > { %14476 = vmatpush1.bf16.msra.mxu1 %v19394_v41  ;;  %14436 = vmatprep.subr.bf16.mxu0 %v19399_v58  ;;  %v19468_v43 = vld [vmem:[%s19909_s6 + $0x332c] ss:$16 sps:$4 sm:$0xff]   ;;  %v19472_v4 = vld [vmem:[%s19909_s6 + $0x3308] ss:$16 sps:$4 sm:$0xff]  }
 0x71c   : > { %14477 = vmatprep.subr.bf16.mxu1 %v19402_v62  ;;  %v19471_v40 = vld [vmem:[%s19909_s6 + $0x310c] ss:$16 sps:$4 sm:$0xff]   ;;  %v19475_v44 = vld [vmem:[%s19909_s6 + $0x34e8] ss:$16 sps:$4 sm:$0xff]  }
 0x71d   : > { %v19474_v7 = vld [vmem:[%s19909_s6 + $0x330c] ss:$16 sps:$4 sm:$0xff]   ;;  %v19478_v58 = vld [vmem:[%s19909_s6 + $0x36e8] ss:$16 sps:$4 sm:$0xff]  }
 0x71e   : > { %14437 = vmatpush1.bf16.msra.mxu0 %v19397_v22  ;;  %v19477_v41 = vld [vmem:[%s19909_s6 + $0x34ec] ss:$16 sps:$4 sm:$0xff]  }
 0x71f   : > { %14478 = vmatpush1.bf16.msra.mxu1 %v19400_v0  ;;  %14438 = vmatprep.subr.bf16.mxu0 %v19405_v10  ;;  %v19480_v34 = vld [vmem:[%s19909_s6 + $0x36ec] ss:$16 sps:$4 sm:$0xff]  }
 0x720   : > { %14479 = vmatprep.subr.bf16.mxu1 %v19408_v25  ;;  %v19483_v62 = vld [vmem:[%s19909_s6 + $0x34cc] ss:$16 sps:$4 sm:$0xff]   ;;  %v22546_v25 = vld [vmem:[#allocation19_spill] sm:$0xff] }
 0x721   : > { %v19486_v22 = vld [vmem:[%s19909_s6 + $0x36cc] ss:$16 sps:$4 sm:$0xff]  }
 0x722   : > { %14439 = vmatpush1.bf16.msra.mxu0 %v19403_v28  ;;  %v22547_v28 = vld [vmem:[#allocation21_spill] sm:$0xff] }
 0x723   : > { %14480 = vmatpush1.bf16.msra.mxu1 %v19406_v37  ;;  %14440 = vmatprep.subr.bf16.mxu0 %v19411_v17  ;;  %v19481_v17 = vld [vmem:[%s19909_s6 + $0x34c8] ss:$16 sps:$4 sm:$0xff]  }
 0x724   : > { %14481 = vmatprep.subr.bf16.mxu1 %v19414_v30  ;;  %v19484_v30 = vld [vmem:[%s19909_s6 + $0x36c8] ss:$16 sps:$4 sm:$0xff]  }
 0x726   : > { %14441 = vmatpush1.bf16.msra.mxu0 %v19409_v3 }
 0x727   : > { %14482 = vmatpush1.bf16.msra.mxu1 %v19412_v46  ;;  %14442 = vmatprep.subr.bf16.mxu0 %v19417_v27  ;;  %v19489_v27 = vld [vmem:[%s19909_s6 + $0x34ac] ss:$16 sps:$4 sm:$0xff]  }
 0x728   : > { %14483 = vmatprep.subr.bf16.mxu1 %v19420_v29  ;;  %v19492_v29 = vld [vmem:[%s19909_s6 + $0x36ac] ss:$16 sps:$4 sm:$0xff]  }
 0x72a   : > { %14443 = vmatpush1.bf16.msra.mxu0 %v19415_v39 }
 0x72b   : > { %14484 = vmatpush1.bf16.msra.mxu1 %v19418_v52  ;;  %14444 = vmatprep.subr.bf16.mxu0 %v19423_v36  ;;  %v22548_v36 = vld [vmem:[#allocation20_spill] sm:$0xff] }
 0x72c   : > { %14485 = vmatprep.subr.bf16.mxu1 %v19426_v50 }
 0x72e   : > { %14445 = vmatpush1.bf16.msra.mxu0 %v19421_v55 }
 0x72f   : > { %14486 = vmatpush1.bf16.msra.mxu1 %v19424_v45  ;;  %14446 = vmatprep.subr.bf16.mxu0 %v19429_v14  ;;  %v19487_v14 = vld [vmem:[%s19909_s6 + $0x34a8] ss:$16 sps:$4 sm:$0xff]  }
 0x730   : > { %14487 = vmatprep.subr.bf16.mxu1 %v19432_v13  ;;  %v19490_v13 = vld [vmem:[%s19909_s6 + $0x36a8] ss:$16 sps:$4 sm:$0xff]  }
 0x732   : > { %14447 = vmatpush2.bf16.msra.mxu0 %v19427_v18 }
 0x733   : > { %14488 = vmatpush2.bf16.msra.mxu1 %v19430_v47  ;;  %14448 = vmatprep.subr.bf16.mxu0 %v19435_v38  ;;  %v19498_v38 = vld [vmem:[%s19909_s6 + $0x368c] ss:$16 sps:$4 sm:$0xff]  }
 0x734   : > { %14489 = vmatprep.subr.bf16.mxu1 %v19438_v6  ;;  %v19493_v6 = vld [vmem:[%s19909_s6 + $0x3488] ss:$16 sps:$4 sm:$0xff]  }
 0x736   : > { %14449 = vmatpush2.bf16.msra.mxu0 %v19433_v54  ;;  %v19496_v54 = vld [vmem:[%s19909_s6 + $0x3688] ss:$16 sps:$4 sm:$0xff]  }
 0x737   : > { %14490 = vmatpush2.bf16.msra.mxu1 %v19436_v59  ;;  %14450 = vmatprep.subr.bf16.mxu0 %v19441_v48  ;;  %v19501_v59 = vld [vmem:[%s19909_s6 + $0x346c] ss:$16 sps:$4 sm:$0xff]  }
 0x738   : > { %14491 = vmatprep.subr.bf16.mxu1 %v19444_v9  ;;  %v19504_v48 = vld [vmem:[%s19909_s6 + $0x366c] ss:$16 sps:$4 sm:$0xff]   ;;  %v19499_v9 = vld [vmem:[%s19909_s6 + $0x3468] ss:$16 sps:$4 sm:$0xff]  }
 0x73a   : > { %14451 = vmatpush2.bf16.msra.mxu0 %v19439_v63  ;;  %v19502_v63 = vld [vmem:[%s19909_s6 + $0x3668] ss:$16 sps:$4 sm:$0xff]  }
 0x73b   : > { %14492 = vmatpush2.bf16.msra.mxu1 %v19442_v11  ;;  %14452 = vmatprep.subr.bf16.mxu0 %v19447_v32  ;;  %v19507_v11 = vld [vmem:[%s19909_s6 + $0x344c] ss:$16 sps:$4 sm:$0xff]  }
 0x73c   : > { %14493 = vmatprep.subr.bf16.mxu1 %v19450_v33  ;;  %v19510_v32 = vld [vmem:[%s19909_s6 + $0x364c] ss:$16 sps:$4 sm:$0xff]   ;;  %v19505_v33 = vld [vmem:[%s19909_s6 + $0x3448] ss:$16 sps:$4 sm:$0xff]  }
 0x73e   : > { %14453 = vmatpush2.bf16.msra.mxu0 %v19445_v23  ;;  %v19508_v23 = vld [vmem:[%s19909_s6 + $0x3648] ss:$16 sps:$4 sm:$0xff]  }
 0x73f   : > { %14494 = vmatpush2.bf16.msra.mxu1 %v19448_v51  ;;  %14454 = vmatprep.subr.bf16.mxu0 %v19453_v57  ;;  %v19513_v51 = vld [vmem:[%s19909_s6 + $0x342c] ss:$16 sps:$4 sm:$0xff]  }
 0x740   : > { %14495 = vmatprep.subr.bf16.mxu1 %v19456_v61  ;;  %v19516_v57 = vld [vmem:[%s19909_s6 + $0x362c] ss:$16 sps:$4 sm:$0xff]   ;;  %v19511_v61 = vld [vmem:[%s19909_s6 + $0x3428] ss:$16 sps:$4 sm:$0xff]  }
 0x742   : > { %14455 = vmatpush2.bf16.msra.mxu0 %v19451_v35  ;;  %v19514_v35 = vld [vmem:[%s19909_s6 + $0x3628] ss:$16 sps:$4 sm:$0xff]  }
 0x743   : > { %14496 = vmatpush2.bf16.msra.mxu1 %v19454_v1  ;;  %14456 = vmatprep.subr.bf16.mxu0 %v19459_v8  ;;  %v19519_v1 = vld [vmem:[%s19909_s6 + $0x340c] ss:$16 sps:$4 sm:$0xff]  }
 0x744   : > { %14497 = vmatprep.subr.bf16.mxu1 %v19462_v53  ;;  %v19522_v8 = vld [vmem:[%s19909_s6 + $0x360c] ss:$16 sps:$4 sm:$0xff]   ;;  %v19517_v53 = vld [vmem:[%s19909_s6 + $0x3408] ss:$16 sps:$4 sm:$0xff]  }
 0x746   : > { %14457 = vmatpush2.bf16.msra.mxu0 %v19457_v16  ;;  %v19520_v16 = vld [vmem:[%s19909_s6 + $0x3608] ss:$16 sps:$4 sm:$0xff]  }
 0x747   : > { %14498 = vmatpush2.bf16.msra.mxu1 %v19460_v15  ;;  %14458 = vmatprep.subr.bf16.mxu0 %v19465_v24  ;;  %v19525_v15 = vld [vmem:[%s19909_s6 + $0x35ec] ss:$16 sps:$4 sm:$0xff]  }
 0x748   : > { %14499 = vmatprep.subr.bf16.mxu1 %v19468_v43  ;;  %v19528_v24 = vld [vmem:[%s19909_s6 + $0x37ec] ss:$16 sps:$4 sm:$0xff]   ;;  %v19523_v43 = vld [vmem:[%s19909_s6 + $0x35e8] ss:$16 sps:$4 sm:$0xff]  }
 0x74a   : > { %14459 = vmatpush2.bf16.msra.mxu0 %v19463_v31  ;;  %v19526_v31 = vld [vmem:[%s19909_s6 + $0x37e8] ss:$16 sps:$4 sm:$0xff]  }
 0x74b   : > { %14500 = vmatpush2.bf16.msra.mxu1 %v19466_v20  ;;  %14460 = vmatprep.subr.bf16.mxu0 %v19471_v40  ;;  %v19531_v20 = vld [vmem:[%s19909_s6 + $0x35cc] ss:$16 sps:$4 sm:$0xff]  }
 0x74c   : > { %14501 = vmatprep.subr.bf16.mxu1 %v19474_v7  ;;  %v19534_v40 = vld [vmem:[%s19909_s6 + $0x37cc] ss:$16 sps:$4 sm:$0xff]   ;;  %v19529_v7 = vld [vmem:[%s19909_s6 + $0x35c8] ss:$16 sps:$4 sm:$0xff]  }
 0x74e   : > { %14461 = vmatpush2.bf16.msra.mxu0 %v19469_v60  ;;  %v19532_v60 = vld [vmem:[%s19909_s6 + $0x37c8] ss:$16 sps:$4 sm:$0xff]  }
 0x74f   : > { %14502 = vmatpush2.bf16.msra.mxu1 %v19472_v4  ;;  %14512 = vmatprep.subr.bf16.mxu0 %v19477_v41  ;;  %v19537_v4 = vld [vmem:[%s19909_s6 + $0x35ac] ss:$16 sps:$4 sm:$0xff]  }
 0x750   : > { %14553 = vmatprep.subr.bf16.mxu1 %v19480_v34  ;;  %v19540_v41 = vld [vmem:[%s19909_s6 + $0x37ac] ss:$16 sps:$4 sm:$0xff]   ;;  %v19535_v34 = vld [vmem:[%s19909_s6 + $0x35a8] ss:$16 sps:$4 sm:$0xff]  }
 0x751   : > { %v14218_v0 = vpop.f32.mrf.mxu0  ;;  %14463 = vmatmul.mubr.bf16.vlgmr.msra.gmra.mxu0 %v22546_v25  ;;  %v19552_v25 = vld [vmem:[%s19909_s6 + $0x376c] ss:$16 sps:$4 sm:$0xff]  }
 0x752   : > { %v14259_v10 = vpop.f32.mrf.mxu1  ;;  %14504 = vmatmul.mubr.bf16.vlgmr.msra.gmra.mxu1 %v22547_v28  ;;  %v14219_v37 = vadd.f32 %v14218_v0, %v22259_v49  ;;  %14513 = vmatpush1.bf16.msra.mxu0 %v19475_v44  ;;  %v22549_v49 = vld [vmem:[#allocation22_spill] sm:$0xff] }
 0x753   : > { %14554 = vmatpush1.bf16.msra.mxu1 %v19478_v58  ;;  %v14220_v3 = vpop.f32.mrf.mxu0  ;;  %14514 = vmatprep.subr.bf16.mxu0 %v19483_v62  ;;  %v19538_v44 = vld [vmem:[%s19909_s6 + $0x37a8] ss:$16 sps:$4 sm:$0xff]   ;;  %v19543_v58 = vld [vmem:[%s19909_s6 + $0x358c] ss:$16 sps:$4 sm:$0xff]  }
 0x754   : > { %v14261_v46 = vpop.f32.mrf.mxu1  ;;  %14555 = vmatprep.subr.bf16.mxu1 %v19486_v22  ;;  %v22333_v39 = vadd.f32 %v14259_v10, %v14219_v37  ;;  %v14221_v52 = vadd.f32 %v14220_v3, %v22264_v12  ;;  %14544 = vmatprep.mubr.bf16.mxu0 %v22548_v36  ;;  %v19495_v12 = vld [vmem:[%s19909_s6 + $0x348c] ss:$16 sps:$4 sm:$0xff]   ;;  %v19541_v22 = vld [vmem:[%s19909_s6 + $0x3588] ss:$16 sps:$4 sm:$0xff]  }
 0x755   : > { %14585 = vmatprep.mubr.bf16.mxu1 %v22549_v49  ;;  %v14222_v50 = vpop.f32.mrf.mxu0  ;;  %v19546_v62 = vld [vmem:[%s19909_s6 + $0x378c] ss:$16 sps:$4 sm:$0xff]   ;;  %v19544_v0 = vld [vmem:[%s19909_s6 + $0x3788] ss:$16 sps:$4 sm:$0xff]  }
 0x756   : > { %v14263_v55 = vpop.f32.mrf.mxu1  ;;  %v22338_v45 = vadd.f32 %v14261_v46, %v14221_v52  ;;  %14515 = vmatpush1.bf16.msra.mxu0 %v19481_v17  ;;  %v19549_v10 = vld [vmem:[%s19909_s6 + $0x356c] ss:$16 sps:$4 sm:$0xff]   ;;  %v19547_v28 = vld [vmem:[%s19909_s6 + $0x3568] ss:$16 sps:$4 sm:$0xff]  }
 0x757   : > { %14556 = vmatpush1.bf16.msra.mxu1 %v19484_v30  ;;  %v14223_v18 = vpop.f32.mrf.mxu0  ;;  %14516 = vmatprep.subr.bf16.mxu0 %v19489_v27  ;;  %v19550_v37 = vld [vmem:[%s19909_s6 + $0x3768] ss:$16 sps:$4 sm:$0xff]   ;;  %v19555_v17 = vld [vmem:[%s19909_s6 + $0x354c] ss:$16 sps:$4 sm:$0xff]  }
 0x758   : > { %v14264_v47 = vpop.f32.mrf.mxu1  ;;  %14557 = vmatprep.subr.bf16.mxu1 %v19492_v29  ;;  %v19558_v30 = vld [vmem:[%s19909_s6 + $0x374c] ss:$16 sps:$4 sm:$0xff]   ;;  %v19553_v3 = vld [vmem:[%s19909_s6 + $0x3548] ss:$16 sps:$4 sm:$0xff]  }
 0x759   : > { %v19556_v46 = vld [vmem:[%s19909_s6 + $0x3748] ss:$16 sps:$4 sm:$0xff]   ;;  %v19561_v27 = vld [vmem:[%s19909_s6 + $0x352c] ss:$16 sps:$4 sm:$0xff]  }
 0x75a   : > { %14517 = vmatpush1.bf16.msra.mxu0 %v19487_v14  ;;  %v19564_v29 = vld [vmem:[%s19909_s6 + $0x372c] ss:$16 sps:$4 sm:$0xff]   ;;  %v19559_v52 = vld [vmem:[%s19909_s6 + $0x3528] ss:$16 sps:$4 sm:$0xff]  }
 0x75b   : > { %14558 = vmatpush1.bf16.msra.mxu1 %v19490_v13  ;;  %14518 = vmatprep.subr.bf16.mxu0 %v19495_v12  ;;  %v19562_v36 = vld [vmem:[%s19909_s6 + $0x3728] ss:$16 sps:$4 sm:$0xff]   ;;  %v19567_v49 = vld [vmem:[%s19909_s6 + $0x350c] ss:$16 sps:$4 sm:$0xff]  }
 0x75c   : > { %14559 = vmatprep.subr.bf16.mxu1 %v19498_v38  ;;  %v19570_v50 = vld [vmem:[%s19909_s6 + $0x370c] ss:$16 sps:$4 sm:$0xff]   ;;  %v19565_v55 = vld [vmem:[%s19909_s6 + $0x3508] ss:$16 sps:$4 sm:$0xff]  }
 0x75d   : > { %v19568_v14 = vld [vmem:[%s19909_s6 + $0x3708] ss:$16 sps:$4 sm:$0xff]   ;;  %v19573_v13 = vld [vmem:[%s19909_s6 + $0x38ec] ss:$16 sps:$4 sm:$0xff]  }
 0x75e   : > { %14519 = vmatpush1.bf16.msra.mxu0 %v19493_v6  ;;  %v19576_v18 = vld [vmem:[%s19909_s6 + $0x3aec] ss:$16 sps:$4 sm:$0xff]   ;;  %v19571_v47 = vld [vmem:[%s19909_s6 + $0x38e8] ss:$16 sps:$4 sm:$0xff]  }
 0x75f   : > { %14560 = vmatpush1.bf16.msra.mxu1 %v19496_v54  ;;  %14520 = vmatprep.subr.bf16.mxu0 %v19501_v59  ;;  %v19574_v12 = vld [vmem:[%s19909_s6 + $0x3ae8] ss:$16 sps:$4 sm:$0xff]   ;;  %v19579_v38 = vld [vmem:[%s19909_s6 + $0x38cc] ss:$16 sps:$4 sm:$0xff]  }
 0x760   : > { %14561 = vmatprep.subr.bf16.mxu1 %v19504_v48  ;;  %v19582_v6 = vld [vmem:[%s19909_s6 + $0x3acc] ss:$16 sps:$4 sm:$0xff]   ;;  %v22550_v48 = vld [vmem:[#allocation23_spill] sm:$0xff] }
 0x762   : > { %14521 = vmatpush1.bf16.msra.mxu0 %v19499_v9 }
 0x763   : > { %14562 = vmatpush1.bf16.msra.mxu1 %v19502_v63  ;;  %14522 = vmatprep.subr.bf16.mxu0 %v19507_v11  ;;  %v19577_v63 = vld [vmem:[%s19909_s6 + $0x38c8] ss:$16 sps:$4 sm:$0xff]  }
 0x764   : > { %14563 = vmatprep.subr.bf16.mxu1 %v19510_v32  ;;  %v19580_v11 = vld [vmem:[%s19909_s6 + $0x3ac8] ss:$16 sps:$4 sm:$0xff]  }
 0x766   : > { %14523 = vmatpush1.bf16.msra.mxu0 %v19505_v33 }
 0x767   : > { %14564 = vmatpush1.bf16.msra.mxu1 %v19508_v23  ;;  %14524 = vmatprep.subr.bf16.mxu0 %v19513_v51  ;;  %v19585_v23 = vld [vmem:[%s19909_s6 + $0x38ac] ss:$16 sps:$4 sm:$0xff]  }
 0x768   : > { %14565 = vmatprep.subr.bf16.mxu1 %v19516_v57  ;;  %v19588_v51 = vld [vmem:[%s19909_s6 + $0x3aac] ss:$16 sps:$4 sm:$0xff]  }
 0x76a   : > { %14525 = vmatpush1.bf16.msra.mxu0 %v19511_v61 }
 0x76b   : > { %14566 = vmatpush1.bf16.msra.mxu1 %v19514_v35  ;;  %14526 = vmatprep.subr.bf16.mxu0 %v19519_v1  ;;  %v19583_v1 = vld [vmem:[%s19909_s6 + $0x38a8] ss:$16 sps:$4 sm:$0xff]  }
 0x76c   : > { %14567 = vmatprep.subr.bf16.mxu1 %v19522_v8  ;;  %v19586_v8 = vld [vmem:[%s19909_s6 + $0x3aa8] ss:$16 sps:$4 sm:$0xff]  }
 0x76e   : > { %14527 = vmatpush1.bf16.msra.mxu0 %v19517_v53 }
 0x76f   : > { %14568 = vmatpush1.bf16.msra.mxu1 %v19520_v16  ;;  %14528 = vmatprep.subr.bf16.mxu0 %v19525_v15  ;;  %v19592_v15 = vld [vmem:[%s19909_s6 + $0x3a88] ss:$16 sps:$4 sm:$0xff]  }
 0x770   : > { %14569 = vmatprep.subr.bf16.mxu1 %v19528_v24  ;;  %v19597_v24 = vld [vmem:[%s19909_s6 + $0x386c] ss:$16 sps:$4 sm:$0xff]  }
 0x772   : > { %14529 = vmatpush2.bf16.msra.mxu0 %v19523_v43  ;;  %v19600_v43 = vld [vmem:[%s19909_s6 + $0x3a6c] ss:$16 sps:$4 sm:$0xff]  }
 0x773   : > { %14570 = vmatpush2.bf16.msra.mxu1 %v19526_v31  ;;  %14530 = vmatprep.subr.bf16.mxu0 %v19531_v20  ;;  %v19595_v31 = vld [vmem:[%s19909_s6 + $0x3868] ss:$16 sps:$4 sm:$0xff]  }
 0x774   : > { %14571 = vmatprep.subr.bf16.mxu1 %v19534_v40  ;;  %v19598_v20 = vld [vmem:[%s19909_s6 + $0x3a68] ss:$16 sps:$4 sm:$0xff]   ;;  %v19603_v40 = vld [vmem:[%s19909_s6 + $0x384c] ss:$16 sps:$4 sm:$0xff]  }
 0x776   : > { %14531 = vmatpush2.bf16.msra.mxu0 %v19529_v7  ;;  %v19606_v7 = vld [vmem:[%s19909_s6 + $0x3a4c] ss:$16 sps:$4 sm:$0xff]  }
 0x777   : > { %14572 = vmatpush2.bf16.msra.mxu1 %v19532_v60  ;;  %14532 = vmatprep.subr.bf16.mxu0 %v19537_v4  ;;  %v19601_v60 = vld [vmem:[%s19909_s6 + $0x3848] ss:$16 sps:$4 sm:$0xff]  }
 0x778   : > { %14573 = vmatprep.subr.bf16.mxu1 %v19540_v41  ;;  %v19604_v4 = vld [vmem:[%s19909_s6 + $0x3a48] ss:$16 sps:$4 sm:$0xff]   ;;  %v19609_v41 = vld [vmem:[%s19909_s6 + $0x382c] ss:$16 sps:$4 sm:$0xff]  }
 0x77a   : > { %14533 = vmatpush2.bf16.msra.mxu0 %v19535_v34  ;;  %v19612_v34 = vld [vmem:[%s19909_s6 + $0x3a2c] ss:$16 sps:$4 sm:$0xff]  }
 0x77b   : > { %14574 = vmatpush2.bf16.msra.mxu1 %v19538_v44  ;;  %14534 = vmatprep.subr.bf16.mxu0 %v19543_v58  ;;  %v19607_v44 = vld [vmem:[%s19909_s6 + $0x3828] ss:$16 sps:$4 sm:$0xff]  }
 0x77c   : > { %14575 = vmatprep.subr.bf16.mxu1 %v19546_v62  ;;  %v19610_v58 = vld [vmem:[%s19909_s6 + $0x3a28] ss:$16 sps:$4 sm:$0xff]   ;;  %v19615_v62 = vld [vmem:[%s19909_s6 + $0x380c] ss:$16 sps:$4 sm:$0xff]  }
 0x77e   : > { %14535 = vmatpush2.bf16.msra.mxu0 %v19541_v22  ;;  %v19618_v22 = vld [vmem:[%s19909_s6 + $0x3a0c] ss:$16 sps:$4 sm:$0xff]  }
 0x77f   : > { %14576 = vmatpush2.bf16.msra.mxu1 %v19544_v0  ;;  %14536 = vmatprep.subr.bf16.mxu0 %v19549_v10  ;;  %v19613_v0 = vld [vmem:[%s19909_s6 + $0x3808] ss:$16 sps:$4 sm:$0xff]  }
 0x780   : > { %14577 = vmatprep.subr.bf16.mxu1 %v19552_v25  ;;  %v19616_v10 = vld [vmem:[%s19909_s6 + $0x3a08] ss:$16 sps:$4 sm:$0xff]   ;;  %v19621_v25 = vld [vmem:[%s19909_s6 + $0x39ec] ss:$16 sps:$4 sm:$0xff]  }
 0x782   : > { %14537 = vmatpush2.bf16.msra.mxu0 %v19547_v28  ;;  %v19624_v28 = vld [vmem:[%s19909_s6 + $0x3bec] ss:$16 sps:$4 sm:$0xff]  }
 0x783   : > { %14578 = vmatpush2.bf16.msra.mxu1 %v19550_v37  ;;  %14538 = vmatprep.subr.bf16.mxu0 %v19555_v17  ;;  %v19619_v37 = vld [vmem:[%s19909_s6 + $0x39e8] ss:$16 sps:$4 sm:$0xff]  }
 0x784   : > { %14579 = vmatprep.subr.bf16.mxu1 %v19558_v30  ;;  %v19622_v17 = vld [vmem:[%s19909_s6 + $0x3be8] ss:$16 sps:$4 sm:$0xff]   ;;  %v19627_v30 = vld [vmem:[%s19909_s6 + $0x39cc] ss:$16 sps:$4 sm:$0xff]  }
 0x786   : > { %14539 = vmatpush2.bf16.msra.mxu0 %v19553_v3  ;;  %v19630_v3 = vld [vmem:[%s19909_s6 + $0x3bcc] ss:$16 sps:$4 sm:$0xff]  }
 0x787   : > { %14580 = vmatpush2.bf16.msra.mxu1 %v19556_v46  ;;  %14540 = vmatprep.subr.bf16.mxu0 %v19561_v27  ;;  %v19625_v46 = vld [vmem:[%s19909_s6 + $0x39c8] ss:$16 sps:$4 sm:$0xff]  }
 0x788   : > { %14581 = vmatprep.subr.bf16.mxu1 %v19564_v29  ;;  %v19628_v27 = vld [vmem:[%s19909_s6 + $0x3bc8] ss:$16 sps:$4 sm:$0xff]   ;;  %v19633_v29 = vld [vmem:[%s19909_s6 + $0x39ac] ss:$16 sps:$4 sm:$0xff]  }
 0x78a   : > { %14541 = vmatpush2.bf16.msra.mxu0 %v19559_v52  ;;  %v19636_v52 = vld [vmem:[%s19909_s6 + $0x3bac] ss:$16 sps:$4 sm:$0xff]  }
 0x78b   : > { %14582 = vmatpush2.bf16.msra.mxu1 %v19562_v36  ;;  %14542 = vmatprep.subr.bf16.mxu0 %v19567_v49  ;;  %v19631_v36 = vld [vmem:[%s19909_s6 + $0x39a8] ss:$16 sps:$4 sm:$0xff]  }
 0x78c   : > { %14583 = vmatprep.subr.bf16.mxu1 %v19570_v50  ;;  %v19634_v49 = vld [vmem:[%s19909_s6 + $0x3ba8] ss:$16 sps:$4 sm:$0xff]   ;;  %v19639_v50 = vld [vmem:[%s19909_s6 + $0x398c] ss:$16 sps:$4 sm:$0xff]  }
 0x78e   : > { %14543 = vmatpush2.bf16.msra.mxu0 %v19565_v55  ;;  %v19642_v55 = vld [vmem:[%s19909_s6 + $0x3b8c] ss:$16 sps:$4 sm:$0xff]  }
 0x78f   : > { %14584 = vmatpush2.bf16.msra.mxu1 %v19568_v14  ;;  %14594 = vmatprep.subr.bf16.mxu0 %v19573_v13  ;;  %v19637_v14 = vld [vmem:[%s19909_s6 + $0x3988] ss:$16 sps:$4 sm:$0xff]  }
 0x790   : > { %14635 = vmatprep.subr.bf16.mxu1 %v19576_v18  ;;  %v19640_v13 = vld [vmem:[%s19909_s6 + $0x3b88] ss:$16 sps:$4 sm:$0xff]   ;;  %v19645_v18 = vld [vmem:[%s19909_s6 + $0x396c] ss:$16 sps:$4 sm:$0xff]  }
 0x791   : > { %v14300_v54 = vpop.f32.mrf.mxu0  ;;  %14545 = vmatmul.mubr.bf16.vlgmr.msra.gmra.mxu0 %v22550_v48  ;;  %v19652_v48 = vld [vmem:[%s19909_s6 + $0x3b48] ss:$16 sps:$4 sm:$0xff]  }
 0x792   : > { %v14341_v59 = vpop.f32.mrf.mxu1  ;;  %14586 = vmatmul.mubr.bf16.vlgmr.msra.gmra.mxu1 %v21275_v56  ;;  %v14301_v9 = vadd.f32 %v14300_v54, %v22333_v39  ;;  %14595 = vmatpush1.bf16.msra.mxu0 %v19571_v47  ;;  %v19648_v47 = vld [vmem:[%s19909_s6 + $0x3b6c] ss:$16 sps:$4 sm:$0xff]  }
 0x793   : > { %14636 = vmatpush1.bf16.msra.mxu1 %v19574_v12  ;;  %v14302_v32 = vpop.f32.mrf.mxu0  ;;  %14596 = vmatprep.subr.bf16.mxu0 %v19579_v38  ;;  %v19643_v12 = vld [vmem:[%s19909_s6 + $0x3968] ss:$16 sps:$4 sm:$0xff]   ;;  %v19654_v54 = vld [vmem:[%s19909_s6 + $0x3b4c] ss:$16 sps:$4 sm:$0xff]  }
 0x794   : > { %v14343_v33 = vpop.f32.mrf.mxu1  ;;  %14637 = vmatprep.subr.bf16.mxu1 %v19582_v6  ;;  %v22407_v57 = vadd.f32 %v14341_v59, %v14301_v9  ;;  %v14303_v56 = vadd.f32 %v14302_v32, %v22338_v45  ;;  %14626 = vmatprep.mubr.bf16.mxu0 %v21271_v5  ;;  %v19591_v5 = vld [vmem:[%s19909_s6 + $0x388c] ss:$16 sps:$4 sm:$0xff]   ;;  %v19589_v45 = vld [vmem:[%s19909_s6 + $0x3888] ss:$16 sps:$4 sm:$0xff]  }
 0x795   : > { %14667 = vmatprep.mubr.bf16.mxu1 %v21283_v19  ;;  %v14304_v39 = vpop.f32.mrf.mxu0  ;;  %v19594_v19 = vld [vmem:[%s19909_s6 + $0x3a8c] ss:$16 sps:$4 sm:$0xff]   ;;  %v19646_v38 = vld [vmem:[%s19909_s6 + $0x3b68] ss:$16 sps:$4 sm:$0xff]  }
 0x796   : > { %v14345_v61 = vpop.f32.mrf.mxu1  ;;  %v22412_v35 = vadd.f32 %v14343_v33, %v14303_v56  ;;  %14597 = vmatpush1.bf16.msra.mxu0 %v19577_v63  ;;  %v19651_v6 = vld [vmem:[%s19909_s6 + $0x394c] ss:$16 sps:$4 sm:$0xff]   ;;  %v19649_v59 = vld [vmem:[%s19909_s6 + $0x3948] ss:$16 sps:$4 sm:$0xff]  }
 0x797   : > { %14638 = vmatpush1.bf16.msra.mxu1 %v19580_v11  ;;  %v14305_v53 = vpop.f32.mrf.mxu0  ;;  %14598 = vmatprep.subr.bf16.mxu0 %v19585_v23  ;;  %v19657_v9 = vld [vmem:[%s19909_s6 + $0x392c] ss:$16 sps:$4 sm:$0xff]   ;;  %v19655_v11 = vld [vmem:[%s19909_s6 + $0x3928] ss:$16 sps:$4 sm:$0xff]  }
 0x798   : > { %v14346_v16 = vpop.f32.mrf.mxu1  ;;  %14639 = vmatprep.subr.bf16.mxu1 %v19588_v51  ;;  %v19660_v63 = vld [vmem:[%s19909_s6 + $0x3b2c] ss:$16 sps:$4 sm:$0xff]   ;;  %v19658_v32 = vld [vmem:[%s19909_s6 + $0x3b28] ss:$16 sps:$4 sm:$0xff]  }
 0x799   : > { %v19663_v33 = vld [vmem:[%s19909_s6 + $0x390c] ss:$16 sps:$4 sm:$0xff]   ;;  %v19661_v51 = vld [vmem:[%s19909_s6 + $0x3908] ss:$16 sps:$4 sm:$0xff]  }
 0x79a   : > { %14599 = vmatpush1.bf16.msra.mxu0 %v19583_v1  ;;  %v19666_v23 = vld [vmem:[%s19909_s6 + $0x3b0c] ss:$16 sps:$4 sm:$0xff]   ;;  %v19664_v56 = vld [vmem:[%s19909_s6 + $0x3b08] ss:$16 sps:$4 sm:$0xff]  }
 0x79b   : > { %14640 = vmatpush1.bf16.msra.mxu1 %v19586_v8  ;;  %14600 = vmatprep.subr.bf16.mxu0 %v19591_v5 }
 0x79c   : > { %14641 = vmatprep.subr.bf16.mxu1 %v19594_v19 }
 0x79e   : > { %14601 = vmatpush1.bf16.msra.mxu0 %v19589_v45 }
 0x79f   : > { %14642 = vmatpush1.bf16.msra.mxu1 %v19592_v15  ;;  %14602 = vmatprep.subr.bf16.mxu0 %v19597_v24 }
 0x7a0   : > { %14643 = vmatprep.subr.bf16.mxu1 %v19600_v43 }
 0x7a2   : > { %14603 = vmatpush1.bf16.msra.mxu0 %v19595_v31 }
 0x7a3   : > { %14644 = vmatpush1.bf16.msra.mxu1 %v19598_v20  ;;  %14604 = vmatprep.subr.bf16.mxu0 %v19603_v40 }
 0x7a4   : > { %14645 = vmatprep.subr.bf16.mxu1 %v19606_v7 }
 0x7a6   : > { %14605 = vmatpush1.bf16.msra.mxu0 %v19601_v60 }
 0x7a7   : > { %14646 = vmatpush1.bf16.msra.mxu1 %v19604_v4  ;;  %14606 = vmatprep.subr.bf16.mxu0 %v19609_v41 }
 0x7a8   : > { %14647 = vmatprep.subr.bf16.mxu1 %v19612_v34 }
 0x7aa   : > { %14607 = vmatpush1.bf16.msra.mxu0 %v19607_v44 }
 0x7ab   : > { %14648 = vmatpush1.bf16.msra.mxu1 %v19610_v58  ;;  %14608 = vmatprep.subr.bf16.mxu0 %v19615_v62 }
 0x7ac   : > { %14649 = vmatprep.subr.bf16.mxu1 %v19618_v22 }
 0x7ae   : > { %14609 = vmatpush1.bf16.msra.mxu0 %v19613_v0 }
 0x7af   : > { %14650 = vmatpush1.bf16.msra.mxu1 %v19616_v10  ;;  %14610 = vmatprep.subr.bf16.mxu0 %v19621_v25 }
 0x7b0   : > { %14651 = vmatprep.subr.bf16.mxu1 %v19624_v28 }
 0x7b2   : > { %14611 = vmatpush2.bf16.msra.mxu0 %v19619_v37 }
 0x7b3   : > { %14652 = vmatpush2.bf16.msra.mxu1 %v19622_v17  ;;  %14612 = vmatprep.subr.bf16.mxu0 %v19627_v30 }
 0x7b4   : > { %14653 = vmatprep.subr.bf16.mxu1 %v19630_v3  ;;  %v19769_v3 = vmov 1983009808  }
 0x7b6   : > { %14613 = vmatpush2.bf16.msra.mxu0 %v19625_v46  ;;  %v14687_v46 = vunpack.c.l.s4 %v19769_v3 }
 0x7b7   : > { %14654 = vmatpush2.bf16.msra.mxu1 %v19628_v27  ;;  %14614 = vmatprep.subr.bf16.mxu0 %v19633_v29 }
 0x7b8   : > { %14655 = vmatprep.subr.bf16.mxu1 %v19636_v52 }
 0x7ba   : > { %14615 = vmatpush2.bf16.msra.mxu0 %v19631_v36 }
 0x7bb   : > { %14656 = vmatpush2.bf16.msra.mxu1 %v19634_v49  ;;  %14616 = vmatprep.subr.bf16.mxu0 %v19639_v50 }
 0x7bc   : > { %14657 = vmatprep.subr.bf16.mxu1 %v19642_v55  ;;  %v14688_v55 = vunpack.c.0.s8 %v14687_v46 }
 0x7be   : > { %14617 = vmatpush2.bf16.msra.mxu0 %v19637_v14 }
 0x7bf   : > { %14658 = vmatpush2.bf16.msra.mxu1 %v19640_v13  ;;  %14618 = vmatprep.subr.bf16.mxu0 %v19645_v18 }
 0x7c0   : > { %14659 = vmatprep.subr.bf16.mxu1 %v19648_v47 }
 0x7c2   : > { %14619 = vmatpush2.bf16.msra.mxu0 %v19643_v12 }
 0x7c3   : > { %14660 = vmatpush2.bf16.msra.mxu1 %v19646_v38  ;;  %14620 = vmatprep.subr.bf16.mxu0 %v19651_v6 }
 0x7c4   : > { %14661 = vmatprep.subr.bf16.mxu1 %v19654_v54  ;;  %v14691_v54 = vsub.s32 %v14688_v55, %v19960_v42 }
 0x7c6   : > { %14621 = vmatpush2.bf16.msra.mxu0 %v19649_v59 }
 0x7c7   : > { %14662 = vmatpush2.bf16.msra.mxu1 %v19652_v48  ;;  %14622 = vmatprep.subr.bf16.mxu0 %v19657_v9 }
 0x7c8   : > { %14663 = vmatprep.subr.bf16.mxu1 %v19660_v63  ;;  %v14692_v63 = vrot.slane %v21601_v26, %v14691_v54 }
 0x7ca   : > { %14623 = vmatpush2.bf16.msra.mxu0 %v19655_v11 }
 0x7cb   : > { %14664 = vmatpush2.bf16.msra.mxu1 %v19658_v32  ;;  %14624 = vmatprep.subr.bf16.mxu0 %v19663_v33 }
 0x7cc   : > { %14665 = vmatprep.subr.bf16.mxu1 %v19666_v23 }
 0x7ce   : > { %14625 = vmatpush2.bf16.msra.mxu0 %v19661_v51 }
 0x7cf   : > { %14666 = vmatpush2.bf16.msra.mxu1 %v19664_v56 }
 0x7d1   : > { %v14382_v39 = vpop.f32.mrf.mxu0  ;;  %14627 = vmatmul.mubr.bf16.vlgmr.msra.gmra.mxu0 %v21351_v2 }
 0x7d2   : > { %v14423_v61 = vpop.f32.mrf.mxu1  ;;  %14668 = vmatmul.mubr.bf16.vlgmr.msra.gmra.mxu1 %v21361_v21  ;;  %v14383_v1 = vadd.f32 %v14382_v39, %v22407_v57 }
 0x7d3   : > { %v14384_v8 = vpop.f32.mrf.mxu0 }
 0x7d4   : > { %v14425_v53 = vpop.f32.mrf.mxu1  ;;  %v14424_v16 = vadd.f32 %v14423_v61, %v14383_v1  ;;  %v14385_v5 = vadd.f32 %v14384_v8, %v22412_v35 }
 0x7d5   : > { %v14386_v19 = vpop.f32.mrf.mxu0 }
 0x7d6   : > { %v14427_v45 = vpop.f32.mrf.mxu1  ;;  %v14426_v15 = vadd.f32 %v14425_v53, %v14385_v5 }
 0x7d7   : > { %v14387_v24 = vpop.f32.mrf.mxu0 }
 0x7d8   : > { %v14428_v43 = vpop.f32.mrf.mxu1 }
 0x811   : > { %v14464_v31 = vpop.f32.mrf.mxu0 }
 0x812   : > { %v14505_v20 = vpop.f32.mrf.mxu1  ;;  %v14465_v40 = vadd.f32 %v14464_v31, %v14424_v16 }
 0x813   : > { %v14466_v7 = vpop.f32.mrf.mxu0 }
 0x814   : > { %v14507_v60 = vpop.f32.mrf.mxu1  ;;  %v14506_v2 = vadd.f32 %v14505_v20, %v14465_v40  ;;  %v14467_v4 = vadd.f32 %v14466_v7, %v14426_v15 }
 0x815   : > { %v14468_v21 = vpop.f32.mrf.mxu0 }
 0x816   : > { %v14509_v57 = vpop.f32.mrf.mxu1  ;;  %v14508_v41 = vadd.f32 %v14507_v60, %v14467_v4 }
 0x817   : > { %v14469_v34 = vpop.f32.mrf.mxu0 }
 0x818   : > { %v14510_v44 = vpop.f32.mrf.mxu1 }
 0x851   : > { %v14546_v58 = vpop.f32.mrf.mxu0 }
 0x852   : > { %v14587_v35 = vpop.f32.mrf.mxu1  ;;  %v14547_v62 = vadd.f32 %v14546_v58, %v14506_v2 }
 0x853   : > { %v14548_v22 = vpop.f32.mrf.mxu0 }
 0x854   : > { %v14589_v0 = vpop.f32.mrf.mxu1  ;;  %v14588_v10 = vadd.f32 %v14587_v35, %v14547_v62  ;;  %v14549_v30 = vadd.f32 %v14548_v22, %v14508_v41 }
 0x855   : > { %v14550_v25 = vpop.f32.mrf.mxu0 }
 0x856   : > { %v14591_v28 = vpop.f32.mrf.mxu1  ;;  %v14590_v52 = vadd.f32 %v14589_v0, %v14549_v30 }
 0x857   : > { %v14551_v37 = vpop.f32.mrf.mxu0 }
 0x858   : > { %v14592_v17 = vpop.f32.mrf.mxu1 }
 0x891   : > { %v14628_v27 = vpop.f32.mrf.mxu0 }
 0x892   : > { %v14669_v29 = vpop.f32.mrf.mxu1  ;;  %v14629_v36 = vadd.f32 %v14628_v27, %v14588_v10 }
 0x893   : > { %v14630_v49 = vpop.f32.mrf.mxu0 }
 0x894   : > { %v14671_v50 = vpop.f32.mrf.mxu1  ;;  %v14670_v14 = vadd.f32 %v14669_v29, %v14629_v36  ;;  %v14631_v13 = vadd.f32 %v14630_v49, %v14590_v52 }
 0x895   : > { %v14632_v18 = vpop.f32.mrf.mxu0 }
 0x896   : > { %v14673_v47 = vpop.f32.mrf.mxu1  ;;  %v14672_v12 = vadd.f32 %v14671_v50, %v14631_v13  ;;  %v14678_v59 = vmax.f32 %v14670_v14, 0.0 }
 0x897   : > { %v14633_v38 = vpop.f32.mrf.mxu0 }
 0x898   : > { %v14674_v6 = vpop.f32.mrf.mxu1  ;;  %v14679_v48 = vmax.f32 %v14672_v12, 0.0 }
 0x89a   : > { %v14685_v9 = vcombine.low %v14678_v59, %v14679_v48 }
 0x89c   : > { %v14699_v11 = vrot.slane %v14685_v9, %v14691_v54 }
 0x89e   : > { %v14700_v32 = vcombine.low %v14692_v63, %v14699_v11 }
 0x8a0   : > { %14702 = vst [vmem:[%s229_s8] sm:$0xff] %v14700_v32 }
 0x8a1 PF: > { %p16_p8 = scmp.ge.s32.totalorder %s19810_s17, 4   ;;  %s22551_s12 = smov %s19754_s13 }
 0x8a2   : > { %s22552_s13 = smov %s19758_s14  ;;  %s22553_s14 = smov %s19820_s20 }
 0x8a3   : > { %s22554_s15 = smov %s19810_s17  ;;  %18 = sbr.rel (!%p16_p8) target bundleno = 5 (0x5), region = 85 }
 0x8a8   :  { %14725 = vsyncpa [#allocation3], 1 }
 0x8a9   :  { %14727 = vsyncpa [#allocation3 + $0x1], 1 }
 0x8aa   :  { %14728 = vsyncpa [#allocation5], 1 }
 0x8ab   :  { %14730 = vsyncpa [#allocation5 + $0x1], 1 }

</bundles_post_ra>
